<compile_context>
chip_gen: v5e
topology: v5e:2x2
jax: 0.10.0
libtpu: 0.0.40
codegen_flags: <defaults>
</compile_context>

<pallas_src>
import numpy as np

import jax
import jax.numpy as jnp
from jax.experimental import pallas as pl
from jax.experimental.pallas import tpu as pltpu


# ----------------------------- Pallas kernels ------------------------------

def _conv_block_kernel(x_ref, w1_ref, b1_ref, p1_ref, s1_ref,
                       w2_ref, b2_ref, p2_ref, s2_ref, o_ref):
    """Per-sample fused conv1+ReLU+pool1+conv2+ReLU+pool2.

    Layouts (all 2-D, channels packed into the lane dim):
      x:   (32, 96)   column = w*3  + c_in
      a1:  (28, 168)  column = w*6  + c_out   (conv1 output)
      h1:  (14, 84)   column = w*6  + c       (after pool1)
      a2:  (10, 160)  column = w*16 + c_out   (conv2 output)
      out: (5, 80)    column = w*16 + c       (after pool2)
    """
    f32 = jnp.float32
    x = x_ref[0]                                                   # (32, 96)

    # ---- conv1 (5x5, 3->6): 25 accumulated tap matmuls on the MXU ----
    acc1 = jnp.zeros((28, 168), f32)
    for t in range(25):
        i, j = divmod(t, 5)
        acc1 = acc1 + jnp.dot(x[i:i + 28, 3 * j:3 * j + 84], w1_ref[t],
                              preferred_element_type=f32)
    a1 = jnp.maximum(acc1 + b1_ref[...], 0.0)                      # (28, 168)

    # ---- fused 2x2 max-pool #1: row compaction (left 0/1 matmuls), max,
    #      then column compaction (right 0/1 matmuls), max ----
    r1 = jnp.maximum(jnp.dot(p1_ref[0], a1, preferred_element_type=f32),
                     jnp.dot(p1_ref[1], a1, preferred_element_type=f32))   # (14,168)
    h1 = jnp.maximum(jnp.dot(r1, s1_ref[0], preferred_element_type=f32),
                     jnp.dot(r1, s1_ref[1], preferred_element_type=f32))   # (14, 84)

    # ---- conv2 (5x5, 6->16): 25 accumulated tap matmuls ----
    acc2 = jnp.zeros((10, 160), f32)
    for t in range(25):
        i, j = divmod(t, 5)
        acc2 = acc2 + jnp.dot(h1[i:i + 10, 6 * j:6 * j + 60], w2_ref[t],
                              preferred_element_type=f32)
    a2 = jnp.maximum(acc2 + b2_ref[...], 0.0)                      # (10, 160)

    # ---- fused 2x2 max-pool #2 ----
    r2 = jnp.maximum(jnp.dot(p2_ref[0], a2, preferred_element_type=f32),
                     jnp.dot(p2_ref[1], a2, preferred_element_type=f32))   # (5, 160)
    h2 = jnp.maximum(jnp.dot(r2, s2_ref[0], preferred_element_type=f32),
                     jnp.dot(r2, s2_ref[1], preferred_element_type=f32))   # (5, 80)

    o_ref[0] = h2.astype(o_ref.dtype)


def _fc_block_kernel(x_ref, w1_ref, b1_ref, w2_ref, b2_ref, w3_ref, b3_ref,
                     o_ref):
    """Fused fc1+ReLU+fc2+ReLU+fc3 on an M-tile of the batch."""
    f32 = jnp.float32
    h = jnp.dot(x_ref[...], w1_ref[...], preferred_element_type=f32) + b1_ref[...]
    h = jnp.maximum(h, 0.0)
    h = jnp.dot(h, w2_ref[...], preferred_element_type=f32) + b2_ref[...]
    h = jnp.maximum(h, 0.0)
    out = jnp.dot(h, w3_ref[...], preferred_element_type=f32) + b3_ref[...]
    o_ref[...] = out.astype(o_ref.dtype)


# --------------------------- pallas_call wrappers ---------------------------

_CONV_FLOPS_PER_SAMPLE = (
    25 * 2 * 28 * 84 * 168                               # conv1 taps
    + 2 * 2 * 14 * 28 * 168 + 2 * 2 * 14 * 168 * 84      # pool1 selections
    + 25 * 2 * 10 * 60 * 160                             # conv2 taps
    + 2 * 2 * 5 * 10 * 160 + 2 * 2 * 5 * 160 * 80)       # pool2 selections
_CONV_WEIGHT_BYTES = 4 * (25 * 84 * 168 + 168 + 2 * 14 * 28 + 2 * 168 * 84
                          + 25 * 60 * 160 + 160 + 2 * 5 * 10 + 2 * 160 * 80)
_FC_FLOPS_PER_SAMPLE = 2 * (400 * 120 + 120 * 84 + 84 * 10)
_FC_WEIGHT_BYTES = 4 * (400 * 120 + 120 + 120 * 84 + 84 + 84 * 10 + 10)

_COMPILER_PARAMS = pltpu.CompilerParams(
    dimension_semantics=("parallel",),
    vmem_limit_bytes=32 * 1024 * 1024,
)


def conv_block_pallas(x_packed, pp):
    """x_packed: (B, 32, 96) f32 -> (B, 5, 80) f32 pooled conv features."""
    B = x_packed.shape[0]
    return pl.pallas_call(
        _conv_block_kernel,
        out_shape=jax.ShapeDtypeStruct((B, 5, 80), jnp.float32),
        grid=(B,),
        in_specs=[
            pl.BlockSpec((1, 32, 96), lambda b: (b, 0, 0)),      # per-sample input
            pl.BlockSpec((25, 84, 168), lambda b: (0, 0, 0)),    # conv1 tap weights
            pl.BlockSpec((1, 168), lambda b: (0, 0)),            # conv1 bias (tiled)
            pl.BlockSpec((2, 14, 28), lambda b: (0, 0, 0)),      # pool1 row selectors
            pl.BlockSpec((2, 168, 84), lambda b: (0, 0, 0)),     # pool1 col selectors
            pl.BlockSpec((25, 60, 160), lambda b: (0, 0, 0)),    # conv2 tap weights
            pl.BlockSpec((1, 160), lambda b: (0, 0)),            # conv2 bias (tiled)
            pl.BlockSpec((2, 5, 10), lambda b: (0, 0, 0)),       # pool2 row selectors
            pl.BlockSpec((2, 160, 80), lambda b: (0, 0, 0)),     # pool2 col selectors
        ],
        out_specs=pl.BlockSpec((1, 5, 80), lambda b: (b, 0, 0)),
        compiler_params=_COMPILER_PARAMS,
        cost_estimate=pl.CostEstimate(
            flops=int(_CONV_FLOPS_PER_SAMPLE * B),
            transcendentals=0,
            bytes_accessed=int(B * (32 * 96 + 5 * 80) * 4 + _CONV_WEIGHT_BYTES)),
    )(x_packed, pp["W1"], pp["b1r"], pp["P1"], pp["S1"],
      pp["W2"], pp["b2r"], pp["P2"], pp["S2"])


def _pick_batch_tile(b):
    if b <= 8:
        return b
    for tb in (256, 128, 64, 32, 16, 8):
        if b % tb == 0:
            return tb
    return b


def fc_block_pallas(feat, pp):
    """feat: (B, 400) f32 (already in fc1's permuted column order) -> (B, 10)."""
    B = feat.shape[0]
    tb = _pick_batch_tile(B)
    return pl.pallas_call(
        _fc_block_kernel,
        out_shape=jax.ShapeDtypeStruct((B, 10), jnp.float32),
        grid=(B // tb,),
        in_specs=[
            pl.BlockSpec((tb, 400), lambda m: (m, 0)),
            pl.BlockSpec((400, 120), lambda m: (0, 0)),
            pl.BlockSpec((1, 120), lambda m: (0, 0)),
            pl.BlockSpec((120, 84), lambda m: (0, 0)),
            pl.BlockSpec((1, 84), lambda m: (0, 0)),
            pl.BlockSpec((84, 10), lambda m: (0, 0)),
            pl.BlockSpec((1, 10), lambda m: (0, 0)),
        ],
        out_specs=pl.BlockSpec((tb, 10), lambda m: (m, 0)),
        compiler_params=_COMPILER_PARAMS,
        cost_estimate=pl.CostEstimate(
            flops=int(_FC_FLOPS_PER_SAMPLE * B),
            transcendentals=0,
            bytes_accessed=int(B * (400 + 10) * 4 + _FC_WEIGHT_BYTES)),
    )(feat, pp["fc1_w"], pp["fc1_b"], pp["fc2_w"], pp["fc2_b"],
      pp["fc3_w"], pp["fc3_b"])


# ----------------------------- parameters ----------------------------------

def init_params(key):
    """Deterministic init matching PyTorch default U(-1/sqrt(fan_in), +...)."""
    def u(k, shape, fan_in):
        bound = 1.0 / float(fan_in) ** 0.5
        return jax.random.uniform(k, shape, jnp.float32, -bound, bound)

    ks = jax.random.split(key, 10)
    return {
        "conv1_w": u(ks[0], (6, 3, 5, 5), 3 * 5 * 5),
        "conv1_b": u(ks[1], (6,), 3 * 5 * 5),
        "conv2_w": u(ks[2], (16, 6, 5, 5), 6 * 5 * 5),
        "conv2_b": u(ks[3], (16,), 6 * 5 * 5),
        "fc1_w": u(ks[4], (120, 16 * 5 * 5), 16 * 5 * 5),  # PyTorch (out, in)
        "fc1_b": u(ks[5], (120,), 16 * 5 * 5),
        "fc2_w": u(ks[6], (84, 120), 120),
        "fc2_b": u(ks[7], (84,), 120),
        "fc3_w": u(ks[8], (10, 84), 84),
        "fc3_b": u(ks[9], (10,), 84),
    }


def prepare_params(params):
    """One-time (outside jit) repack of PyTorch weights into kernel layouts."""
    f32 = jnp.float32

    # Conv taps -> block-diagonal matmul weights for the packed (H, W*C) layout:
    #   W[t] = kron(I_Wout, w[i,j])  with w[i,j] of shape (Cin, Cout), t = i*5+j.
    w1t = jnp.transpose(params["conv1_w"], (2, 3, 1, 0)).astype(f32)   # (5,5,3,6)
    eye28 = jnp.eye(28, dtype=f32)
    W1 = jnp.stack([jnp.kron(eye28, w1t[i, j])
                    for i in range(5) for j in range(5)])              # (25,84,168)
    b1r = jnp.tile(params["conv1_b"].astype(f32), 28).reshape(1, 168)

    w2t = jnp.transpose(params["conv2_w"], (2, 3, 1, 0)).astype(f32)   # (5,5,6,16)
    eye10 = jnp.eye(10, dtype=f32)
    W2 = jnp.stack([jnp.kron(eye10, w2t[i, j])
                    for i in range(5) for j in range(5)])              # (25,60,160)
    b2r = jnp.tile(params["conv2_b"].astype(f32), 10).reshape(1, 160)

    # 0/1 selection matrices implementing the 2x2 max-pool compaction.
    def row_sel(n_out):                       # (2, n_out, 2*n_out)
        P = np.zeros((2, n_out, 2 * n_out), np.float32)
        P[0, np.arange(n_out), 2 * np.arange(n_out)] = 1.0
        P[1, np.arange(n_out), 2 * np.arange(n_out) + 1] = 1.0
        return jnp.asarray(P)

    def col_sel(w_out, ch):                   # (2, 2*w_out*ch, w_out*ch)
        S = np.zeros((2, 2 * w_out * ch, w_out * ch), np.float32)
        for w in range(w_out):
            for c in range(ch):
                S[0, (2 * w) * ch + c, w * ch + c] = 1.0
                S[1, (2 * w + 1) * ch + c, w * ch + c] = 1.0
        return jnp.asarray(S)

    # FC weights: pre-transposed; fold the PyTorch (C,H,W) flatten permutation
    # into fc1's rows. Our kernel-1 flatten order is idx_new = h*80 + w*16 + c.
    perm = np.zeros(400, np.int32)
    for h in range(5):
        for w in range(5):
            for c in range(16):
                perm[h * 80 + w * 16 + c] = c * 25 + h * 5 + w
    fc1_w = jnp.asarray(params["fc1_w"]).T[perm].astype(f32)           # (400,120)

    return {
        "W1": W1, "b1r": b1r, "P1": row_sel(14), "S1": col_sel(14, 6),
        "W2": W2, "b2r": b2r, "P2": row_sel(5), "S2": col_sel(5, 16),
        "fc1_w": fc1_w,
        "fc1_b": params["fc1_b"].reshape(1, 120).astype(f32),
        "fc2_w": params["fc2_w"].T.astype(f32),
        "fc2_b": params["fc2_b"].reshape(1, 84).astype(f32),
        "fc3_w": params["fc3_w"].T.astype(f32),
        "fc3_b": params["fc3_b"].reshape(1, 10).astype(f32),
    }


# ----------------------------- forward pass --------------------------------

def net_forward(prepared, x_nchw):
    B = x_nchw.shape[0]
    # NCHW -> NHWC -> packed 2-D (H, W*C) rows. Tiny input relayout only.
    x = jnp.transpose(x_nchw, (0, 2, 3, 1)).reshape(B, 32, 96)
    feat = conv_block_pallas(x, prepared)            # (B, 5, 80), fused conv stack
    feat = feat.reshape(B, 400)                      # free row-major reshape
    return fc_block_pallas(feat, prepared)           # (B, 10), fused FC stack


def net_forward_reference(params, x_nchw):
    """Plain-JAX reference of the PyTorch Net forward (for verification)."""
    hi = jax.lax.Precision.HIGHEST
    x = jnp.transpose(x_nchw, (0, 2, 3, 1))
    for wk, bk in (("conv1_w", "conv1_b"), ("conv2_w", "conv2_b")):
        w = jnp.transpose(params[wk], (2, 3, 1, 0))  # -> HWIO
        x = jax.lax.conv_general_dilated(
            x, w, (1, 1), "VALID",
            dimension_numbers=("NHWC", "HWIO", "NHWC"), precision=hi)
        x = jax.nn.relu(x + params[bk])
        x = jax.lax.reduce_window(x, -jnp.inf, jax.lax.max,
                                  (1, 2, 2, 1), (1, 2, 2, 1), "VALID")
    x = jnp.transpose(x, (0, 3, 1, 2)).reshape(x.shape[0], -1)     # (C,H,W) flatten
    x = jax.nn.relu(jnp.dot(x, params["fc1_w"].T, precision=hi) + params["fc1_b"])
    x = jax.nn.relu(jnp.dot(x, params["fc2_w"].T, precision=hi) + params["fc2_b"])
    return jnp.dot(x, params["fc3_w"].T, precision=hi) + params["fc3_b"]


# ----------------------------------------------------------------------------

if __name__ == "__main__":
    params = init_params(jax.random.PRNGKey(42))
    prepared = prepare_params(params)   # weight repack done once, outside jit
    x = jax.random.normal(jax.random.PRNGKey(0), (2, 3, 32, 32), jnp.float32)

    out = jax.block_until_ready(jax.jit(net_forward)(prepared, x))

    assert out.shape == (2, 10), out.shape
    assert out.dtype == jnp.float32, out.dtype
    assert bool(jnp.all(jnp.isfinite(out)))

    ref = jax.block_until_ready(jax.jit(net_forward_reference)(params, x))
    err = float(jnp.max(jnp.abs(out - ref)))
    assert err < 2e-2, f"mismatch vs plain-JAX reference: max abs err = {err}"

    print("KERNEL_OK")
</pallas_src>

<mosaic_0001>
module attributes {stable_mosaic.version = 11 : i64} {
  func.func @_fc_block_kernel(%arg0: i32, %arg1: memref<2x400xf32, #tpu.memory_space<vmem>>, %arg2: memref<400x120xf32, #tpu.memory_space<vmem>>, %arg3: memref<1x120xf32, #tpu.memory_space<vmem>>, %arg4: memref<120x84xf32, #tpu.memory_space<vmem>>, %arg5: memref<1x84xf32, #tpu.memory_space<vmem>>, %arg6: memref<84x10xf32, #tpu.memory_space<vmem>>, %arg7: memref<1x10xf32, #tpu.memory_space<vmem>>, %arg8: memref<2x10xf32, #tpu.memory_space<vmem>>) attributes {dimension_semantics = [#tpu.dimension_semantics<parallel>], iteration_bounds = array<i64: 1>, scalar_prefetch = 0 : i64, scratch_operands = 0 : i64, tpu.core_type = #tpu.core_type<tc>, window_params = [{transform_indices = @transform_0, window_bounds = array<i64: 2, 400>}, {pipeline_mode = #tpu.pipeline_mode<synchronous>, transform_indices = @transform_1, window_bounds = array<i64: 400, 120>}, {pipeline_mode = #tpu.pipeline_mode<synchronous>, transform_indices = @transform_2, window_bounds = array<i64: 1, 120>}, {pipeline_mode = #tpu.pipeline_mode<synchronous>, transform_indices = @transform_3, window_bounds = array<i64: 120, 84>}, {pipeline_mode = #tpu.pipeline_mode<synchronous>, transform_indices = @transform_4, window_bounds = array<i64: 1, 84>}, {pipeline_mode = #tpu.pipeline_mode<synchronous>, transform_indices = @transform_5, window_bounds = array<i64: 84, 10>}, {pipeline_mode = #tpu.pipeline_mode<synchronous>, transform_indices = @transform_6, window_bounds = array<i64: 1, 10>}, {transform_indices = @transform_7, window_bounds = array<i64: 2, 10>}]} {
    %c0 = arith.constant 0 : index
    %c0_0 = arith.constant 0 : index
    %0 = vector.load %arg1[%c0, %c0_0] : memref<2x400xf32, #tpu.memory_space<vmem>>, vector<2x400xf32>
    %c0_1 = arith.constant 0 : index
    %c0_2 = arith.constant 0 : index
    %1 = vector.load %arg2[%c0_1, %c0_2] : memref<400x120xf32, #tpu.memory_space<vmem>>, vector<400x120xf32>
    %cst = arith.constant dense<0.000000e+00> : vector<2x120xf32>
    %2 = tpu.matmul %0, %1, %cst {dimension_numbers = #tpu.dot_dimension_numbers<[1], [0], [0], [1], [0, 0, 1, 1], [], []>} : vector<2x400xf32>, vector<400x120xf32>, vector<2x120xf32> -> vector<2x120xf32>
    %c0_3 = arith.constant 0 : index
    %c0_4 = arith.constant 0 : index
    %3 = vector.load %arg3[%c0_3, %c0_4] : memref<1x120xf32, #tpu.memory_space<vmem>>, vector<1x120xf32>
    %4 = vector.broadcast %3 : vector<1x120xf32> to vector<2x120xf32>
    %5 = arith.addf %2, %4 : vector<2x120xf32>
    %cst_5 = arith.constant 0.000000e+00 : f32
    %6 = vector.broadcast %cst_5 : f32 to vector<2x120xf32>
    %7 = arith.maximumf %5, %6 : vector<2x120xf32>
    %c0_6 = arith.constant 0 : index
    %c0_7 = arith.constant 0 : index
    %8 = vector.load %arg4[%c0_6, %c0_7] : memref<120x84xf32, #tpu.memory_space<vmem>>, vector<120x84xf32>
    %cst_8 = arith.constant dense<0.000000e+00> : vector<2x84xf32>
    %9 = tpu.matmul %7, %8, %cst_8 {dimension_numbers = #tpu.dot_dimension_numbers<[1], [0], [0], [1], [0, 0, 1, 1], [], []>} : vector<2x120xf32>, vector<120x84xf32>, vector<2x84xf32> -> vector<2x84xf32>
    %c0_9 = arith.constant 0 : index
    %c0_10 = arith.constant 0 : index
    %10 = vector.load %arg5[%c0_9, %c0_10] : memref<1x84xf32, #tpu.memory_space<vmem>>, vector<1x84xf32>
    %11 = vector.broadcast %10 : vector<1x84xf32> to vector<2x84xf32>
    %12 = arith.addf %9, %11 : vector<2x84xf32>
    %cst_11 = arith.constant 0.000000e+00 : f32
    %13 = vector.broadcast %cst_11 : f32 to vector<2x84xf32>
    %14 = arith.maximumf %12, %13 : vector<2x84xf32>
    %c0_12 = arith.constant 0 : index
    %c0_13 = arith.constant 0 : index
    %15 = vector.load %arg6[%c0_12, %c0_13] : memref<84x10xf32, #tpu.memory_space<vmem>>, vector<84x10xf32>
    %cst_14 = arith.constant dense<0.000000e+00> : vector<2x10xf32>
    %16 = tpu.matmul %14, %15, %cst_14 {dimension_numbers = #tpu.dot_dimension_numbers<[1], [0], [0], [1], [0, 0, 1, 1], [], []>} : vector<2x84xf32>, vector<84x10xf32>, vector<2x10xf32> -> vector<2x10xf32>
    %c0_15 = arith.constant 0 : index
    %c0_16 = arith.constant 0 : index
    %17 = vector.load %arg7[%c0_15, %c0_16] : memref<1x10xf32, #tpu.memory_space<vmem>>, vector<1x10xf32>
    %18 = vector.broadcast %17 : vector<1x10xf32> to vector<2x10xf32>
    %19 = arith.addf %16, %18 : vector<2x10xf32>
    %c0_17 = arith.constant 0 : index
    %c0_18 = arith.constant 0 : index
    %20 = vector.load %arg8[%c0_17, %c0_18] : memref<2x10xf32, #tpu.memory_space<vmem>>, vector<2x10xf32>
    tpu.vector_store %arg8[%c0_17, %c0_18], %19 {strides = array<i32>} : memref<2x10xf32, #tpu.memory_space<vmem>>, vector<2x10xf32>,
    return
  }
  func.func @transform_0(%arg0: i32) -> (i32, i32) {
    %c0_i32 = arith.constant 0 : i32
    %c0_i32_0 = arith.constant 0 : i32
    return %arg0, %c0_i32 : i32, i32
  }
  func.func @transform_1(%arg0: i32) -> (i32, i32) {
    %c0_i32 = arith.constant 0 : i32
    %c0_i32_0 = arith.constant 0 : i32
    %c0_i32_1 = arith.constant 0 : i32
    return %c0_i32, %c0_i32_0 : i32, i32
  }
  func.func @transform_2(%arg0: i32) -> (i32, i32) {
    %c0_i32 = arith.constant 0 : i32
    %c0_i32_0 = arith.constant 0 : i32
    %c0_i32_1 = arith.constant 0 : i32
    return %c0_i32, %c0_i32_0 : i32, i32
  }
  func.func @transform_3(%arg0: i32) -> (i32, i32) {
    %c0_i32 = arith.constant 0 : i32
    %c0_i32_0 = arith.constant 0 : i32
    %c0_i32_1 = arith.constant 0 : i32
    return %c0_i32, %c0_i32_0 : i32, i32
  }
  func.func @transform_4(%arg0: i32) -> (i32, i32) {
    %c0_i32 = arith.constant 0 : i32
    %c0_i32_0 = arith.constant 0 : i32
    %c0_i32_1 = arith.constant 0 : i32
    return %c0_i32, %c0_i32_0 : i32, i32
  }
  func.func @transform_5(%arg0: i32) -> (i32, i32) {
    %c0_i32 = arith.constant 0 : i32
    %c0_i32_0 = arith.constant 0 : i32
    %c0_i32_1 = arith.constant 0 : i32
    return %c0_i32, %c0_i32_0 : i32, i32
  }
  func.func @transform_6(%arg0: i32) -> (i32, i32) {
    %c0_i32 = arith.constant 0 : i32
    %c0_i32_0 = arith.constant 0 : i32
    %c0_i32_1 = arith.constant 0 : i32
    return %c0_i32, %c0_i32_0 : i32, i32
  }
  func.func @transform_7(%arg0: i32) -> (i32, i32) {
    %c0_i32 = arith.constant 0 : i32
    %c0_i32_0 = arith.constant 0 : i32
    return %arg0, %c0_i32 : i32, i32
  }
}

module attributes {stable_mosaic.version = 11 : i64} {
  func.func @_conv_block_kernel(%arg0: i32, %arg1: memref<1x32x96xf32, #tpu.memory_space<vmem>>, %arg2: memref<25x84x168xf32, #tpu.memory_space<vmem>>, %arg3: memref<1x168xf32, #tpu.memory_space<vmem>>, %arg4: memref<2x14x28xf32, #tpu.memory_space<vmem>>, %arg5: memref<2x168x84xf32, #tpu.memory_space<vmem>>, %arg6: memref<25x60x160xf32, #tpu.memory_space<vmem>>, %arg7: memref<1x160xf32, #tpu.memory_space<vmem>>, %arg8: memref<2x5x10xf32, #tpu.memory_space<vmem>>, %arg9: memref<2x160x80xf32, #tpu.memory_space<vmem>>, %arg10: memref<1x5x80xf32, #tpu.memory_space<vmem>>) attributes {dimension_semantics = [#tpu.dimension_semantics<parallel>], iteration_bounds = array<i64: 2>, scalar_prefetch = 0 : i64, scratch_operands = 0 : i64, tpu.core_type = #tpu.core_type<tc>, window_params = [{transform_indices = @transform_0, window_bounds = array<i64: 1, 32, 96>}, {pipeline_mode = #tpu.pipeline_mode<synchronous>, transform_indices = @transform_1, window_bounds = array<i64: 25, 84, 168>}, {pipeline_mode = #tpu.pipeline_mode<synchronous>, transform_indices = @transform_2, window_bounds = array<i64: 1, 168>}, {pipeline_mode = #tpu.pipeline_mode<synchronous>, transform_indices = @transform_3, window_bounds = array<i64: 2, 14, 28>}, {pipeline_mode = #tpu.pipeline_mode<synchronous>, transform_indices = @transform_4, window_bounds = array<i64: 2, 168, 84>}, {pipeline_mode = #tpu.pipeline_mode<synchronous>, transform_indices = @transform_5, window_bounds = array<i64: 25, 60, 160>}, {pipeline_mode = #tpu.pipeline_mode<synchronous>, transform_indices = @transform_6, window_bounds = array<i64: 1, 160>}, {pipeline_mode = #tpu.pipeline_mode<synchronous>, transform_indices = @transform_7, window_bounds = array<i64: 2, 5, 10>}, {pipeline_mode = #tpu.pipeline_mode<synchronous>, transform_indices = @transform_8, window_bounds = array<i64: 2, 160, 80>}, {transform_indices = @transform_9, window_bounds = array<i64: 1, 5, 80>}]} {
    %c0 = arith.constant 0 : index
    %c0_0 = arith.constant 0 : index
    %c0_1 = arith.constant 0 : index
    %0 = vector.load %arg1[%c0, %c0_0, %c0_1] : memref<1x32x96xf32, #tpu.memory_space<vmem>>, vector<1x32x96xf32>
    %1 = vector.shape_cast %0 : vector<1x32x96xf32> to vector<32x96xf32>
    %cst = arith.constant 0.000000e+00 : f32
    %2 = vector.broadcast %cst : f32 to vector<28x168xf32>
    %3 = vector.extract_strided_slice %1 {offsets = [0, 0], sizes = [28, 84], strides = [1, 1]} : vector<32x96xf32> to vector<28x84xf32>
    %c0_2 = arith.constant 0 : index
    %c0_3 = arith.constant 0 : index
    %c0_4 = arith.constant 0 : index
    %4 = vector.load %arg2[%c0_2, %c0_3, %c0_4] : memref<25x84x168xf32, #tpu.memory_space<vmem>>, vector<1x84x168xf32>
    %5 = vector.shape_cast %4 : vector<1x84x168xf32> to vector<84x168xf32>
    %cst_5 = arith.constant dense<0.000000e+00> : vector<28x168xf32>
    %6 = tpu.matmul %3, %5, %cst_5 {dimension_numbers = #tpu.dot_dimension_numbers<[1], [0], [0], [1], [0, 0, 1, 1], [], []>} : vector<28x84xf32>, vector<84x168xf32>, vector<28x168xf32> -> vector<28x168xf32>
    %7 = arith.addf %2, %6 : vector<28x168xf32>
    %8 = vector.extract_strided_slice %1 {offsets = [0, 3], sizes = [28, 84], strides = [1, 1]} : vector<32x96xf32> to vector<28x84xf32>
    %c1 = arith.constant 1 : index
    %c0_6 = arith.constant 0 : index
    %c0_7 = arith.constant 0 : index
    %9 = vector.load %arg2[%c1, %c0_6, %c0_7] : memref<25x84x168xf32, #tpu.memory_space<vmem>>, vector<1x84x168xf32>
    %10 = vector.shape_cast %9 : vector<1x84x168xf32> to vector<84x168xf32>
    %cst_8 = arith.constant dense<0.000000e+00> : vector<28x168xf32>
    %11 = tpu.matmul %8, %10, %cst_8 {dimension_numbers = #tpu.dot_dimension_numbers<[1], [0], [0], [1], [0, 0, 1, 1], [], []>} : vector<28x84xf32>, vector<84x168xf32>, vector<28x168xf32> -> vector<28x168xf32>
    %12 = arith.addf %7, %11 : vector<28x168xf32>
    %13 = vector.extract_strided_slice %1 {offsets = [0, 6], sizes = [28, 84], strides = [1, 1]} : vector<32x96xf32> to vector<28x84xf32>
    %c2 = arith.constant 2 : index
    %c0_9 = arith.constant 0 : index
    %c0_10 = arith.constant 0 : index
    %14 = vector.load %arg2[%c2, %c0_9, %c0_10] : memref<25x84x168xf32, #tpu.memory_space<vmem>>, vector<1x84x168xf32>
    %15 = vector.shape_cast %14 : vector<1x84x168xf32> to vector<84x168xf32>
    %cst_11 = arith.constant dense<0.000000e+00> : vector<28x168xf32>
    %16 = tpu.matmul %13, %15, %cst_11 {dimension_numbers = #tpu.dot_dimension_numbers<[1], [0], [0], [1], [0, 0, 1, 1], [], []>} : vector<28x84xf32>, vector<84x168xf32>, vector<28x168xf32> -> vector<28x168xf32>
    %17 = arith.addf %12, %16 : vector<28x168xf32>
    %18 = vector.extract_strided_slice %1 {offsets = [0, 9], sizes = [28, 84], strides = [1, 1]} : vector<32x96xf32> to vector<28x84xf32>
    %c3 = arith.constant 3 : index
    %c0_12 = arith.constant 0 : index
    %c0_13 = arith.constant 0 : index
    %19 = vector.load %arg2[%c3, %c0_12, %c0_13] : memref<25x84x168xf32, #tpu.memory_space<vmem>>, vector<1x84x168xf32>
    %20 = vector.shape_cast %19 : vector<1x84x168xf32> to vector<84x168xf32>
    %cst_14 = arith.constant dense<0.000000e+00> : vector<28x168xf32>
    %21 = tpu.matmul %18, %20, %cst_14 {dimension_numbers = #tpu.dot_dimension_numbers<[1], [0], [0], [1], [0, 0, 1, 1], [], []>} : vector<28x84xf32>, vector<84x168xf32>, vector<28x168xf32> -> vector<28x168xf32>
    %22 = arith.addf %17, %21 : vector<28x168xf32>
    %23 = vector.extract_strided_slice %1 {offsets = [0, 12], sizes = [28, 84], strides = [1, 1]} : vector<32x96xf32> to vector<28x84xf32>
    %c4 = arith.constant 4 : index
    %c0_15 = arith.constant 0 : index
    %c0_16 = arith.constant 0 : index
    %24 = vector.load %arg2[%c4, %c0_15, %c0_16] : memref<25x84x168xf32, #tpu.memory_space<vmem>>, vector<1x84x168xf32>
    %25 = vector.shape_cast %24 : vector<1x84x168xf32> to vector<84x168xf32>
    %cst_17 = arith.constant dense<0.000000e+00> : vector<28x168xf32>
    %26 = tpu.matmul %23, %25, %cst_17 {dimension_numbers = #tpu.dot_dimension_numbers<[1], [0], [0], [1], [0, 0, 1, 1], [], []>} : vector<28x84xf32>, vector<84x168xf32>, vector<28x168xf32> -> vector<28x168xf32>
    %27 = arith.addf %22, %26 : vector<28x168xf32>
    %28 = vector.extract_strided_slice %1 {offsets = [1, 0], sizes = [28, 84], strides = [1, 1]} : vector<32x96xf32> to vector<28x84xf32>
    %c5 = arith.constant 5 : index
    %c0_18 = arith.constant 0 : index
    %c0_19 = arith.constant 0 : index
    %29 = vector.load %arg2[%c5, %c0_18, %c0_19] : memref<25x84x168xf32, #tpu.memory_space<vmem>>, vector<1x84x168xf32>
    %30 = vector.shape_cast %29 : vector<1x84x168xf32> to vector<84x168xf32>
    %cst_20 = arith.constant dense<0.000000e+00> : vector<28x168xf32>
    %31 = tpu.matmul %28, %30, %cst_20 {dimension_numbers = #tpu.dot_dimension_numbers<[1], [0], [0], [1], [0, 0, 1, 1], [], []>} : vector<28x84xf32>, vector<84x168xf32>, vector<28x168xf32> -> vector<28x168xf32>
    %32 = arith.addf %27, %31 : vector<28x168xf32>
    %33 = vector.extract_strided_slice %1 {offsets = [1, 3], sizes = [28, 84], strides = [1, 1]} : vector<32x96xf32> to vector<28x84xf32>
    %c6 = arith.constant 6 : index
    %c0_21 = arith.constant 0 : index
    %c0_22 = arith.constant 0 : index
    %34 = vector.load %arg2[%c6, %c0_21, %c0_22] : memref<25x84x168xf32, #tpu.memory_space<vmem>>, vector<1x84x168xf32>
    %35 = vector.shape_cast %34 : vector<1x84x168xf32> to vector<84x168xf32>
    %cst_23 = arith.constant dense<0.000000e+00> : vector<28x168xf32>
    %36 = tpu.matmul %33, %35, %cst_23 {dimension_numbers = #tpu.dot_dimension_numbers<[1], [0], [0], [1], [0, 0, 1, 1], [], []>} : vector<28x84xf32>, vector<84x168xf32>, vector<28x168xf32> -> vector<28x168xf32>
    %37 = arith.addf %32, %36 : vector<28x168xf32>
    %38 = vector.extract_strided_slice %1 {offsets = [1, 6], sizes = [28, 84], strides = [1, 1]} : vector<32x96xf32> to vector<28x84xf32>
    %c7 = arith.constant 7 : index
    %c0_24 = arith.constant 0 : index
    %c0_25 = arith.constant 0 : index
    %39 = vector.load %arg2[%c7, %c0_24, %c0_25] : memref<25x84x168xf32, #tpu.memory_space<vmem>>, vector<1x84x168xf32>
    %40 = vector.shape_cast %39 : vector<1x84x168xf32> to vector<84x168xf32>
    %cst_26 = arith.constant dense<0.000000e+00> : vector<28x168xf32>
    %41 = tpu.matmul %38, %40, %cst_26 {dimension_numbers = #tpu.dot_dimension_numbers<[1], [0], [0], [1], [0, 0, 1, 1], [], []>} : vector<28x84xf32>, vector<84x168xf32>, vector<28x168xf32> -> vector<28x168xf32>
    %42 = arith.addf %37, %41 : vector<28x168xf32>
    %43 = vector.extract_strided_slice %1 {offsets = [1, 9], sizes = [28, 84], strides = [1, 1]} : vector<32x96xf32> to vector<28x84xf32>
    %c8 = arith.constant 8 : index
    %c0_27 = arith.constant 0 : index
    %c0_28 = arith.constant 0 : index
    %44 = vector.load %arg2[%c8, %c0_27, %c0_28] : memref<25x84x168xf32, #tpu.memory_space<vmem>>, vector<1x84x168xf32>
    %45 = vector.shape_cast %44 : vector<1x84x168xf32> to vector<84x168xf32>
    %cst_29 = arith.constant dense<0.000000e+00> : vector<28x168xf32>
    %46 = tpu.matmul %43, %45, %cst_29 {dimension_numbers = #tpu.dot_dimension_numbers<[1], [0], [0], [1], [0, 0, 1, 1], [], []>} : vector<28x84xf32>, vector<84x168xf32>, vector<28x168xf32> -> vector<28x168xf32>
    %47 = arith.addf %42, %46 : vector<28x168xf32>
    %48 = vector.extract_strided_slice %1 {offsets = [1, 12], sizes = [28, 84], strides = [1, 1]} : vector<32x96xf32> to vector<28x84xf32>
    %c9 = arith.constant 9 : index
    %c0_30 = arith.constant 0 : index
    %c0_31 = arith.constant 0 : index
    %49 = vector.load %arg2[%c9, %c0_30, %c0_31] : memref<25x84x168xf32, #tpu.memory_space<vmem>>, vector<1x84x168xf32>
    %50 = vector.shape_cast %49 : vector<1x84x168xf32> to vector<84x168xf32>
    %cst_32 = arith.constant dense<0.000000e+00> : vector<28x168xf32>
    %51 = tpu.matmul %48, %50, %cst_32 {dimension_numbers = #tpu.dot_dimension_numbers<[1], [0], [0], [1], [0, 0, 1, 1], [], []>} : vector<28x84xf32>, vector<84x168xf32>, vector<28x168xf32> -> vector<28x168xf32>
    %52 = arith.addf %47, %51 : vector<28x168xf32>
    %53 = vector.extract_strided_slice %1 {offsets = [2, 0], sizes = [28, 84], strides = [1, 1]} : vector<32x96xf32> to vector<28x84xf32>
    %c10 = arith.constant 10 : index
    %c0_33 = arith.constant 0 : index
    %c0_34 = arith.constant 0 : index
    %54 = vector.load %arg2[%c10, %c0_33, %c0_34] : memref<25x84x168xf32, #tpu.memory_space<vmem>>, vector<1x84x168xf32>
    %55 = vector.shape_cast %54 : vector<1x84x168xf32> to vector<84x168xf32>
    %cst_35 = arith.constant dense<0.000000e+00> : vector<28x168xf32>
    %56 = tpu.matmul %53, %55, %cst_35 {dimension_numbers = #tpu.dot_dimension_numbers<[1], [0], [0], [1], [0, 0, 1, 1], [], []>} : vector<28x84xf32>, vector<84x168xf32>, vector<28x168xf32> -> vector<28x168xf32>
    %57 = arith.addf %52, %56 : vector<28x168xf32>
    %58 = vector.extract_strided_slice %1 {offsets = [2, 3], sizes = [28, 84], strides = [1, 1]} : vector<32x96xf32> to vector<28x84xf32>
    %c11 = arith.constant 11 : index
    %c0_36 = arith.constant 0 : index
    %c0_37 = arith.constant 0 : index
    %59 = vector.load %arg2[%c11, %c0_36, %c0_37] : memref<25x84x168xf32, #tpu.memory_space<vmem>>, vector<1x84x168xf32>
    %60 = vector.shape_cast %59 : vector<1x84x168xf32> to vector<84x168xf32>
    %cst_38 = arith.constant dense<0.000000e+00> : vector<28x168xf32>
    %61 = tpu.matmul %58, %60, %cst_38 {dimension_numbers = #tpu.dot_dimension_numbers<[1], [0], [0], [1], [0, 0, 1, 1], [], []>} : vector<28x84xf32>, vector<84x168xf32>, vector<28x168xf32> -> vector<28x168xf32>
    %62 = arith.addf %57, %61 : vector<28x168xf32>
    %63 = vector.extract_strided_slice %1 {offsets = [2, 6], sizes = [28, 84], strides = [1, 1]} : vector<32x96xf32> to vector<28x84xf32>
    %c12 = arith.constant 12 : index
    %c0_39 = arith.constant 0 : index
    %c0_40 = arith.constant 0 : index
    %64 = vector.load %arg2[%c12, %c0_39, %c0_40] : memref<25x84x168xf32, #tpu.memory_space<vmem>>, vector<1x84x168xf32>
    %65 = vector.shape_cast %64 : vector<1x84x168xf32> to vector<84x168xf32>
    %cst_41 = arith.constant dense<0.000000e+00> : vector<28x168xf32>
    %66 = tpu.matmul %63, %65, %cst_41 {dimension_numbers = #tpu.dot_dimension_numbers<[1], [0], [0], [1], [0, 0, 1, 1], [], []>} : vector<28x84xf32>, vector<84x168xf32>, vector<28x168xf32> -> vector<28x168xf32>
    %67 = arith.addf %62, %66 : vector<28x168xf32>
    %68 = vector.extract_strided_slice %1 {offsets = [2, 9], sizes = [28, 84], strides = [1, 1]} : vector<32x96xf32> to vector<28x84xf32>
    %c13 = arith.constant 13 : index
    %c0_42 = arith.constant 0 : index
    %c0_43 = arith.constant 0 : index
    %69 = vector.load %arg2[%c13, %c0_42, %c0_43] : memref<25x84x168xf32, #tpu.memory_space<vmem>>, vector<1x84x168xf32>
    %70 = vector.shape_cast %69 : vector<1x84x168xf32> to vector<84x168xf32>
    %cst_44 = arith.constant dense<0.000000e+00> : vector<28x168xf32>
    %71 = tpu.matmul %68, %70, %cst_44 {dimension_numbers = #tpu.dot_dimension_numbers<[1], [0], [0], [1], [0, 0, 1, 1], [], []>} : vector<28x84xf32>, vector<84x168xf32>, vector<28x168xf32> -> vector<28x168xf32>
    %72 = arith.addf %67, %71 : vector<28x168xf32>
    %73 = vector.extract_strided_slice %1 {offsets = [2, 12], sizes = [28, 84], strides = [1, 1]} : vector<32x96xf32> to vector<28x84xf32>
    %c14 = arith.constant 14 : index
    %c0_45 = arith.constant 0 : index
    %c0_46 = arith.constant 0 : index
    %74 = vector.load %arg2[%c14, %c0_45, %c0_46] : memref<25x84x168xf32, #tpu.memory_space<vmem>>, vector<1x84x168xf32>
    %75 = vector.shape_cast %74 : vector<1x84x168xf32> to vector<84x168xf32>
    %cst_47 = arith.constant dense<0.000000e+00> : vector<28x168xf32>
    %76 = tpu.matmul %73, %75, %cst_47 {dimension_numbers = #tpu.dot_dimension_numbers<[1], [0], [0], [1], [0, 0, 1, 1], [], []>} : vector<28x84xf32>, vector<84x168xf32>, vector<28x168xf32> -> vector<28x168xf32>
    %77 = arith.addf %72, %76 : vector<28x168xf32>
    %78 = vector.extract_strided_slice %1 {offsets = [3, 0], sizes = [28, 84], strides = [1, 1]} : vector<32x96xf32> to vector<28x84xf32>
    %c15 = arith.constant 15 : index
    %c0_48 = arith.constant 0 : index
    %c0_49 = arith.constant 0 : index
    %79 = vector.load %arg2[%c15, %c0_48, %c0_49] : memref<25x84x168xf32, #tpu.memory_space<vmem>>, vector<1x84x168xf32>
    %80 = vector.shape_cast %79 : vector<1x84x168xf32> to vector<84x168xf32>
    %cst_50 = arith.constant dense<0.000000e+00> : vector<28x168xf32>
    %81 = tpu.matmul %78, %80, %cst_50 {dimension_numbers = #tpu.dot_dimension_numbers<[1], [0], [0], [1], [0, 0, 1, 1], [], []>} : vector<28x84xf32>, vector<84x168xf32>, vector<28x168xf32> -> vector<28x168xf32>
    %82 = arith.addf %77, %81 : vector<28x168xf32>
    %83 = vector.extract_strided_slice %1 {offsets = [3, 3], sizes = [28, 84], strides = [1, 1]} : vector<32x96xf32> to vector<28x84xf32>
    %c16 = arith.constant 16 : index
    %c0_51 = arith.constant 0 : index
    %c0_52 = arith.constant 0 : index
    %84 = vector.load %arg2[%c16, %c0_51, %c0_52] : memref<25x84x168xf32, #tpu.memory_space<vmem>>, vector<1x84x168xf32>
    %85 = vector.shape_cast %84 : vector<1x84x168xf32> to vector<84x168xf32>
    %cst_53 = arith.constant dense<0.000000e+00> : vector<28x168xf32>
    %86 = tpu.matmul %83, %85, %cst_53 {dimension_numbers = #tpu.dot_dimension_numbers<[1], [0], [0], [1], [0, 0, 1, 1], [], []>} : vector<28x84xf32>, vector<84x168xf32>, vector<28x168xf32> -> vector<28x168xf32>
    %87 = arith.addf %82, %86 : vector<28x168xf32>
    %88 = vector.extract_strided_slice %1 {offsets = [3, 6], sizes = [28, 84], strides = [1, 1]} : vector<32x96xf32> to vector<28x84xf32>
    %c17 = arith.constant 17 : index
    %c0_54 = arith.constant 0 : index
    %c0_55 = arith.constant 0 : index
    %89 = vector.load %arg2[%c17, %c0_54, %c0_55] : memref<25x84x168xf32, #tpu.memory_space<vmem>>, vector<1x84x168xf32>
    %90 = vector.shape_cast %89 : vector<1x84x168xf32> to vector<84x168xf32>
    %cst_56 = arith.constant dense<0.000000e+00> : vector<28x168xf32>
    %91 = tpu.matmul %88, %90, %cst_56 {dimension_numbers = #tpu.dot_dimension_numbers<[1], [0], [0], [1], [0, 0, 1, 1], [], []>} : vector<28x84xf32>, vector<84x168xf32>, vector<28x168xf32> -> vector<28x168xf32>
    %92 = arith.addf %87, %91 : vector<28x168xf32>
    %93 = vector.extract_strided_slice %1 {offsets = [3, 9], sizes = [28, 84], strides = [1, 1]} : vector<32x96xf32> to vector<28x84xf32>
    %c18 = arith.constant 18 : index
    %c0_57 = arith.constant 0 : index
    %c0_58 = arith.constant 0 : index
    %94 = vector.load %arg2[%c18, %c0_57, %c0_58] : memref<25x84x168xf32, #tpu.memory_space<vmem>>, vector<1x84x168xf32>
    %95 = vector.shape_cast %94 : vector<1x84x168xf32> to vector<84x168xf32>
    %cst_59 = arith.constant dense<0.000000e+00> : vector<28x168xf32>
    %96 = tpu.matmul %93, %95, %cst_59 {dimension_numbers = #tpu.dot_dimension_numbers<[1], [0], [0], [1], [0, 0, 1, 1], [], []>} : vector<28x84xf32>, vector<84x168xf32>, vector<28x168xf32> -> vector<28x168xf32>
    %97 = arith.addf %92, %96 : vector<28x168xf32>
    %98 = vector.extract_strided_slice %1 {offsets = [3, 12], sizes = [28, 84], strides = [1, 1]} : vector<32x96xf32> to vector<28x84xf32>
    %c19 = arith.constant 19 : index
    %c0_60 = arith.constant 0 : index
    %c0_61 = arith.constant 0 : index
    %99 = vector.load %arg2[%c19, %c0_60, %c0_61] : memref<25x84x168xf32, #tpu.memory_space<vmem>>, vector<1x84x168xf32>
    %100 = vector.shape_cast %99 : vector<1x84x168xf32> to vector<84x168xf32>
    %cst_62 = arith.constant dense<0.000000e+00> : vector<28x168xf32>
    %101 = tpu.matmul %98, %100, %cst_62 {dimension_numbers = #tpu.dot_dimension_numbers<[1], [0], [0], [1], [0, 0, 1, 1], [], []>} : vector<28x84xf32>, vector<84x168xf32>, vector<28x168xf32> -> vector<28x168xf32>
    %102 = arith.addf %97, %101 : vector<28x168xf32>
    %103 = vector.extract_strided_slice %1 {offsets = [4, 0], sizes = [28, 84], strides = [1, 1]} : vector<32x96xf32> to vector<28x84xf32>
    %c20 = arith.constant 20 : index
    %c0_63 = arith.constant 0 : index
    %c0_64 = arith.constant 0 : index
    %104 = vector.load %arg2[%c20, %c0_63, %c0_64] : memref<25x84x168xf32, #tpu.memory_space<vmem>>, vector<1x84x168xf32>
    %105 = vector.shape_cast %104 : vector<1x84x168xf32> to vector<84x168xf32>
    %cst_65 = arith.constant dense<0.000000e+00> : vector<28x168xf32>
    %106 = tpu.matmul %103, %105, %cst_65 {dimension_numbers = #tpu.dot_dimension_numbers<[1], [0], [0], [1], [0, 0, 1, 1], [], []>} : vector<28x84xf32>, vector<84x168xf32>, vector<28x168xf32> -> vector<28x168xf32>
    %107 = arith.addf %102, %106 : vector<28x168xf32>
    %108 = vector.extract_strided_slice %1 {offsets = [4, 3], sizes = [28, 84], strides = [1, 1]} : vector<32x96xf32> to vector<28x84xf32>
    %c21 = arith.constant 21 : index
    %c0_66 = arith.constant 0 : index
    %c0_67 = arith.constant 0 : index
    %109 = vector.load %arg2[%c21, %c0_66, %c0_67] : memref<25x84x168xf32, #tpu.memory_space<vmem>>, vector<1x84x168xf32>
    %110 = vector.shape_cast %109 : vector<1x84x168xf32> to vector<84x168xf32>
    %cst_68 = arith.constant dense<0.000000e+00> : vector<28x168xf32>
    %111 = tpu.matmul %108, %110, %cst_68 {dimension_numbers = #tpu.dot_dimension_numbers<[1], [0], [0], [1], [0, 0, 1, 1], [], []>} : vector<28x84xf32>, vector<84x168xf32>, vector<28x168xf32> -> vector<28x168xf32>
    %112 = arith.addf %107, %111 : vector<28x168xf32>
    %113 = vector.extract_strided_slice %1 {offsets = [4, 6], sizes = [28, 84], strides = [1, 1]} : vector<32x96xf32> to vector<28x84xf32>
    %c22 = arith.constant 22 : index
    %c0_69 = arith.constant 0 : index
    %c0_70 = arith.constant 0 : index
    %114 = vector.load %arg2[%c22, %c0_69, %c0_70] : memref<25x84x168xf32, #tpu.memory_space<vmem>>, vector<1x84x168xf32>
    %115 = vector.shape_cast %114 : vector<1x84x168xf32> to vector<84x168xf32>
    %cst_71 = arith.constant dense<0.000000e+00> : vector<28x168xf32>
    %116 = tpu.matmul %113, %115, %cst_71 {dimension_numbers = #tpu.dot_dimension_numbers<[1], [0], [0], [1], [0, 0, 1, 1], [], []>} : vector<28x84xf32>, vector<84x168xf32>, vector<28x168xf32> -> vector<28x168xf32>
    %117 = arith.addf %112, %116 : vector<28x168xf32>
    %118 = vector.extract_strided_slice %1 {offsets = [4, 9], sizes = [28, 84], strides = [1, 1]} : vector<32x96xf32> to vector<28x84xf32>
    %c23 = arith.constant 23 : index
    %c0_72 = arith.constant 0 : index
    %c0_73 = arith.constant 0 : index
    %119 = vector.load %arg2[%c23, %c0_72, %c0_73] : memref<25x84x168xf32, #tpu.memory_space<vmem>>, vector<1x84x168xf32>
    %120 = vector.shape_cast %119 : vector<1x84x168xf32> to vector<84x168xf32>
    %cst_74 = arith.constant dense<0.000000e+00> : vector<28x168xf32>
    %121 = tpu.matmul %118, %120, %cst_74 {dimension_numbers = #tpu.dot_dimension_numbers<[1], [0], [0], [1], [0, 0, 1, 1], [], []>} : vector<28x84xf32>, vector<84x168xf32>, vector<28x168xf32> -> vector<28x168xf32>
    %122 = arith.addf %117, %121 : vector<28x168xf32>
    %123 = vector.extract_strided_slice %1 {offsets = [4, 12], sizes = [28, 84], strides = [1, 1]} : vector<32x96xf32> to vector<28x84xf32>
    %c24 = arith.constant 24 : index
    %c0_75 = arith.constant 0 : index
    %c0_76 = arith.constant 0 : index
    %124 = vector.load %arg2[%c24, %c0_75, %c0_76] : memref<25x84x168xf32, #tpu.memory_space<vmem>>, vector<1x84x168xf32>
    %125 = vector.shape_cast %124 : vector<1x84x168xf32> to vector<84x168xf32>
    %cst_77 = arith.constant dense<0.000000e+00> : vector<28x168xf32>
    %126 = tpu.matmul %123, %125, %cst_77 {dimension_numbers = #tpu.dot_dimension_numbers<[1], [0], [0], [1], [0, 0, 1, 1], [], []>} : vector<28x84xf32>, vector<84x168xf32>, vector<28x168xf32> -> vector<28x168xf32>
    %127 = arith.addf %122, %126 : vector<28x168xf32>
    %c0_78 = arith.constant 0 : index
    %c0_79 = arith.constant 0 : index
    %128 = vector.load %arg3[%c0_78, %c0_79] : memref<1x168xf32, #tpu.memory_space<vmem>>, vector<1x168xf32>
    %129 = vector.broadcast %128 : vector<1x168xf32> to vector<28x168xf32>
    %130 = arith.addf %127, %129 : vector<28x168xf32>
    %cst_80 = arith.constant 0.000000e+00 : f32
    %131 = vector.broadcast %cst_80 : f32 to vector<28x168xf32>
    %132 = arith.maximumf %130, %131 : vector<28x168xf32>
    %c0_81 = arith.constant 0 : index
    %c0_82 = arith.constant 0 : index
    %c0_83 = arith.constant 0 : index
    %133 = vector.load %arg4[%c0_81, %c0_82, %c0_83] : memref<2x14x28xf32, #tpu.memory_space<vmem>>, vector<1x14x28xf32>
    %134 = vector.shape_cast %133 : vector<1x14x28xf32> to vector<14x28xf32>
    %cst_84 = arith.constant dense<0.000000e+00> : vector<14x168xf32>
    %135 = tpu.matmul %134, %132, %cst_84 {dimension_numbers = #tpu.dot_dimension_numbers<[1], [0], [0], [1], [0, 0, 1, 1], [], []>} : vector<14x28xf32>, vector<28x168xf32>, vector<14x168xf32> -> vector<14x168xf32>
    %c1_85 = arith.constant 1 : index
    %c0_86 = arith.constant 0 : index
    %c0_87 = arith.constant 0 : index
    %136 = vector.load %arg4[%c1_85, %c0_86, %c0_87] : memref<2x14x28xf32, #tpu.memory_space<vmem>>, vector<1x14x28xf32>
    %137 = vector.shape_cast %136 : vector<1x14x28xf32> to vector<14x28xf32>
    %cst_88 = arith.constant dense<0.000000e+00> : vector<14x168xf32>
    %138 = tpu.matmul %137, %132, %cst_88 {dimension_numbers = #tpu.dot_dimension_numbers<[1], [0], [0], [1], [0, 0, 1, 1], [], []>} : vector<14x28xf32>, vector<28x168xf32>, vector<14x168xf32> -> vector<14x168xf32>
    %139 = arith.maximumf %135, %138 : vector<14x168xf32>
    %c0_89 = arith.constant 0 : index
    %c0_90 = arith.constant 0 : index
    %c0_91 = arith.constant 0 : index
    %140 = vector.load %arg5[%c0_89, %c0_90, %c0_91] : memref<2x168x84xf32, #tpu.memory_space<vmem>>, vector<1x168x84xf32>
    %141 = vector.shape_cast %140 : vector<1x168x84xf32> to vector<168x84xf32>
    %cst_92 = arith.constant dense<0.000000e+00> : vector<14x84xf32>
    %142 = tpu.matmul %139, %141, %cst_92 {dimension_numbers = #tpu.dot_dimension_numbers<[1], [0], [0], [1], [0, 0, 1, 1], [], []>} : vector<14x168xf32>, vector<168x84xf32>, vector<14x84xf32> -> vector<14x84xf32>
    %c1_93 = arith.constant 1 : index
    %c0_94 = arith.constant 0 : index
    %c0_95 = arith.constant 0 : index
    %143 = vector.load %arg5[%c1_93, %c0_94, %c0_95] : memref<2x168x84xf32, #tpu.memory_space<vmem>>, vector<1x168x84xf32>
    %144 = vector.shape_cast %143 : vector<1x168x84xf32> to vector<168x84xf32>
    %cst_96 = arith.constant dense<0.000000e+00> : vector<14x84xf32>
    %145 = tpu.matmul %139, %144, %cst_96 {dimension_numbers = #tpu.dot_dimension_numbers<[1], [0], [0], [1], [0, 0, 1, 1], [], []>} : vector<14x168xf32>, vector<168x84xf32>, vector<14x84xf32> -> vector<14x84xf32>
    %146 = arith.maximumf %142, %145 : vector<14x84xf32>
    %cst_97 = arith.constant 0.000000e+00 : f32
    %147 = vector.broadcast %cst_97 : f32 to vector<10x160xf32>
    %148 = vector.extract_strided_slice %146 {offsets = [0, 0], sizes = [10, 60], strides = [1, 1]} : vector<14x84xf32> to vector<10x60xf32>
    %c0_98 = arith.constant 0 : index
    %c0_99 = arith.constant 0 : index
    %c0_100 = arith.constant 0 : index
    %149 = vector.load %arg6[%c0_98, %c0_99, %c0_100] : memref<25x60x160xf32, #tpu.memory_space<vmem>>, vector<1x60x160xf32>
    %150 = vector.shape_cast %149 : vector<1x60x160xf32> to vector<60x160xf32>
    %cst_101 = arith.constant dense<0.000000e+00> : vector<10x160xf32>
    %151 = tpu.matmul %148, %150, %cst_101 {dimension_numbers = #tpu.dot_dimension_numbers<[1], [0], [0], [1], [0, 0, 1, 1], [], []>} : vector<10x60xf32>, vector<60x160xf32>, vector<10x160xf32> -> vector<10x160xf32>
    %152 = arith.addf %147, %151 : vector<10x160xf32>
    %153 = vector.extract_strided_slice %146 {offsets = [0, 6], sizes = [10, 60], strides = [1, 1]} : vector<14x84xf32> to vector<10x60xf32>
    %c1_102 = arith.constant 1 : index
    %c0_103 = arith.constant 0 : index
    %c0_104 = arith.constant 0 : index
    %154 = vector.load %arg6[%c1_102, %c0_103, %c0_104] : memref<25x60x160xf32, #tpu.memory_space<vmem>>, vector<1x60x160xf32>
    %155 = vector.shape_cast %154 : vector<1x60x160xf32> to vector<60x160xf32>
    %cst_105 = arith.constant dense<0.000000e+00> : vector<10x160xf32>
    %156 = tpu.matmul %153, %155, %cst_105 {dimension_numbers = #tpu.dot_dimension_numbers<[1], [0], [0], [1], [0, 0, 1, 1], [], []>} : vector<10x60xf32>, vector<60x160xf32>, vector<10x160xf32> -> vector<10x160xf32>
    %157 = arith.addf %152, %156 : vector<10x160xf32>
    %158 = vector.extract_strided_slice %146 {offsets = [0, 12], sizes = [10, 60], strides = [1, 1]} : vector<14x84xf32> to vector<10x60xf32>
    %c2_106 = arith.constant 2 : index
    %c0_107 = arith.constant 0 : index
    %c0_108 = arith.constant 0 : index
    %159 = vector.load %arg6[%c2_106, %c0_107, %c0_108] : memref<25x60x160xf32, #tpu.memory_space<vmem>>, vector<1x60x160xf32>
    %160 = vector.shape_cast %159 : vector<1x60x160xf32> to vector<60x160xf32>
    %cst_109 = arith.constant dense<0.000000e+00> : vector<10x160xf32>
    %161 = tpu.matmul %158, %160, %cst_109 {dimension_numbers = #tpu.dot_dimension_numbers<[1], [0], [0], [1], [0, 0, 1, 1], [], []>} : vector<10x60xf32>, vector<60x160xf32>, vector<10x160xf32> -> vector<10x160xf32>
    %162 = arith.addf %157, %161 : vector<10x160xf32>
    %163 = vector.extract_strided_slice %146 {offsets = [0, 18], sizes = [10, 60], strides = [1, 1]} : vector<14x84xf32> to vector<10x60xf32>
    %c3_110 = arith.constant 3 : index
    %c0_111 = arith.constant 0 : index
    %c0_112 = arith.constant 0 : index
    %164 = vector.load %arg6[%c3_110, %c0_111, %c0_112] : memref<25x60x160xf32, #tpu.memory_space<vmem>>, vector<1x60x160xf32>
    %165 = vector.shape_cast %164 : vector<1x60x160xf32> to vector<60x160xf32>
    %cst_113 = arith.constant dense<0.000000e+00> : vector<10x160xf32>
    %166 = tpu.matmul %163, %165, %cst_113 {dimension_numbers = #tpu.dot_dimension_numbers<[1], [0], [0], [1], [0, 0, 1, 1], [], []>} : vector<10x60xf32>, vector<60x160xf32>, vector<10x160xf32> -> vector<10x160xf32>
    %167 = arith.addf %162, %166 : vector<10x160xf32>
    %168 = vector.extract_strided_slice %146 {offsets = [0, 24], sizes = [10, 60], strides = [1, 1]} : vector<14x84xf32> to vector<10x60xf32>
    %c4_114 = arith.constant 4 : index
    %c0_115 = arith.constant 0 : index
    %c0_116 = arith.constant 0 : index
    %169 = vector.load %arg6[%c4_114, %c0_115, %c0_116] : memref<25x60x160xf32, #tpu.memory_space<vmem>>, vector<1x60x160xf32>
    %170 = vector.shape_cast %169 : vector<1x60x160xf32> to vector<60x160xf32>
    %cst_117 = arith.constant dense<0.000000e+00> : vector<10x160xf32>
    %171 = tpu.matmul %168, %170, %cst_117 {dimension_numbers = #tpu.dot_dimension_numbers<[1], [0], [0], [1], [0, 0, 1, 1], [], []>} : vector<10x60xf32>, vector<60x160xf32>, vector<10x160xf32> -> vector<10x160xf32>
    %172 = arith.addf %167, %171 : vector<10x160xf32>
    %173 = vector.extract_strided_slice %146 {offsets = [1, 0], sizes = [10, 60], strides = [1, 1]} : vector<14x84xf32> to vector<10x60xf32>
    %c5_118 = arith.constant 5 : index
    %c0_119 = arith.constant 0 : index
    %c0_120 = arith.constant 0 : index
    %174 = vector.load %arg6[%c5_118, %c0_119, %c0_120] : memref<25x60x160xf32, #tpu.memory_space<vmem>>, vector<1x60x160xf32>
    %175 = vector.shape_cast %174 : vector<1x60x160xf32> to vector<60x160xf32>
    %cst_121 = arith.constant dense<0.000000e+00> : vector<10x160xf32>
    %176 = tpu.matmul %173, %175, %cst_121 {dimension_numbers = #tpu.dot_dimension_numbers<[1], [0], [0], [1], [0, 0, 1, 1], [], []>} : vector<10x60xf32>, vector<60x160xf32>, vector<10x160xf32> -> vector<10x160xf32>
    %177 = arith.addf %172, %176 : vector<10x160xf32>
    %178 = vector.extract_strided_slice %146 {offsets = [1, 6], sizes = [10, 60], strides = [1, 1]} : vector<14x84xf32> to vector<10x60xf32>
    %c6_122 = arith.constant 6 : index
    %c0_123 = arith.constant 0 : index
    %c0_124 = arith.constant 0 : index
    %179 = vector.load %arg6[%c6_122, %c0_123, %c0_124] : memref<25x60x160xf32, #tpu.memory_space<vmem>>, vector<1x60x160xf32>
    %180 = vector.shape_cast %179 : vector<1x60x160xf32> to vector<60x160xf32>
    %cst_125 = arith.constant dense<0.000000e+00> : vector<10x160xf32>
    %181 = tpu.matmul %178, %180, %cst_125 {dimension_numbers = #tpu.dot_dimension_numbers<[1], [0], [0], [1], [0, 0, 1, 1], [], []>} : vector<10x60xf32>, vector<60x160xf32>, vector<10x160xf32> -> vector<10x160xf32>
    %182 = arith.addf %177, %181 : vector<10x160xf32>
    %183 = vector.extract_strided_slice %146 {offsets = [1, 12], sizes = [10, 60], strides = [1, 1]} : vector<14x84xf32> to vector<10x60xf32>
    %c7_126 = arith.constant 7 : index
    %c0_127 = arith.constant 0 : index
    %c0_128 = arith.constant 0 : index
    %184 = vector.load %arg6[%c7_126, %c0_127, %c0_128] : memref<25x60x160xf32, #tpu.memory_space<vmem>>, vector<1x60x160xf32>
    %185 = vector.shape_cast %184 : vector<1x60x160xf32> to vector<60x160xf32>
    %cst_129 = arith.constant dense<0.000000e+00> : vector<10x160xf32>
    %186 = tpu.matmul %183, %185, %cst_129 {dimension_numbers = #tpu.dot_dimension_numbers<[1], [0], [0], [1], [0, 0, 1, 1], [], []>} : vector<10x60xf32>, vector<60x160xf32>, vector<10x160xf32> -> vector<10x160xf32>
    %187 = arith.addf %182, %186 : vector<10x160xf32>
    %188 = vector.extract_strided_slice %146 {offsets = [1, 18], sizes = [10, 60], strides = [1, 1]} : vector<14x84xf32> to vector<10x60xf32>
    %c8_130 = arith.constant 8 : index
    %c0_131 = arith.constant 0 : index
    %c0_132 = arith.constant 0 : index
    %189 = vector.load %arg6[%c8_130, %c0_131, %c0_132] : memref<25x60x160xf32, #tpu.memory_space<vmem>>, vector<1x60x160xf32>
    %190 = vector.shape_cast %189 : vector<1x60x160xf32> to vector<60x160xf32>
    %cst_133 = arith.constant dense<0.000000e+00> : vector<10x160xf32>
    %191 = tpu.matmul %188, %190, %cst_133 {dimension_numbers = #tpu.dot_dimension_numbers<[1], [0], [0], [1], [0, 0, 1, 1], [], []>} : vector<10x60xf32>, vector<60x160xf32>, vector<10x160xf32> -> vector<10x160xf32>
    %192 = arith.addf %187, %191 : vector<10x160xf32>
    %193 = vector.extract_strided_slice %146 {offsets = [1, 24], sizes = [10, 60], strides = [1, 1]} : vector<14x84xf32> to vector<10x60xf32>
    %c9_134 = arith.constant 9 : index
    %c0_135 = arith.constant 0 : index
    %c0_136 = arith.constant 0 : index
    %194 = vector.load %arg6[%c9_134, %c0_135, %c0_136] : memref<25x60x160xf32, #tpu.memory_space<vmem>>, vector<1x60x160xf32>
    %195 = vector.shape_cast %194 : vector<1x60x160xf32> to vector<60x160xf32>
    %cst_137 = arith.constant dense<0.000000e+00> : vector<10x160xf32>
    %196 = tpu.matmul %193, %195, %cst_137 {dimension_numbers = #tpu.dot_dimension_numbers<[1], [0], [0], [1], [0, 0, 1, 1], [], []>} : vector<10x60xf32>, vector<60x160xf32>, vector<10x160xf32> -> vector<10x160xf32>
    %197 = arith.addf %192, %196 : vector<10x160xf32>
    %198 = vector.extract_strided_slice %146 {offsets = [2, 0], sizes = [10, 60], strides = [1, 1]} : vector<14x84xf32> to vector<10x60xf32>
    %c10_138 = arith.constant 10 : index
    %c0_139 = arith.constant 0 : index
    %c0_140 = arith.constant 0 : index
    %199 = vector.load %arg6[%c10_138, %c0_139, %c0_140] : memref<25x60x160xf32, #tpu.memory_space<vmem>>, vector<1x60x160xf32>
    %200 = vector.shape_cast %199 : vector<1x60x160xf32> to vector<60x160xf32>
    %cst_141 = arith.constant dense<0.000000e+00> : vector<10x160xf32>
    %201 = tpu.matmul %198, %200, %cst_141 {dimension_numbers = #tpu.dot_dimension_numbers<[1], [0], [0], [1], [0, 0, 1, 1], [], []>} : vector<10x60xf32>, vector<60x160xf32>, vector<10x160xf32> -> vector<10x160xf32>
    %202 = arith.addf %197, %201 : vector<10x160xf32>
    %203 = vector.extract_strided_slice %146 {offsets = [2, 6], sizes = [10, 60], strides = [1, 1]} : vector<14x84xf32> to vector<10x60xf32>
    %c11_142 = arith.constant 11 : index
    %c0_143 = arith.constant 0 : index
    %c0_144 = arith.constant 0 : index
    %204 = vector.load %arg6[%c11_142, %c0_143, %c0_144] : memref<25x60x160xf32, #tpu.memory_space<vmem>>, vector<1x60x160xf32>
    %205 = vector.shape_cast %204 : vector<1x60x160xf32> to vector<60x160xf32>
    %cst_145 = arith.constant dense<0.000000e+00> : vector<10x160xf32>
    %206 = tpu.matmul %203, %205, %cst_145 {dimension_numbers = #tpu.dot_dimension_numbers<[1], [0], [0], [1], [0, 0, 1, 1], [], []>} : vector<10x60xf32>, vector<60x160xf32>, vector<10x160xf32> -> vector<10x160xf32>
    %207 = arith.addf %202, %206 : vector<10x160xf32>
    %208 = vector.extract_strided_slice %146 {offsets = [2, 12], sizes = [10, 60], strides = [1, 1]} : vector<14x84xf32> to vector<10x60xf32>
    %c12_146 = arith.constant 12 : index
    %c0_147 = arith.constant 0 : index
    %c0_148 = arith.constant 0 : index
    %209 = vector.load %arg6[%c12_146, %c0_147, %c0_148] : memref<25x60x160xf32, #tpu.memory_space<vmem>>, vector<1x60x160xf32>
    %210 = vector.shape_cast %209 : vector<1x60x160xf32> to vector<60x160xf32>
    %cst_149 = arith.constant dense<0.000000e+00> : vector<10x160xf32>
    %211 = tpu.matmul %208, %210, %cst_149 {dimension_numbers = #tpu.dot_dimension_numbers<[1], [0], [0], [1], [0, 0, 1, 1], [], []>} : vector<10x60xf32>, vector<60x160xf32>, vector<10x160xf32> -> vector<10x160xf32>
    %212 = arith.addf %207, %211 : vector<10x160xf32>
    %213 = vector.extract_strided_slice %146 {offsets = [2, 18], sizes = [10, 60], strides = [1, 1]} : vector<14x84xf32> to vector<10x60xf32>
    %c13_150 = arith.constant 13 : index
    %c0_151 = arith.constant 0 : index
    %c0_152 = arith.constant 0 : index
    %214 = vector.load %arg6[%c13_150, %c0_151, %c0_152] : memref<25x60x160xf32, #tpu.memory_space<vmem>>, vector<1x60x160xf32>
    %215 = vector.shape_cast %214 : vector<1x60x160xf32> to vector<60x160xf32>
    %cst_153 = arith.constant dense<0.000000e+00> : vector<10x160xf32>
    %216 = tpu.matmul %213, %215, %cst_153 {dimension_numbers = #tpu.dot_dimension_numbers<[1], [0], [0], [1], [0, 0, 1, 1], [], []>} : vector<10x60xf32>, vector<60x160xf32>, vector<10x160xf32> -> vector<10x160xf32>
    %217 = arith.addf %212, %216 : vector<10x160xf32>
    %218 = vector.extract_strided_slice %146 {offsets = [2, 24], sizes = [10, 60], strides = [1, 1]} : vector<14x84xf32> to vector<10x60xf32>
    %c14_154 = arith.constant 14 : index
    %c0_155 = arith.constant 0 : index
    %c0_156 = arith.constant 0 : index
    %219 = vector.load %arg6[%c14_154, %c0_155, %c0_156] : memref<25x60x160xf32, #tpu.memory_space<vmem>>, vector<1x60x160xf32>
    %220 = vector.shape_cast %219 : vector<1x60x160xf32> to vector<60x160xf32>
    %cst_157 = arith.constant dense<0.000000e+00> : vector<10x160xf32>
    %221 = tpu.matmul %218, %220, %cst_157 {dimension_numbers = #tpu.dot_dimension_numbers<[1], [0], [0], [1], [0, 0, 1, 1], [], []>} : vector<10x60xf32>, vector<60x160xf32>, vector<10x160xf32> -> vector<10x160xf32>
    %222 = arith.addf %217, %221 : vector<10x160xf32>
    %223 = vector.extract_strided_slice %146 {offsets = [3, 0], sizes = [10, 60], strides = [1, 1]} : vector<14x84xf32> to vector<10x60xf32>
    %c15_158 = arith.constant 15 : index
    %c0_159 = arith.constant 0 : index
    %c0_160 = arith.constant 0 : index
    %224 = vector.load %arg6[%c15_158, %c0_159, %c0_160] : memref<25x60x160xf32, #tpu.memory_space<vmem>>, vector<1x60x160xf32>
    %225 = vector.shape_cast %224 : vector<1x60x160xf32> to vector<60x160xf32>
    %cst_161 = arith.constant dense<0.000000e+00> : vector<10x160xf32>
    %226 = tpu.matmul %223, %225, %cst_161 {dimension_numbers = #tpu.dot_dimension_numbers<[1], [0], [0], [1], [0, 0, 1, 1], [], []>} : vector<10x60xf32>, vector<60x160xf32>, vector<10x160xf32> -> vector<10x160xf32>
    %227 = arith.addf %222, %226 : vector<10x160xf32>
    %228 = vector.extract_strided_slice %146 {offsets = [3, 6], sizes = [10, 60], strides = [1, 1]} : vector<14x84xf32> to vector<10x60xf32>
    %c16_162 = arith.constant 16 : index
    %c0_163 = arith.constant 0 : index
    %c0_164 = arith.constant 0 : index
    %229 = vector.load %arg6[%c16_162, %c0_163, %c0_164] : memref<25x60x160xf32, #tpu.memory_space<vmem>>, vector<1x60x160xf32>
    %230 = vector.shape_cast %229 : vector<1x60x160xf32> to vector<60x160xf32>
    %cst_165 = arith.constant dense<0.000000e+00> : vector<10x160xf32>
    %231 = tpu.matmul %228, %230, %cst_165 {dimension_numbers = #tpu.dot_dimension_numbers<[1], [0], [0], [1], [0, 0, 1, 1], [], []>} : vector<10x60xf32>, vector<60x160xf32>, vector<10x160xf32> -> vector<10x160xf32>
    %232 = arith.addf %227, %231 : vector<10x160xf32>
    %233 = vector.extract_strided_slice %146 {offsets = [3, 12], sizes = [10, 60], strides = [1, 1]} : vector<14x84xf32> to vector<10x60xf32>
    %c17_166 = arith.constant 17 : index
    %c0_167 = arith.constant 0 : index
    %c0_168 = arith.constant 0 : index
    %234 = vector.load %arg6[%c17_166, %c0_167, %c0_168] : memref<25x60x160xf32, #tpu.memory_space<vmem>>, vector<1x60x160xf32>
    %235 = vector.shape_cast %234 : vector<1x60x160xf32> to vector<60x160xf32>
    %cst_169 = arith.constant dense<0.000000e+00> : vector<10x160xf32>
    %236 = tpu.matmul %233, %235, %cst_169 {dimension_numbers = #tpu.dot_dimension_numbers<[1], [0], [0], [1], [0, 0, 1, 1], [], []>} : vector<10x60xf32>, vector<60x160xf32>, vector<10x160xf32> -> vector<10x160xf32>
    %237 = arith.addf %232, %236 : vector<10x160xf32>
    %238 = vector.extract_strided_slice %146 {offsets = [3, 18], sizes = [10, 60], strides = [1, 1]} : vector<14x84xf32> to vector<10x60xf32>
    %c18_170 = arith.constant 18 : index
    %c0_171 = arith.constant 0 : index
    %c0_172 = arith.constant 0 : index
    %239 = vector.load %arg6[%c18_170, %c0_171, %c0_172] : memref<25x60x160xf32, #tpu.memory_space<vmem>>, vector<1x60x160xf32>
    %240 = vector.shape_cast %239 : vector<1x60x160xf32> to vector<60x160xf32>
    %cst_173 = arith.constant dense<0.000000e+00> : vector<10x160xf32>
    %241 = tpu.matmul %238, %240, %cst_173 {dimension_numbers = #tpu.dot_dimension_numbers<[1], [0], [0], [1], [0, 0, 1, 1], [], []>} : vector<10x60xf32>, vector<60x160xf32>, vector<10x160xf32> -> vector<10x160xf32>
    %242 = arith.addf %237, %241 : vector<10x160xf32>
    %243 = vector.extract_strided_slice %146 {offsets = [3, 24], sizes = [10, 60], strides = [1, 1]} : vector<14x84xf32> to vector<10x60xf32>
    %c19_174 = arith.constant 19 : index
    %c0_175 = arith.constant 0 : index
    %c0_176 = arith.constant 0 : index
    %244 = vector.load %arg6[%c19_174, %c0_175, %c0_176] : memref<25x60x160xf32, #tpu.memory_space<vmem>>, vector<1x60x160xf32>
    %245 = vector.shape_cast %244 : vector<1x60x160xf32> to vector<60x160xf32>
    %cst_177 = arith.constant dense<0.000000e+00> : vector<10x160xf32>
    %246 = tpu.matmul %243, %245, %cst_177 {dimension_numbers = #tpu.dot_dimension_numbers<[1], [0], [0], [1], [0, 0, 1, 1], [], []>} : vector<10x60xf32>, vector<60x160xf32>, vector<10x160xf32> -> vector<10x160xf32>
    %247 = arith.addf %242, %246 : vector<10x160xf32>
    %248 = vector.extract_strided_slice %146 {offsets = [4, 0], sizes = [10, 60], strides = [1, 1]} : vector<14x84xf32> to vector<10x60xf32>
    %c20_178 = arith.constant 20 : index
    %c0_179 = arith.constant 0 : index
    %c0_180 = arith.constant 0 : index
    %249 = vector.load %arg6[%c20_178, %c0_179, %c0_180] : memref<25x60x160xf32, #tpu.memory_space<vmem>>, vector<1x60x160xf32>
    %250 = vector.shape_cast %249 : vector<1x60x160xf32> to vector<60x160xf32>
    %cst_181 = arith.constant dense<0.000000e+00> : vector<10x160xf32>
    %251 = tpu.matmul %248, %250, %cst_181 {dimension_numbers = #tpu.dot_dimension_numbers<[1], [0], [0], [1], [0, 0, 1, 1], [], []>} : vector<10x60xf32>, vector<60x160xf32>, vector<10x160xf32> -> vector<10x160xf32>
    %252 = arith.addf %247, %251 : vector<10x160xf32>
    %253 = vector.extract_strided_slice %146 {offsets = [4, 6], sizes = [10, 60], strides = [1, 1]} : vector<14x84xf32> to vector<10x60xf32>
    %c21_182 = arith.constant 21 : index
    %c0_183 = arith.constant 0 : index
    %c0_184 = arith.constant 0 : index
    %254 = vector.load %arg6[%c21_182, %c0_183, %c0_184] : memref<25x60x160xf32, #tpu.memory_space<vmem>>, vector<1x60x160xf32>
    %255 = vector.shape_cast %254 : vector<1x60x160xf32> to vector<60x160xf32>
    %cst_185 = arith.constant dense<0.000000e+00> : vector<10x160xf32>
    %256 = tpu.matmul %253, %255, %cst_185 {dimension_numbers = #tpu.dot_dimension_numbers<[1], [0], [0], [1], [0, 0, 1, 1], [], []>} : vector<10x60xf32>, vector<60x160xf32>, vector<10x160xf32> -> vector<10x160xf32>
    %257 = arith.addf %252, %256 : vector<10x160xf32>
    %258 = vector.extract_strided_slice %146 {offsets = [4, 12], sizes = [10, 60], strides = [1, 1]} : vector<14x84xf32> to vector<10x60xf32>
    %c22_186 = arith.constant 22 : index
    %c0_187 = arith.constant 0 : index
    %c0_188 = arith.constant 0 : index
    %259 = vector.load %arg6[%c22_186, %c0_187, %c0_188] : memref<25x60x160xf32, #tpu.memory_space<vmem>>, vector<1x60x160xf32>
    %260 = vector.shape_cast %259 : vector<1x60x160xf32> to vector<60x160xf32>
    %cst_189 = arith.constant dense<0.000000e+00> : vector<10x160xf32>
    %261 = tpu.matmul %258, %260, %cst_189 {dimension_numbers = #tpu.dot_dimension_numbers<[1], [0], [0], [1], [0, 0, 1, 1], [], []>} : vector<10x60xf32>, vector<60x160xf32>, vector<10x160xf32> -> vector<10x160xf32>
    %262 = arith.addf %257, %261 : vector<10x160xf32>
    %263 = vector.extract_strided_slice %146 {offsets = [4, 18], sizes = [10, 60], strides = [1, 1]} : vector<14x84xf32> to vector<10x60xf32>
    %c23_190 = arith.constant 23 : index
    %c0_191 = arith.constant 0 : index
    %c0_192 = arith.constant 0 : index
    %264 = vector.load %arg6[%c23_190, %c0_191, %c0_192] : memref<25x60x160xf32, #tpu.memory_space<vmem>>, vector<1x60x160xf32>
    %265 = vector.shape_cast %264 : vector<1x60x160xf32> to vector<60x160xf32>
    %cst_193 = arith.constant dense<0.000000e+00> : vector<10x160xf32>
    %266 = tpu.matmul %263, %265, %cst_193 {dimension_numbers = #tpu.dot_dimension_numbers<[1], [0], [0], [1], [0, 0, 1, 1], [], []>} : vector<10x60xf32>, vector<60x160xf32>, vector<10x160xf32> -> vector<10x160xf32>
    %267 = arith.addf %262, %266 : vector<10x160xf32>
    %268 = vector.extract_strided_slice %146 {offsets = [4, 24], sizes = [10, 60], strides = [1, 1]} : vector<14x84xf32> to vector<10x60xf32>
    %c24_194 = arith.constant 24 : index
    %c0_195 = arith.constant 0 : index
    %c0_196 = arith.constant 0 : index
    %269 = vector.load %arg6[%c24_194, %c0_195, %c0_196] : memref<25x60x160xf32, #tpu.memory_space<vmem>>, vector<1x60x160xf32>
    %270 = vector.shape_cast %269 : vector<1x60x160xf32> to vector<60x160xf32>
    %cst_197 = arith.constant dense<0.000000e+00> : vector<10x160xf32>
    %271 = tpu.matmul %268, %270, %cst_197 {dimension_numbers = #tpu.dot_dimension_numbers<[1], [0], [0], [1], [0, 0, 1, 1], [], []>} : vector<10x60xf32>, vector<60x160xf32>, vector<10x160xf32> -> vector<10x160xf32>
    %272 = arith.addf %267, %271 : vector<10x160xf32>
    %c0_198 = arith.constant 0 : index
    %c0_199 = arith.constant 0 : index
    %273 = vector.load %arg7[%c0_198, %c0_199] : memref<1x160xf32, #tpu.memory_space<vmem>>, vector<1x160xf32>
    %274 = vector.broadcast %273 : vector<1x160xf32> to vector<10x160xf32>
    %275 = arith.addf %272, %274 : vector<10x160xf32>
    %cst_200 = arith.constant 0.000000e+00 : f32
    %276 = vector.broadcast %cst_200 : f32 to vector<10x160xf32>
    %277 = arith.maximumf %275, %276 : vector<10x160xf32>
    %c0_201 = arith.constant 0 : index
    %c0_202 = arith.constant 0 : index
    %c0_203 = arith.constant 0 : index
    %278 = vector.load %arg8[%c0_201, %c0_202, %c0_203] : memref<2x5x10xf32, #tpu.memory_space<vmem>>, vector<1x5x10xf32>
    %279 = vector.shape_cast %278 : vector<1x5x10xf32> to vector<5x10xf32>
    %cst_204 = arith.constant dense<0.000000e+00> : vector<5x160xf32>
    %280 = tpu.matmul %279, %277, %cst_204 {dimension_numbers = #tpu.dot_dimension_numbers<[1], [0], [0], [1], [0, 0, 1, 1], [], []>} : vector<5x10xf32>, vector<10x160xf32>, vector<5x160xf32> -> vector<5x160xf32>
    %c1_205 = arith.constant 1 : index
    %c0_206 = arith.constant 0 : index
    %c0_207 = arith.constant 0 : index
    %281 = vector.load %arg8[%c1_205, %c0_206, %c0_207] : memref<2x5x10xf32, #tpu.memory_space<vmem>>, vector<1x5x10xf32>
    %282 = vector.shape_cast %281 : vector<1x5x10xf32> to vector<5x10xf32>
    %cst_208 = arith.constant dense<0.000000e+00> : vector<5x160xf32>
    %283 = tpu.matmul %282, %277, %cst_208 {dimension_numbers = #tpu.dot_dimension_numbers<[1], [0], [0], [1], [0, 0, 1, 1], [], []>} : vector<5x10xf32>, vector<10x160xf32>, vector<5x160xf32> -> vector<5x160xf32>
    %284 = arith.maximumf %280, %283 : vector<5x160xf32>
    %c0_209 = arith.constant 0 : index
    %c0_210 = arith.constant 0 : index
    %c0_211 = arith.constant 0 : index
    %285 = vector.load %arg9[%c0_209, %c0_210, %c0_211] : memref<2x160x80xf32, #tpu.memory_space<vmem>>, vector<1x160x80xf32>
    %286 = vector.shape_cast %285 : vector<1x160x80xf32> to vector<160x80xf32>
    %cst_212 = arith.constant dense<0.000000e+00> : vector<5x80xf32>
    %287 = tpu.matmul %284, %286, %cst_212 {dimension_numbers = #tpu.dot_dimension_numbers<[1], [0], [0], [1], [0, 0, 1, 1], [], []>} : vector<5x160xf32>, vector<160x80xf32>, vector<5x80xf32> -> vector<5x80xf32>
    %c1_213 = arith.constant 1 : index
    %c0_214 = arith.constant 0 : index
    %c0_215 = arith.constant 0 : index
    %288 = vector.load %arg9[%c1_213, %c0_214, %c0_215] : memref<2x160x80xf32, #tpu.memory_space<vmem>>, vector<1x160x80xf32>
    %289 = vector.shape_cast %288 : vector<1x160x80xf32> to vector<160x80xf32>
    %cst_216 = arith.constant dense<0.000000e+00> : vector<5x80xf32>
    %290 = tpu.matmul %284, %289, %cst_216 {dimension_numbers = #tpu.dot_dimension_numbers<[1], [0], [0], [1], [0, 0, 1, 1], [], []>} : vector<5x160xf32>, vector<160x80xf32>, vector<5x80xf32> -> vector<5x80xf32>
    %291 = arith.maximumf %287, %290 : vector<5x80xf32>
    %c0_217 = arith.constant 0 : index
    %c0_218 = arith.constant 0 : index
    %c0_219 = arith.constant 0 : index
    %292 = vector.load %arg10[%c0_217, %c0_218, %c0_219] : memref<1x5x80xf32, #tpu.memory_space<vmem>>, vector<1x5x80xf32>
    %293 = vector.shape_cast %292 : vector<1x5x80xf32> to vector<5x80xf32>
    %294 = vector.shape_cast %291 : vector<5x80xf32> to vector<1x5x80xf32>
    tpu.vector_store %arg10[%c0_217, %c0_218, %c0_219], %294 {strides = array<i32>} : memref<1x5x80xf32, #tpu.memory_space<vmem>>, vector<1x5x80xf32>,
    return
  }
  func.func @transform_0(%arg0: i32) -> (i32, i32, i32) {
    %c0_i32 = arith.constant 0 : i32
    %c0_i32_0 = arith.constant 0 : i32
    %c0_i32_1 = arith.constant 0 : i32
    return %arg0, %c0_i32, %c0_i32_0 : i32, i32, i32
  }
  func.func @transform_1(%arg0: i32) -> (i32, i32, i32) {
    %c0_i32 = arith.constant 0 : i32
    %c0_i32_0 = arith.constant 0 : i32
    %c0_i32_1 = arith.constant 0 : i32
    %c0_i32_2 = arith.constant 0 : i32
    return %c0_i32, %c0_i32_0, %c0_i32_1 : i32, i32, i32
  }
  func.func @transform_2(%arg0: i32) -> (i32, i32) {
    %c0_i32 = arith.constant 0 : i32
    %c0_i32_0 = arith.constant 0 : i32
    %c0_i32_1 = arith.constant 0 : i32
    return %c0_i32, %c0_i32_0 : i32, i32
  }
  func.func @transform_3(%arg0: i32) -> (i32, i32, i32) {
    %c0_i32 = arith.constant 0 : i32
    %c0_i32_0 = arith.constant 0 : i32
    %c0_i32_1 = arith.constant 0 : i32
    %c0_i32_2 = arith.constant 0 : i32
    return %c0_i32, %c0_i32_0, %c0_i32_1 : i32, i32, i32
  }
  func.func @transform_4(%arg0: i32) -> (i32, i32, i32) {
    %c0_i32 = arith.constant 0 : i32
    %c0_i32_0 = arith.constant 0 : i32
    %c0_i32_1 = arith.constant 0 : i32
    %c0_i32_2 = arith.constant 0 : i32
    return %c0_i32, %c0_i32_0, %c0_i32_1 : i32, i32, i32
  }
  func.func @transform_5(%arg0: i32) -> (i32, i32, i32) {
    %c0_i32 = arith.constant 0 : i32
    %c0_i32_0 = arith.constant 0 : i32
    %c0_i32_1 = arith.constant 0 : i32
    %c0_i32_2 = arith.constant 0 : i32
    return %c0_i32, %c0_i32_0, %c0_i32_1 : i32, i32, i32
  }
  func.func @transform_6(%arg0: i32) -> (i32, i32) {
    %c0_i32 = arith.constant 0 : i32
    %c0_i32_0 = arith.constant 0 : i32
    %c0_i32_1 = arith.constant 0 : i32
    return %c0_i32, %c0_i32_0 : i32, i32
  }
  func.func @transform_7(%arg0: i32) -> (i32, i32, i32) {
    %c0_i32 = arith.constant 0 : i32
    %c0_i32_0 = arith.constant 0 : i32
    %c0_i32_1 = arith.constant 0 : i32
    %c0_i32_2 = arith.constant 0 : i32
    return %c0_i32, %c0_i32_0, %c0_i32_1 : i32, i32, i32
  }
  func.func @transform_8(%arg0: i32) -> (i32, i32, i32) {
    %c0_i32 = arith.constant 0 : i32
    %c0_i32_0 = arith.constant 0 : i32
    %c0_i32_1 = arith.constant 0 : i32
    %c0_i32_2 = arith.constant 0 : i32
    return %c0_i32, %c0_i32_0, %c0_i32_1 : i32, i32, i32
  }
  func.func @transform_9(%arg0: i32) -> (i32, i32, i32) {
    %c0_i32 = arith.constant 0 : i32
    %c0_i32_0 = arith.constant 0 : i32
    %c0_i32_1 = arith.constant 0 : i32
    return %arg0, %c0_i32, %c0_i32_0 : i32, i32, i32
  }
}

</mosaic_0001>

<bundles_post_ra>
// kernel: net_forward.3
= control target key start
LH: loop header
LB: loop body
LE: loop exit
PB: predicated region body
PF: predicated region fallthrough
CT: control target
= control target key end

     0   :  { %s598_s0 = inlined_call_operand.vmem [shape: f32[2,400], index: 0, kind: input, shape index: {}]   ;;  %s599_s1 = inlined_call_operand.vmem [shape: f32[400,120], index: 1, kind: input, shape index: {}]   ;;  %s600_s2 = inlined_call_operand.vmem [shape: f32[1,120], index: 2, kind: input, shape index: {}]   ;;  %s601_s3 = inlined_call_operand.vmem [shape: f32[120,84], index: 3, kind: input, shape index: {}]   ;;  %s602_s4 = inlined_call_operand.vmem [shape: f32[1,84], index: 4, kind: input, shape index: {}]   ;;  %s603_s5 = inlined_call_operand.vmem [shape: f32[84,10], index: 5, kind: input, shape index: {}]   ;;  %s604_s6 = inlined_call_operand.vmem [shape: f32[1,10], index: 6, kind: input, shape index: {}]   ;;  %s605_s7 = inlined_call_operand.hbm [shape: f32[2,10], index: 7, kind: output, shape index: {}]  }
   0x1   :  { %v75_v0 = vld [vmem:[%s599_s1 + $0x178] sm:$0xff]  ;;  %v74_v2 = vld [vmem:[%s599_s1 + $0x170] sm:$0xff]  ;;  %v73_v5 = vld [vmem:[%s599_s1 + $0x168] sm:$0xff] }
   0x2   :  { %v43_v1 = vld [vmem:[%s599_s1 + $0x78] sm:$0xff]  ;;  %134 = vmatpush.msra.mxu2 %v75_v0  ;;  %v42_v3 = vld [vmem:[%s599_s1 + $0x70] sm:$0xff]  ;;  %v41_v6 = vld [vmem:[%s599_s1 + $0x68] sm:$0xff] }
   0x3   :  { %94 = vmatpush.msra.mxu0 %v43_v1  ;;  %v59_v4 = vld [vmem:[%s599_s1 + $0xf8] sm:$0xff]  ;;  %v58_v7 = vld [vmem:[%s599_s1 + $0xf0] sm:$0xff]  ;;  %v57_v8 = vld [vmem:[%s599_s1 + $0xe8] sm:$0xff] }
   0x4   :  { %114 = vmatpush.msra.mxu1 %v59_v4  ;;  %135 = vmatpush.msra.mxu2 %v74_v2  ;;  %v72_v9 = vld [vmem:[%s599_s1 + $0x160] sm:$0xff]  ;;  %v71_v12 = vld [vmem:[%s599_s1 + $0x158] sm:$0xff]  ;;  %v70_v15 = vld [vmem:[%s599_s1 + $0x150] sm:$0xff] }
   0x5   :  { %95 = vmatpush.msra.mxu0 %v42_v3  ;;  %v40_v10 = vld [vmem:[%s599_s1 + $0x60] sm:$0xff]  ;;  %v39_v13 = vld [vmem:[%s599_s1 + $0x58] sm:$0xff]  ;;  %v38_v16 = vld [vmem:[%s599_s1 + $0x50] sm:$0xff] }
   0x6   :  { %115 = vmatpush.msra.mxu1 %v58_v7  ;;  %136 = vmatpush.msra.mxu2 %v73_v5  ;;  %v56_v11 = vld [vmem:[%s599_s1 + $0xe0] sm:$0xff]  ;;  %v55_v14 = vld [vmem:[%s599_s1 + $0xd8] sm:$0xff]  ;;  %v54_v17 = vld [vmem:[%s599_s1 + $0xd0] sm:$0xff] }
   0x7   :  { %96 = vmatpush.msra.mxu0 %v41_v6  ;;  %v69_v18 = vld [vmem:[%s599_s1 + $0x148] sm:$0xff]  ;;  %v68_v21 = vld [vmem:[%s599_s1 + $0x140] sm:$0xff]  ;;  %v67_v24 = vld [vmem:[%s599_s1 + $0x138] sm:$0xff] }
   0x8   :  { %116 = vmatpush.msra.mxu1 %v57_v8  ;;  %137 = vmatpush.msra.mxu2 %v72_v9  ;;  %v37_v19 = vld [vmem:[%s599_s1 + $0x48] sm:$0xff]  ;;  %v36_v22 = vld [vmem:[%s599_s1 + $0x40] sm:$0xff]  ;;  %v35_v25 = vld [vmem:[%s599_s1 + $0x38] sm:$0xff] }
   0x9   :  { %97 = vmatpush.msra.mxu0 %v40_v10  ;;  %v53_v20 = vld [vmem:[%s599_s1 + $0xc8] sm:$0xff]  ;;  %v52_v23 = vld [vmem:[%s599_s1 + $0xc0] sm:$0xff]  ;;  %v51_v26 = vld [vmem:[%s599_s1 + $0xb8] sm:$0xff] }
   0xa   :  { %117 = vmatpush.msra.mxu1 %v56_v11  ;;  %138 = vmatpush.msra.mxu2 %v71_v12  ;;  %v77_v27 = vld [vmem:[%s599_s1 + $0x188] sm:$0xff]  ;;  %v27_v28 = vld [vmem:[%s598_s0] sm:$0xff]  ;;  %v66_v29 = vld [vmem:[%s599_s1 + $0x130] sm:$0xff] }
   0xb   :  { %98 = vmatpush.msra.mxu0 %v39_v13  ;;  %v34_v30 = vld [vmem:[%s599_s1 + $0x30] sm:$0xff]  ;;  %168 = vmatpush.msra.mxu3 %v77_v27  ;;  %83 = vst [vmem:[#allocation1] ss:$4 sm:$0xff] %v27_v28  ;;  %v76_v31 = vld [vmem:[%s599_s1 + $0x180] sm:$0xff]  ;;  %v65_v34 = vld [vmem:[%s599_s1 + $0x128] sm:$0xff] }
   0xc   :  { %118 = vmatpush.msra.mxu1 %v55_v14  ;;  %139 = vmatpush.msra.mxu2 %v70_v15  ;;  %v50_v32 = vld [vmem:[%s599_s1 + $0xb0] sm:$0xff]  ;;  %v33_v35 = vld [vmem:[%s599_s1 + $0x28] sm:$0xff]  ;;  %v64_v36 = vld [vmem:[%s599_s1 + $0x120] sm:$0xff] }
   0xd   :  { %99 = vmatpush.msra.mxu0 %v38_v16  ;;  %v189_v33 = vld [vmem:[%s601_s3 + $0x70] sm:$0xff]  ;;  %169 = vmatpush.msra.mxu3 %v76_v31  ;;  %v32_v37 = vld [vmem:[%s599_s1 + $0x20] sm:$0xff]  ;;  %v49_v38 = vld [vmem:[%s599_s1 + $0xa8] sm:$0xff] }
   0xe   :  { %119 = vmatpush.msra.mxu1 %v54_v17  ;;  %140 = vmatpush.msra.mxu2 %v69_v18  ;;  %v188_v39 = vld [vmem:[%s601_s3 + $0x68] sm:$0xff]  ;;  %v48_v40 = vld [vmem:[%s599_s1 + $0xa0] sm:$0xff] }
   0xf   :  { %100 = vmatpush.msra.mxu0 %v37_v19  ;;  %199 = vmatpush.msrb.mxu3 %v189_v33  ;;  %v187_v41 = vld [vmem:[%s601_s3 + $0x60] sm:$0xff] }
  0x10   :  { %120 = vmatpush.msra.mxu1 %v53_v20  ;;  %141 = vmatpush.msra.mxu2 %v68_v21 }
  0x11   :  { %101 = vmatpush.msra.mxu0 %v36_v22 }
  0x12   :  { %121 = vmatpush.msra.mxu1 %v52_v23  ;;  %142 = vmatpush.msra.mxu2 %v67_v24 }
  0x13   :  { %102 = vmatpush.msra.mxu0 %v35_v25 }
  0x14   :  { %122 = vmatpush.msra.mxu1 %v51_v26  ;;  %143 = vmatpush.msra.mxu2 %v66_v29 }
  0x15   :  { %103 = vmatpush.msra.mxu0 %v34_v30 }
  0x16   :  { %123 = vmatpush.msra.mxu1 %v50_v32  ;;  %144 = vmatpush.msra.mxu2 %v65_v34 }
  0x17   :  { %104 = vmatpush.msra.mxu0 %v33_v35 }
  0x18   :  { %12 = vsyncpa [#allocation3], 0  ;;  %124 = vmatpush.msra.mxu1 %v49_v38  ;;  %v63_v42 = vld [vmem:[%s599_s1 + $0x118] sm:$0xff]  ;;  %200 = vmatpush.msrb.mxu3 %v188_v39  ;;  %vm91_vm0 = vcmask 130048   ;;  %v62_v45 = vld [vmem:[%s599_s1 + $0x110] sm:$0xff]  ;;  %vm238_vm1 = vcmask 1043456  }
  0x19   :  { %v31_v43 = vld [vmem:[%s599_s1 + $0x18] sm:$0xff]  ;;  %145 = vmatpush.msra.mxu2 %v64_v36  ;;  %105 = vmatpush.msra.mxu0 %v32_v37  ;;  %v30_v46 = vld [vmem:[%s599_s1 + $0x10] sm:$0xff]  ;;  %v61_v50 = vld [vmem:[%s599_s1 + $0x108] sm:$0xff]  ;;  %vm194_vm2 = vcmask 982016   ;;  %vm234_vm3 = vcmask 687104   ;;  %s314_s15 = smov [#allocation2]  }
  0x1a   :  { %v47_v44 = vld [vmem:[%s599_s1 + $0x98] sm:$0xff]  ;;  %125 = vmatpush.msra.mxu1 %v48_v40  ;;  %201 = vmatpush.msrb.mxu3 %v187_v41  ;;  %v46_v48 = vld [vmem:[%s599_s1 + $0x90] sm:$0xff]  ;;  %v29_v51 = vld [vmem:[%s599_s1 + $0x8] sm:$0xff]  ;;  %s269_s16 = sshll.u32 %s314_s15, 4  ;;  %vm262_vm4 = vcmask 74752   ;;  %s270_s16 = int_to_ptr.vmem [resolvable:$true] %s269_s16 }
  0x1b   :  { %v87_v47 = vld.sshfl [vmem:[#allocation1 + $0x18] sm:$0xff pattern:$0x73625140]  ;;  %146 = vmatpush.msra.mxu2 %v63_v42  ;;  %106 = vmatpush.msra.mxu0 %v31_v43  ;;  %v45_v52 = vld [vmem:[%s599_s1 + $0x88] sm:$0xff]  ;;  %v185_v53 = vld [vmem:[%s601_s3 + $0x50] sm:$0xff] }
  0x1c   :  { %v186_v49 = vld [vmem:[%s601_s3 + $0x58] sm:$0xff]  ;;  %126 = vmatpush.msra.mxu1 %v47_v44  ;;  %280 = vmatmul.msk.f32.vlgmr.msra.gmra.mxu3 %vm91_vm0, %v87_v47  ;;  %v60_v54 = vld [vmem:[%s599_s1 + $0x100] sm:$0xff]  ;;  %v86_v56 = vld.sshfl [vmem:[#allocation1 + $0x10] sm:$0xff pattern:$0x73625140] }
  0x1d   :  { %147 = vmatpush.msra.mxu2 %v62_v45  ;;  %107 = vmatpush.msra.mxu0 %v30_v46  ;;  %v28_v55 = vld [vmem:[%s599_s1] sm:$0xff]  ;;  %v184_v59 = vld [vmem:[%s601_s3 + $0x48] sm:$0xff]  ;;  %v182_v62 = vld [vmem:[%s601_s3 + $0x38] sm:$0xff] }
  0x1e   :  { %127 = vmatpush.msra.mxu1 %v46_v48  ;;  %202 = vmatpush.msrb.mxu3 %v186_v49  ;;  %v84_v57 = vld.sshfl [vmem:[#allocation1] sm:$0xff pattern:$0x73625140]  ;;  %v85_v60 = vld.sshfl [vmem:[#allocation1 + $0x8] sm:$0xff pattern:$0x73625140] }
  0x1f   :  { %148 = vmatpush.msra.mxu2 %v61_v50  ;;  %108 = vmatpush.msra.mxu0 %v29_v51  ;;  %v44_v58 = vld [vmem:[%s599_s1 + $0x80] sm:$0xff]  ;;  %v181_v63 = vld [vmem:[%s601_s3 + $0x30] sm:$0xff]  ;;  %v180_v0 = vld [vmem:[%s601_s3 + $0x28] sm:$0xff] }
  0x20   :  { %128 = vmatpush.msra.mxu1 %v45_v52  ;;  %203 = vmatpush.msrb.mxu3 %v185_v53  ;;  %v183_v61 = vld [vmem:[%s601_s3 + $0x40] sm:$0xff]  ;;  %v178_v2 = vld [vmem:[%s601_s3 + $0x18] sm:$0xff]  ;;  %v177_v3 = vld [vmem:[%s601_s3 + $0x10] sm:$0xff] }
  0x21   :  { %149 = vmatpush.msra.mxu2 %v60_v54  ;;  %109 = vmatpush.msra.mxu0 %v28_v55  ;;  %v179_v1 = vld [vmem:[%s601_s3 + $0x20] sm:$0xff]  ;;  %v176_v4 = vld [vmem:[%s601_s3 + $0x8] sm:$0xff]  ;;  %v229_v6 = vld [vmem:[%s603_s5 + $0x50] sm:$0xf] }
  0x22   :  { %150 = vmatmul.f32.vlgmr.msra.gmra.mxu2 %v86_v56  ;;  %110 = vmatmul.f32.vlgmr.msra.gmra.mxu0 %v84_v57  ;;  %v175_v5 = vld [vmem:[%s601_s3] sm:$0xff]  ;;  %v228_v7 = vld [vmem:[%s603_s5 + $0x48] sm:$0xff]  ;;  %v226_v9 = vld [vmem:[%s603_s5 + $0x38] sm:$0xff] }
  0x23   :  { %129 = vmatpush.msra.mxu1 %v44_v58  ;;  %204 = vmatpush.msrb.mxu3 %v184_v59  ;;  %v227_v8 = vld [vmem:[%s603_s5 + $0x40] sm:$0xff]  ;;  %v225_v10 = vld [vmem:[%s603_s5 + $0x30] sm:$0xff]  ;;  %v224_v11 = vld [vmem:[%s603_s5 + $0x28] sm:$0xff] }
  0x24   :  { %130 = vmatmul.f32.vlgmr.msra.gmra.mxu1 %v85_v60  ;;  %282 = vmatpush.msk.msrb.mxu0 %vm238_vm1, %v229_v6  ;;  %v223_v12 = vld [vmem:[%s603_s5 + $0x20] sm:$0xff]  ;;  %v222_v13 = vld [vmem:[%s603_s5 + $0x18] sm:$0xff]  ;;  %v221_v24 = vld [vmem:[%s603_s5 + $0x10] sm:$0xff] }
  0x25   :  { %205 = vmatpush.msrb.mxu3 %v183_v61  ;;  %v285_v14 = vld [vmem:[%s600_s2] ss:$0 sm:$0xff]  ;;  %v220_v25 = vld [vmem:[%s603_s5 + $0x8] sm:$0xff] }
  0x26   :  { %248 = vmatpush.msrb.mxu0 %v228_v7  ;;  %v219_v26 = vld [vmem:[%s603_s5] sm:$0xff]  ;;  %s271_s5 = sshll.u32 %s605_s7, 4  ;;  %s272_s5 = int_to_ptr.hbm [resolvable:$true] %s271_s5 }
  0x27   :  { %206 = vmatpush.msrb.mxu3 %v182_v62  ;;  %v286_v27 = vld [vmem:[%s602_s4] ss:$0 sm:$0xff] }
  0x28   :  { %249 = vmatpush.msrb.mxu0 %v227_v8  ;;  %v287_v31 = vld [vmem:[%s604_s6] ss:$0 sm:$0xff] }
  0x29   :  { %207 = vmatpush.msrb.mxu3 %v181_v63 }
  0x2a   :  { %250 = vmatpush.msrb.mxu0 %v226_v9 }
  0x2b   :  { %208 = vmatpush.msrb.mxu3 %v180_v0 }
  0x2c   :  { %251 = vmatpush.msrb.mxu0 %v225_v10 }
  0x2d   :  { %209 = vmatpush.msrb.mxu3 %v179_v1 }
  0x2e   :  { %252 = vmatpush.msrb.mxu0 %v224_v11 }
  0x2f   :  { %210 = vmatpush.msrb.mxu3 %v178_v2 }
  0x30   :  { %253 = vmatpush.msrb.mxu0 %v223_v12 }
  0x31   :  { %211 = vmatpush.msrb.mxu3 %v177_v3 }
  0x32   :  { %254 = vmatpush.msrb.mxu0 %v222_v13 }
  0x33   :  { %212 = vmatpush.msrb.mxu3 %v176_v4 }
  0x34   :  { %255 = vmatpush.msrb.mxu0 %v221_v24 }
  0x35   :  { %213 = vmatpush.msrb.mxu3 %v175_v5 }
  0x36   :  { %256 = vmatpush.msrb.mxu0 %v220_v25 }
  0x38   :  { %257 = vmatpush.msrb.mxu0 %v219_v26 }
  0x9f   :  { %v111_v15 = vpop.f32.mrf.mxu0  ;;  %v171_v20 = vpop.f32.mrf.mxu3 }
  0xa0   :  { %v112_v16 = vadd.f32 %v285_v14, %v111_v15 }
  0xa1   :  { %v131_v17 = vpop.f32.mrf.mxu1 }
  0xa2   :  { %v132_v18 = vadd.f32 %v131_v17, %v112_v16 }
  0xa5   :  { %v151_v19 = vpop.f32.mrf.mxu2 }
  0xa6   :  { %v152_v21 = vadd.f32 %v151_v19, %v132_v18 }
  0xa8   :  { %v172_v22 = vadd.f32 %v171_v20, %v152_v21 }
  0xaa   :  { %v174_v23 = vmax.f32 %v172_v22, 0.0 }
  0xac   :  { %281 = vmatmul.msk.f32.vlgmr.msrb.gmra.mxu3 %vm194_vm2, %v174_v23 }
 0x12f   :  { %v215_v28 = vpop.f32.mrf.mxu3 }
 0x130   :  { %v216_v29 = vadd.f32 %v286_v27, %v215_v28 }
 0x132   :  { %v218_v30 = vmax.f32 %v216_v29, 0.0 }
 0x134   :  { %283 = vmatmul.msk.f32.vlgmr.msrb.gmra.mxu0 %vm234_vm3, %v218_v30 }
 0x1b1   :  { %v259_v32 = vpop.f32.mrf.mxu0 }
 0x1b2   :  { %v260_v33 = vadd.f32 %v287_v31, %v259_v32 }
 0x1b4   :  { %263 = vst.msk [vmem:[#allocation2] sm:$0x3] %vm262_vm4, %v260_v33 }
 0x1b5   :  { %274 = dma.vmem_to_hbm [thread:$0]  %s270_s16, 32, %s272_s5, [#allocation3]  }
 0x1b6   :  { %312 = dma.done.wait [#allocation3], 32  }
 0x1b7   :  { %313 = vsyncadd [#allocation3], 4294967264 }
 0x1b8   :  { %279 = vsyncpa [#allocation3], 1 }

// kernel: net_forward.2
= control target key start
LH: loop header
LB: loop body
LE: loop exit
PB: predicated region body
PF: predicated region fallthrough
CT: control target
= control target key end

     0   :  { %s7156_s30 = smov 0   ;;  %s11937_s0 = inlined_call_operand.vmem [shape: f32[2,32,96], index: 0, kind: input, shape index: {}]   ;;  %s11938_s1 = inlined_call_operand.vmem [shape: f32[25,84,168], index: 1, kind: input, shape index: {}]   ;;  %s11939_s2 = inlined_call_operand.vmem [shape: f32[1,168], index: 2, kind: input, shape index: {}]   ;;  %s11940_s3 = inlined_call_operand.vmem [shape: f32[2,14,28], index: 3, kind: input, shape index: {}]   ;;  %s11941_s4 = inlined_call_operand.vmem [shape: f32[2,168,84], index: 4, kind: input, shape index: {}]   ;;  %s11942_s5 = inlined_call_operand.vmem [shape: f32[25,60,160], index: 5, kind: input, shape index: {}]   ;;  %s11943_s6 = inlined_call_operand.vmem [shape: f32[1,160], index: 6, kind: input, shape index: {}]   ;;  %s11944_s7 = inlined_call_operand.vmem [shape: f32[2,5,10], index: 7, kind: input, shape index: {}]   ;;  %s11945_s8 = inlined_call_operand.vmem [shape: f32[2,160,80], index: 8, kind: input, shape index: {}]   ;;  %s11946_s9 = inlined_call_operand.vmem [shape: f32[2,5,80], index: 9, kind: output, shape index: {}]  }
   0x1 LB: > { %s5681_s10 = sadd.s32 4294967295, %s7098_s30   ;;  %p5685_p0 = scmp.ge.s32.totalorder %s7098_s30, 1  ;;  %s7098_s30 = sphi %s7156_s30, %s19_s30  }
   0x2   : > { %p287_p1 = scmp.lt.s32.totalorder %s7098_s30, 3 }
   0x4   : > { %p288_p2 = pnand %p5685_p0, %p287_p1 }
   0x6   : > { %291 = sbr.rel (%p288_p2) target bundleno = 1730 (0x6c2), region = 56 }
   0xb   : > { %p322_p3 = scmp.lt.s32.totalorder %s5681_s10, 1  ;;  %s7100_s15 = smov 125   ;;  %v355_v4 = vld [vmem:[%s11938_s1 + $0xa0] sm:$0xf]  ;;  %vm401_vm0 = vcmask 1043456   ;;  %v353_v6 = vld [vmem:[%s11938_s1 + $0x90] sm:$0xff] }
   0xc   : > { %s7101_s16 = smov 122   ;;  %v356_v5 = vld [vmem:[%s11938_s1 + $0xa8] sm:$0xf]  ;;  %5721 = vmatpush.msk.msra.mxu2 %vm401_vm0, %v355_v4  ;;  %v354_v7 = vld [vmem:[%s11938_s1 + $0x98] sm:$0xff]  ;;  %v351_v8 = vld [vmem:[%s11938_s1 + $0x80] sm:$0xff]  ;;  %s7102_s17 = smov 119  }
   0xd   : > { %s12024_s10 = smov (!%p322_p3, %s5681_s10), 1  ;;  %5726 = vmatpush.msk.msra.mxu3 %vm401_vm0, %v356_v5  ;;  %v352_v9 = vld [vmem:[%s11938_s1 + $0x88] sm:$0xff]  ;;  %v5709_v10 = vld [vmem:[%s11938_s1 + $0x150] sm:$0xf]  ;;  %v5710_v11 = vld [vmem:[%s11938_s1 + $0x158] sm:$0xf] }
   0xe   : > { %s7073_s11 = sshll.u32 %s12024_s10, 5  ;;  %486 = vmatpush.msra.mxu2 %v353_v6  ;;  %5711 = vmatpush.msk.msra.mxu0 %vm401_vm0, %v5709_v10  ;;  %v349_v12 = vld [vmem:[%s11938_s1 + $0x70] sm:$0xff]  ;;  %v350_v13 = vld [vmem:[%s11938_s1 + $0x78] sm:$0xff]  ;;  %v5707_v14 = vld [vmem:[%s11938_s1 + $0x140] sm:$0xff]  ;;  %s7103_s12 = smov 116   ;;  %vm392_vm1 = vcmask 687104  }
   0xf   : > { %s7170_s14 = scalar_lea.vmem %s11937_s0, %s7073_s11  ;;  %515 = vmatpush.msra.mxu3 %v354_v7  ;;  %5716 = vmatpush.msk.msra.mxu1 %vm401_vm0, %v5710_v11  ;;  %v5708_v15 = vld [vmem:[%s11938_s1 + $0x148] sm:$0xff]  ;;  %v347_v16 = vld [vmem:[%s11938_s1 + $0x60] sm:$0xff]  ;;  %v5705_v18 = vld [vmem:[%s11938_s1 + $0x130] sm:$0xff]  ;;  %vm894_vm2 = vcmask 1046528   ;;  %vm1449_vm3 = vcmask 1045504   ;;  %vm2004_vm4 = vcmask 1044480  }
  0x10   : > { %v7173_v0 = vld [vmem:[%s7170_s14] sm:$0xff]  ;;  %v7176_v1 = vld [vmem:[%s7170_s14 + $0x10] sm:$0xff]  ;;  %v7185_v2 = vld [vmem:[%s7170_s14 + $0x8] sm:$0xff]  ;;  %487 = vmatpush.msra.mxu2 %v351_v8  ;;  %414 = vmatpush.msra.mxu0 %v5707_v14  ;;  %vm3114_vm5 = vcmask 228352   ;;  %vm3253_vm6 = vcmask 326656   ;;  %vm3415_vm7 = vcmask 490496  }
  0x11   : > { %384 = vrot.lane.b32.xlu0 %v7173_v0, %s7100_s15  ;;  %388 = vrot.lane.b32.xlu1 %v7176_v1, %s7100_s15  ;;  %v7188_v3 = vld [vmem:[%s7170_s14 + $0x18] sm:$0xff]  ;;  %v348_v17 = vld [vmem:[%s11938_s1 + $0x68] sm:$0xff]  ;;  %v895_v41 = vrot.slane %v7173_v0, 1  ;;  %v896_v42 = vrot.slane %v7185_v2, 1  ;;  %v898_v48 = vrot.slane %v7176_v1, 1  ;;  %s7104_s22 = smov 110  }
  0x12   : > { %561 = vrot.lane.b32.xlu2 %v7173_v0, %s7101_s16  ;;  %516 = vmatpush.msra.mxu3 %v352_v9  ;;  %v5706_v19 = vld [vmem:[%s11938_s1 + $0x138] sm:$0xff]  ;;  %v345_v20 = vld [vmem:[%s11938_s1 + $0x50] sm:$0xff]  ;;  %v5703_v22 = vld [vmem:[%s11938_s1 + $0x120] sm:$0xff]  ;;  %v7368_v53 = vrot.slane %v7188_v3, 1  ;;  %s7105_s23 = smov 104   ;;  %vm5406_vm8 = vcmask 1041408  }
  0x13   : > { %488 = vmatpush.msra.mxu2 %v349_v12  ;;  %443 = vmatpush.msra.mxu1 %v5708_v15  ;;  %v346_v21 = vld [vmem:[%s11938_s1 + $0x58] sm:$0xff]  ;;  %v5704_v23 = vld [vmem:[%s11938_s1 + $0x128] sm:$0xff]  ;;  %v343_v24 = vld [vmem:[%s11938_s1 + $0x40] sm:$0xff]  ;;  %v7346_v47 = vsel %vm894_vm2, %v895_v41, %v896_v42  ;;  %v7362_v51 = vsel %vm894_vm2, %v896_v42, %v898_v48  ;;  %vm5402_vm9 = vcmask 80896   ;;  %vm5520_vm10 = vcmask 261120  }
  0x14   : > { %517 = vmatpush.msra.mxu3 %v350_v13  ;;  %415 = vmatpush.msra.mxu0 %v5705_v18  ;;  %v344_v25 = vld [vmem:[%s11938_s1 + $0x48] sm:$0xff]  ;;  %v5701_v26 = vld [vmem:[%s11938_s1 + $0x110] sm:$0xff]  ;;  %v5702_v27 = vld [vmem:[%s11938_s1 + $0x118] sm:$0xff]  ;;  %v7376_v54 = vsel %vm894_vm2, %v898_v48, %v7368_v53  ;;  %vm5626_vm11 = vcmask 651264  }
  0x15   : > { %489 = vmatpush.msra.mxu2 %v347_v16  ;;  %444 = vmatpush.msra.mxu1 %v5706_v19  ;;  %v341_v28 = vld [vmem:[%s11938_s1 + $0x30] sm:$0xff]  ;;  %v342_v29 = vld [vmem:[%s11938_s1 + $0x38] sm:$0xff]  ;;  %v5699_v30 = vld [vmem:[%s11938_s1 + $0x100] sm:$0xff] }
  0x16   : > { %518 = vmatpush.msra.mxu3 %v348_v17  ;;  %416 = vmatpush.msra.mxu0 %v5703_v22  ;;  %v5700_v31 = vld [vmem:[%s11938_s1 + $0x108] sm:$0xff]  ;;  %v339_v32 = vld [vmem:[%s11938_s1 + $0x20] sm:$0xff]  ;;  %v5697_v34 = vld [vmem:[%s11938_s1 + $0xf0] sm:$0xff] }
  0x17   : > { %490 = vmatpush.msra.mxu2 %v345_v20  ;;  %445 = vmatpush.msra.mxu1 %v5704_v23  ;;  %v340_v33 = vld [vmem:[%s11938_s1 + $0x28] sm:$0xff]  ;;  %v5698_v35 = vld [vmem:[%s11938_s1 + $0xf8] sm:$0xff]  ;;  %v337_v36 = vld [vmem:[%s11938_s1 + $0x10] sm:$0xff] }
  0x18   : > { %519 = vmatpush.msra.mxu3 %v346_v21  ;;  %417 = vmatpush.msra.mxu0 %v5701_v26  ;;  %v338_v37 = vld [vmem:[%s11938_s1 + $0x18] sm:$0xff]  ;;  %v5695_v38 = vld [vmem:[%s11938_s1 + $0xe0] sm:$0xff]  ;;  %v5696_v39 = vld [vmem:[%s11938_s1 + $0xe8] sm:$0xff] }
  0x19   : > { %386 = vrot.lane.b32.xlu0 %v7185_v2, %s7100_s15  ;;  %390 = vrot.lane.b32.xlu1 %v7188_v3, %s7100_s15  ;;  %v335_v40 = vld [vmem:[%s11938_s1] sm:$0xff]  ;;  %v336_v43 = vld [vmem:[%s11938_s1 + $0x8] sm:$0xff] }
  0x1a   : > { %563 = vrot.lane.b32.xlu2 %v7185_v2, %s7101_s16  ;;  %491 = vmatpush.msra.mxu2 %v343_v24  ;;  %v5693_v44 = vld [vmem:[%s11938_s1 + $0xd0] sm:$0xff]  ;;  %v5694_v45 = vld [vmem:[%s11938_s1 + $0xd8] sm:$0xff]  ;;  %v5691_v46 = vld [vmem:[%s11938_s1 + $0xc0] sm:$0xff] }
  0x1b   : > { %520 = vmatpush.msra.mxu3 %v344_v25  ;;  %446 = vmatpush.msra.mxu1 %v5702_v27  ;;  %v5692_v49 = vld [vmem:[%s11938_s1 + $0xc8] sm:$0xff]  ;;  %v5689_v50 = vld [vmem:[%s11938_s1 + $0xb0] sm:$0xff]  ;;  %v5690_v52 = vld [vmem:[%s11938_s1 + $0xb8] sm:$0xff] }
  0x1c   : > { %492 = vmatpush.msra.mxu2 %v341_v28  ;;  %418 = vmatpush.msra.mxu0 %v5699_v30  ;;  %v5783_v55 = vld [vmem:[%s11938_s1 + $0x2b0] sm:$0xf]  ;;  %v5784_v56 = vld [vmem:[%s11938_s1 + $0x2b8] sm:$0xf]  ;;  %v5781_v57 = vld [vmem:[%s11938_s1 + $0x2a0] sm:$0xff] }
  0x1d   : > { %521 = vmatpush.msra.mxu3 %v342_v29  ;;  %447 = vmatpush.msra.mxu1 %v5700_v31  ;;  %v5782_v58 = vld [vmem:[%s11938_s1 + $0x2a8] sm:$0xff]  ;;  %v5751_v59 = vld [vmem:[%s11938_s1 + $0x200] sm:$0xf]  ;;  %v5779_v62 = vld [vmem:[%s11938_s1 + $0x290] sm:$0xff] }
  0x1e   : > { %493 = vmatpush.msra.mxu2 %v339_v32  ;;  %419 = vmatpush.msra.mxu0 %v5697_v34  ;;  %v5752_v61 = vld [vmem:[%s11938_s1 + $0x208] sm:$0xf]  ;;  %v5780_v63 = vld [vmem:[%s11938_s1 + $0x298] sm:$0xff]  ;;  %v5749_v4 = vld [vmem:[%s11938_s1 + $0x1f0] sm:$0xff] }
  0x1f   : > { %522 = vmatpush.msra.mxu3 %v340_v33  ;;  %448 = vmatpush.msra.mxu1 %v5698_v35  ;;  %v5750_v5 = vld [vmem:[%s11938_s1 + $0x1f8] sm:$0xff]  ;;  %v5777_v6 = vld [vmem:[%s11938_s1 + $0x280] sm:$0xff]  ;;  %v5778_v7 = vld [vmem:[%s11938_s1 + $0x288] sm:$0xff] }
  0x20   : > { %494 = vmatpush.msra.mxu2 %v337_v36  ;;  %420 = vmatpush.msra.mxu0 %v5695_v38  ;;  %v5747_v8 = vld [vmem:[%s11938_s1 + $0x1e0] sm:$0xff]  ;;  %v5748_v9 = vld [vmem:[%s11938_s1 + $0x1e8] sm:$0xff]  ;;  %v5775_v10 = vld [vmem:[%s11938_s1 + $0x270] sm:$0xff] }
  0x21   : > { %565 = vrot.lane.b32.xlu0 %v7176_v1, %s7101_s16  ;;  %567 = vrot.lane.b32.xlu1 %v7188_v3, %s7101_s16  ;;  %v5776_v11 = vld [vmem:[%s11938_s1 + $0x278] sm:$0xff]  ;;  %v5745_v12 = vld [vmem:[%s11938_s1 + $0x1d0] sm:$0xff] }
  0x22   : > { %672 = vrot.lane.b32.xlu2 %v7173_v0, %s7102_s17  ;;  %523 = vmatpush.msra.mxu3 %v338_v37  ;;  %v5746_v13 = vld [vmem:[%s11938_s1 + $0x1d8] sm:$0xff]  ;;  %v5773_v14 = vld [vmem:[%s11938_s1 + $0x260] sm:$0xff]  ;;  %v5774_v16 = vld [vmem:[%s11938_s1 + $0x268] sm:$0xff] }
  0x23   : > { %449 = vmatpush.msra.mxu1 %v5696_v39  ;;  %495 = vmatpush.msra.mxu2 %v335_v40  ;;  %v5743_v17 = vld [vmem:[%s11938_s1 + $0x1c0] sm:$0xff]  ;;  %v5744_v18 = vld [vmem:[%s11938_s1 + $0x1c8] sm:$0xff]  ;;  %v5771_v19 = vld [vmem:[%s11938_s1 + $0x250] sm:$0xff] }
  0x24   : > { %524 = vmatpush.msra.mxu3 %v336_v43  ;;  %5722 = vmatmul.msk.f32.vlgmr.msra.gmra.mxu2 %vm392_vm1, %v7173_v0  ;;  %v5772_v20 = vld [vmem:[%s11938_s1 + $0x258] sm:$0xff]  ;;  %v5741_v21 = vld [vmem:[%s11938_s1 + $0x1b0] sm:$0xff]  ;;  %v5769_v23 = vld [vmem:[%s11938_s1 + $0x240] sm:$0xff] }
  0x25   : > { %5727 = vmatmul.msk.f32.vlgmr.msra.gmra.mxu3 %vm392_vm1, %v7173_v0  ;;  %421 = vmatpush.msra.mxu0 %v5693_v44  ;;  %v5742_v22 = vld [vmem:[%s11938_s1 + $0x1b8] sm:$0xff]  ;;  %v5770_v24 = vld [vmem:[%s11938_s1 + $0x248] sm:$0xff]  ;;  %v5739_v25 = vld [vmem:[%s11938_s1 + $0x1a0] sm:$0xff] }
  0x26   : > { %450 = vmatpush.msra.mxu1 %v5694_v45  ;;  %5785 = vmatpush.msk.msrb.mxu2 %vm401_vm0, %v5783_v55  ;;  %v5740_v26 = vld [vmem:[%s11938_s1 + $0x1a8] sm:$0xff]  ;;  %v5767_v27 = vld [vmem:[%s11938_s1 + $0x230] sm:$0xff]  ;;  %v5768_v28 = vld [vmem:[%s11938_s1 + $0x238] sm:$0xff] }
  0x27   : > { %422 = vmatpush.msra.mxu0 %v5691_v46  ;;  %5790 = vmatpush.msk.msrb.mxu3 %vm401_vm0, %v5784_v56  ;;  %v5737_v29 = vld [vmem:[%s11938_s1 + $0x190] sm:$0xff]  ;;  %v5738_v30 = vld [vmem:[%s11938_s1 + $0x198] sm:$0xff]  ;;  %v5765_v31 = vld [vmem:[%s11938_s1 + $0x220] sm:$0xff] }
  0x28   : > { %451 = vmatpush.msra.mxu1 %v5692_v49  ;;  %700 = vmatpush.msrb.mxu2 %v5781_v57  ;;  %v5766_v32 = vld [vmem:[%s11938_s1 + $0x228] sm:$0xff]  ;;  %v5735_v33 = vld [vmem:[%s11938_s1 + $0x180] sm:$0xff]  ;;  %v5763_v35 = vld [vmem:[%s11938_s1 + $0x210] sm:$0xff] }
  0x29   : > { %674 = vrot.lane.b32.xlu0 %v7185_v2, %s7102_s17  ;;  %783 = vrot.lane.b32.xlu1 %v7173_v0, %s7103_s12  ;;  %v5736_v34 = vld [vmem:[%s11938_s1 + $0x188] sm:$0xff]  ;;  %v5764_v36 = vld [vmem:[%s11938_s1 + $0x218] sm:$0xff] }
  0x2a   : > { %676 = vrot.lane.b32.xlu2 %v7176_v1, %s7102_s17  ;;  %423 = vmatpush.msra.mxu0 %v5689_v50  ;;  %v5733_v38 = vld [vmem:[%s11938_s1 + $0x170] sm:$0xff]  ;;  %v5734_v39 = vld [vmem:[%s11938_s1 + $0x178] sm:$0xff]  ;;  %v5731_v40 = vld [vmem:[%s11938_s1 + $0x160] sm:$0xff] }
  0x2b   : > { %452 = vmatpush.msra.mxu1 %v5690_v52  ;;  %729 = vmatpush.msrb.mxu3 %v5782_v58  ;;  %v5732_v41 = vld [vmem:[%s11938_s1 + $0x168] sm:$0xff]  ;;  %v5847_v44 = vld [vmem:[%s11938_s1 + $0x410] sm:$0xf]  ;;  %v5848_v45 = vld [vmem:[%s11938_s1 + $0x418] sm:$0xf] }
  0x2c   : > { %5723 = vmatmul.msk.f32.gmra.mxu2 %vm392_vm1, %v7185_v2  ;;  %5753 = vmatpush.msk.msrb.mxu0 %vm401_vm0, %v5751_v59  ;;  %v5845_v48 = vld [vmem:[%s11938_s1 + $0x400] sm:$0xff]  ;;  %v5846_v49 = vld [vmem:[%s11938_s1 + $0x408] sm:$0xff]  ;;  %v5843_v55 = vld [vmem:[%s11938_s1 + $0x3f0] sm:$0xff] }
  0x2d   : > { %5728 = vmatmul.msk.f32.gmra.mxu3 %vm392_vm1, %v7185_v2  ;;  %5758 = vmatpush.msk.msrb.mxu1 %vm401_vm0, %v5752_v61  ;;  %v5815_v50 = vld [vmem:[%s11938_s1 + $0x360] sm:$0xf]  ;;  %v5816_v52 = vld [vmem:[%s11938_s1 + $0x368] sm:$0xf]  ;;  %v5844_v56 = vld [vmem:[%s11938_s1 + $0x3f8] sm:$0xff] }
  0x2e   : > { %701 = vmatpush.msrb.mxu2 %v5779_v62  ;;  %730 = vmatpush.msrb.mxu3 %v5780_v63  ;;  %v5813_v58 = vld [vmem:[%s11938_s1 + $0x350] sm:$0xff]  ;;  %v5814_v59 = vld [vmem:[%s11938_s1 + $0x358] sm:$0xff]  ;;  %v5841_v61 = vld [vmem:[%s11938_s1 + $0x3e0] sm:$0xff] }
  0x2f   : > { %589 = vmatpush.msrb.mxu0 %v5749_v4  ;;  %618 = vmatpush.msrb.mxu1 %v5750_v5  ;;  %v5842_v62 = vld [vmem:[%s11938_s1 + $0x3e8] sm:$0xff]  ;;  %v5811_v63 = vld [vmem:[%s11938_s1 + $0x340] sm:$0xff]  ;;  %v5839_v5 = vld [vmem:[%s11938_s1 + $0x3d0] sm:$0xff] }
  0x30   : > { %702 = vmatpush.msrb.mxu2 %v5777_v6  ;;  %731 = vmatpush.msrb.mxu3 %v5778_v7  ;;  %v5812_v4 = vld [vmem:[%s11938_s1 + $0x348] sm:$0xff]  ;;  %v5840_v6 = vld [vmem:[%s11938_s1 + $0x3d8] sm:$0xff]  ;;  %v1451_v7 = vrot.slane %v7185_v2, 2 }
  0x31   : > { %678 = vrot.lane.b32.xlu1 %v7188_v3, %s7102_s17  ;;  %785 = vrot.lane.b32.xlu0 %v7185_v2, %s7103_s12  ;;  %v5809_v2 = vld [vmem:[%s11938_s1 + $0x330] sm:$0xff] }
  0x32   : > { %787 = vrot.lane.b32.xlu2 %v7176_v1, %s7103_s12  ;;  %590 = vmatpush.msrb.mxu0 %v5747_v8  ;;  %v1453_v8 = vrot.slane %v7176_v1, 2 }
  0x33   : > { %619 = vmatpush.msrb.mxu1 %v5748_v9  ;;  %703 = vmatpush.msrb.mxu2 %v5775_v10 }
  0x34   : > { %5724 = vmatmul.msk.f32.gmra.mxu2 %vm392_vm1, %v7176_v1  ;;  %732 = vmatpush.msrb.mxu3 %v5776_v11  ;;  %v7623_v10 = vsel %vm1449_vm3, %v1451_v7, %v1453_v8  ;;  %v5810_v11 = vld [vmem:[%s11938_s1 + $0x338] sm:$0xff] }
  0x35   : > { %5729 = vmatmul.msk.f32.gmra.mxu3 %vm392_vm1, %v7176_v1  ;;  %591 = vmatpush.msrb.mxu0 %v5745_v12  ;;  %v5837_v12 = vld [vmem:[%s11938_s1 + $0x3c0] sm:$0xff]  ;;  %v5872_v1 = vld [vmem:[%s11938_s1 + $0x488] sm:$0xff] }
  0x36   : > { %620 = vmatpush.msrb.mxu1 %v5746_v13  ;;  %704 = vmatpush.msrb.mxu2 %v5773_v14  ;;  %v5838_v13 = vld [vmem:[%s11938_s1 + $0x3c8] sm:$0xff]  ;;  %v5807_v14 = vld [vmem:[%s11938_s1 + $0x320] sm:$0xff] }
  0x37   : > { %733 = vmatpush.msrb.mxu3 %v5774_v16  ;;  %592 = vmatpush.msrb.mxu0 %v5743_v17  ;;  %v5808_v16 = vld [vmem:[%s11938_s1 + $0x328] sm:$0xff] }
  0x38   : > { %621 = vmatpush.msrb.mxu1 %v5744_v18  ;;  %705 = vmatpush.msrb.mxu2 %v5771_v19  ;;  %v5835_v18 = vld [vmem:[%s11938_s1 + $0x3b0] sm:$0xff]  ;;  %v5836_v19 = vld [vmem:[%s11938_s1 + $0x3b8] sm:$0xff] }
  0x39   : > { %789 = vrot.lane.b32.xlu0 %v7188_v3, %s7103_s12  ;;  %1005 = vrot.lane.b32.xlu1 %v7346_v47, %s7100_s15 }
  0x3a   : > { %1007 = vrot.lane.b32.xlu2 %v7362_v51, %s7100_s15  ;;  %734 = vmatpush.msrb.mxu3 %v5772_v20  ;;  %v5805_v20 = vld [vmem:[%s11938_s1 + $0x310] sm:$0xff] }
  0x3b   : > { %593 = vmatpush.msrb.mxu0 %v5741_v21  ;;  %622 = vmatpush.msrb.mxu1 %v5742_v22  ;;  %v5806_v21 = vld [vmem:[%s11938_s1 + $0x318] sm:$0xff]  ;;  %v5833_v22 = vld [vmem:[%s11938_s1 + $0x3a0] sm:$0xff] }
  0x3c   : > { %5725 = vmatmul.msk.f32.gmra.mxu2 %vm392_vm1, %v7188_v3  ;;  %735 = vmatpush.msrb.mxu3 %v5770_v24  ;;  %v5803_v24 = vld [vmem:[%s11938_s1 + $0x300] sm:$0xff] }
  0x3d   : > { %5730 = vmatmul.msk.f32.gmra.mxu3 %vm392_vm1, %v7188_v3  ;;  %706 = vmatpush.msrb.mxu2 %v5769_v23  ;;  %v5834_v23 = vld [vmem:[%s11938_s1 + $0x3a8] sm:$0xff] }
  0x3e   : > { %594 = vmatpush.msrb.mxu0 %v5739_v25  ;;  %623 = vmatpush.msrb.mxu1 %v5740_v26  ;;  %v1450_v25 = vrot.slane %v7173_v0, 2  ;;  %v5801_v0 = vld [vmem:[%s11938_s1 + $0x2f0] sm:$0xff] }
  0x3f   : > { %707 = vmatpush.msrb.mxu2 %v5767_v27  ;;  %736 = vmatpush.msrb.mxu3 %v5768_v28  ;;  %v5804_v27 = vld [vmem:[%s11938_s1 + $0x308] sm:$0xff]  ;;  %v5831_v28 = vld [vmem:[%s11938_s1 + $0x390] sm:$0xff] }
  0x40   : > { %595 = vmatpush.msrb.mxu0 %v5737_v29  ;;  %624 = vmatpush.msrb.mxu1 %v5738_v30  ;;  %v5832_v29 = vld [vmem:[%s11938_s1 + $0x398] sm:$0xff] }
  0x41   : > { %1009 = vrot.lane.b32.xlu0 %v7376_v54, %s7100_s15  ;;  %1011 = vrot.lane.b32.xlu1 %v7368_v53, %s7100_s15  ;;  %v5802_v30 = vld [vmem:[%s11938_s1 + $0x2f8] sm:$0xff] }
  0x42   : > { %1116 = vrot.lane.b32.xlu2 %v7346_v47, %s7101_s16  ;;  %708 = vmatpush.msrb.mxu2 %v5765_v31  ;;  %v7689_v31 = vsel %vm1449_vm3, %v1450_v25, %v1451_v7  ;;  %v5902_v7 = vld [vmem:[%s11938_s1 + $0x528] sm:$0xff]  ;;  %v5863_v25 = vld [vmem:[%s11938_s1 + $0x440] sm:$0xff] }
  0x43   : > { %737 = vmatpush.msrb.mxu3 %v5766_v32  ;;  %596 = vmatpush.msrb.mxu0 %v5735_v33  ;;  %v5829_v32 = vld [vmem:[%s11938_s1 + $0x380] sm:$0xff]  ;;  %v5830_v33 = vld [vmem:[%s11938_s1 + $0x388] sm:$0xff] }
  0x44   : > { %625 = vmatpush.msrb.mxu1 %v5736_v34  ;;  %709 = vmatpush.msrb.mxu2 %v5763_v35  ;;  %v5799_v34 = vld [vmem:[%s11938_s1 + $0x2e0] sm:$0xff]  ;;  %v5800_v35 = vld [vmem:[%s11938_s1 + $0x2e8] sm:$0xff] }
  0x45   : > { %738 = vmatpush.msrb.mxu3 %v5764_v36  ;;  %597 = vmatpush.msrb.mxu0 %v5733_v38  ;;  %v5828_v38 = vld [vmem:[%s11938_s1 + $0x378] sm:$0xff] }
  0x46   : > { %626 = vmatpush.msrb.mxu1 %v5734_v39  ;;  %5849 = vmatpush.msk.msra.mxu2 %vm401_vm0, %v5847_v44  ;;  %v5796_v44 = vld [vmem:[%s11938_s1 + $0x2c8] sm:$0xff] }
  0x47   : > { %598 = vmatpush.msrb.mxu0 %v5731_v40  ;;  %5854 = vmatpush.msk.msra.mxu3 %vm401_vm0, %v5848_v45  ;;  %v5797_v40 = vld [vmem:[%s11938_s1 + $0x2d0] sm:$0xff]  ;;  %v7735_v45 = vrot.slane %v7188_v3, 2 }
  0x48   : > { %627 = vmatpush.msrb.mxu1 %v5732_v41  ;;  %922 = vmatpush.msra.mxu2 %v5845_v48  ;;  %v5798_v41 = vld [vmem:[%s11938_s1 + $0x2d8] sm:$0xff]  ;;  %v5910_v48 = vld [vmem:[%s11938_s1 + $0x568] sm:$0xff] }
  0x49   : > { %1118 = vrot.lane.b32.xlu0 %v7362_v51, %s7101_s16  ;;  %1227 = vrot.lane.b32.xlu1 %v7346_v47, %s7102_s17 }
  0x4a   : > { %1120 = vrot.lane.b32.xlu2 %v7376_v54, %s7101_s16  ;;  %951 = vmatpush.msra.mxu3 %v5846_v49  ;;  %v5879_v49 = vld [vmem:[%s11938_s1 + $0x4c0] sm:$0xf] }
  0x4b   : > { %923 = vmatpush.msra.mxu2 %v5843_v55  ;;  %v5877_v55 = vld [vmem:[%s11938_s1 + $0x4b0] sm:$0xff] }
  0x4c   : > { %952 = vmatpush.msra.mxu3 %v5844_v56  ;;  %v5878_v56 = vld [vmem:[%s11938_s1 + $0x4b8] sm:$0xff] }
  0x4d   : > { %924 = vmatpush.msra.mxu2 %v5841_v61  ;;  %v5876_v61 = vld [vmem:[%s11938_s1 + $0x4a8] sm:$0xff] }
  0x4e   : > { %953 = vmatpush.msra.mxu3 %v5842_v62  ;;  %v5903_v62 = vld [vmem:[%s11938_s1 + $0x530] sm:$0xff] }
  0x4f   : > { %925 = vmatpush.msra.mxu2 %v5839_v5  ;;  %v5874_v5 = vld [vmem:[%s11938_s1 + $0x498] sm:$0xff] }
  0x50   : > { %954 = vmatpush.msra.mxu3 %v5840_v6  ;;  %v7818_v6 = vsel %vm1449_vm3, %v1453_v8, %v7735_v45  ;;  %v5899_v8 = vld [vmem:[%s11938_s1 + $0x510] sm:$0xff] }
  0x51   : > { %1122 = vrot.lane.b32.xlu1 %v7368_v53, %s7101_s16  ;;  %1229 = vrot.lane.b32.xlu0 %v7362_v51, %s7102_s17 }
  0x52   : > { %1231 = vrot.lane.b32.xlu2 %v7376_v54, %s7102_s17  ;;  %926 = vmatpush.msra.mxu2 %v5837_v12  ;;  %v5870_v12 = vld [vmem:[%s11938_s1 + $0x478] sm:$0xff] }
  0x53   : > { %955 = vmatpush.msra.mxu3 %v5838_v13  ;;  %v5897_v13 = vld [vmem:[%s11938_s1 + $0x500] sm:$0xff] }
  0x54   : > { %927 = vmatpush.msra.mxu2 %v5835_v18 }
  0x55   : > { %956 = vmatpush.msra.mxu3 %v5836_v19  ;;  %v5868_v19 = vld [vmem:[%s11938_s1 + $0x468] sm:$0xff] }
  0x56   : > { %928 = vmatpush.msra.mxu2 %v5833_v22  ;;  %v5866_v22 = vld [vmem:[%s11938_s1 + $0x458] sm:$0xff] }
  0x57   : > { %957 = vmatpush.msra.mxu3 %v5834_v23  ;;  %v5893_v23 = vld [vmem:[%s11938_s1 + $0x4e0] sm:$0xff] }
  0x58   : > { %929 = vmatpush.msra.mxu2 %v5831_v28 }
  0x59   : > { %1338 = vrot.lane.b32.xlu1 %v7346_v47, %s7103_s12  ;;  %1233 = vrot.lane.b32.xlu0 %v7368_v53, %s7102_s17 }
  0x5a   : > { %1340 = vrot.lane.b32.xlu2 %v7362_v51, %s7103_s12  ;;  %958 = vmatpush.msra.mxu3 %v5832_v29  ;;  %v5892_v29 = vld [vmem:[%s11938_s1 + $0x4d8] sm:$0xff] }
  0x5b   : > { %930 = vmatpush.msra.mxu2 %v5829_v32  ;;  %v5859_v32 = vld [vmem:[%s11938_s1 + $0x420] sm:$0xff] }
  0x5c   : > { %959 = vmatpush.msra.mxu3 %v5830_v33 }
  0x5e   : > { %960 = vmatpush.msra.mxu3 %v5828_v38  ;;  %v5973_v38 = vld [vmem:[%s11938_s1 + $0x6c0] sm:$0xff] }
  0x61   : > { %1342 = vrot.lane.b32.xlu0 %v7376_v54, %s7103_s12  ;;  %1344 = vrot.lane.b32.xlu1 %v7368_v53, %s7103_s12 }
  0x62   : > { %1560 = vrot.lane.b32.xlu2 %v7689_v31, %s7100_s15 }
  0x69   : > { %1562 = vrot.lane.b32.xlu0 %v7623_v10, %s7100_s15  ;;  %1671 = vrot.lane.b32.xlu1 %v7689_v31, %s7101_s16 }
  0x6a   : > { %1564 = vrot.lane.b32.xlu2 %v7818_v6, %s7100_s15 }
  0x6c   : > { %v7433_v60 = vpop.permute.xlu2 %561 }
  0x71   : > { %1566 = vrot.lane.b32.xlu1 %v7735_v45, %s7100_s15  ;;  %1673 = vrot.lane.b32.xlu0 %v7623_v10, %s7101_s16 }
  0x72   : > { %1675 = vrot.lane.b32.xlu2 %v7818_v6, %s7101_s16 }
  0x74   : > { %v7479_v15 = vpop.permute.xlu2 %563 }
  0x79   : > { %1782 = vrot.lane.b32.xlu1 %v7689_v31, %s7102_s17  ;;  %1677 = vrot.lane.b32.xlu0 %v7735_v45, %s7101_s16 }
  0x7a   : > { %1784 = vrot.lane.b32.xlu2 %v7623_v10, %s7102_s17 }
  0x7c   : > { %v673_v37 = vpop.permute.xlu2 %672 }
  0x7d   : > { %5786 = vmatmul.msk.f32.vlgmr.msrb.gmra.mxu2 %vm392_vm1, %v673_v37  ;;  %5791 = vmatmul.msk.f32.vlgmr.msrb.gmra.mxu3 %vm392_vm1, %v673_v37  ;;  %v5827_v37 = vld [vmem:[%s11938_s1 + $0x370] sm:$0xff] }
  0x7e   : > { %931 = vmatpush.msra.mxu2 %v5827_v37  ;;  %v5943_v37 = vld [vmem:[%s11938_s1 + $0x620] sm:$0xf] }
  0x81   : > { %1893 = vrot.lane.b32.xlu0 %v7689_v31, %s7103_s12  ;;  %1786 = vrot.lane.b32.xlu1 %v7818_v6, %s7102_s17 }
  0x82   : > { %1895 = vrot.lane.b32.xlu2 %v7623_v10, %s7103_s12 }
  0x83   : > { %v385_v42 = vpop.permute.xlu0 %384  ;;  %v389_v43 = vpop.permute.xlu1 %388 }
  0x84   : > { %5712 = vmatmul.msk.f32.vlgmr.msra.gmra.mxu0 %vm392_vm1, %v385_v42  ;;  %5717 = vmatmul.msk.f32.vlgmr.msra.gmra.mxu1 %vm392_vm1, %v385_v42  ;;  %v677_v39 = vpop.permute.xlu2 %676  ;;  %v5911_v42 = vld [vmem:[%s11938_s1 + $0x570] sm:$0xf] }
  0x85   : > { %5817 = vmatpush.msk.msra.mxu0 %vm401_vm0, %v5815_v50  ;;  %5822 = vmatpush.msk.msra.mxu1 %vm401_vm0, %v5816_v52  ;;  %v5907_v50 = vld [vmem:[%s11938_s1 + $0x550] sm:$0xff]  ;;  %v5908_v52 = vld [vmem:[%s11938_s1 + $0x558] sm:$0xff] }
  0x86   : > { %5913 = vmatpush.msk.msrb.mxu2 %vm401_vm0, %v5911_v42 }
  0x87   : > { %811 = vmatpush.msra.mxu0 %v5813_v58  ;;  %840 = vmatpush.msra.mxu1 %v5814_v59  ;;  %v5906_v58 = vld [vmem:[%s11938_s1 + $0x548] sm:$0xff]  ;;  %v5875_v59 = vld [vmem:[%s11938_s1 + $0x4a0] sm:$0xff] }
  0x89   : > { %812 = vmatpush.msra.mxu0 %v5811_v63  ;;  %841 = vmatpush.msra.mxu1 %v5812_v4  ;;  %v5904_v63 = vld [vmem:[%s11938_s1 + $0x538] sm:$0xff]  ;;  %v5873_v4 = vld [vmem:[%s11938_s1 + $0x490] sm:$0xff] }
  0x8a   : > { %1788 = vrot.lane.b32.xlu0 %v7735_v45, %s7102_s17  ;;  %1897 = vrot.lane.b32.xlu1 %v7818_v6, %s7103_s12 }
  0x8b   : > { %v387_v46 = vpop.permute.xlu0 %386  ;;  %v391_v57 = vpop.permute.xlu1 %390  ;;  %813 = vmatpush.msra.mxu0 %v5809_v2  ;;  %842 = vmatpush.msra.mxu1 %v5810_v11  ;;  %v5900_v2 = vld [vmem:[%s11938_s1 + $0x518] sm:$0xff]  ;;  %v5869_v11 = vld [vmem:[%s11938_s1 + $0x470] sm:$0xff] }
  0x8c   : > { %5713 = vmatmul.msk.f32.gmra.mxu0 %vm392_vm1, %v387_v46  ;;  %5718 = vmatmul.msk.f32.gmra.mxu1 %vm392_vm1, %v387_v46  ;;  %v5909_v46 = vld [vmem:[%s11938_s1 + $0x560] sm:$0xff]  ;;  %v7865_v18 = vpop.permute.xlu2 %787 }
  0x8d   : > { %814 = vmatpush.msra.mxu0 %v5807_v14  ;;  %843 = vmatpush.msra.mxu1 %v5808_v16  ;;  %v5898_v14 = vld [vmem:[%s11938_s1 + $0x508] sm:$0xff]  ;;  %v5867_v16 = vld [vmem:[%s11938_s1 + $0x460] sm:$0xff] }
  0x8e   : > { %1144 = vmatpush.msrb.mxu2 %v5909_v46  ;;  %v5970_v46 = vld [vmem:[%s11938_s1 + $0x6a8] sm:$0xff]  ;;  %1899 = vrot.lane.b32.xlu2 %v7735_v45, %s7103_s12 }
  0x8f   : > { %815 = vmatpush.msra.mxu0 %v5805_v20  ;;  %844 = vmatpush.msra.mxu1 %v5806_v21  ;;  %v5896_v20 = vld [vmem:[%s11938_s1 + $0x4f8] sm:$0xff]  ;;  %v5865_v21 = vld [vmem:[%s11938_s1 + $0x450] sm:$0xff] }
  0x90   : > { %1145 = vmatpush.msrb.mxu2 %v5907_v50  ;;  %v5967_v50 = vld [vmem:[%s11938_s1 + $0x690] sm:$0xff] }
  0x91   : > { %816 = vmatpush.msra.mxu0 %v5803_v24  ;;  %845 = vmatpush.msra.mxu1 %v5804_v27  ;;  %v5894_v24 = vld [vmem:[%s11938_s1 + $0x4e8] sm:$0xff]  ;;  %v5891_v27 = vld [vmem:[%s11938_s1 + $0x4d0] sm:$0xff] }
  0x93   : > { %v7616_v9 = vpop.permute.xlu0 %565  ;;  %v7645_v17 = vpop.permute.xlu1 %567  ;;  %817 = vmatpush.msra.mxu0 %v5801_v0  ;;  %846 = vmatpush.msra.mxu1 %v5802_v30  ;;  %v5862_v0 = vld [vmem:[%s11938_s1 + $0x438] sm:$0xff] }
  0x94   : > { %5714 = vmatmul.msk.f32.gmra.mxu0 %vm392_vm1, %v389_v43  ;;  %5719 = vmatmul.msk.f32.gmra.mxu1 %vm392_vm1, %v389_v43  ;;  %v5795_v43 = vld [vmem:[%s11938_s1 + $0x2c0] sm:$0xff]  ;;  %v7920_v30 = vpop.permute.xlu2 %1007 }
  0x95   : > { %818 = vmatpush.msra.mxu0 %v5799_v34  ;;  %847 = vmatpush.msra.mxu1 %v5800_v35  ;;  %v5860_v34 = vld [vmem:[%s11938_s1 + $0x428] sm:$0xff]  ;;  %v5975_v35 = vld [vmem:[%s11938_s1 + $0x6d0] sm:$0xf] }
  0x97   : > { %819 = vmatpush.msra.mxu0 %v5797_v40  ;;  %848 = vmatpush.msra.mxu1 %v5798_v41  ;;  %v5974_v40 = vld [vmem:[%s11938_s1 + $0x6c8] sm:$0xff]  ;;  %v5941_v41 = vld [vmem:[%s11938_s1 + $0x610] sm:$0xff] }
  0x99   : > { %820 = vmatpush.msra.mxu0 %v5795_v43  ;;  %849 = vmatpush.msra.mxu1 %v5796_v44  ;;  %v5972_v43 = vld [vmem:[%s11938_s1 + $0x6b8] sm:$0xff] }
  0x9a   : > { %v5942_v44 = vld [vmem:[%s11938_s1 + $0x618] sm:$0xff] }
  0x9b   : > { %v675_v26 = vpop.permute.xlu0 %674  ;;  %v7703_v36 = vpop.permute.xlu1 %783 }
  0x9c   : > { %5715 = vmatmul.msk.f32.gmra.mxu0 %vm392_vm1, %v391_v57  ;;  %5720 = vmatmul.msk.f32.gmra.mxu1 %vm392_vm1, %v391_v57  ;;  %v5905_v57 = vld [vmem:[%s11938_s1 + $0x540] sm:$0xff] }
  0x9d   : > { %5787 = vmatmul.msk.f32.gmra.mxu2 %vm392_vm1, %v675_v26  ;;  %5792 = vmatmul.msk.f32.gmra.mxu3 %vm392_vm1, %v675_v26  ;;  %v5864_v26 = vld [vmem:[%s11938_s1 + $0x448] sm:$0xff] }
  0x9e   : > { %1146 = vmatpush.msrb.mxu2 %v5905_v57  ;;  %v5965_v57 = vld [vmem:[%s11938_s1 + $0x680] sm:$0xff] }
  0xa0   : > { %1147 = vmatpush.msrb.mxu2 %v5903_v62 }
  0xa3   : > { %v679_v3 = vpop.permute.xlu1 %678 }
  0xa4   : > { %5754 = vmatmul.msk.f32.vlgmr.msrb.gmra.mxu0 %vm392_vm1, %v7433_v60  ;;  %5759 = vmatmul.msk.f32.vlgmr.msrb.gmra.mxu1 %vm392_vm1, %v7433_v60  ;;  %v5912_v60 = vld [vmem:[%s11938_s1 + $0x578] sm:$0xf] }
  0xa5   : > { %5788 = vmatmul.msk.f32.gmra.mxu2 %vm392_vm1, %v677_v39  ;;  %5793 = vmatmul.msk.f32.gmra.mxu3 %vm392_vm1, %v677_v39  ;;  %v5944_v39 = vld [vmem:[%s11938_s1 + $0x628] sm:$0xf] }
  0xa6   : > { %5918 = vmatpush.msk.msrb.mxu3 %vm401_vm0, %v5912_v60  ;;  %5881 = vmatpush.msk.msrb.mxu0 %vm401_vm0, %v5879_v49  ;;  %v1117_v60 = vpop.permute.xlu2 %1116  ;;  %v5939_v49 = vld [vmem:[%s11938_s1 + $0x600] sm:$0xff] }
  0xa8   : > { %1173 = vmatpush.msrb.mxu3 %v5910_v48  ;;  %1033 = vmatpush.msrb.mxu0 %v5877_v55  ;;  %v5937_v55 = vld [vmem:[%s11938_s1 + $0x5f0] sm:$0xff] }
  0xaa   : > { %1174 = vmatpush.msrb.mxu3 %v5908_v52  ;;  %1034 = vmatpush.msrb.mxu0 %v5875_v59  ;;  %v5968_v52 = vld [vmem:[%s11938_s1 + $0x698] sm:$0xff]  ;;  %v5935_v59 = vld [vmem:[%s11938_s1 + $0x5e0] sm:$0xff] }
  0xab   : > { %v7925_v33 = vpop.permute.xlu1 %1005 }
  0xac   : > { %5755 = vmatmul.msk.f32.gmra.mxu0 %vm392_vm1, %v7479_v15  ;;  %5760 = vmatmul.msk.f32.gmra.mxu1 %vm392_vm1, %v7479_v15  ;;  %v5880_v15 = vld [vmem:[%s11938_s1 + $0x4c8] sm:$0xf] }
  0xad   : > { %5789 = vmatmul.msk.f32.gmra.mxu2 %vm392_vm1, %v679_v3  ;;  %5794 = vmatmul.msk.f32.gmra.mxu3 %vm392_vm1, %v679_v3  ;;  %v5969_v3 = vld [vmem:[%s11938_s1 + $0x6a0] sm:$0xff] }
  0xae   : > { %5886 = vmatpush.msk.msrb.mxu1 %vm401_vm0, %v5880_v15  ;;  %1175 = vmatpush.msrb.mxu3 %v5906_v58  ;;  %v5940_v15 = vld [vmem:[%s11938_s1 + $0x608] sm:$0xff] }
  0xaf   : > { %1035 = vmatpush.msrb.mxu0 %v5873_v4  ;;  %v5966_v58 = vld [vmem:[%s11938_s1 + $0x688] sm:$0xff]  ;;  %v5964_v4 = vld [vmem:[%s11938_s1 + $0x678] sm:$0xff] }
  0xb0   : > { %1062 = vmatpush.msrb.mxu1 %v5878_v56  ;;  %1176 = vmatpush.msrb.mxu3 %v5904_v63  ;;  %v5938_v56 = vld [vmem:[%s11938_s1 + $0x5f8] sm:$0xff]  ;;  %v5963_v63 = vld [vmem:[%s11938_s1 + $0x670] sm:$0xff] }
  0xb2   : > { %1063 = vmatpush.msrb.mxu1 %v5876_v61  ;;  %1177 = vmatpush.msrb.mxu3 %v5902_v7  ;;  %v5936_v61 = vld [vmem:[%s11938_s1 + $0x5e8] sm:$0xff]  ;;  %v5961_v7 = vld [vmem:[%s11938_s1 + $0x660] sm:$0xff] }
  0xb3   : > { %v7988_v48 = vpop.permute.xlu1 %1011 }
  0xb4   : > { %5756 = vmatmul.msk.f32.gmra.mxu0 %vm392_vm1, %v7616_v9  ;;  %5761 = vmatmul.msk.f32.gmra.mxu1 %vm392_vm1, %v7616_v9  ;;  %v5871_v9 = vld [vmem:[%s11938_s1 + $0x480] sm:$0xff] }
  0xb5   : > { %5850 = vmatmul.msk.f32.vlgmr.msra.gmra.mxu2 %vm392_vm1, %v7346_v47  ;;  %5855 = vmatmul.msk.f32.vlgmr.msra.gmra.mxu3 %vm392_vm1, %v7346_v47  ;;  %v5901_v47 = vld [vmem:[%s11938_s1 + $0x520] sm:$0xff] }
  0xb6   : > { %1064 = vmatpush.msrb.mxu1 %v5874_v5  ;;  %1148 = vmatpush.msrb.mxu2 %v5901_v47  ;;  %v5933_v5 = vld [vmem:[%s11938_s1 + $0x5d0] sm:$0xff]  ;;  %v5934_v47 = vld [vmem:[%s11938_s1 + $0x5d8] sm:$0xff] }
  0xb7   : > { %1036 = vmatpush.msrb.mxu0 %v5871_v9  ;;  %1178 = vmatpush.msrb.mxu3 %v5900_v2  ;;  %v5962_v9 = vld [vmem:[%s11938_s1 + $0x668] sm:$0xff] }
  0xb8   : > { %1065 = vmatpush.msrb.mxu1 %v5872_v1  ;;  %1149 = vmatpush.msrb.mxu2 %v5899_v8  ;;  %v5931_v8 = vld [vmem:[%s11938_s1 + $0x5c0] sm:$0xff]  ;;  %v5932_v2 = vld [vmem:[%s11938_s1 + $0x5c8] sm:$0xff] }
  0xb9   : > { %1037 = vmatpush.msrb.mxu0 %v5869_v11  ;;  %1179 = vmatpush.msrb.mxu3 %v5898_v14  ;;  %v5959_v11 = vld [vmem:[%s11938_s1 + $0x650] sm:$0xff]  ;;  %v5930_v14 = vld [vmem:[%s11938_s1 + $0x5b8] sm:$0xff] }
  0xba   : > { %1066 = vmatpush.msrb.mxu1 %v5870_v12  ;;  %1150 = vmatpush.msrb.mxu2 %v5897_v13  ;;  %v5960_v12 = vld [vmem:[%s11938_s1 + $0x658] sm:$0xff]  ;;  %v5929_v13 = vld [vmem:[%s11938_s1 + $0x5b0] sm:$0xff] }
  0xbb   : > { %1038 = vmatpush.msrb.mxu0 %v5867_v16  ;;  %1180 = vmatpush.msrb.mxu3 %v5896_v20  ;;  %v8046_v1 = vpop.permute.xlu1 %1227  ;;  %v1121_v16 = vpop.permute.xlu2 %1120  ;;  %v5955_v20 = vld [vmem:[%s11938_s1 + $0x630] sm:$0xff] }
  0xbc   : > { %5757 = vmatmul.msk.f32.gmra.mxu0 %vm392_vm1, %v7645_v17  ;;  %5762 = vmatmul.msk.f32.gmra.mxu1 %vm392_vm1, %v7645_v17  ;;  %v786_v17 = vpop.permute.xlu0 %785 }
  0xbd   : > { %5851 = vmatmul.msk.f32.gmra.mxu2 %vm392_vm1, %v7362_v51  ;;  %5856 = vmatmul.msk.f32.gmra.mxu3 %vm392_vm1, %v7362_v51  ;;  %v5895_v51 = vld [vmem:[%s11938_s1 + $0x4f0] sm:$0xff] }
  0xbe   : > { %1067 = vmatpush.msrb.mxu1 %v5868_v19  ;;  %1151 = vmatpush.msrb.mxu2 %v5895_v51  ;;  %v5927_v19 = vld [vmem:[%s11938_s1 + $0x5a0] sm:$0xff]  ;;  %v5928_v51 = vld [vmem:[%s11938_s1 + $0x5a8] sm:$0xff] }
  0xbf   : > { %1039 = vmatpush.msrb.mxu0 %v5865_v21  ;;  %1181 = vmatpush.msrb.mxu3 %v5894_v24  ;;  %v5956_v21 = vld [vmem:[%s11938_s1 + $0x638] sm:$0xff]  ;;  %v8099_v24 = vld [vmem:[%s7170_s14 + $0x8] sm:$0xff] }
  0xc0   : > { %1068 = vmatpush.msrb.mxu1 %v5866_v22  ;;  %1152 = vmatpush.msrb.mxu2 %v5893_v23  ;;  %v5925_v22 = vld [vmem:[%s11938_s1 + $0x590] sm:$0xff]  ;;  %v5926_v23 = vld [vmem:[%s11938_s1 + $0x598] sm:$0xff] }
  0xc1   : > { %1040 = vmatpush.msrb.mxu0 %v5863_v25  ;;  %1182 = vmatpush.msrb.mxu3 %v5892_v29  ;;  %v2006_v25 = vrot.slane %v8099_v24, 3  ;;  %v5923_v29 = vld [vmem:[%s11938_s1 + $0x580] sm:$0xff] }
  0xc2   : > { %1069 = vmatpush.msrb.mxu1 %v5864_v26  ;;  %1153 = vmatpush.msrb.mxu2 %v5891_v27  ;;  %v8103_v26 = vld [vmem:[%s7170_s14 + $0x10] sm:$0xff] }
  0xc3   : > { %v2008_v27 = vrot.slane %v8103_v26, 3 }
  0xc4   : > { %5818 = vmatmul.msk.f32.vlgmr.msra.gmra.mxu0 %vm392_vm1, %v7703_v36  ;;  %5823 = vmatmul.msk.f32.vlgmr.msra.gmra.mxu1 %vm392_vm1, %v7703_v36  ;;  %v7907_v28 = vpop.permute.xlu0 %789  ;;  %v5976_v36 = vld [vmem:[%s11938_s1 + $0x6d8] sm:$0xf] }
  0xc5   : > { %5852 = vmatmul.msk.f32.gmra.mxu2 %vm392_vm1, %v7376_v54  ;;  %5857 = vmatmul.msk.f32.gmra.mxu3 %vm392_vm1, %v7376_v54  ;;  %v5861_v54 = vld [vmem:[%s11938_s1 + $0x430] sm:$0xff] }
  0xc6   : > { %1041 = vmatpush.msrb.mxu0 %v5861_v54  ;;  %1070 = vmatpush.msrb.mxu1 %v5862_v0  ;;  %v6039_v54 = vld [vmem:[%s11938_s1 + $0x830] sm:$0xf]  ;;  %v8113_v0 = vld [vmem:[%s7170_s14] sm:$0xff] }
  0xc7   : > { %5977 = vmatpush.msk.msra.mxu2 %vm401_vm0, %v5975_v35  ;;  %5982 = vmatpush.msk.msra.mxu3 %vm401_vm0, %v5976_v36  ;;  %v6040_v35 = vld [vmem:[%s11938_s1 + $0x838] sm:$0xf] }
  0xc8   : > { %1042 = vmatpush.msrb.mxu0 %v5859_v32  ;;  %1071 = vmatpush.msrb.mxu1 %v5860_v34  ;;  %v2005_v32 = vrot.slane %v8113_v0, 3  ;;  %v8124_v34 = vsel %vm2004_vm4, %v2006_v25, %v2008_v27 }
  0xc9   : > { %1366 = vmatpush.msra.mxu2 %v5973_v38  ;;  %1395 = vmatpush.msra.mxu3 %v5974_v40  ;;  %v6007_v38 = vld [vmem:[%s11938_s1 + $0x780] sm:$0xf]  ;;  %v6008_v40 = vld [vmem:[%s11938_s1 + $0x788] sm:$0xf] }
  0xca   : > { %5945 = vmatpush.msk.msra.mxu0 %vm401_vm0, %v5943_v37  ;;  %5950 = vmatpush.msk.msra.mxu1 %vm401_vm0, %v5944_v39  ;;  %v8135_v36 = vsel %vm2004_vm4, %v2005_v32, %v2006_v25  ;;  %v6037_v37 = vld [vmem:[%s11938_s1 + $0x820] sm:$0xff]  ;;  %v6038_v39 = vld [vmem:[%s11938_s1 + $0x828] sm:$0xff] }
  0xcb   : > { %1396 = vmatpush.msra.mxu3 %v5972_v43  ;;  %2117 = vrot.lane.b32.xlu1 %v8124_v34, %s7100_s15  ;;  %v8163_v43 = vpop.f32.mrf.mxu2  ;;  %v5992_v32 = vld [vmem:[%s11938_s1 + $0x708] sm:$0xff] }
  0xcc   : > { %5819 = vmatmul.msk.f32.gmra.mxu0 %vm392_vm1, %v786_v17  ;;  %5824 = vmatmul.msk.f32.gmra.mxu1 %vm392_vm1, %v786_v17  ;;  %v7967_v42 = vpop.permute.xlu0 %1009  ;;  %v5957_v17 = vld [vmem:[%s11938_s1 + $0x640] sm:$0xff] }
  0xcd   : > { %5853 = vmatmul.msk.f32.gmra.mxu2 %vm392_vm1, %v7368_v53  ;;  %5858 = vmatmul.msk.f32.gmra.mxu3 %vm392_vm1, %v7368_v53  ;;  %v5971_v53 = vld [vmem:[%s11938_s1 + $0x6b0] sm:$0xff] }
  0xce   : > { %1255 = vmatpush.msra.mxu0 %v5941_v41  ;;  %1367 = vmatpush.msra.mxu2 %v5971_v53  ;;  %v8155_v41 = vpop.permute.xlu2 %1231  ;;  %v6035_v53 = vld [vmem:[%s11938_s1 + $0x810] sm:$0xff] }
  0xcf   : > { %1284 = vmatpush.msra.mxu1 %v5942_v44  ;;  %1397 = vmatpush.msra.mxu3 %v5970_v46  ;;  %v8165_v44 = vpop.f32.mrf.mxu3  ;;  %v6006_v46 = vld [vmem:[%s11938_s1 + $0x778] sm:$0xff] }
  0xd0   : > { %1368 = vmatpush.msra.mxu2 %v5969_v3  ;;  %1256 = vmatpush.msra.mxu0 %v5939_v49  ;;  %v6005_v3 = vld [vmem:[%s11938_s1 + $0x770] sm:$0xff] }
  0xd1   : > { %1285 = vmatpush.msra.mxu1 %v5940_v15  ;;  %1398 = vmatpush.msra.mxu3 %v5968_v52  ;;  %v6033_v15 = vld [vmem:[%s11938_s1 + $0x800] sm:$0xff] }
  0xd2   : > { %1369 = vmatpush.msra.mxu2 %v5967_v50  ;;  %1257 = vmatpush.msra.mxu0 %v5937_v55  ;;  %v6034_v50 = vld [vmem:[%s11938_s1 + $0x808] sm:$0xff]  ;;  %v6003_v52 = vld [vmem:[%s11938_s1 + $0x760] sm:$0xff] }
  0xd3   : > { %1286 = vmatpush.msra.mxu1 %v5938_v56  ;;  %1399 = vmatpush.msra.mxu3 %v5966_v58  ;;  %v6004_v55 = vld [vmem:[%s11938_s1 + $0x768] sm:$0xff]  ;;  %v8200_v56 = vld [vmem:[%s7170_s14 + $0x18] sm:$0xff] }
  0xd4   : > { %5820 = vmatmul.msk.f32.gmra.mxu0 %vm392_vm1, %v7865_v18  ;;  %5825 = vmatmul.msk.f32.gmra.mxu1 %vm392_vm1, %v7865_v18  ;;  %v1119_v62 = vpop.permute.xlu0 %1118  ;;  %v5958_v18 = vld [vmem:[%s11938_s1 + $0x648] sm:$0xff]  ;;  %v6032_v58 = vld [vmem:[%s11938_s1 + $0x7f8] sm:$0xff] }
  0xd5   : > { %5914 = vmatmul.msk.f32.vlgmr.msrb.gmra.mxu2 %vm392_vm1, %v1117_v60  ;;  %5919 = vmatmul.msk.f32.vlgmr.msrb.gmra.mxu3 %vm392_vm1, %v1117_v60  ;;  %v6036_v60 = vld [vmem:[%s11938_s1 + $0x818] sm:$0xff] }
  0xd6   : > { %1370 = vmatpush.msra.mxu2 %v5965_v57  ;;  %1258 = vmatpush.msra.mxu0 %v5935_v59  ;;  %v8203_v57 = vrot.slane %v8200_v56, 3  ;;  %v6001_v59 = vld [vmem:[%s11938_s1 + $0x750] sm:$0xff] }
  0xd7   : > { %1287 = vmatpush.msra.mxu1 %v5936_v61  ;;  %1400 = vmatpush.msra.mxu3 %v5964_v4  ;;  %v6002_v61 = vld [vmem:[%s11938_s1 + $0x758] sm:$0xff]  ;;  %v6030_v4 = vld [vmem:[%s11938_s1 + $0x7e8] sm:$0xff] }
  0xd8   : > { %1371 = vmatpush.msra.mxu2 %v5963_v63  ;;  %1259 = vmatpush.msra.mxu0 %v5933_v5  ;;  %v6029_v63 = vld [vmem:[%s11938_s1 + $0x7e0] sm:$0xff]  ;;  %v1341_v5 = vpop.permute.xlu2 %1340  ;;  %v8288_v25 = vsel %vm2004_vm4, %v2008_v27, %v8203_v57  ;;  %v6022_v27 = vld [vmem:[%s11938_s1 + $0x7a8] sm:$0xff] }
  0xd9   : > { %1288 = vmatpush.msra.mxu1 %v5934_v47  ;;  %1401 = vmatpush.msra.mxu3 %v5962_v9  ;;  %v8226_v47 = vpop.f32.mrf.mxu2  ;;  %v5999_v9 = vld [vmem:[%s11938_s1 + $0x740] sm:$0xff] }
  0xda   : > { %1372 = vmatpush.msra.mxu2 %v5961_v7  ;;  %1260 = vmatpush.msra.mxu0 %v5931_v8  ;;  %v8228_v7 = vpop.f32.mrf.mxu3  ;;  %v6000_v8 = vld [vmem:[%s11938_s1 + $0x748] sm:$0xff] }
  0xdb   : > { %1289 = vmatpush.msra.mxu1 %v5932_v2  ;;  %1402 = vmatpush.msra.mxu3 %v5960_v12  ;;  %v6027_v2 = vld [vmem:[%s11938_s1 + $0x7d0] sm:$0xff] }
  0xdc   : > { %5821 = vmatmul.msk.f32.gmra.mxu0 %vm392_vm1, %v7907_v28  ;;  %5826 = vmatmul.msk.f32.gmra.mxu1 %vm392_vm1, %v7907_v28  ;;  %v1123_v28 = vpop.permute.xlu1 %1122  ;;  %v5997_v12 = vld [vmem:[%s11938_s1 + $0x730] sm:$0xff] }
  0xdd   : > { %5915 = vmatmul.msk.f32.gmra.mxu2 %vm392_vm1, %v1119_v62  ;;  %5920 = vmatmul.msk.f32.gmra.mxu3 %vm392_vm1, %v1119_v62 }
  0xde   : > { %1373 = vmatpush.msra.mxu2 %v5959_v11  ;;  %1261 = vmatpush.msra.mxu0 %v5929_v13  ;;  %v6028_v11 = vld [vmem:[%s11938_s1 + $0x7d8] sm:$0xff]  ;;  %v6025_v13 = vld [vmem:[%s11938_s1 + $0x7c0] sm:$0xff] }
  0xdf   : > { %1290 = vmatpush.msra.mxu1 %v5930_v14  ;;  %1403 = vmatpush.msra.mxu3 %v5958_v18  ;;  %v6026_v14 = vld [vmem:[%s11938_s1 + $0x7c8] sm:$0xff]  ;;  %v6023_v18 = vld [vmem:[%s11938_s1 + $0x7b0] sm:$0xff] }
  0xe0   : > { %1374 = vmatpush.msra.mxu2 %v5957_v17  ;;  %1262 = vmatpush.msra.mxu0 %v5927_v19  ;;  %v5996_v17 = vld [vmem:[%s11938_s1 + $0x728] sm:$0xff]  ;;  %v6024_v19 = vld [vmem:[%s11938_s1 + $0x7b8] sm:$0xff] }
  0xe1   : > { %1291 = vmatpush.msra.mxu1 %v5928_v51  ;;  %1404 = vmatpush.msra.mxu3 %v5956_v21 }
  0xe2   : > { %1375 = vmatpush.msra.mxu2 %v5955_v20  ;;  %1263 = vmatpush.msra.mxu0 %v5925_v22  ;;  %v8280_v22 = vpop.f32.mrf.mxu2 }
  0xe3   : > { %1292 = vmatpush.msra.mxu1 %v5926_v23  ;;  %6046 = vmatpush.msk.msrb.mxu3 %vm401_vm0, %v6040_v35  ;;  %v8282_v23 = vpop.f32.mrf.mxu3  ;;  %v6020_v35 = vld [vmem:[%s11938_s1 + $0x798] sm:$0xff] }
  0xe4   : > { %5882 = vmatmul.msk.f32.vlgmr.msrb.gmra.mxu0 %vm392_vm1, %v7925_v33  ;;  %5887 = vmatmul.msk.f32.vlgmr.msrb.gmra.mxu1 %vm392_vm1, %v7925_v33  ;;  %v5924_v33 = vld [vmem:[%s11938_s1 + $0x588] sm:$0xff]  ;;  %v1339_v49 = vpop.permute.xlu1 %1338 }
  0xe5   : > { %5916 = vmatmul.msk.f32.gmra.mxu2 %vm392_vm1, %v1121_v16  ;;  %5921 = vmatmul.msk.f32.gmra.mxu3 %vm392_vm1, %v1121_v16  ;;  %v5995_v16 = vld [vmem:[%s11938_s1 + $0x720] sm:$0xff] }
  0xe6   : > { %1264 = vmatpush.msra.mxu0 %v5923_v29  ;;  %6041 = vmatpush.msk.msrb.mxu2 %vm401_vm0, %v6039_v54  ;;  %v6021_v29 = vld [vmem:[%s11938_s1 + $0x7a0] sm:$0xff] }
  0xe7   : > { %1293 = vmatpush.msra.mxu1 %v5924_v33  ;;  %2115 = vrot.lane.b32.xlu0 %v8135_v36, %s7100_s15  ;;  %v5991_v54 = vld [vmem:[%s11938_s1 + $0x700] sm:$0xff]  ;;  %v6019_v33 = vld [vmem:[%s11938_s1 + $0x790] sm:$0xff] }
  0xe8   : > { %1588 = vmatpush.msrb.mxu2 %v6037_v37  ;;  %6009 = vmatpush.msk.msrb.mxu0 %vm401_vm0, %v6007_v38  ;;  %v5989_v37 = vld [vmem:[%s11938_s1 + $0x6f0] sm:$0xff] }
  0xe9   : > { %1617 = vmatpush.msrb.mxu3 %v6038_v39  ;;  %6014 = vmatpush.msk.msrb.mxu1 %vm401_vm0, %v6008_v40 }
  0xea   : > { %1589 = vmatpush.msrb.mxu2 %v6035_v53  ;;  %1477 = vmatpush.msrb.mxu0 %v6005_v3  ;;  %v5990_v53 = vld [vmem:[%s11938_s1 + $0x6f8] sm:$0xff]  ;;  %v5988_v3 = vld [vmem:[%s11938_s1 + $0x6e8] sm:$0xff] }
  0xeb   : > { %1618 = vmatpush.msrb.mxu3 %v6036_v60  ;;  %1506 = vmatpush.msrb.mxu1 %v6006_v46  ;;  %v5987_v60 = vld [vmem:[%s11938_s1 + $0x6e0] sm:$0xff]  ;;  %v6103_v46 = vld [vmem:[%s11938_s1 + $0x990] sm:$0xf] }
  0xec   : > { %5883 = vmatmul.msk.f32.gmra.mxu0 %vm392_vm1, %v7920_v30  ;;  %5888 = vmatmul.msk.f32.gmra.mxu1 %vm392_vm1, %v7920_v30  ;;  %v8145_v30 = vpop.permute.xlu0 %1229  ;;  %v1345_v40 = vpop.permute.xlu1 %1344 }
  0xed   : > { %5917 = vmatmul.msk.f32.gmra.mxu2 %vm392_vm1, %v1123_v28  ;;  %5922 = vmatmul.msk.f32.gmra.mxu3 %vm392_vm1, %v1123_v28  ;;  %v5993_v28 = vld [vmem:[%s11938_s1 + $0x710] sm:$0xff] }
  0xee   : > { %2226 = vrot.lane.b32.xlu1 %v8135_v36, %s7101_s16  ;;  %1590 = vmatpush.msrb.mxu2 %v6033_v15  ;;  %v8349_v15 = vpop.f32.mrf.mxu3 }
  0xef   : > { %1619 = vmatpush.msrb.mxu3 %v6034_v50  ;;  %1478 = vmatpush.msrb.mxu0 %v6003_v52  ;;  %v6101_v50 = vld [vmem:[%s11938_s1 + $0x980] sm:$0xff] }
  0xf0   : > { %1507 = vmatpush.msrb.mxu1 %v6004_v55  ;;  %2121 = vrot.lane.b32.xlu0 %v8203_v57, %s7100_s15  ;;  %v6071_v52 = vld [vmem:[%s11938_s1 + $0x8e0] sm:$0xf]  ;;  %v6102_v55 = vld [vmem:[%s11938_s1 + $0x988] sm:$0xff] }
  0xf1   : > { %1620 = vmatpush.msrb.mxu3 %v6032_v58  ;;  %1479 = vmatpush.msrb.mxu0 %v6001_v59 }
  0xf2   : > { %1508 = vmatpush.msrb.mxu1 %v6002_v61  ;;  %2119 = vrot.lane.b32.xlu2 %v8288_v25, %s7100_s15  ;;  %v1561_v61 = vpop.permute.xlu2 %1560 }
  0xf3   : > { %1621 = vmatpush.msrb.mxu3 %v6030_v4  ;;  %1480 = vmatpush.msrb.mxu0 %v5999_v9  ;;  %v6100_v4 = vld [vmem:[%s11938_s1 + $0x978] sm:$0xff] }
  0xf4   : > { %5884 = vmatmul.msk.f32.gmra.mxu0 %vm392_vm1, %v7967_v42  ;;  %5889 = vmatmul.msk.f32.gmra.mxu1 %vm392_vm1, %v7967_v42  ;;  %v6031_v42 = vld [vmem:[%s11938_s1 + $0x7f0] sm:$0xff]  ;;  %v8216_v62 = vpop.permute.xlu0 %1233  ;;  %v6070_v9 = vld [vmem:[%s11938_s1 + $0x8d8] sm:$0xff] }
  0xf5   : > { %5978 = vmatmul.msk.f32.vlgmr.msra.gmra.mxu2 %vm392_vm1, %v1339_v49  ;;  %5983 = vmatmul.msk.f32.vlgmr.msra.gmra.mxu3 %vm392_vm1, %v1339_v49  ;;  %v8347_v49 = vpop.f32.mrf.mxu2 }
  0xf6   : > { %1591 = vmatpush.msrb.mxu2 %v6031_v42  ;;  %1509 = vmatpush.msrb.mxu1 %v6000_v8  ;;  %v6072_v42 = vld [vmem:[%s11938_s1 + $0x8e8] sm:$0xf] }
  0xf7   : > { %1622 = vmatpush.msrb.mxu3 %v6028_v11  ;;  %1481 = vmatpush.msrb.mxu0 %v5997_v12  ;;  %v6098_v11 = vld [vmem:[%s11938_s1 + $0x968] sm:$0xff]  ;;  %v6067_v12 = vld [vmem:[%s11938_s1 + $0x8c0] sm:$0xff] }
  0xf8   : > { %1592 = vmatpush.msrb.mxu2 %v6029_v63  ;;  %2337 = vrot.lane.b32.xlu0 %v8135_v36, %s7102_s17  ;;  %v6099_v63 = vld [vmem:[%s11938_s1 + $0x970] sm:$0xff] }
  0xf9   : > { %1623 = vmatpush.msrb.mxu3 %v6026_v14  ;;  %1482 = vmatpush.msrb.mxu0 %v5995_v16  ;;  %v6096_v14 = vld [vmem:[%s11938_s1 + $0x958] sm:$0xff] }
  0xfa   : > { %1593 = vmatpush.msrb.mxu2 %v6027_v2  ;;  %2230 = vrot.lane.b32.xlu1 %v8288_v25, %s7101_s16 }
  0xfb   : > { %1624 = vmatpush.msrb.mxu3 %v6024_v19  ;;  %1483 = vmatpush.msrb.mxu0 %v5993_v28  ;;  %v6065_v19 = vld [vmem:[%s11938_s1 + $0x8b0] sm:$0xff]  ;;  %v6093_v28 = vld [vmem:[%s11938_s1 + $0x940] sm:$0xff] }
  0xfc   : > { %5885 = vmatmul.msk.f32.gmra.mxu0 %vm392_vm1, %v7988_v48  ;;  %5890 = vmatmul.msk.f32.gmra.mxu1 %vm392_vm1, %v7988_v48  ;;  %v5998_v48 = vld [vmem:[%s11938_s1 + $0x738] sm:$0xff]  ;;  %v1343_v21 = vpop.permute.xlu0 %1342 }
  0xfd   : > { %5979 = vmatmul.msk.f32.gmra.mxu2 %vm392_vm1, %v1341_v5  ;;  %5984 = vmatmul.msk.f32.gmra.mxu3 %vm392_vm1, %v1341_v5  ;;  %v6069_v5 = vld [vmem:[%s11938_s1 + $0x8d0] sm:$0xff] }
  0xfe   : > { %1510 = vmatpush.msrb.mxu1 %v5998_v48  ;;  %1594 = vmatpush.msrb.mxu2 %v6025_v13  ;;  %v6068_v48 = vld [vmem:[%s11938_s1 + $0x8c8] sm:$0xff]  ;;  %v6095_v13 = vld [vmem:[%s11938_s1 + $0x950] sm:$0xff] }
  0xff   : > { %1625 = vmatpush.msrb.mxu3 %v6022_v27  ;;  %1484 = vmatpush.msrb.mxu0 %v5991_v54  ;;  %v6064_v27 = vld [vmem:[%s11938_s1 + $0x8a8] sm:$0xff]  ;;  %v6091_v54 = vld [vmem:[%s11938_s1 + $0x930] sm:$0xff] }
 0x100   : > { %1511 = vmatpush.msrb.mxu1 %v5996_v17  ;;  %1595 = vmatpush.msrb.mxu2 %v6023_v18  ;;  %v8398_v8 = vpop.f32.mrf.mxu2  ;;  %v8400_v2 = vpop.f32.mrf.mxu3 }
 0x101   : > { %v8272_v51 = vpop.f32.mrf.mxu0  ;;  %v8274_v20 = vpop.f32.mrf.mxu1  ;;  %1626 = vmatpush.msrb.mxu3 %v6020_v35  ;;  %1485 = vmatpush.msrb.mxu0 %v5989_v37 }
 0x102   : > { %1596 = vmatpush.msrb.mxu2 %v6021_v29  ;;  %2232 = vrot.lane.b32.xlu0 %v8203_v57, %s7101_s16  ;;  %v6094_v29 = vld [vmem:[%s11938_s1 + $0x948] sm:$0xff] }
 0x103   : > { %1486 = vmatpush.msrb.mxu0 %v5987_v60  ;;  %2341 = vrot.lane.b32.xlu1 %v8288_v25, %s7102_s17 }
 0x104   : > { %5946 = vmatmul.msk.f32.vlgmr.msra.gmra.mxu0 %vm392_vm1, %v8046_v1  ;;  %5951 = vmatmul.msk.f32.vlgmr.msra.gmra.mxu1 %vm392_vm1, %v8046_v1  ;;  %v5994_v1 = vld [vmem:[%s11938_s1 + $0x718] sm:$0xff]  ;;  %v1563_v18 = vpop.permute.xlu0 %1562 }
 0x105   : > { %5980 = vmatmul.msk.f32.gmra.mxu2 %vm392_vm1, %v1343_v21  ;;  %5985 = vmatmul.msk.f32.gmra.mxu3 %vm392_vm1, %v1343_v21  ;;  %v6066_v21 = vld [vmem:[%s11938_s1 + $0x8b8] sm:$0xff] }
 0x106   : > { %1512 = vmatpush.msrb.mxu1 %v5994_v1  ;;  %1597 = vmatpush.msrb.mxu2 %v6019_v33  ;;  %v8443_v1 = vpop.permute.xlu1 %1671  ;;  %v6061_v33 = vld [vmem:[%s11938_s1 + $0x890] sm:$0xff] }
 0x107   : > { %6073 = vmatpush.msk.msra.mxu0 %vm401_vm0, %v6071_v52  ;;  %2228 = vrot.lane.b32.xlu2 %v8124_v34, %s7101_s16  ;;  %v6060_v52 = vld [vmem:[%s11938_s1 + $0x888] sm:$0xff] }
 0x108   : > { %1513 = vmatpush.msrb.mxu1 %v5992_v32  ;;  %6105 = vmatpush.msk.msra.mxu2 %vm401_vm0, %v6103_v46  ;;  %v6092_v32 = vld [vmem:[%s11938_s1 + $0x938] sm:$0xff]  ;;  %v1565_v46 = vpop.permute.xlu2 %1564 }
 0x109   : > { %v8325_v38 = vpop.f32.mrf.mxu0  ;;  %v8327_v39 = vpop.f32.mrf.mxu1  ;;  %1699 = vmatpush.msra.mxu0 %v6069_v5  ;;  %v6086_v5 = vld [vmem:[%s11938_s1 + $0x908] sm:$0xff] }
 0x10a   : > { %1514 = vmatpush.msrb.mxu1 %v5990_v53  ;;  %1810 = vmatpush.msra.mxu2 %v6101_v50  ;;  %v6089_v53 = vld [vmem:[%s11938_s1 + $0x920] sm:$0xff] }
 0x10b   : > { %2448 = vrot.lane.b32.xlu0 %v8135_v36, %s7103_s12  ;;  %1700 = vmatpush.msra.mxu0 %v6067_v12  ;;  %v6059_v50 = vld [vmem:[%s11938_s1 + $0x880] sm:$0xff]  ;;  %v6056_v12 = vld [vmem:[%s11938_s1 + $0x868] sm:$0xff] }
 0x10c   : > { %5947 = vmatmul.msk.f32.gmra.mxu0 %vm392_vm1, %v8145_v30  ;;  %5952 = vmatmul.msk.f32.gmra.mxu1 %vm392_vm1, %v8145_v30  ;;  %v6104_v30 = vld [vmem:[%s11938_s1 + $0x998] sm:$0xf] }
 0x10d   : > { %5981 = vmatmul.msk.f32.gmra.mxu2 %vm392_vm1, %v1345_v40  ;;  %5986 = vmatmul.msk.f32.gmra.mxu3 %vm392_vm1, %v1345_v40  ;;  %v6062_v40 = vld [vmem:[%s11938_s1 + $0x898] sm:$0xff] }
 0x10e   : > { %1515 = vmatpush.msrb.mxu1 %v5988_v3  ;;  %6110 = vmatpush.msk.msra.mxu3 %vm401_vm0, %v6104_v30  ;;  %v6090_v30 = vld [vmem:[%s11938_s1 + $0x928] sm:$0xff] }
 0x10f   : > { %1811 = vmatpush.msra.mxu2 %v6099_v63  ;;  %2450 = vrot.lane.b32.xlu1 %v8124_v34, %s7103_s12  ;;  %v6085_v63 = vld [vmem:[%s11938_s1 + $0x900] sm:$0xff] }
 0x110   : > { %1839 = vmatpush.msra.mxu3 %v6102_v55  ;;  %6078 = vmatpush.msk.msra.mxu1 %vm401_vm0, %v6072_v42  ;;  %v6087_v55 = vld [vmem:[%s11938_s1 + $0x910] sm:$0xff]  ;;  %v6088_v42 = vld [vmem:[%s11938_s1 + $0x918] sm:$0xff] }
 0x111   : > { %v8371_v58 = vpop.f32.mrf.mxu0  ;;  %v8373_v59 = vpop.f32.mrf.mxu1  ;;  %1701 = vmatpush.msra.mxu0 %v6065_v19  ;;  %v6084_v19 = vld [vmem:[%s11938_s1 + $0x8f8] sm:$0xff]  ;;  %2339 = vrot.lane.b32.xlu2 %v8124_v34, %s7102_s17 }
 0x112   : > { %1840 = vmatpush.msra.mxu3 %v6100_v4  ;;  %1728 = vmatpush.msra.mxu1 %v6070_v9  ;;  %v1567_v4 = vpop.permute.xlu1 %1566  ;;  %v6055_v9 = vld [vmem:[%s11938_s1 + $0x860] sm:$0xff] }
 0x113   : > { %2454 = vrot.lane.b32.xlu0 %v8203_v57, %s7103_s12 }
 0x114   : > { %5948 = vmatmul.msk.f32.gmra.mxu0 %vm392_vm1, %v8155_v41  ;;  %5953 = vmatmul.msk.f32.gmra.mxu1 %vm392_vm1, %v8155_v41  ;;  %v6097_v41 = vld [vmem:[%s11938_s1 + $0x960] sm:$0xff] }
 0x115   : > { %6042 = vmatmul.msk.f32.vlgmr.msrb.gmra.mxu2 %vm392_vm1, %v1561_v61  ;;  %6047 = vmatmul.msk.f32.vlgmr.msrb.gmra.mxu3 %vm392_vm1, %v1561_v61  ;;  %v6058_v61 = vld [vmem:[%s11938_s1 + $0x878] sm:$0xff] }
 0x116   : > { %1812 = vmatpush.msra.mxu2 %v6097_v41  ;;  %1841 = vmatpush.msra.mxu3 %v6098_v11 }
 0x117   : > { %1729 = vmatpush.msra.mxu1 %v6068_v48  ;;  %v6083_v48 = vld [vmem:[%s11938_s1 + $0x8f0] sm:$0xff] }
 0x118   : > { %1813 = vmatpush.msra.mxu2 %v6095_v13  ;;  %1842 = vmatpush.msra.mxu3 %v6096_v14 }
 0x119   : > { %v8424_v16 = vpop.f32.mrf.mxu0  ;;  %v8426_v17 = vpop.f32.mrf.mxu1  ;;  %1730 = vmatpush.msra.mxu1 %v6066_v21  ;;  %v6053_v21 = vld [vmem:[%s11938_s1 + $0x850] sm:$0xff]  ;;  %2343 = vrot.lane.b32.xlu2 %v8203_v57, %s7102_s17 }
 0x11a   : > { %1814 = vmatpush.msra.mxu2 %v6093_v28  ;;  %1843 = vmatpush.msra.mxu3 %v6094_v29  ;;  %v2559_v28 = vrot.slane %v8113_v0, 4  ;;  %v2560_v29 = vrot.slane %v8099_v24, 4  ;;  %v6051_v0 = vld [vmem:[%s11938_s1 + $0x840] sm:$0xff] }
 0x11b   : > { %1731 = vmatpush.msra.mxu1 %v6064_v27  ;;  %v6052_v27 = vld [vmem:[%s11938_s1 + $0x848] sm:$0xff] }
 0x11c   : > { %5949 = vmatmul.msk.f32.gmra.mxu0 %vm392_vm1, %v8216_v62  ;;  %5954 = vmatmul.msk.f32.gmra.mxu1 %vm392_vm1, %v8216_v62  ;;  %v6063_v62 = vld [vmem:[%s11938_s1 + $0x8a0] sm:$0xff] }
 0x11d   : > { %6043 = vmatmul.msk.f32.gmra.mxu2 %vm392_vm1, %v1563_v18  ;;  %6048 = vmatmul.msk.f32.gmra.mxu3 %vm392_vm1, %v1563_v18  ;;  %v8529_v18 = vpop.permute.xlu0 %1673 }
 0x11e   : > { %1702 = vmatpush.msra.mxu0 %v6063_v62  ;;  %1815 = vmatpush.msra.mxu2 %v6091_v54  ;;  %v6054_v62 = vld [vmem:[%s11938_s1 + $0x858] sm:$0xff]  ;;  %v8557_v54 = vpop.permute.xlu2 %1675 }
 0x11f   : > { %1844 = vmatpush.msra.mxu3 %v6092_v32  ;;  %1732 = vmatpush.msra.mxu1 %v6062_v40  ;;  %v6168_v32 = vld [vmem:[%s11938_s1 + $0xaf8] sm:$0xf] }
 0x120   : > { %v8465_v35 = vpop.f32.mrf.mxu2  ;;  %v8467_v37 = vpop.f32.mrf.mxu3  ;;  %1703 = vmatpush.msra.mxu0 %v6061_v33  ;;  %1816 = vmatpush.msra.mxu2 %v6089_v53  ;;  %v8567_v33 = vsel %vm401_vm0, %v2559_v28, %v2560_v29  ;;  %v6132_v28 = vld [vmem:[%s11938_s1 + $0xa28] sm:$0xff] }
 0x121   : > { %v8475_v60 = vpop.f32.mrf.mxu0  ;;  %v8477_v3 = vpop.f32.mrf.mxu1  ;;  %1845 = vmatpush.msra.mxu3 %v6090_v30  ;;  %1733 = vmatpush.msra.mxu1 %v6060_v52  ;;  %v6135_v30 = vld [vmem:[%s11938_s1 + $0xa40] sm:$0xf] }
 0x122   : > { %1704 = vmatpush.msra.mxu0 %v6059_v50  ;;  %1817 = vmatpush.msra.mxu2 %v6087_v55  ;;  %v1783_v55 = vpop.permute.xlu1 %1782 }
 0x123   : > { %1846 = vmatpush.msra.mxu3 %v6088_v42  ;;  %1734 = vmatpush.msra.mxu1 %v6058_v61  ;;  %v6166_v42 = vld [vmem:[%s11938_s1 + $0xae8] sm:$0xff]  ;;  %v6163_v61 = vld [vmem:[%s11938_s1 + $0xad0] sm:$0xff] }
 0x124   : > { %6010 = vmatmul.msk.f32.vlgmr.msrb.gmra.mxu0 %vm392_vm1, %v7689_v31  ;;  %6015 = vmatmul.msk.f32.vlgmr.msrb.gmra.mxu1 %vm392_vm1, %v7689_v31  ;;  %v6057_v31 = vld [vmem:[%s11938_s1 + $0x870] sm:$0xff] }
 0x125   : > { %6044 = vmatmul.msk.f32.gmra.mxu2 %vm392_vm1, %v1565_v46  ;;  %6049 = vmatmul.msk.f32.gmra.mxu3 %vm392_vm1, %v1565_v46  ;;  %v6165_v46 = vld [vmem:[%s11938_s1 + $0xae0] sm:$0xff] }
 0x126   : > { %1705 = vmatpush.msra.mxu0 %v6057_v31  ;;  %1818 = vmatpush.msra.mxu2 %v6085_v63  ;;  %v6136_v31 = vld [vmem:[%s11938_s1 + $0xa48] sm:$0xf]  ;;  %v6133_v63 = vld [vmem:[%s11938_s1 + $0xa30] sm:$0xff] }
 0x127   : > { %1847 = vmatpush.msra.mxu3 %v6086_v5  ;;  %1735 = vmatpush.msra.mxu1 %v6056_v12  ;;  %v6164_v5 = vld [vmem:[%s11938_s1 + $0xad8] sm:$0xff]  ;;  %v6162_v12 = vld [vmem:[%s11938_s1 + $0xac8] sm:$0xff] }
 0x128   : > { %v8515_v41 = vpop.f32.mrf.mxu2  ;;  %v8517_v11 = vpop.f32.mrf.mxu3  ;;  %1706 = vmatpush.msra.mxu0 %v6055_v9  ;;  %1819 = vmatpush.msra.mxu2 %v6083_v48  ;;  %v6161_v9 = vld [vmem:[%s11938_s1 + $0xac0] sm:$0xff] }
 0x129   : > { %v8525_v13 = vpop.f32.mrf.mxu0  ;;  %v8527_v14 = vpop.f32.mrf.mxu1  ;;  %1848 = vmatpush.msra.mxu3 %v6084_v19  ;;  %1736 = vmatpush.msra.mxu1 %v6054_v62  ;;  %v6131_v48 = vld [vmem:[%s11938_s1 + $0xa20] sm:$0xff]  ;;  %v6159_v62 = vld [vmem:[%s11938_s1 + $0xab0] sm:$0xff] }
 0x12a   : > { %1707 = vmatpush.msra.mxu0 %v6053_v21  ;;  %2669 = vrot.lane.b32.xlu1 %v8567_v33, %s7100_s15 }
 0x12b   : > { %1737 = vmatpush.msra.mxu1 %v6052_v27  ;;  %6174 = vmatpush.msk.msrb.mxu3 %vm401_vm0, %v6168_v32  ;;  %v527_v32 = vadd.f32 %v8165_v44, %v8274_v20  ;;  %v6130_v44 = vld [vmem:[%s11938_s1 + $0xa18] sm:$0xff]  ;;  %v6158_v20 = vld [vmem:[%s11938_s1 + $0xaa8] sm:$0xff] }
 0x12c   : > { %6011 = vmatmul.msk.f32.gmra.mxu0 %vm392_vm1, %v7623_v10  ;;  %6016 = vmatmul.msk.f32.gmra.mxu1 %vm392_vm1, %v7623_v10  ;;  %v6167_v10 = vld [vmem:[%s11938_s1 + $0xaf0] sm:$0xf] }
 0x12d   : > { %6045 = vmatmul.msk.f32.gmra.mxu2 %vm392_vm1, %v1567_v4  ;;  %6050 = vmatmul.msk.f32.gmra.mxu3 %vm392_vm1, %v1567_v4  ;;  %v8608_v4 = vpop.permute.xlu0 %1677 }
 0x12e   : > { %1708 = vmatpush.msra.mxu0 %v6051_v0  ;;  %6169 = vmatpush.msk.msrb.mxu2 %vm401_vm0, %v6167_v10  ;;  %v498_v10 = vadd.f32 %v8163_v43, %v8272_v51  ;;  %v642_v43 = vadd.f32 %v8477_v3, %v527_v32  ;;  %v6157_v51 = vld [vmem:[%s11938_s1 + $0xaa0] sm:$0xff] }
 0x12f   : > { %2061 = vmatpush.msrb.mxu3 %v6166_v42  ;;  %6142 = vmatpush.msk.msrb.mxu1 %vm401_vm0, %v6136_v31  ;;  %v6155_v31 = vld [vmem:[%s11938_s1 + $0xa90] sm:$0xff] }
 0x130   : > { %v8569_v40 = vpop.f32.mrf.mxu2  ;;  %v8571_v53 = vpop.f32.mrf.mxu3  ;;  %2032 = vmatpush.msrb.mxu2 %v6165_v46  ;;  %6137 = vmatpush.msk.msrb.mxu0 %vm401_vm0, %v6135_v30  ;;  %v6160_v30 = vld [vmem:[%s11938_s1 + $0xab8] sm:$0xff]  ;;  %v641_v42 = vadd.f32 %v8475_v60, %v498_v10  ;;  %v6128_v60 = vld [vmem:[%s11938_s1 + $0xa08] sm:$0xff] }
 0x131   : > { %v8581_v50 = vpop.f32.mrf.mxu0  ;;  %v8583_v52 = vpop.f32.mrf.mxu1  ;;  %2062 = vmatpush.msrb.mxu3 %v6164_v5  ;;  %v753_v5 = vadd.f32 %v8400_v2, %v642_v43  ;;  %2452 = vrot.lane.b32.xlu2 %v8288_v25, %s7103_s12  ;;  %v530_v2 = vadd.f32 %v8228_v7, %v8327_v39  ;;  %v6154_v7 = vld [vmem:[%s11938_s1 + $0xa88] sm:$0xff]  ;;  %v6121_v43 = vld [vmem:[%s11938_s1 + $0x9d0] sm:$0xff] }
 0x132   : > { %2033 = vmatpush.msrb.mxu2 %v6163_v61  ;;  %1921 = vmatpush.msrb.mxu0 %v6133_v63  ;;  %v1785_v46 = vpop.permute.xlu2 %1784  ;;  %v6156_v61 = vld [vmem:[%s11938_s1 + $0xa98] sm:$0xff]  ;;  %v752_v63 = vadd.f32 %v8398_v8, %v641_v42  ;;  %v501_v8 = vadd.f32 %v8226_v47, %v8325_v38  ;;  %v6153_v47 = vld [vmem:[%s11938_s1 + $0xa80] sm:$0xff] }
 0x133   : > { %2063 = vmatpush.msrb.mxu3 %v6162_v12  ;;  %v6125_v12 = vld [vmem:[%s11938_s1 + $0x9f0] sm:$0xff]  ;;  %v644_v38 = vadd.f32 %v8527_v14, %v530_v2  ;;  %v6124_v14 = vld [vmem:[%s11938_s1 + $0x9e8] sm:$0xff]  ;;  %2780 = vrot.lane.b32.xlu0 %v8567_v33, %s7101_s16 }
 0x134   : > { %6012 = vmatmul.msk.f32.gmra.mxu0 %vm392_vm1, %v7818_v6  ;;  %6017 = vmatmul.msk.f32.gmra.mxu1 %vm392_vm1, %v7818_v6  ;;  %v6134_v6 = vld [vmem:[%s11938_s1 + $0xa38] sm:$0xff]  ;;  %v643_v42 = vadd.f32 %v8525_v13, %v501_v8  ;;  %v6123_v13 = vld [vmem:[%s11938_s1 + $0x9e0] sm:$0xff] }
 0x135   : > { %6106 = vmatmul.msk.f32.vlgmr.msra.gmra.mxu2 %vm392_vm1, %v1783_v55  ;;  %6111 = vmatmul.msk.f32.vlgmr.msra.gmra.mxu3 %vm392_vm1, %v1783_v55  ;;  %v6129_v55 = vld [vmem:[%s11938_s1 + $0xa10] sm:$0xff]  ;;  %v8675_v3 = vpop.permute.xlu0 %1893 }
 0x136   : > { %1950 = vmatpush.msrb.mxu1 %v6134_v6  ;;  %2034 = vmatpush.msrb.mxu2 %v6161_v9 }
 0x137   : > { %1922 = vmatpush.msrb.mxu0 %v6131_v48  ;;  %2064 = vmatpush.msrb.mxu3 %v6160_v30  ;;  %v6126_v48 = vld [vmem:[%s11938_s1 + $0x9f8] sm:$0xff]  ;;  %v2562_v30 = vrot.slane %v8103_v26, 4 }
 0x138   : > { %v8626_v19 = vpop.f32.mrf.mxu2  ;;  %v8628_v21 = vpop.f32.mrf.mxu3  ;;  %1951 = vmatpush.msrb.mxu1 %v6132_v28  ;;  %2035 = vmatpush.msrb.mxu2 %v6159_v62 }
 0x139   : > { %v8638_v0 = vpop.f32.mrf.mxu0  ;;  %v8640_v27 = vpop.f32.mrf.mxu1  ;;  %1923 = vmatpush.msrb.mxu0 %v6129_v55  ;;  %2065 = vmatpush.msrb.mxu3 %v6158_v20  ;;  %v8703_v55 = vrot.slane %v8200_v56, 4  ;;  %v755_v20 = vadd.f32 %v8467_v37, %v644_v38  ;;  %v533_v37 = vadd.f32 %v8282_v23, %v8373_v59  ;;  %v8820_v38 = vsel %vm401_vm0, %v2560_v29, %v2562_v30 }
 0x13a   : > { %1952 = vmatpush.msrb.mxu1 %v6130_v44  ;;  %2036 = vmatpush.msrb.mxu2 %v6157_v51  ;;  %v6122_v44 = vld [vmem:[%s11938_s1 + $0x9d8] sm:$0xff]  ;;  %v754_v51 = vadd.f32 %v8465_v35, %v643_v42 }
 0x13b   : > { %2066 = vmatpush.msrb.mxu3 %v6156_v61  ;;  %v6150_v61 = vld [vmem:[%s11938_s1 + $0xa68] sm:$0xff]  ;;  %2675 = vrot.lane.b32.xlu0 %v8703_v55, %s7100_s15 }
 0x13c   : > { %6013 = vmatmul.msk.f32.gmra.mxu0 %vm392_vm1, %v7735_v45  ;;  %6018 = vmatmul.msk.f32.gmra.mxu1 %vm392_vm1, %v7735_v45  ;;  %v6127_v45 = vld [vmem:[%s11938_s1 + $0xa00] sm:$0xff] }
 0x13d   : > { %6107 = vmatmul.msk.f32.gmra.mxu2 %vm392_vm1, %v1785_v46  ;;  %6112 = vmatmul.msk.f32.gmra.mxu3 %vm392_vm1, %v1785_v46  ;;  %v1787_v46 = vpop.permute.xlu1 %1786  ;;  %v1789_v8 = vpop.permute.xlu0 %1788 }
 0x13e   : > { %1924 = vmatpush.msrb.mxu0 %v6127_v45  ;;  %1953 = vmatpush.msrb.mxu1 %v6128_v60 }
 0x13f   : > { %2037 = vmatpush.msrb.mxu2 %v6155_v31  ;;  %2067 = vmatpush.msrb.mxu3 %v6154_v7  ;;  %v6149_v31 = vld [vmem:[%s11938_s1 + $0xa60] sm:$0xff]  ;;  %v6232_v7 = vld [vmem:[%s11938_s1 + $0xc58] sm:$0xf] }
 0x140   : > { %v8685_v6 = vpop.f32.mrf.mxu2  ;;  %v8687_v9 = vpop.f32.mrf.mxu3  ;;  %1925 = vmatpush.msrb.mxu0 %v6125_v12  ;;  %1954 = vmatpush.msrb.mxu1 %v6126_v48 }
 0x141   : > { %v822_v28 = vpop.f32.mrf.mxu0  ;;  %v851_v62 = vpop.f32.mrf.mxu1  ;;  %2038 = vmatpush.msrb.mxu2 %v6153_v47  ;;  %2671 = vrot.lane.b32.xlu2 %v8820_v38, %s7100_s15 }
 0x142   : > { %v863_v10 = vadd.f32 %v822_v28, %v752_v63  ;;  %v864_v32 = vadd.f32 %v851_v62, %v753_v5  ;;  %1926 = vmatpush.msrb.mxu0 %v6123_v13  ;;  %1955 = vmatpush.msrb.mxu1 %v6124_v14  ;;  %v504_v63 = vadd.f32 %v8280_v22, %v8371_v58  ;;  %v6119_v22 = vld [vmem:[%s11938_s1 + $0x9c0] sm:$0xff]  ;;  %v6120_v58 = vld [vmem:[%s11938_s1 + $0x9c8] sm:$0xff] }
 0x143   : > { %v646_v28 = vadd.f32 %v8583_v52, %v533_v37  ;;  %v6148_v52 = vld [vmem:[%s11938_s1 + $0xa58] sm:$0xff]  ;;  %v6115_v62 = vld [vmem:[%s11938_s1 + $0x9a0] sm:$0xff]  ;;  %v536_v14 = vadd.f32 %v8349_v15, %v8426_v17  ;;  %v6230_v17 = vld [vmem:[%s11938_s1 + $0xc48] sm:$0xff]  ;;  %2891 = vrot.lane.b32.xlu0 %v8567_v33, %s7102_s17 }
 0x144   : > { %v8714_v39 = vadd.f32 %v8626_v19, %v863_v10  ;;  %v8717_v56 = vadd.f32 %v8628_v21, %v864_v32  ;;  %6074 = vmatmul.msk.f32.vlgmr.msra.gmra.mxu0 %vm392_vm1, %v8443_v1  ;;  %6079 = vmatmul.msk.f32.vlgmr.msra.gmra.mxu1 %vm392_vm1, %v8443_v1  ;;  %v6151_v19 = vld [vmem:[%s11938_s1 + $0xa70] sm:$0xff]  ;;  %v6152_v1 = vld [vmem:[%s11938_s1 + $0xa78] sm:$0xff]  ;;  %v8741_v21 = vsel %vm401_vm0, %v2562_v30, %v8703_v55  ;;  %v6116_v10 = vld [vmem:[%s11938_s1 + $0x9a8] sm:$0xff] }
 0x145   : > { %6108 = vmatmul.msk.f32.gmra.mxu2 %vm392_vm1, %v1787_v46  ;;  %6113 = vmatmul.msk.f32.gmra.mxu3 %vm392_vm1, %v1787_v46  ;;  %v645_v2 = vadd.f32 %v8581_v50, %v504_v63  ;;  %v6147_v50 = vld [vmem:[%s11938_s1 + $0xa50] sm:$0xff]  ;;  %v757_v46 = vadd.f32 %v8517_v11, %v646_v28  ;;  %v6228_v30 = vld [vmem:[%s11938_s1 + $0xc38] sm:$0xff]  ;;  %v6195_v63 = vld [vmem:[%s11938_s1 + $0xb80] sm:$0xff] }
 0x146   : > { %2039 = vmatpush.msrb.mxu2 %v6151_v19  ;;  %2068 = vmatpush.msrb.mxu3 %v6152_v1  ;;  %v6198_v1 = vld [vmem:[%s11938_s1 + $0xb98] sm:$0xff]  ;;  %v6191_v28 = vld [vmem:[%s11938_s1 + $0xb60] sm:$0xff] }
 0x147   : > { %2673 = vrot.lane.b32.xlu1 %v8741_v21, %s7100_s15  ;;  %1927 = vmatpush.msrb.mxu0 %v6121_v43  ;;  %v756_v32 = vadd.f32 %v8515_v41, %v645_v2  ;;  %v507_v41 = vadd.f32 %v8347_v49, %v8424_v16  ;;  %v6229_v49 = vld [vmem:[%s11938_s1 + $0xc40] sm:$0xff]  ;;  %v648_v16 = vadd.f32 %v8640_v27, %v536_v14  ;;  %v6200_v27 = vld [vmem:[%s11938_s1 + $0xba8] sm:$0xf]  ;;  %v8912_v2 = vpop.permute.xlu1 %1897 }
 0x148   : > { %v8751_v45 = vpop.f32.mrf.mxu2  ;;  %v8753_v60 = vpop.f32.mrf.mxu3  ;;  %1956 = vmatpush.msrb.mxu1 %v6122_v44  ;;  %2040 = vmatpush.msrb.mxu2 %v6149_v31 }
 0x149   : > { %v825_v35 = vpop.f32.mrf.mxu0  ;;  %v854_v5 = vpop.f32.mrf.mxu1  ;;  %2069 = vmatpush.msrb.mxu3 %v6150_v61  ;;  %1928 = vmatpush.msrb.mxu0 %v6119_v22  ;;  %v647_v24 = vadd.f32 %v8638_v0, %v507_v41  ;;  %v6199_v0 = vld [vmem:[%s11938_s1 + $0xba0] sm:$0xf]  ;;  %v759_v44 = vadd.f32 %v8571_v53, %v648_v16  ;;  %v6194_v22 = vld [vmem:[%s11938_s1 + $0xb78] sm:$0xff]  ;;  %v6185_v16 = vld [vmem:[%s11938_s1 + $0xb30] sm:$0xff] }
 0x14a   : > { %v865_v12 = vadd.f32 %v825_v35, %v754_v51  ;;  %v866_v48 = vadd.f32 %v854_v5, %v755_v20  ;;  %1957 = vmatpush.msrb.mxu1 %v6120_v58  ;;  %2041 = vmatpush.msrb.mxu2 %v6147_v50  ;;  %v6196_v35 = vld [vmem:[%s11938_s1 + $0xb88] sm:$0xff]  ;;  %v6221_v58 = vld [vmem:[%s11938_s1 + $0xc00] sm:$0xff] }
 0x14b   : > { %2070 = vmatpush.msrb.mxu3 %v6148_v52  ;;  %v758_v43 = vadd.f32 %v8569_v40, %v647_v24  ;;  %2895 = vrot.lane.b32.xlu0 %v8741_v21, %s7102_s17 }
 0x14c   : > { %v8778_v23 = vadd.f32 %v8685_v6, %v865_v12  ;;  %v8781_v59 = vadd.f32 %v8687_v9, %v866_v48  ;;  %6075 = vmatmul.msk.f32.gmra.mxu0 %vm392_vm1, %v8529_v18  ;;  %6080 = vmatmul.msk.f32.gmra.mxu1 %vm392_vm1, %v8529_v18  ;;  %v6117_v6 = vld [vmem:[%s11938_s1 + $0x9b0] sm:$0xff]  ;;  %v6118_v18 = vld [vmem:[%s11938_s1 + $0x9b8] sm:$0xff] }
 0x14d   : > { %6109 = vmatmul.msk.f32.gmra.mxu2 %vm392_vm1, %v1789_v8  ;;  %6114 = vmatmul.msk.f32.gmra.mxu3 %vm392_vm1, %v1789_v8  ;;  %v6231_v9 = vld [vmem:[%s11938_s1 + $0xc50] sm:$0xf]  ;;  %v6224_v48 = vld [vmem:[%s11938_s1 + $0xc18] sm:$0xff]  ;;  %v8910_v8 = vpop.permute.xlu2 %1895 }
 0x14e   : > { %1929 = vmatpush.msrb.mxu0 %v6117_v6  ;;  %1958 = vmatpush.msrb.mxu1 %v6118_v18  ;;  %v6223_v12 = vld [vmem:[%s11938_s1 + $0xc10] sm:$0xff]  ;;  %v6192_v6 = vld [vmem:[%s11938_s1 + $0xb68] sm:$0xff] }
 0x14f   : > { %6233 = vmatpush.msk.msra.mxu2 %vm401_vm0, %v6231_v9  ;;  %6238 = vmatpush.msk.msra.mxu3 %vm401_vm0, %v6232_v7  ;;  %v6219_v18 = vld [vmem:[%s11938_s1 + $0xbf0] sm:$0xff]  ;;  %v8977_v14 = vpop.permute.xlu1 %2117 }
 0x150   : > { %v942_v42 = vpop.f32.mrf.mxu2  ;;  %v971_v47 = vpop.f32.mrf.mxu3  ;;  %1930 = vmatpush.msrb.mxu0 %v6115_v62  ;;  %1959 = vmatpush.msrb.mxu1 %v6116_v10 }
 0x151   : > { %v828_v13 = vpop.f32.mrf.mxu0  ;;  %v857_v11 = vpop.f32.mrf.mxu1  ;;  %2784 = vrot.lane.b32.xlu1 %v8741_v21, %s7101_s16  ;;  %2254 = vmatpush.msra.mxu2 %v6229_v49 }
 0x152   : > { %v867_v19 = vadd.f32 %v828_v13, %v756_v32  ;;  %v868_v26 = vadd.f32 %v857_v11, %v757_v46  ;;  %2283 = vmatpush.msra.mxu3 %v6230_v17  ;;  %6201 = vmatpush.msk.msra.mxu0 %vm401_vm0, %v6199_v0  ;;  %v6220_v46 = vld [vmem:[%s11938_s1 + $0xbf8] sm:$0xff]  ;;  %v6187_v13 = vld [vmem:[%s11938_s1 + $0xb40] sm:$0xff]  ;;  %v6188_v11 = vld [vmem:[%s11938_s1 + $0xb48] sm:$0xff] }
 0x153   : > { %6206 = vmatpush.msk.msra.mxu1 %vm401_vm0, %v6200_v27  ;;  %v6186_v17 = vld [vmem:[%s11938_s1 + $0xb38] sm:$0xff]  ;;  %2782 = vrot.lane.b32.xlu2 %v8820_v38, %s7101_s16 }
 0x154   : > { %v8838_v29 = vadd.f32 %v8751_v45, %v867_v19  ;;  %v8841_v15 = vadd.f32 %v8753_v60, %v868_v26  ;;  %6076 = vmatmul.msk.f32.gmra.mxu0 %vm392_vm1, %v8557_v54  ;;  %6081 = vmatmul.msk.f32.gmra.mxu1 %vm392_vm1, %v8557_v54  ;;  %v6227_v54 = vld [vmem:[%s11938_s1 + $0xc30] sm:$0xff]  ;;  %v6225_v45 = vld [vmem:[%s11938_s1 + $0xc20] sm:$0xff]  ;;  %v6226_v60 = vld [vmem:[%s11938_s1 + $0xc28] sm:$0xff] }
 0x155   : > { %6170 = vmatmul.msk.f32.vlgmr.msrb.gmra.mxu2 %vm392_vm1, %v8135_v36  ;;  %6175 = vmatmul.msk.f32.vlgmr.msrb.gmra.mxu3 %vm392_vm1, %v8135_v36  ;;  %v6197_v36 = vld [vmem:[%s11938_s1 + $0xb90] sm:$0xff]  ;;  %v8963_v41 = vpop.permute.xlu2 %1899  ;;  %v6216_v19 = vld [vmem:[%s11938_s1 + $0xbd8] sm:$0xff] }
 0x156   : > { %2255 = vmatpush.msra.mxu2 %v6227_v54  ;;  %2284 = vmatpush.msra.mxu3 %v6228_v30 }
 0x157   : > { %2143 = vmatpush.msra.mxu0 %v6197_v36  ;;  %2172 = vmatpush.msra.mxu1 %v6198_v1  ;;  %v6213_v36 = vld [vmem:[%s11938_s1 + $0xbc0] sm:$0xff]  ;;  %v6214_v1 = vld [vmem:[%s11938_s1 + $0xbc8] sm:$0xff] }
 0x158   : > { %v1155_v51 = vpop.f32.mrf.mxu2  ;;  %v1184_v20 = vpop.f32.mrf.mxu3  ;;  %2256 = vmatpush.msra.mxu2 %v6225_v45  ;;  %2285 = vmatpush.msra.mxu3 %v6226_v60  ;;  %v6181_v45 = vld [vmem:[%s11938_s1 + $0xb10] sm:$0xff]  ;;  %v6182_v60 = vld [vmem:[%s11938_s1 + $0xb18] sm:$0xff] }
 0x159   : > { %v831_v31 = vpop.f32.mrf.mxu0  ;;  %v860_v61 = vpop.f32.mrf.mxu1  ;;  %2144 = vmatpush.msra.mxu0 %v6195_v63  ;;  %2173 = vmatpush.msra.mxu1 %v6196_v35  ;;  %v6180_v63 = vld [vmem:[%s11938_s1 + $0xb08] sm:$0xff] }
 0x15a   : > { %v869_v40 = vadd.f32 %v831_v31, %v758_v43  ;;  %v870_v53 = vadd.f32 %v860_v61, %v759_v44  ;;  %2257 = vmatpush.msra.mxu2 %v6223_v12  ;;  %2286 = vmatpush.msra.mxu3 %v6224_v48  ;;  %v8982_v26 = vpop.permute.xlu0 %2115 }
 0x15b   : > { %2893 = vrot.lane.b32.xlu1 %v8820_v38, %s7102_s17  ;;  %2174 = vmatpush.msra.mxu1 %v6194_v22 }
 0x15c   : > { %v8892_v5 = vadd.f32 %v942_v42, %v869_v40  ;;  %v8894_v37 = vadd.f32 %v971_v47, %v870_v53  ;;  %6077 = vmatmul.msk.f32.gmra.mxu0 %vm392_vm1, %v8608_v4  ;;  %6082 = vmatmul.msk.f32.gmra.mxu1 %vm392_vm1, %v8608_v4  ;;  %v6193_v4 = vld [vmem:[%s11938_s1 + $0xb70] sm:$0xff]  ;;  %v6179_v53 = vld [vmem:[%s11938_s1 + $0xb00] sm:$0xff] }
 0x15d   : > { %6171 = vmatmul.msk.f32.gmra.mxu2 %vm392_vm1, %v8124_v34  ;;  %6176 = vmatmul.msk.f32.gmra.mxu3 %vm392_vm1, %v8124_v34  ;;  %v6222_v34 = vld [vmem:[%s11938_s1 + $0xc08] sm:$0xff]  ;;  %v6189_v42 = vld [vmem:[%s11938_s1 + $0xb50] sm:$0xff]  ;;  %v9030_v31 = vpop.permute.xlu2 %2119 }
 0x15e   : > { %2145 = vmatpush.msra.mxu0 %v6193_v4  ;;  %2258 = vmatpush.msra.mxu2 %v6221_v58  ;;  %v6296_v58 = vld [vmem:[%s11938_s1 + $0xdb8] sm:$0xf] }
 0x15f   : > { %2287 = vmatpush.msra.mxu3 %v6222_v34  ;;  %2175 = vmatpush.msra.mxu1 %v6192_v6  ;;  %v6261_v6 = vld [vmem:[%s11938_s1 + $0xcf0] sm:$0xff] }
 0x160   : > { %v1158_v50 = vpop.f32.mrf.mxu2  ;;  %v1187_v52 = vpop.f32.mrf.mxu3  ;;  %2146 = vmatpush.msra.mxu0 %v6191_v28  ;;  %2259 = vmatpush.msra.mxu2 %v6219_v18  ;;  %v6263_v28 = vld [vmem:[%s11938_s1 + $0xd00] sm:$0xf]  ;;  %v6262_v18 = vld [vmem:[%s11938_s1 + $0xcf8] sm:$0xff] }
 0x161   : > { %v1044_v9 = vpop.f32.mrf.mxu0  ;;  %v1073_v62 = vpop.f32.mrf.mxu1  ;;  %2288 = vmatpush.msra.mxu3 %v6220_v46  ;;  %v6259_v46 = vld [vmem:[%s11938_s1 + $0xce0] sm:$0xff]  ;;  %2786 = vrot.lane.b32.xlu2 %v8703_v55, %s7101_s16 }
 0x162   : > { %v1085_v10 = vadd.f32 %v1044_v9, %v8714_v39  ;;  %v1086_v32 = vadd.f32 %v1073_v62, %v8717_v56  ;;  %v6190_v39 = vld [vmem:[%s11938_s1 + $0xb58] sm:$0xff]  ;;  %v6217_v56 = vld [vmem:[%s11938_s1 + $0xbe0] sm:$0xff]  ;;  %2147 = vmatpush.msra.mxu0 %v6189_v42  ;;  %v2227_v4 = vpop.permute.xlu1 %2226  ;;  %v9046_v22 = vpop.permute.xlu0 %2121  ;;  %3006 = vrot.lane.b32.xlu0 %v8741_v21, %s7103_s12 }
 0x163   : > { %2176 = vmatpush.msra.mxu1 %v6190_v39  ;;  %2260 = vmatpush.msra.mxu2 %v6217_v56  ;;  %v6292_v9 = vld [vmem:[%s11938_s1 + $0xd98] sm:$0xff] }
 0x164   : > { %v8945_v47 = vadd.f32 %v1155_v51, %v1085_v10  ;;  %v8947_v7 = vadd.f32 %v1184_v20, %v1086_v32  ;;  %6138 = vmatmul.msk.f32.vlgmr.msrb.gmra.mxu0 %vm392_vm1, %v8675_v3  ;;  %6143 = vmatmul.msk.f32.vlgmr.msrb.gmra.mxu1 %vm392_vm1, %v8675_v3  ;;  %v6218_v3 = vld [vmem:[%s11938_s1 + $0xbe8] sm:$0xff]  ;;  %v6211_v51 = vld [vmem:[%s11938_s1 + $0xbb0] sm:$0xff]  ;;  %v6212_v20 = vld [vmem:[%s11938_s1 + $0xbb8] sm:$0xff] }
 0x165   : > { %6172 = vmatmul.msk.f32.gmra.mxu2 %vm392_vm1, %v8288_v25  ;;  %6177 = vmatmul.msk.f32.gmra.mxu3 %vm392_vm1, %v8288_v25  ;;  %v6215_v25 = vld [vmem:[%s11938_s1 + $0xbd0] sm:$0xff]  ;;  %v6289_v32 = vld [vmem:[%s11938_s1 + $0xd80] sm:$0xff] }
 0x166   : > { %2289 = vmatpush.msra.mxu3 %v6218_v3  ;;  %2148 = vmatpush.msra.mxu0 %v6187_v13  ;;  %v2229_v13 = vpop.permute.xlu2 %2228 }
 0x167   : > { %2177 = vmatpush.msra.mxu1 %v6188_v11  ;;  %2261 = vmatpush.msra.mxu2 %v6215_v25  ;;  %v6290_v11 = vld [vmem:[%s11938_s1 + $0xd88] sm:$0xff] }
 0x168   : > { %v1161_v24 = vpop.f32.mrf.mxu2  ;;  %v1190_v49 = vpop.f32.mrf.mxu3  ;;  %2290 = vmatpush.msra.mxu3 %v6216_v19  ;;  %2149 = vmatpush.msra.mxu0 %v6185_v16  ;;  %v6260_v25 = vld [vmem:[%s11938_s1 + $0xce8] sm:$0xff]  ;;  %v6288_v16 = vld [vmem:[%s11938_s1 + $0xd78] sm:$0xff] }
 0x169   : > { %v1047_v0 = vpop.f32.mrf.mxu0  ;;  %v1076_v27 = vpop.f32.mrf.mxu1  ;;  %2178 = vmatpush.msra.mxu1 %v6186_v17  ;;  %2262 = vmatpush.msra.mxu2 %v6213_v36  ;;  %v6285_v17 = vld [vmem:[%s11938_s1 + $0xd60] sm:$0xff]  ;;  %v6256_v36 = vld [vmem:[%s11938_s1 + $0xcc8] sm:$0xff] }
 0x16a   : > { %v1087_v54 = vadd.f32 %v1047_v0, %v8778_v23  ;;  %v1088_v30 = vadd.f32 %v1076_v27, %v8781_v59  ;;  %v6183_v23 = vld [vmem:[%s11938_s1 + $0xb20] sm:$0xff]  ;;  %v6184_v59 = vld [vmem:[%s11938_s1 + $0xb28] sm:$0xff]  ;;  %2291 = vmatpush.msra.mxu3 %v6214_v1  ;;  %v6283_v1 = vld [vmem:[%s11938_s1 + $0xd50] sm:$0xff]  ;;  %3002 = vrot.lane.b32.xlu2 %v8567_v33, %s7103_s12 }
 0x16b   : > { %2150 = vmatpush.msra.mxu0 %v6183_v23  ;;  %2179 = vmatpush.msra.mxu1 %v6184_v59  ;;  %v6255_v0 = vld [vmem:[%s11938_s1 + $0xcc0] sm:$0xff]  ;;  %v6286_v27 = vld [vmem:[%s11938_s1 + $0xd68] sm:$0xff] }
 0x16c   : > { %v9000_v43 = vadd.f32 %v1158_v50, %v1087_v54  ;;  %v9002_v44 = vadd.f32 %v1187_v52, %v1088_v30  ;;  %6139 = vmatmul.msk.f32.gmra.mxu0 %vm392_vm1, %v8910_v8  ;;  %6144 = vmatmul.msk.f32.gmra.mxu1 %vm392_vm1, %v8910_v8  ;;  %v6264_v50 = vld [vmem:[%s11938_s1 + $0xd08] sm:$0xf] }
 0x16d   : > { %6173 = vmatmul.msk.f32.gmra.mxu2 %vm392_vm1, %v8203_v57  ;;  %6178 = vmatmul.msk.f32.gmra.mxu3 %vm392_vm1, %v8203_v57  ;;  %v6295_v57 = vld [vmem:[%s11938_s1 + $0xdb0] sm:$0xf]  ;;  %v6294_v52 = vld [vmem:[%s11938_s1 + $0xda8] sm:$0xff] }
 0x16e   : > { %2263 = vmatpush.msra.mxu2 %v6211_v51  ;;  %2292 = vmatpush.msra.mxu3 %v6212_v20 }
 0x16f   : > { %2151 = vmatpush.msra.mxu0 %v6181_v45  ;;  %2180 = vmatpush.msra.mxu1 %v6182_v60  ;;  %v2231_v45 = vpop.permute.xlu1 %2230  ;;  %v6284_v60 = vld [vmem:[%s11938_s1 + $0xd58] sm:$0xff] }
 0x170   : > { %v1164_v61 = vpop.f32.mrf.mxu2  ;;  %v1193_v40 = vpop.f32.mrf.mxu3  ;;  %6297 = vmatpush.msk.msrb.mxu2 %vm401_vm0, %v6295_v57  ;;  %6302 = vmatpush.msk.msrb.mxu3 %vm401_vm0, %v6296_v58  ;;  %v6249_v58 = vld [vmem:[%s11938_s1 + $0xc90] sm:$0xff] }
 0x171   : > { %v1050_v35 = vpop.f32.mrf.mxu0  ;;  %v1079_v12 = vpop.f32.mrf.mxu1  ;;  %2152 = vmatpush.msra.mxu0 %v6179_v53  ;;  %2181 = vmatpush.msra.mxu1 %v6180_v63  ;;  %v6251_v53 = vld [vmem:[%s11938_s1 + $0xca0] sm:$0xff]  ;;  %v6252_v63 = vld [vmem:[%s11938_s1 + $0xca8] sm:$0xff] }
 0x172   : > { %v1089_v48 = vadd.f32 %v1050_v35, %v8838_v29  ;;  %v1090_v8 = vadd.f32 %v1079_v12, %v8841_v15  ;;  %v6293_v29 = vld [vmem:[%s11938_s1 + $0xda0] sm:$0xff]  ;;  %2505 = vmatpush.msrb.mxu3 %v6294_v52  ;;  %3004 = vrot.lane.b32.xlu1 %v8820_v38, %s7103_s12  ;;  %v6279_v12 = vld [vmem:[%s11938_s1 + $0xd30] sm:$0xff] }
 0x173   : > { %2476 = vmatpush.msrb.mxu2 %v6293_v29  ;;  %6265 = vmatpush.msk.msrb.mxu0 %vm401_vm0, %v6263_v28 }
 0x174   : > { %v9054_v34 = vadd.f32 %v1161_v24, %v1089_v48  ;;  %v9056_v15 = vadd.f32 %v1190_v49, %v1090_v8  ;;  %6140 = vmatmul.msk.f32.gmra.mxu0 %vm392_vm1, %v8912_v2  ;;  %6145 = vmatmul.msk.f32.gmra.mxu1 %vm392_vm1, %v8912_v2  ;;  %v6291_v2 = vld [vmem:[%s11938_s1 + $0xd90] sm:$0xff]  ;;  %v9120_v49 = vpop.permute.xlu0 %2337  ;;  %v6280_v48 = vld [vmem:[%s11938_s1 + $0xd38] sm:$0xff] }
 0x175   : > { %6234 = vmatmul.msk.f32.vlgmr.msra.gmra.mxu2 %vm392_vm1, %v2227_v4  ;;  %6239 = vmatmul.msk.f32.vlgmr.msra.gmra.mxu3 %vm392_vm1, %v2227_v4  ;;  %v6257_v24 = vld [vmem:[%s11938_s1 + $0xcd0] sm:$0xff] }
 0x176   : > { %6270 = vmatpush.msk.msrb.mxu1 %vm401_vm0, %v6264_v50  ;;  %2477 = vmatpush.msrb.mxu2 %v6291_v2  ;;  %v6250_v2 = vld [vmem:[%s11938_s1 + $0xc98] sm:$0xff] }
 0x177   : > { %2365 = vmatpush.msrb.mxu0 %v6261_v6  ;;  %2506 = vmatpush.msrb.mxu3 %v6292_v9  ;;  %v6277_v6 = vld [vmem:[%s11938_s1 + $0xd20] sm:$0xff] }
 0x178   : > { %v1377_v62 = vpop.f32.mrf.mxu2  ;;  %v1406_v10 = vpop.f32.mrf.mxu3  ;;  %2394 = vmatpush.msrb.mxu1 %v6262_v18  ;;  %2478 = vmatpush.msrb.mxu2 %v6289_v32  ;;  %v6276_v32 = vld [vmem:[%s11938_s1 + $0xd18] sm:$0xff] }
 0x179   : > { %v1053_v42 = vpop.f32.mrf.mxu0  ;;  %v1082_v39 = vpop.f32.mrf.mxu1  ;;  %2366 = vmatpush.msrb.mxu0 %v6259_v46  ;;  %2507 = vmatpush.msrb.mxu3 %v6290_v11 }
 0x17a   : > { %v1091_v56 = vadd.f32 %v1053_v42, %v8892_v5  ;;  %v1092_v3 = vadd.f32 %v1082_v39, %v8894_v37  ;;  %v6287_v37 = vld [vmem:[%s11938_s1 + $0xd70] sm:$0xff]  ;;  %2395 = vmatpush.msrb.mxu1 %v6260_v25  ;;  %2897 = vrot.lane.b32.xlu2 %v8703_v55, %s7102_s17  ;;  %v9226_v46 = vpop.permute.xlu1 %2341  ;;  %v6246_v39 = vld [vmem:[%s11938_s1 + $0xc78] sm:$0xff] }
 0x17b   : > { %2479 = vmatpush.msrb.mxu2 %v6287_v37  ;;  %2367 = vmatpush.msrb.mxu0 %v6257_v24  ;;  %v6245_v42 = vld [vmem:[%s11938_s1 + $0xc70] sm:$0xff] }
 0x17c   : > { %v9104_v19 = vadd.f32 %v1164_v61, %v1091_v56  ;;  %v9106_v5 = vadd.f32 %v1193_v40, %v1092_v3  ;;  %6141 = vmatmul.msk.f32.gmra.mxu0 %vm392_vm1, %v8963_v41  ;;  %6146 = vmatmul.msk.f32.gmra.mxu1 %vm392_vm1, %v8963_v41  ;;  %v6258_v41 = vld [vmem:[%s11938_s1 + $0xcd8] sm:$0xff]  ;;  %v6281_v40 = vld [vmem:[%s11938_s1 + $0xd40] sm:$0xff]  ;;  %v2233_v35 = vpop.permute.xlu0 %2232 }
 0x17d   : > { %6235 = vmatmul.msk.f32.gmra.mxu2 %vm392_vm1, %v2229_v13  ;;  %6240 = vmatmul.msk.f32.gmra.mxu3 %vm392_vm1, %v2229_v13  ;;  %v6359_v13 = vld [vmem:[%s11938_s1 + $0xf10] sm:$0xf] }
 0x17e   : > { %2508 = vmatpush.msrb.mxu3 %v6288_v16  ;;  %2396 = vmatpush.msrb.mxu1 %v6258_v41  ;;  %v6243_v41 = vld [vmem:[%s11938_s1 + $0xc60] sm:$0xff] }
 0x17f   : > { %2480 = vmatpush.msrb.mxu2 %v6285_v17  ;;  %2368 = vmatpush.msrb.mxu0 %v6255_v0  ;;  %v6244_v17 = vld [vmem:[%s11938_s1 + $0xc68] sm:$0xff] }
 0x180   : > { %v1380_v54 = vpop.f32.mrf.mxu2  ;;  %v1409_v30 = vpop.f32.mrf.mxu3  ;;  %2509 = vmatpush.msrb.mxu3 %v6286_v27  ;;  %2397 = vmatpush.msrb.mxu1 %v6256_v36  ;;  %v6357_v27 = vld [vmem:[%s11938_s1 + $0xf00] sm:$0xff]  ;;  %v6355_v36 = vld [vmem:[%s11938_s1 + $0xef0] sm:$0xff] }
 0x181   : > { %v1266_v23 = vpop.f32.mrf.mxu0  ;;  %v1295_v59 = vpop.f32.mrf.mxu1  ;;  %2481 = vmatpush.msrb.mxu2 %v6283_v1  ;;  %3008 = vrot.lane.b32.xlu1 %v8703_v55, %s7103_s12 }
 0x182   : > { %v1307_v51 = vadd.f32 %v1266_v23, %v8945_v47  ;;  %v1308_v20 = vadd.f32 %v1295_v59, %v8947_v7  ;;  %v6253_v47 = vld [vmem:[%s11938_s1 + $0xcb0] sm:$0xff]  ;;  %v6254_v7 = vld [vmem:[%s11938_s1 + $0xcb8] sm:$0xff]  ;;  %2510 = vmatpush.msrb.mxu3 %v6284_v60  ;;  %v6353_v60 = vld [vmem:[%s11938_s1 + $0xee0] sm:$0xff] }
 0x183   : > { %2369 = vmatpush.msrb.mxu0 %v6253_v47  ;;  %2398 = vmatpush.msrb.mxu1 %v6254_v7  ;;  %v6325_v23 = vld [vmem:[%s11938_s1 + $0xe50] sm:$0xff]  ;;  %v6326_v59 = vld [vmem:[%s11938_s1 + $0xe58] sm:$0xff] }
 0x184   : > { %v9150_v57 = vadd.f32 %v1377_v62, %v1307_v51  ;;  %v9152_v61 = vadd.f32 %v1406_v10, %v1308_v20  ;;  %6202 = vmatmul.msk.f32.vlgmr.msra.gmra.mxu0 %vm392_vm1, %v8982_v26  ;;  %6207 = vmatmul.msk.f32.vlgmr.msra.gmra.mxu1 %vm392_vm1, %v8982_v26  ;;  %v6282_v26 = vld [vmem:[%s11938_s1 + $0xd48] sm:$0xff]  ;;  %v9215_v62 = vpop.permute.xlu2 %2339  ;;  %v2449_v16 = vpop.permute.xlu0 %2448 }
 0x185   : > { %6236 = vmatmul.msk.f32.gmra.mxu2 %vm392_vm1, %v2231_v45  ;;  %6241 = vmatmul.msk.f32.gmra.mxu3 %vm392_vm1, %v2231_v45  ;;  %v6248_v10 = vld [vmem:[%s11938_s1 + $0xc88] sm:$0xff]  ;;  %v6356_v45 = vld [vmem:[%s11938_s1 + $0xef8] sm:$0xff] }
 0x186   : > { %2482 = vmatpush.msrb.mxu2 %v6281_v40  ;;  %2511 = vmatpush.msrb.mxu3 %v6282_v26 }
 0x187   : > { %2370 = vmatpush.msrb.mxu0 %v6251_v53  ;;  %2399 = vmatpush.msrb.mxu1 %v6252_v63  ;;  %v2451_v53 = vpop.permute.xlu1 %2450  ;;  %v6354_v63 = vld [vmem:[%s11938_s1 + $0xee8] sm:$0xff] }
 0x188   : > { %v1383_v8 = vpop.f32.mrf.mxu2  ;;  %v1412_v4 = vpop.f32.mrf.mxu3  ;;  %2483 = vmatpush.msrb.mxu2 %v6279_v12  ;;  %2512 = vmatpush.msrb.mxu3 %v6280_v48 }
 0x189   : > { %v1269_v29 = vpop.f32.mrf.mxu0  ;;  %v1298_v28 = vpop.f32.mrf.mxu1  ;;  %2371 = vmatpush.msrb.mxu0 %v6249_v58  ;;  %2400 = vmatpush.msrb.mxu1 %v6250_v2  ;;  %v6349_v58 = vld [vmem:[%s11938_s1 + $0xec0] sm:$0xff]  ;;  %v6320_v2 = vld [vmem:[%s11938_s1 + $0xe28] sm:$0xff] }
 0x18a   : > { %v1309_v50 = vadd.f32 %v1269_v29, %v9000_v43  ;;  %v1310_v52 = vadd.f32 %v1298_v28, %v9002_v44  ;;  %v6278_v43 = vld [vmem:[%s11938_s1 + $0xd28] sm:$0xff]  ;;  %v6247_v44 = vld [vmem:[%s11938_s1 + $0xc80] sm:$0xff]  ;;  %2484 = vmatpush.msrb.mxu2 %v6277_v6  ;;  %v6347_v6 = vld [vmem:[%s11938_s1 + $0xeb0] sm:$0xff] }
 0x18b   : > { %2513 = vmatpush.msrb.mxu3 %v6278_v43  ;;  %2372 = vmatpush.msrb.mxu0 %v6247_v44  ;;  %v6350_v29 = vld [vmem:[%s11938_s1 + $0xec8] sm:$0xff]  ;;  %v6319_v28 = vld [vmem:[%s11938_s1 + $0xe20] sm:$0xff] }
 0x18c   : > { %v9199_v18 = vadd.f32 %v1380_v54, %v1309_v50  ;;  %v9201_v9 = vadd.f32 %v1409_v30, %v1310_v52  ;;  %6203 = vmatmul.msk.f32.gmra.mxu0 %vm392_vm1, %v8977_v14  ;;  %6208 = vmatmul.msk.f32.gmra.mxu1 %vm392_vm1, %v8977_v14  ;;  %v6275_v14 = vld [vmem:[%s11938_s1 + $0xd10] sm:$0xff]  ;;  %v6327_v54 = vld [vmem:[%s11938_s1 + $0xe60] sm:$0xf]  ;;  %v6358_v30 = vld [vmem:[%s11938_s1 + $0xf08] sm:$0xff]  ;;  %v9278_v1 = vpop.permute.xlu2 %2343 }
 0x18d   : > { %6237 = vmatmul.msk.f32.gmra.mxu2 %vm392_vm1, %v2233_v35  ;;  %6242 = vmatmul.msk.f32.gmra.mxu3 %vm392_vm1, %v2233_v35  ;;  %v6323_v35 = vld [vmem:[%s11938_s1 + $0xe40] sm:$0xff] }
 0x18e   : > { %2401 = vmatpush.msrb.mxu1 %v6248_v10  ;;  %2485 = vmatpush.msrb.mxu2 %v6275_v14 }
 0x18f   : > { %2514 = vmatpush.msrb.mxu3 %v6276_v32  ;;  %2373 = vmatpush.msrb.mxu0 %v6245_v42  ;;  %v6348_v42 = vld [vmem:[%s11938_s1 + $0xeb8] sm:$0xff] }
 0x190   : > { %v1386_v56 = vpop.f32.mrf.mxu2  ;;  %v1415_v3 = vpop.f32.mrf.mxu3  ;;  %2402 = vmatpush.msrb.mxu1 %v6246_v39  ;;  %6361 = vmatpush.msk.msra.mxu2 %vm401_vm0, %v6359_v13  ;;  %v6317_v39 = vld [vmem:[%s11938_s1 + $0xe10] sm:$0xff]  ;;  %v6346_v13 = vld [vmem:[%s11938_s1 + $0xea8] sm:$0xff] }
 0x191   : > { %v1272_v11 = vpop.f32.mrf.mxu0  ;;  %v1301_v25 = vpop.f32.mrf.mxu1  ;;  %2374 = vmatpush.msrb.mxu0 %v6243_v41 }
 0x192   : > { %v1311_v37 = vadd.f32 %v1272_v11, %v9054_v34  ;;  %v1312_v24 = vadd.f32 %v1301_v25, %v9056_v15  ;;  %v6360_v15 = vld [vmem:[%s11938_s1 + $0xf18] sm:$0xf]  ;;  %2403 = vmatpush.msrb.mxu1 %v6244_v17  ;;  %2697 = vmatpush.msra.mxu2 %v6357_v27  ;;  %v6316_v11 = vld [vmem:[%s11938_s1 + $0xe08] sm:$0xff]  ;;  %v6343_v25 = vld [vmem:[%s11938_s1 + $0xe90] sm:$0xff] }
 0x193   : > { %6366 = vmatpush.msk.msra.mxu3 %vm401_vm0, %v6360_v15  ;;  %6329 = vmatpush.msk.msra.mxu0 %vm401_vm0, %v6327_v54  ;;  %v6314_v17 = vld [vmem:[%s11938_s1 + $0xdf8] sm:$0xff]  ;;  %v6341_v15 = vld [vmem:[%s11938_s1 + $0xe80] sm:$0xff] }
 0x194   : > { %v9250_v0 = vadd.f32 %v1383_v8, %v1311_v37  ;;  %v9252_v34 = vadd.f32 %v1412_v4, %v1312_v24  ;;  %6204 = vmatmul.msk.f32.gmra.mxu0 %vm392_vm1, %v9030_v31  ;;  %6209 = vmatmul.msk.f32.gmra.mxu1 %vm392_vm1, %v9030_v31  ;;  %v6328_v31 = vld [vmem:[%s11938_s1 + $0xe68] sm:$0xf]  ;;  %v6352_v8 = vld [vmem:[%s11938_s1 + $0xed8] sm:$0xff]  ;;  %v2453_v32 = vpop.permute.xlu2 %2452  ;;  %v6313_v24 = vld [vmem:[%s11938_s1 + $0xdf0] sm:$0xff] }
 0x195   : > { %6298 = vmatmul.msk.f32.vlgmr.msrb.gmra.mxu2 %vm392_vm1, %v2449_v16  ;;  %6303 = vmatmul.msk.f32.vlgmr.msrb.gmra.mxu3 %vm392_vm1, %v2449_v16  ;;  %v6322_v4 = vld [vmem:[%s11938_s1 + $0xe38] sm:$0xff] }
 0x196   : > { %6334 = vmatpush.msk.msra.mxu1 %vm401_vm0, %v6328_v31  ;;  %2726 = vmatpush.msra.mxu3 %v6358_v30  ;;  %v6344_v37 = vld [vmem:[%s11938_s1 + $0xe98] sm:$0xff] }
 0x197   : > { %2698 = vmatpush.msra.mxu2 %v6355_v36  ;;  %2586 = vmatpush.msra.mxu0 %v6325_v23  ;;  %v2455_v36 = vpop.permute.xlu0 %2454  ;;  %v6342_v23 = vld [vmem:[%s11938_s1 + $0xe88] sm:$0xff] }
 0x198   : > { %v1599_v51 = vpop.f32.mrf.mxu2  ;;  %v1628_v20 = vpop.f32.mrf.mxu3  ;;  %2615 = vmatpush.msra.mxu1 %v6326_v59  ;;  %2727 = vmatpush.msra.mxu3 %v6356_v45  ;;  %v6311_v59 = vld [vmem:[%s11938_s1 + $0xde0] sm:$0xff]  ;;  %v6340_v45 = vld [vmem:[%s11938_s1 + $0xe78] sm:$0xff] }
 0x199   : > { %v1275_v47 = vpop.f32.mrf.mxu0  ;;  %v1304_v7 = vpop.f32.mrf.mxu1  ;;  %2699 = vmatpush.msra.mxu2 %v6353_v60  ;;  %2587 = vmatpush.msra.mxu0 %v6323_v35  ;;  %v6310_v60 = vld [vmem:[%s11938_s1 + $0xdd8] sm:$0xff]  ;;  %v6421_v35 = vld [vmem:[%s11938_s1 + $0x1060] sm:$0xff] }
 0x19a   : > { %v1313_v40 = vadd.f32 %v1275_v47, %v9104_v19  ;;  %v1314_v26 = vadd.f32 %v1304_v7, %v9106_v5  ;;  %v6324_v19 = vld [vmem:[%s11938_s1 + $0xe48] sm:$0xff]  ;;  %v6351_v5 = vld [vmem:[%s11938_s1 + $0xed0] sm:$0xff]  ;;  %2728 = vmatpush.msra.mxu3 %v6354_v63  ;;  %v6307_v7 = vld [vmem:[%s11938_s1 + $0xdc0] sm:$0xff] }
 0x19b   : > { %2616 = vmatpush.msra.mxu1 %v6324_v19  ;;  %2700 = vmatpush.msra.mxu2 %v6351_v5  ;;  %v6423_v47 = vld [vmem:[%s11938_s1 + $0x1070] sm:$0xf]  ;;  %v6308_v63 = vld [vmem:[%s11938_s1 + $0xdc8] sm:$0xff] }
 0x19c   : > { %v9303_v12 = vadd.f32 %v1386_v56, %v1313_v40  ;;  %v9305_v48 = vadd.f32 %v1415_v3, %v1314_v26  ;;  %6205 = vmatmul.msk.f32.gmra.mxu0 %vm392_vm1, %v9046_v22  ;;  %6210 = vmatmul.msk.f32.gmra.mxu1 %vm392_vm1, %v9046_v22  ;;  %v6321_v22 = vld [vmem:[%s11938_s1 + $0xe30] sm:$0xff]  ;;  %v6424_v40 = vld [vmem:[%s11938_s1 + $0x1078] sm:$0xf] }
 0x19d   : > { %6299 = vmatmul.msk.f32.gmra.mxu2 %vm392_vm1, %v2451_v53  ;;  %6304 = vmatmul.msk.f32.gmra.mxu3 %vm392_vm1, %v2451_v53 }
 0x19e   : > { %2729 = vmatpush.msra.mxu3 %v6352_v8  ;;  %2588 = vmatpush.msra.mxu0 %v6321_v22 }
 0x19f   : > { %2617 = vmatpush.msra.mxu1 %v6322_v4  ;;  %2701 = vmatpush.msra.mxu2 %v6349_v58  ;;  %v2670_v4 = vpop.permute.xlu1 %2669  ;;  %v6422_v58 = vld [vmem:[%s11938_s1 + $0x1068] sm:$0xff] }
 0x1a0   : > { %v1602_v50 = vpop.f32.mrf.mxu2  ;;  %v1631_v52 = vpop.f32.mrf.mxu3  ;;  %2730 = vmatpush.msra.mxu3 %v6350_v29  ;;  %2589 = vmatpush.msra.mxu0 %v6319_v28  ;;  %v6391_v29 = vld [vmem:[%s11938_s1 + $0xfc0] sm:$0xf] }
 0x1a1   : > { %v1488_v43 = vpop.f32.mrf.mxu0  ;;  %v1517_v44 = vpop.f32.mrf.mxu1  ;;  %2618 = vmatpush.msra.mxu1 %v6320_v2  ;;  %2702 = vmatpush.msra.mxu2 %v6347_v6  ;;  %v6390_v2 = vld [vmem:[%s11938_s1 + $0xfb8] sm:$0xff]  ;;  %v6417_v6 = vld [vmem:[%s11938_s1 + $0x1040] sm:$0xff] }
 0x1a2   : > { %v1529_v10 = vadd.f32 %v1488_v43, %v9150_v57  ;;  %v1530_v14 = vadd.f32 %v1517_v44, %v9152_v61  ;;  %v6318_v57 = vld [vmem:[%s11938_s1 + $0xe18] sm:$0xff]  ;;  %v6345_v61 = vld [vmem:[%s11938_s1 + $0xea0] sm:$0xff]  ;;  %2731 = vmatpush.msra.mxu3 %v6348_v42  ;;  %2590 = vmatpush.msra.mxu0 %v6317_v39  ;;  %v6418_v43 = vld [vmem:[%s11938_s1 + $0x1048] sm:$0xff] }
 0x1a3   : > { %2619 = vmatpush.msra.mxu1 %v6318_v57  ;;  %2703 = vmatpush.msra.mxu2 %v6345_v61  ;;  %v6387_v44 = vld [vmem:[%s11938_s1 + $0xfa0] sm:$0xff]  ;;  %v6415_v42 = vld [vmem:[%s11938_s1 + $0x1030] sm:$0xff] }
 0x1a4   : > { %v9351_v56 = vadd.f32 %v1599_v51, %v1529_v10  ;;  %v9353_v3 = vadd.f32 %v1628_v20, %v1530_v14  ;;  %6266 = vmatmul.msk.f32.vlgmr.msrb.gmra.mxu0 %vm392_vm1, %v9120_v49  ;;  %6271 = vmatmul.msk.f32.vlgmr.msrb.gmra.mxu1 %vm392_vm1, %v9120_v49  ;;  %v6315_v49 = vld [vmem:[%s11938_s1 + $0xe00] sm:$0xff] }
 0x1a5   : > { %6300 = vmatmul.msk.f32.gmra.mxu2 %vm392_vm1, %v2453_v32  ;;  %6305 = vmatmul.msk.f32.gmra.mxu3 %vm392_vm1, %v2453_v32  ;;  %v6388_v32 = vld [vmem:[%s11938_s1 + $0xfa8] sm:$0xff] }
 0x1a6   : > { %2732 = vmatpush.msra.mxu3 %v6346_v13  ;;  %2591 = vmatpush.msra.mxu0 %v6315_v49  ;;  %v2672_v49 = vpop.permute.xlu2 %2671 }
 0x1a7   : > { %2620 = vmatpush.msra.mxu1 %v6316_v11  ;;  %2704 = vmatpush.msra.mxu2 %v6343_v25  ;;  %v6416_v11 = vld [vmem:[%s11938_s1 + $0x1038] sm:$0xff]  ;;  %v6385_v25 = vld [vmem:[%s11938_s1 + $0xf90] sm:$0xff] }
 0x1a8   : > { %v1605_v16 = vpop.f32.mrf.mxu2  ;;  %v1634_v41 = vpop.f32.mrf.mxu3  ;;  %2733 = vmatpush.msra.mxu3 %v6344_v37  ;;  %2592 = vmatpush.msra.mxu0 %v6313_v24 }
 0x1a9   : > { %v1491_v27 = vpop.f32.mrf.mxu0  ;;  %v1520_v54 = vpop.f32.mrf.mxu1  ;;  %2621 = vmatpush.msra.mxu1 %v6314_v17  ;;  %2705 = vmatpush.msra.mxu2 %v6341_v15  ;;  %v6384_v17 = vld [vmem:[%s11938_s1 + $0xf88] sm:$0xff]  ;;  %v6411_v15 = vld [vmem:[%s11938_s1 + $0x1010] sm:$0xff] }
 0x1aa   : > { %v1531_v31 = vadd.f32 %v1491_v27, %v9199_v18  ;;  %v1532_v30 = vadd.f32 %v1520_v54, %v9201_v9  ;;  %v6312_v18 = vld [vmem:[%s11938_s1 + $0xde8] sm:$0xff]  ;;  %v6339_v9 = vld [vmem:[%s11938_s1 + $0xe70] sm:$0xff]  ;;  %2734 = vmatpush.msra.mxu3 %v6342_v23  ;;  %2593 = vmatpush.msra.mxu0 %v6311_v59  ;;  %v6412_v27 = vld [vmem:[%s11938_s1 + $0x1018] sm:$0xff] }
 0x1ab   : > { %2622 = vmatpush.msra.mxu1 %v6312_v18  ;;  %2706 = vmatpush.msra.mxu2 %v6339_v9  ;;  %v6381_v54 = vld [vmem:[%s11938_s1 + $0xf70] sm:$0xff]  ;;  %v6409_v23 = vld [vmem:[%s11938_s1 + $0x1000] sm:$0xff] }
 0x1ac   : > { %v9399_v51 = vadd.f32 %v1602_v50, %v1531_v31  ;;  %v9401_v20 = vadd.f32 %v1631_v52, %v1532_v30  ;;  %6267 = vmatmul.msk.f32.gmra.mxu0 %vm392_vm1, %v9215_v62  ;;  %6272 = vmatmul.msk.f32.gmra.mxu1 %vm392_vm1, %v9215_v62  ;;  %v6309_v62 = vld [vmem:[%s11938_s1 + $0xdd0] sm:$0xff]  ;;  %v6420_v52 = vld [vmem:[%s11938_s1 + $0x1058] sm:$0xff] }
 0x1ad   : > { %6301 = vmatmul.msk.f32.gmra.mxu2 %vm392_vm1, %v2455_v36  ;;  %6306 = vmatmul.msk.f32.gmra.mxu3 %vm392_vm1, %v2455_v36  ;;  %v6382_v36 = vld [vmem:[%s11938_s1 + $0xf78] sm:$0xff] }
 0x1ae   : > { %2735 = vmatpush.msra.mxu3 %v6340_v45  ;;  %2594 = vmatpush.msra.mxu0 %v6309_v62  ;;  %v6410_v45 = vld [vmem:[%s11938_s1 + $0x1008] sm:$0xff]  ;;  %v6379_v62 = vld [vmem:[%s11938_s1 + $0xf60] sm:$0xff] }
 0x1af   : > { %2623 = vmatpush.msra.mxu1 %v6310_v60  ;;  %6425 = vmatpush.msk.msrb.mxu2 %vm401_vm0, %v6423_v47  ;;  %v6380_v60 = vld [vmem:[%s11938_s1 + $0xf68] sm:$0xff]  ;;  %v6407_v47 = vld [vmem:[%s11938_s1 + $0xff0] sm:$0xff] }
 0x1b0   : > { %v1608_v26 = vpop.f32.mrf.mxu2  ;;  %v1637_v53 = vpop.f32.mrf.mxu3  ;;  %2595 = vmatpush.msra.mxu0 %v6307_v7  ;;  %6430 = vmatpush.msk.msrb.mxu3 %vm401_vm0, %v6424_v40  ;;  %v6408_v7 = vld [vmem:[%s11938_s1 + $0xff8] sm:$0xff] }
 0x1b1   : > { %v1494_v19 = vpop.f32.mrf.mxu0  ;;  %v1523_v5 = vpop.f32.mrf.mxu1  ;;  %2624 = vmatpush.msra.mxu1 %v6308_v63  ;;  %2919 = vmatpush.msrb.mxu2 %v6421_v35  ;;  %v6378_v40 = vld [vmem:[%s11938_s1 + $0xf58] sm:$0xff]  ;;  %v6406_v63 = vld [vmem:[%s11938_s1 + $0xfe8] sm:$0xff]  ;;  %v6375_v35 = vld [vmem:[%s11938_s1 + $0xf40] sm:$0xff] }
 0x1b2   : > { %v1533_v8 = vadd.f32 %v1494_v19, %v9250_v0  ;;  %v1534_v22 = vadd.f32 %v1523_v5, %v9252_v34  ;;  %v6392_v0 = vld [vmem:[%s11938_s1 + $0xfc8] sm:$0xf]  ;;  %v6419_v34 = vld [vmem:[%s11938_s1 + $0x1050] sm:$0xff]  ;;  %2948 = vmatpush.msrb.mxu3 %v6422_v58  ;;  %6393 = vmatpush.msk.msrb.mxu0 %vm401_vm0, %v6391_v29  ;;  %v6404_v29 = vld [vmem:[%s11938_s1 + $0xfd8] sm:$0xff] }
 0x1b3   : > { %6398 = vmatpush.msk.msrb.mxu1 %vm401_vm0, %v6392_v0  ;;  %2920 = vmatpush.msrb.mxu2 %v6419_v34  ;;  %v6373_v0 = vld [vmem:[%s11938_s1 + $0xf30] sm:$0xff]  ;;  %v9613_v34 = vpop.permute.xlu2 %2782 }
 0x1b4   : > { %v9449_v28 = vadd.f32 %v1605_v16, %v1533_v8  ;;  %v9451_v50 = vadd.f32 %v1634_v41, %v1534_v22  ;;  %6268 = vmatmul.msk.f32.gmra.mxu0 %vm392_vm1, %v9226_v46  ;;  %6273 = vmatmul.msk.f32.gmra.mxu1 %vm392_vm1, %v9226_v46  ;;  %v6389_v46 = vld [vmem:[%s11938_s1 + $0xfb0] sm:$0xff]  ;;  %v9519_v16 = vpop.permute.xlu0 %2780  ;;  %v6414_v41 = vld [vmem:[%s11938_s1 + $0x1028] sm:$0xff] }
 0x1b5   : > { %6362 = vmatmul.msk.f32.vlgmr.msra.gmra.mxu2 %vm392_vm1, %v2670_v4  ;;  %6367 = vmatmul.msk.f32.vlgmr.msra.gmra.mxu3 %vm392_vm1, %v2670_v4  ;;  %v6376_v8 = vld [vmem:[%s11938_s1 + $0xf48] sm:$0xff]  ;;  %v6403_v22 = vld [vmem:[%s11938_s1 + $0xfd0] sm:$0xff] }
 0x1b6   : > { %2949 = vmatpush.msrb.mxu3 %v6420_v52  ;;  %2808 = vmatpush.msrb.mxu0 %v6389_v46  ;;  %v6374_v52 = vld [vmem:[%s11938_s1 + $0xf38] sm:$0xff]  ;;  %v6371_v46 = vld [vmem:[%s11938_s1 + $0xf20] sm:$0xff] }
 0x1b7   : > { %2837 = vmatpush.msrb.mxu1 %v6390_v2  ;;  %2921 = vmatpush.msrb.mxu2 %v6417_v6  ;;  %v6455_v2 = vld [vmem:[%s11938_s1 + $0x1120] sm:$0xf] }
 0x1b8   : > { %v9485_v10 = vpop.f32.mrf.mxu2  ;;  %v9487_v14 = vpop.f32.mrf.mxu3  ;;  %2950 = vmatpush.msrb.mxu3 %v6418_v43  ;;  %2809 = vmatpush.msrb.mxu0 %v6387_v44  ;;  %v6456_v43 = vld [vmem:[%s11938_s1 + $0x1128] sm:$0xf] }
 0x1b9   : > { %v1497_v39 = vpop.f32.mrf.mxu0  ;;  %v1526_v57 = vpop.f32.mrf.mxu1  ;;  %2838 = vmatpush.msrb.mxu1 %v6388_v32  ;;  %2922 = vmatpush.msrb.mxu2 %v6415_v42  ;;  %v6453_v42 = vld [vmem:[%s11938_s1 + $0x1110] sm:$0xff] }
 0x1ba   : > { %v1535_v61 = vadd.f32 %v1497_v39, %v9303_v12  ;;  %v1536_v13 = vadd.f32 %v1526_v57, %v9305_v48  ;;  %v6386_v12 = vld [vmem:[%s11938_s1 + $0xf98] sm:$0xff]  ;;  %v6413_v48 = vld [vmem:[%s11938_s1 + $0x1020] sm:$0xff]  ;;  %2951 = vmatpush.msrb.mxu3 %v6416_v11  ;;  %2810 = vmatpush.msrb.mxu0 %v6385_v25  ;;  %v2674_v9 = vpop.permute.xlu1 %2673  ;;  %v6452_v25 = vld [vmem:[%s11938_s1 + $0x1108] sm:$0xff] }
 0x1bb   : > { %2839 = vmatpush.msrb.mxu1 %v6386_v12  ;;  %2923 = vmatpush.msrb.mxu2 %v6413_v48  ;;  %v9657_v11 = vpop.permute.xlu2 %2786  ;;  %v6449_v12 = vld [vmem:[%s11938_s1 + $0x10f0] sm:$0xff]  ;;  %v6447_v48 = vld [vmem:[%s11938_s1 + $0x10e0] sm:$0xff] }
 0x1bc   : > { %v9503_v37 = vadd.f32 %v1608_v26, %v1535_v61  ;;  %v9505_v24 = vadd.f32 %v1637_v53, %v1536_v13  ;;  %6269 = vmatmul.msk.f32.gmra.mxu0 %vm392_vm1, %v9278_v1  ;;  %6274 = vmatmul.msk.f32.gmra.mxu1 %vm392_vm1, %v9278_v1  ;;  %v6383_v1 = vld [vmem:[%s11938_s1 + $0xf80] sm:$0xff]  ;;  %v2676_v53 = vpop.permute.xlu0 %2675  ;;  %v6454_v13 = vld [vmem:[%s11938_s1 + $0x1118] sm:$0xff] }
 0x1bd   : > { %6363 = vmatmul.msk.f32.gmra.mxu2 %vm392_vm1, %v2672_v49  ;;  %6368 = vmatmul.msk.f32.gmra.mxu3 %vm392_vm1, %v2672_v49  ;;  %v6405_v26 = vld [vmem:[%s11938_s1 + $0xfe0] sm:$0xff] }
 0x1be   : > { %2952 = vmatpush.msrb.mxu3 %v6414_v41  ;;  %2811 = vmatpush.msrb.mxu0 %v6383_v1  ;;  %v6451_v49 = vld [vmem:[%s11938_s1 + $0x1100] sm:$0xff] }
 0x1bf   : > { %2840 = vmatpush.msrb.mxu1 %v6384_v17  ;;  %2924 = vmatpush.msrb.mxu2 %v6411_v15 }
 0x1c0   : > { %v9539_v31 = vpop.f32.mrf.mxu2  ;;  %v9541_v30 = vpop.f32.mrf.mxu3  ;;  %2953 = vmatpush.msrb.mxu3 %v6412_v27  ;;  %2812 = vmatpush.msrb.mxu0 %v6381_v54  ;;  %v6448_v54 = vld [vmem:[%s11938_s1 + $0x10e8] sm:$0xff] }
 0x1c1   : > { %v9549_v59 = vpop.f32.mrf.mxu0  ;;  %v9551_v18 = vpop.f32.mrf.mxu1  ;;  %2841 = vmatpush.msrb.mxu1 %v6382_v36  ;;  %2925 = vmatpush.msrb.mxu2 %v6409_v23  ;;  %v6445_v36 = vld [vmem:[%s11938_s1 + $0x10d0] sm:$0xff]  ;;  %v6446_v23 = vld [vmem:[%s11938_s1 + $0x10d8] sm:$0xff] }
 0x1c2   : > { %2954 = vmatpush.msrb.mxu3 %v6410_v45  ;;  %2813 = vmatpush.msrb.mxu0 %v6379_v62  ;;  %v6444_v62 = vld [vmem:[%s11938_s1 + $0x10c8] sm:$0xff] }
 0x1c3   : > { %2842 = vmatpush.msrb.mxu1 %v6380_v60  ;;  %2926 = vmatpush.msrb.mxu2 %v6407_v47  ;;  %v9629_v6 = vpop.permute.xlu1 %2784 }
 0x1c4   : > { %6330 = vmatmul.msk.f32.vlgmr.msra.gmra.mxu0 %vm392_vm1, %v8567_v33  ;;  %6335 = vmatmul.msk.f32.vlgmr.msra.gmra.mxu1 %vm392_vm1, %v8567_v33  ;;  %v6377_v33 = vld [vmem:[%s11938_s1 + $0xf50] sm:$0xff]  ;;  %v2892_v61 = vpop.permute.xlu0 %2891  ;;  %v3003_v45 = vpop.permute.xlu2 %3002 }
 0x1c5   : > { %6364 = vmatmul.msk.f32.gmra.mxu2 %vm392_vm1, %v2674_v9  ;;  %6369 = vmatmul.msk.f32.gmra.mxu3 %vm392_vm1, %v2674_v9  ;;  %v6443_v9 = vld [vmem:[%s11938_s1 + $0x10c0] sm:$0xff] }
 0x1c6   : > { %2955 = vmatpush.msrb.mxu3 %v6408_v7  ;;  %2814 = vmatpush.msrb.mxu0 %v6377_v33 }
 0x1c7   : > { %2843 = vmatpush.msrb.mxu1 %v6378_v40  ;;  %2927 = vmatpush.msrb.mxu2 %v6405_v26  ;;  %v6442_v26 = vld [vmem:[%s11938_s1 + $0x10b8] sm:$0xff] }
 0x1c8   : > { %v9589_v19 = vpop.f32.mrf.mxu2  ;;  %v9591_v5 = vpop.f32.mrf.mxu3  ;;  %2956 = vmatpush.msrb.mxu3 %v6406_v63  ;;  %2815 = vmatpush.msrb.mxu0 %v6375_v35  ;;  %v6440_v63 = vld [vmem:[%s11938_s1 + $0x10a8] sm:$0xff]  ;;  %v6437_v35 = vld [vmem:[%s11938_s1 + $0x1090] sm:$0xff] }
 0x1c9   : > { %v9599_v4 = vpop.f32.mrf.mxu0  ;;  %v9601_v58 = vpop.f32.mrf.mxu1  ;;  %2844 = vmatpush.msrb.mxu1 %v6376_v8  ;;  %2928 = vmatpush.msrb.mxu2 %v6403_v22  ;;  %v6438_v8 = vld [vmem:[%s11938_s1 + $0x1098] sm:$0xff] }
 0x1ca   : > { %2957 = vmatpush.msrb.mxu3 %v6404_v29  ;;  %2816 = vmatpush.msrb.mxu0 %v6373_v0 }
 0x1cb   : > { %2845 = vmatpush.msrb.mxu1 %v6374_v52 }
 0x1cc   : > { %6331 = vmatmul.msk.f32.gmra.mxu0 %vm392_vm1, %v8820_v38  ;;  %6336 = vmatmul.msk.f32.gmra.mxu1 %vm392_vm1, %v8820_v38  ;;  %v6372_v38 = vld [vmem:[%s11938_s1 + $0xf28] sm:$0xff]  ;;  %v2896_v40 = vpop.permute.xlu0 %2895 }
 0x1cd   : > { %6365 = vmatmul.msk.f32.gmra.mxu2 %vm392_vm1, %v2676_v53  ;;  %6370 = vmatmul.msk.f32.gmra.mxu3 %vm392_vm1, %v2676_v53  ;;  %v2894_v27 = vpop.permute.xlu1 %2893  ;;  %v6439_v53 = vld [vmem:[%s11938_s1 + $0x10a0] sm:$0xff] }
 0x1ce   : > { %2817 = vmatpush.msrb.mxu0 %v6371_v46  ;;  %2846 = vmatpush.msrb.mxu1 %v6372_v38  ;;  %v6436_v38 = vld [vmem:[%s11938_s1 + $0x1088] sm:$0xff] }
 0x1d0   : > { %v9634_v44 = vpop.f32.mrf.mxu2  ;;  %v9636_v32 = vpop.f32.mrf.mxu3  ;;  %6457 = vmatpush.msk.msra.mxu0 %vm401_vm0, %v6455_v2  ;;  %6462 = vmatpush.msk.msra.mxu1 %vm401_vm0, %v6456_v43 }
 0x1d1   : > { %v9641_v39 = vpop.f32.mrf.mxu0  ;;  %v9643_v57 = vpop.f32.mrf.mxu1 }
 0x1d2   : > { %3030 = vmatpush.msra.mxu0 %v6453_v42  ;;  %3059 = vmatpush.msra.mxu1 %v6454_v13 }
 0x1d4   : > { %6332 = vmatmul.msk.f32.gmra.mxu0 %vm392_vm1, %v8741_v21  ;;  %6337 = vmatmul.msk.f32.gmra.mxu1 %vm392_vm1, %v8741_v21  ;;  %v6450_v21 = vld [vmem:[%s11938_s1 + $0x10f8] sm:$0xff]  ;;  %v2898_v22 = vpop.permute.xlu2 %2897 }
 0x1d5   : > { %6426 = vmatmul.msk.f32.vlgmr.msrb.gmra.mxu2 %vm392_vm1, %v2892_v61  ;;  %6431 = vmatmul.msk.f32.vlgmr.msrb.gmra.mxu3 %vm392_vm1, %v2892_v61 }
 0x1d6   : > { %3031 = vmatpush.msra.mxu0 %v6451_v49  ;;  %3060 = vmatpush.msra.mxu1 %v6452_v25 }
 0x1d8   : > { %v9673_v41 = vpop.f32.mrf.mxu2  ;;  %v9675_v1 = vpop.f32.mrf.mxu3  ;;  %3032 = vmatpush.msra.mxu0 %v6449_v12  ;;  %3061 = vmatpush.msra.mxu1 %v6450_v21 }
 0x1d9   : > { %v9677_v17 = vpop.f32.mrf.mxu0  ;;  %v9679_v15 = vpop.f32.mrf.mxu1 }
 0x1da   : > { %3033 = vmatpush.msra.mxu0 %v6447_v48  ;;  %3062 = vmatpush.msra.mxu1 %v6448_v54 }
 0x1dc   : > { %6333 = vmatmul.msk.f32.gmra.mxu0 %vm392_vm1, %v8703_v55  ;;  %6338 = vmatmul.msk.f32.gmra.mxu1 %vm392_vm1, %v8703_v55  ;;  %v6441_v55 = vld [vmem:[%s11938_s1 + $0x10b0] sm:$0xff] }
 0x1dd   : > { %6427 = vmatmul.msk.f32.gmra.mxu2 %vm392_vm1, %v2894_v27  ;;  %6432 = vmatmul.msk.f32.gmra.mxu3 %vm392_vm1, %v2894_v27 }
 0x1de   : > { %3034 = vmatpush.msra.mxu0 %v6445_v36  ;;  %3063 = vmatpush.msra.mxu1 %v6446_v23  ;;  %v3007_v36 = vpop.permute.xlu0 %3006 }
 0x1e0   : > { %v9705_v60 = vpop.f32.mrf.mxu2  ;;  %v9707_v47 = vpop.f32.mrf.mxu3  ;;  %3035 = vmatpush.msra.mxu0 %v6443_v9  ;;  %3064 = vmatpush.msra.mxu1 %v6444_v62 }
 0x1e1   : > { %v9709_v7 = vpop.f32.mrf.mxu0  ;;  %v9711_v33 = vpop.f32.mrf.mxu1 }
 0x1e2   : > { %3036 = vmatpush.msra.mxu0 %v6441_v55  ;;  %3065 = vmatpush.msra.mxu1 %v6442_v26 }
 0x1e4   : > { %6394 = vmatmul.msk.f32.vlgmr.msrb.gmra.mxu0 %vm392_vm1, %v9519_v16  ;;  %6399 = vmatmul.msk.f32.vlgmr.msrb.gmra.mxu1 %vm392_vm1, %v9519_v16  ;;  %v6435_v16 = vld [vmem:[%s11938_s1 + $0x1080] sm:$0xff]  ;;  %v3005_v21 = vpop.permute.xlu1 %3004 }
 0x1e5   : > { %6428 = vmatmul.msk.f32.gmra.mxu2 %vm392_vm1, %v2896_v40  ;;  %6433 = vmatmul.msk.f32.gmra.mxu3 %vm392_vm1, %v2896_v40 }
 0x1e6   : > { %3037 = vmatpush.msra.mxu0 %v6439_v53  ;;  %3066 = vmatpush.msra.mxu1 %v6440_v63 }
 0x1e8   : > { %3038 = vmatpush.msra.mxu0 %v6437_v35  ;;  %v9741_v52 = vpop.f32.mrf.mxu2  ;;  %v9743_v46 = vpop.f32.mrf.mxu3  ;;  %3067 = vmatpush.msra.mxu1 %v6438_v8 }
 0x1e9   : > { %v9737_v29 = vpop.f32.mrf.mxu0  ;;  %v9739_v0 = vpop.f32.mrf.mxu1 }
 0x1ea   : > { %3039 = vmatpush.msra.mxu0 %v6435_v16  ;;  %3068 = vmatpush.msra.mxu1 %v6436_v38 }
 0x1ec   : > { %6395 = vmatmul.msk.f32.gmra.mxu0 %vm392_vm1, %v9613_v34  ;;  %6400 = vmatmul.msk.f32.gmra.mxu1 %vm392_vm1, %v9613_v34 }
 0x1ed   : > { %6429 = vmatmul.msk.f32.gmra.mxu2 %vm392_vm1, %v2898_v22  ;;  %6434 = vmatmul.msk.f32.gmra.mxu3 %vm392_vm1, %v2898_v22 }
 0x1f0   : > { %v9762_v42 = vpop.f32.mrf.mxu2  ;;  %v9764_v61 = vpop.f32.mrf.mxu3 }
 0x1f1   : > { %v9754_v2 = vpop.f32.mrf.mxu0  ;;  %v9756_v43 = vpop.f32.mrf.mxu1 }
 0x1f3   : > { %v3009_v55 = vpop.permute.xlu1 %3008 }
 0x1f4   : > { %6396 = vmatmul.msk.f32.gmra.mxu0 %vm392_vm1, %v9629_v6  ;;  %6401 = vmatmul.msk.f32.gmra.mxu1 %vm392_vm1, %v9629_v6 }
 0x1f8   : > { %v9774_v49 = vpop.f32.mrf.mxu2  ;;  %v9776_v25 = vpop.f32.mrf.mxu3 }
 0x1f9   : > { %v9766_v34 = vpop.f32.mrf.mxu0  ;;  %v9768_v13 = vpop.f32.mrf.mxu1  ;;  %11947 = vst [vmem:[#allocation2_spill] sm:$0xff] %v9774_v49 }
 0x1fa   : > { %11948 = vst [vmem:[#allocation3_spill] sm:$0xff] %v9776_v25 }
 0x1fc   : > { %6397 = vmatmul.msk.f32.gmra.mxu0 %vm392_vm1, %v9657_v11  ;;  %6402 = vmatmul.msk.f32.gmra.mxu1 %vm392_vm1, %v9657_v11 }
 0x200   : > { %v9784_v48 = vpop.f32.mrf.mxu2  ;;  %v9786_v27 = vpop.f32.mrf.mxu3 }
 0x201   : > { %v9778_v12 = vpop.f32.mrf.mxu0  ;;  %v9780_v6 = vpop.f32.mrf.mxu1 }
 0x204   : > { %6458 = vmatmul.msk.f32.vlgmr.msra.gmra.mxu0 %vm392_vm1, %v3003_v45  ;;  %6463 = vmatmul.msk.f32.vlgmr.msra.gmra.mxu1 %vm392_vm1, %v3003_v45 }
 0x208   : > { %v9798_v62 = vpop.f32.mrf.mxu2  ;;  %v9800_v45 = vpop.f32.mrf.mxu3 }
 0x209   : > { %v9788_v54 = vpop.f32.mrf.mxu0  ;;  %v9790_v11 = vpop.f32.mrf.mxu1 }
 0x20c   : > { %6459 = vmatmul.msk.f32.gmra.mxu0 %vm392_vm1, %v3005_v21  ;;  %6464 = vmatmul.msk.f32.gmra.mxu1 %vm392_vm1, %v3005_v21 }
 0x210   : > { %v9808_v53 = vpop.f32.mrf.mxu2  ;;  %v9810_v63 = vpop.f32.mrf.mxu3 }
 0x211   : > { %v9794_v23 = vpop.f32.mrf.mxu0  ;;  %v9796_v9 = vpop.f32.mrf.mxu1  ;;  %11949 = vst [vmem:[#allocation4_spill] sm:$0xff] %v9810_v63 }
 0x214   : > { %6460 = vmatmul.msk.f32.gmra.mxu0 %vm392_vm1, %v3007_v36  ;;  %6465 = vmatmul.msk.f32.gmra.mxu1 %vm392_vm1, %v3007_v36 }
 0x218   : > { %v9818_v16 = vpop.f32.mrf.mxu2  ;;  %v9820_v22 = vpop.f32.mrf.mxu3 }
 0x219   : > { %v9804_v40 = vpop.f32.mrf.mxu0  ;;  %v9806_v26 = vpop.f32.mrf.mxu1  ;;  %11952 = vst [vmem:[#allocation7_spill] sm:$0xff] %v9818_v16 }
 0x21a   : > { %11953 = vst [vmem:[#allocation8_spill] sm:$0xff] %v9820_v22 }
 0x21c   : > { %6461 = vmatmul.msk.f32.gmra.mxu0 %vm392_vm1, %v3009_v55  ;;  %6466 = vmatmul.msk.f32.gmra.mxu1 %vm392_vm1, %v3009_v55 }
 0x220   : > { %v9826_v36 = vpop.f32.mrf.mxu2  ;;  %v9828_v25 = vpop.f32.mrf.mxu3 }
 0x221   : > { %v9814_v35 = vpop.f32.mrf.mxu0  ;;  %v9816_v8 = vpop.f32.mrf.mxu1  ;;  %11956 = vst [vmem:[#allocation11_spill] sm:$0xff] %v9826_v36 }
 0x222   : > { %11950 = vst [vmem:[#allocation5_spill] sm:$0xff] %v9814_v35 }
 0x223   : > { %11951 = vst [vmem:[#allocation6_spill] sm:$0xff] %v9816_v8 }
 0x224   : > { %11957 = vst [vmem:[#allocation12_spill] sm:$0xff] %v9828_v25 }
 0x228   : > { %v9838_v8 = vpop.f32.mrf.mxu2  ;;  %v9840_v16 = vpop.f32.mrf.mxu3 }
 0x229   : > { %v9822_v38 = vpop.f32.mrf.mxu0  ;;  %v9824_v21 = vpop.f32.mrf.mxu1  ;;  %11962 = vst [vmem:[#allocation17_spill] sm:$0xff] %v9838_v8 }
 0x22a   : > { %11954 = vst [vmem:[#allocation9_spill] sm:$0xff] %v9822_v38 }
 0x22b   : > { %11955 = vst [vmem:[#allocation10_spill] sm:$0xff] %v9824_v21 }
 0x22c   : > { %11963 = vst [vmem:[#allocation18_spill] sm:$0xff] %v9840_v16 }
 0x230   : > { %v9846_v21 = vpop.f32.mrf.mxu2  ;;  %v9848_v36 = vpop.f32.mrf.mxu3 }
 0x231   : > { %v9830_v49 = vpop.f32.mrf.mxu0  ;;  %v9832_v63 = vpop.f32.mrf.mxu1  ;;  %11966 = vst [vmem:[#allocation21_spill] sm:$0xff] %v9846_v21 }
 0x232   : > { %11958 = vst [vmem:[#allocation13_spill] sm:$0xff] %v9830_v49 }
 0x233   : > { %11959 = vst [vmem:[#allocation14_spill] sm:$0xff] %v9832_v63 }
 0x234   : > { %11967 = vst [vmem:[#allocation22_spill] sm:$0xff] %v9848_v36 }
 0x238   : > { %v9854_v63 = vpop.f32.mrf.mxu2 }
 0x239   : > { %v9834_v55 = vpop.f32.mrf.mxu0  ;;  %v9836_v35 = vpop.f32.mrf.mxu1  ;;  %11970 = vst [vmem:[#allocation25_spill] sm:$0xff] %v9854_v63 }
 0x23a   : > { %11960 = vst [vmem:[#allocation15_spill] sm:$0xff] %v9834_v55  ;;  %v9856_v55 = vpop.f32.mrf.mxu3 }
 0x23b   : > { %11961 = vst [vmem:[#allocation16_spill] sm:$0xff] %v9836_v35 }
 0x23c   : > { %11971 = vst [vmem:[#allocation26_spill] sm:$0xff] %v9856_v55 }
 0x240   : > { %v9862_v16 = vpop.f32.mrf.mxu2 }
 0x241   : > { %v9842_v22 = vpop.f32.mrf.mxu0  ;;  %v9844_v38 = vpop.f32.mrf.mxu1  ;;  %11974 = vst [vmem:[#allocation29_spill] sm:$0xff] %v9862_v16 }
 0x242   : > { %11964 = vst [vmem:[#allocation19_spill] sm:$0xff] %v9842_v22  ;;  %v9864_v22 = vpop.f32.mrf.mxu3 }
 0x243   : > { %11965 = vst [vmem:[#allocation20_spill] sm:$0xff] %v9844_v38 }
 0x244   : > { %11975 = vst [vmem:[#allocation30_spill] sm:$0xff] %v9864_v22 }
 0x249   : > { %v9850_v25 = vpop.f32.mrf.mxu0  ;;  %v9852_v49 = vpop.f32.mrf.mxu1 }
 0x24a   : > { %11968 = vst [vmem:[#allocation23_spill] sm:$0xff] %v9850_v25  ;;  %v9876_v63 = vpop.f32.mrf.mxu3 }
 0x24b   : > { %11969 = vst [vmem:[#allocation24_spill] sm:$0xff] %v9852_v49  ;;  %v9874_v49 = vpop.f32.mrf.mxu2 }
 0x24c   : > { %11979 = vst [vmem:[#allocation34_spill] sm:$0xff] %v9876_v63  ;;  %v1753_v63 = vadd.f32 %v9599_v4, %v9399_v51 }
 0x24e   : > { %v1864_v4 = vadd.f32 %v9539_v31, %v1753_v63  ;;  %v11985_v63 = vld [vmem:[#allocation4_spill] sm:$0xff] }
 0x250   : > { %v1975_v31 = vadd.f32 %v9737_v29, %v1864_v4  ;;  %v11993_v4 = vld [vmem:[#allocation16_spill] sm:$0xff] }
 0x251   : > { %v9858_v35 = vpop.f32.mrf.mxu0  ;;  %v9860_v8 = vpop.f32.mrf.mxu1 }
 0x252   : > { %11972 = vst [vmem:[#allocation27_spill] sm:$0xff] %v9858_v35  ;;  %v9884_v16 = vpop.f32.mrf.mxu3 }
 0x253   : > { %11973 = vst [vmem:[#allocation28_spill] sm:$0xff] %v9860_v8  ;;  %v9882_v8 = vpop.f32.mrf.mxu2 }
 0x254   : > { %11982 = vst [vmem:[#allocation37_spill] sm:$0xff] %v9884_v16 }
 0x259   : > { %v9866_v38 = vpop.f32.mrf.mxu0  ;;  %v9868_v21 = vpop.f32.mrf.mxu1 }
 0x25a   : > { %11976 = vst [vmem:[#allocation31_spill] sm:$0xff] %v9866_v38 }
 0x25b   : > { %v9902_v16 = vpop.f32.mrf.mxu2 }
 0x261   : > { %v9870_v36 = vpop.f32.mrf.mxu0  ;;  %v9872_v25 = vpop.f32.mrf.mxu1 }
 0x262   : > { %11977 = vst [vmem:[#allocation32_spill] sm:$0xff] %v9870_v36  ;;  %v1755_v36 = vadd.f32 %v9641_v39, %v9449_v28  ;;  %v1751_v28 = vadd.f32 %v9549_v59, %v9351_v56 }
 0x263   : > { %11978 = vst [vmem:[#allocation33_spill] sm:$0xff] %v9872_v25  ;;  %v1756_v25 = vadd.f32 %v9643_v57, %v9451_v50  ;;  %v1752_v50 = vadd.f32 %v9551_v18, %v9353_v3 }
 0x264   : > { %v1866_v51 = vadd.f32 %v9589_v19, %v1755_v36  ;;  %v1862_v59 = vadd.f32 %v9485_v10, %v1751_v28  ;;  %v2086_v10 = vadd.f32 %v9705_v60, %v1975_v31  ;;  %v11987_v36 = vld [vmem:[#allocation14_spill] sm:$0xff]  ;;  %v11989_v28 = vld [vmem:[#allocation3_spill] sm:$0xff] }
 0x265   : > { %v1863_v18 = vadd.f32 %v9487_v14, %v1752_v50  ;;  %v11990_v50 = vld [vmem:[#allocation9_spill] sm:$0xff]  ;;  %v11997_v31 = vld [vmem:[#allocation18_spill] sm:$0xff] }
 0x266   : > { %v1977_v56 = vadd.f32 %v9754_v2, %v1866_v51  ;;  %v2197_v60 = vadd.f32 %v9788_v54, %v2086_v10  ;;  %v11991_v51 = vld [vmem:[#allocation10_spill] sm:$0xff]  ;;  %v12000_v10 = vld [vmem:[#allocation21_spill] sm:$0xff] }
 0x268   : > { %v2308_v54 = vadd.f32 %v9784_v48, %v2197_v60  ;;  %v12004_v60 = vld [vmem:[#allocation7_spill] sm:$0xff] }
 0x269   : > { %v9878_v55 = vpop.f32.mrf.mxu0  ;;  %v9880_v35 = vpop.f32.mrf.mxu1 }
 0x26a   : > { %11980 = vst [vmem:[#allocation35_spill] sm:$0xff] %v9878_v55  ;;  %v1757_v55 = vadd.f32 %v9677_v17, %v9503_v37  ;;  %v2088_v17 = vadd.f32 %v9741_v52, %v1977_v56 }
 0x26b   : > { %11981 = vst [vmem:[#allocation36_spill] sm:$0xff] %v9880_v35  ;;  %v1754_v35 = vadd.f32 %v9601_v58, %v9401_v20  ;;  %v1867_v20 = vadd.f32 %v9591_v5, %v1756_v25 }
 0x26c   : > { %v1868_v39 = vadd.f32 %v9634_v44, %v1757_v55  ;;  %v1973_v44 = vadd.f32 %v9709_v7, %v1862_v59  ;;  %v2199_v2 = vadd.f32 %v9794_v23, %v2088_v17  ;;  %v11988_v55 = vld [vmem:[#allocation2_spill] sm:$0xff]  ;;  %v11996_v59 = vld [vmem:[#allocation17_spill] sm:$0xff] }
 0x26d   : > { %v1865_v37 = vadd.f32 %v9541_v30, %v1754_v35  ;;  %v1978_v3 = vadd.f32 %v9756_v43, %v1867_v20  ;;  %v11992_v20 = vld [vmem:[#allocation15_spill] sm:$0xff] }
 0x26e   : > { %v1979_v19 = vadd.f32 %v9766_v34, %v1868_v39  ;;  %v9938_v34 = vpop.f32.mrf.mxu2  ;;  %v11995_v39 = vld [vmem:[#allocation6_spill] sm:$0xff] }
 0x26f   : > { %v1976_v30 = vadd.f32 %v9739_v0, %v1865_v37  ;;  %v11994_v37 = vld [vmem:[#allocation5_spill] sm:$0xff] }
 0x270   : > { %v2090_v29 = vadd.f32 %v9762_v42, %v1979_v19  ;;  %v11998_v19 = vld [vmem:[#allocation11_spill] sm:$0xff] }
 0x271   : > { %v9886_v22 = vpop.f32.mrf.mxu0  ;;  %v9888_v38 = vpop.f32.mrf.mxu1  ;;  %v2087_v14 = vadd.f32 %v9707_v47, %v1976_v30 }
 0x272   : > { %11983 = vst [vmem:[#allocation38_spill] sm:$0xff] %v9886_v22  ;;  %v1758_v22 = vadd.f32 %v9679_v15, %v9505_v24  ;;  %v2089_v15 = vadd.f32 %v9743_v46, %v1978_v3 }
 0x273   : > { %11984 = vst [vmem:[#allocation39_spill] sm:$0xff] %v9888_v38  ;;  %v9904_v38 = vpop.f32.mrf.mxu3  ;;  %v2198_v47 = vadd.f32 %v9790_v11, %v2087_v14 }
 0x274   : > { %v1869_v57 = vadd.f32 %v9636_v32, %v1758_v22  ;;  %v1974_v32 = vadd.f32 %v9711_v33, %v1863_v18  ;;  %v2200_v43 = vadd.f32 %v9796_v9, %v2089_v15  ;;  %v2084_v33 = vadd.f32 %v9673_v41, %v1973_v44  ;;  %v11986_v22 = vld [vmem:[#allocation13_spill] sm:$0xff]  ;;  %v11999_v44 = vld [vmem:[#allocation12_spill] sm:$0xff] }
 0x275   : > { %v2310_v41 = vadd.f32 %v9798_v62, %v2199_v2  ;;  %v2309_v11 = vadd.f32 %v9786_v27, %v2198_v47  ;;  %v2419_v62 = vadd.f32 %v11990_v50, %v2308_v54  ;;  %v12002_v2 = vld [vmem:[#allocation27_spill] sm:$0xff] }
 0x276   : > { %v1980_v5 = vadd.f32 %v9768_v13, %v1869_v57  ;;  %v2085_v52 = vadd.f32 %v9675_v1, %v1974_v32  ;;  %v2195_v25 = vadd.f32 %v9778_v12, %v2084_v33  ;;  %v2311_v1 = vadd.f32 %v9800_v45, %v2200_v43  ;;  %v2936_v17 = vpop.f32.mrf.mxu2  ;;  %v12003_v33 = vld [vmem:[#allocation28_spill] sm:$0xff]  ;;  %v12008_v54 = vld [vmem:[#allocation31_spill] sm:$0xff] }
 0x277   : > { %v2420_v45 = vadd.f32 %v11991_v51, %v2309_v11 }
 0x278   : > { %v2091_v0 = vadd.f32 %v9764_v61, %v1980_v5  ;;  %v2201_v61 = vadd.f32 %v9804_v40, %v2090_v29  ;;  %v2196_v23 = vadd.f32 %v9780_v6, %v2085_v52  ;;  %v2421_v40 = vadd.f32 %v11986_v22, %v2310_v41  ;;  %v12001_v29 = vld [vmem:[#allocation22_spill] sm:$0xff]  ;;  %v12007_v41 = vld [vmem:[#allocation24_spill] sm:$0xff] }
 0x279   : > { %v9914_v58 = vpop.f32.mrf.mxu0  ;;  %v9916_v24 = vpop.f32.mrf.mxu1  ;;  %v2306_v12 = vadd.f32 %v11988_v55, %v2195_v25  ;;  %v2530_v5 = vadd.f32 %v11998_v19, %v2419_v62  ;;  %v2531_v32 = vadd.f32 %v11999_v44, %v2420_v45  ;;  %v12006_v25 = vld [vmem:[#allocation23_spill] sm:$0xff]  ;;  %v12010_v22 = vld [vmem:[#allocation20_spill] sm:$0xff] }
 0x27a   : > { %v2202_v13 = vadd.f32 %v9806_v26, %v2091_v0  ;;  %v2312_v9 = vadd.f32 %v9808_v53, %v2201_v61  ;;  %v2422_v26 = vadd.f32 %v11987_v36, %v2311_v1  ;;  %v2307_v6 = vadd.f32 %v11989_v28, %v2196_v23  ;;  %v12005_v61 = vld [vmem:[#allocation8_spill] sm:$0xff] }
 0x27b   : > { %v9940_v7 = vpop.f32.mrf.mxu3  ;;  %v2417_v53 = vadd.f32 %v11994_v37, %v2306_v12  ;;  %v2532_v18 = vadd.f32 %v11996_v59, %v2421_v40  ;;  %v2640_v23 = vadd.f32 %v12006_v25, %v2530_v5  ;;  %v2641_v1 = vadd.f32 %v12007_v41, %v2531_v32  ;;  %v12012_v12 = vld [vmem:[#allocation29_spill] sm:$0xff]  ;;  %v12019_v59 = vld [vmem:[#allocation35_spill] sm:$0xff]  ;;  %v12021_v44 = vld [vmem:[#allocation32_spill] sm:$0xff] }
 0x27c   : > { %v2313_v35 = vadd.f32 %v11985_v63, %v2202_v13  ;;  %v2423_v48 = vadd.f32 %v11992_v20, %v2312_v9  ;;  %v2418_v57 = vadd.f32 %v11995_v39, %v2307_v6  ;;  %v2533_v30 = vadd.f32 %v11997_v31, %v2422_v26  ;;  %v12009_v63 = vld [vmem:[#allocation19_spill] sm:$0xff]  ;;  %v12011_v26 = vld [vmem:[#allocation34_spill] sm:$0xff]  ;;  %v12014_v20 = vld [vmem:[#allocation37_spill] sm:$0xff] }
 0x27d   : > { %v2642_v43 = vadd.f32 %v12002_v2, %v2532_v18  ;;  %v2528_v47 = vadd.f32 %v12004_v60, %v2417_v53  ;;  %v2751_v28 = vadd.f32 %v12012_v12, %v2640_v23  ;;  %v12013_v6 = vld [vmem:[#allocation30_spill] sm:$0xff]  ;;  %v12017_v53 = vld [vmem:[#allocation25_spill] sm:$0xff]  ;;  %v12020_v31 = vld [vmem:[#allocation36_spill] sm:$0xff] }
 0x27e   : > { %v2424_v27 = vadd.f32 %v11993_v4, %v2313_v35  ;;  %v2534_v14 = vadd.f32 %v12000_v10, %v2423_v48  ;;  %v2643_v52 = vadd.f32 %v12003_v33, %v2533_v30  ;;  %v2529_v13 = vadd.f32 %v12005_v61, %v2418_v57  ;;  %v12015_v4 = vld [vmem:[#allocation38_spill] sm:$0xff]  ;;  %v12022_v32 = vld [vmem:[#allocation33_spill] sm:$0xff] }
 0x27f   : > { %v2638_v35 = vadd.f32 %v12009_v63, %v2528_v47  ;;  %v2753_v36 = vadd.f32 %v9874_v49, %v2642_v43  ;;  %v2752_v50 = vadd.f32 %v12013_v6, %v2641_v1  ;;  %v12018_v57 = vld [vmem:[#allocation26_spill] sm:$0xff]  ;;  %v2862_v18 = vadd.f32 %v12019_v59, %v2751_v28  ;;  %v3245_v6 = vld [vmem:[%s11941_s4 + $0x68] sm:$0xff]  ;;  %v6474_v59 = vld [vmem:[%s11940_s3 + $0x18] sm:$0x3f] }
 0x280   : > { %v2535_v0 = vadd.f32 %v12001_v29, %v2424_v27  ;;  %v2644_v11 = vadd.f32 %v12008_v54, %v2534_v14  ;;  %v2639_v40 = vadd.f32 %v12010_v22, %v2529_v13  ;;  %v2754_v55 = vadd.f32 %v12011_v26, %v2643_v52  ;;  %v12016_v27 = vld [vmem:[#allocation39_spill] sm:$0xff]  ;;  %v2939_v14 = vpop.f32.mrf.mxu2  ;;  %v3090_v43 = vld [vmem:[%s11939_s2] sm:$0x3]  ;;  %v3247_v26 = vld [vmem:[%s11941_s4 + $0x78] sm:$0xff] }
 0x281   : > { %v9946_v46 = vpop.f32.mrf.mxu0  ;;  %v9948_v42 = vpop.f32.mrf.mxu1  ;;  %v2749_v39 = vadd.f32 %v12017_v53, %v2638_v35  ;;  %v2863_v30 = vadd.f32 %v12020_v31, %v2752_v50  ;;  %v2973_v33 = vadd.f32 %v9938_v34, %v2862_v18  ;;  %v3092_v25 = vperm.slane %v3090_v43, 0  ;;  %3260 = vmatpush.msrb.mxu0 %v3247_v26  ;;  %v6495_v53 = vld [vmem:[%s11941_s4 + $0x108] sm:$0xff]  ;;  %v6492_v31 = vld [vmem:[%s11941_s4 + $0xf0] sm:$0xff] }
 0x282   : > { %v2645_v9 = vadd.f32 %v9868_v21, %v2535_v0  ;;  %v2755_v45 = vadd.f32 %v9882_v8, %v2644_v11  ;;  %v2864_v21 = vadd.f32 %v12015_v4, %v2753_v36  ;;  %v2865_v37 = vadd.f32 %v12016_v27, %v2754_v55  ;;  %v3246_v55 = vld [vmem:[%s11941_s4 + $0x70] sm:$0xff]  ;;  %v3113_v4 = vld [vmem:[%s11940_s3 + $0x8] sm:$0x3f]  ;;  %v6497_v27 = vld [vmem:[%s11941_s4 + $0x118] sm:$0xff] }
 0x283   : > { %v2965_v15 = vpop.f32.mrf.mxu3  ;;  %v2750_v49 = vadd.f32 %v12018_v57, %v2639_v40  ;;  %v2860_v8 = vadd.f32 %v12021_v44, %v2749_v39  ;;  %v2974_v52 = vadd.f32 %v9940_v7, %v2863_v30  ;;  %v3093_v23 = vperm.slane %v3090_v43, 1  ;;  %3261 = vmatpush.msrb.mxu0 %v3246_v55  ;;  %v6473_v39 = vld [vmem:[%s11940_s3 + $0x10] sm:$0xff]  ;;  %v6494_v57 = vld [vmem:[%s11941_s4 + $0x100] sm:$0xff]  ;;  %v3241_v18 = vld [vmem:[%s11941_s4 + $0x48] sm:$0xff] }
 0x284   : > { %v2756_v48 = vadd.f32 %v12014_v20, %v2645_v9  ;;  %v2866_v19 = vadd.f32 %v9914_v58, %v2755_v45  ;;  %v2975_v0 = vadd.f32 %v2936_v17, %v2864_v21  ;;  %v2976_v2 = vadd.f32 %v2965_v15, %v2865_v37  ;;  %v3244_v45 = vld [vmem:[%s11941_s4 + $0x60] sm:$0xff]  ;;  %v3243_v20 = vld [vmem:[%s11941_s4 + $0x58] sm:$0xff]  ;;  %v6496_v37 = vld [vmem:[%s11941_s4 + $0x110] sm:$0xff] }
 0x285   : > { %v2861_v10 = vadd.f32 %v12022_v32, %v2750_v49  ;;  %v2971_v61 = vadd.f32 %v9902_v16, %v2860_v8  ;;  %3262 = vmatpush.msrb.mxu0 %v3245_v6  ;;  %v6498_v21 = vld [vmem:[%s11941_s4 + $0x120] sm:$0xff]  ;;  %v6493_v49 = vld [vmem:[%s11941_s4 + $0xf8] sm:$0xff]  ;;  %v3238_v8 = vld [vmem:[%s11941_s4 + $0x30] sm:$0xff] }
 0x286   : > { %v2867_v5 = vadd.f32 %v9916_v24, %v2756_v48  ;;  %v2977_v60 = vadd.f32 %v2939_v14, %v2866_v19  ;;  %v3242_v48 = vld [vmem:[%s11941_s4 + $0x50] sm:$0xff]  ;;  %v3240_v30 = vld [vmem:[%s11941_s4 + $0x40] sm:$0xff]  ;;  %v6491_v19 = vld [vmem:[%s11941_s4 + $0xe8] sm:$0xff] }
 0x287   : > { %v2972_v13 = vadd.f32 %v9904_v38, %v2861_v10  ;;  %v3082_v34 = vadd.f32 %v9946_v46, %v2971_v61  ;;  %3263 = vmatpush.msrb.mxu0 %v3244_v45  ;;  %v6490_v44 = vld [vmem:[%s11941_s4 + $0xe0] sm:$0xff]  ;;  %v6489_v32 = vld [vmem:[%s11941_s4 + $0xd8] sm:$0xff]  ;;  %v3237_v10 = vld [vmem:[%s11941_s4 + $0x28] sm:$0xff] }
 0x288   : > { %v6488_v14 = vld [vmem:[%s11941_s4 + $0xd0] sm:$0xff]  ;;  %v6503_v43 = vld [vmem:[%s11941_s4 + $0x148] sm:$0xff]  ;;  %v6485_v61 = vld [vmem:[%s11941_s4 + $0xb8] sm:$0xff] }
 0x289   : > { %v3044_v56 = vpop.f32.mrf.mxu0  ;;  %v3073_v3 = vpop.f32.mrf.mxu1  ;;  %v3083_v7 = vadd.f32 %v9948_v42, %v2972_v13  ;;  %3264 = vmatpush.msrb.mxu0 %v3243_v20  ;;  %v6501_v13 = vld [vmem:[%s11941_s4 + $0x138] sm:$0xff]  ;;  %v3385_v55 = vld [vmem:[%s11942_s5 + $0x48] sm:$0xff] }
 0x28a   : > { %v3084_v41 = vadd.f32 %v3044_v56, %v2973_v33  ;;  %v3085_v1 = vadd.f32 %v3073_v3, %v2974_v52  ;;  %v3096_v56 = vadd.f32 %v3092_v25, %v3082_v34  ;;  %v3235_v33 = vld [vmem:[%s11941_s4 + $0x18] sm:$0xff] }
 0x28b   : > { %v2968_v29 = vpop.f32.mrf.mxu3  ;;  %v3097_v3 = vadd.f32 %v3093_v23, %v3083_v7  ;;  %3265 = vmatpush.msrb.mxu0 %v3242_v48  ;;  %v3251_v52 = vld [vmem:[%s11941_s4 + $0x98] sm:$0xff]  ;;  %v3389_v7 = vld [vmem:[%s11942_s5 + $0x68] sm:$0xff] }
 0x28c   : > { %v2978_v58 = vadd.f32 %v2968_v29, %v2867_v5  ;;  %v3098_v40 = vadd.f32 %v3092_v25, %v3084_v41  ;;  %v3099_v16 = vadd.f32 %v3093_v23, %v3085_v1  ;;  %v3104_v50 = vmax.f32 %v3096_v56, 0.0  ;;  %v3239_v5 = vld [vmem:[%s11941_s4 + $0x38] sm:$0xff]  ;;  %v3236_v29 = vld [vmem:[%s11941_s4 + $0x20] sm:$0xff] }
 0x28d   : > { %3266 = vmatpush.msrb.mxu0 %v3241_v18  ;;  %v3232_v41 = vld [vmem:[%s11941_s4] sm:$0xff]  ;;  %v3391_v34 = vld [vmem:[%s11942_s5 + $0x78] sm:$0xf] }
 0x28e   : > { %v3106_v12 = vmax.f32 %v3098_v40, 0.0  ;;  %v3107_v28 = vmax.f32 %v3099_v16, 0.0  ;;  %v3248_v1 = vld [vmem:[%s11941_s4 + $0x80] sm:$0xff]  ;;  %v3379_v6 = vld [vmem:[%s11942_s5 + $0x18] sm:$0xff] }
 0x28f   : > { %3267 = vmatpush.msrb.mxu0 %v3240_v30 }
 0x291   : > { %v3047_v62 = vpop.f32.mrf.mxu0  ;;  %v3076_v51 = vpop.f32.mrf.mxu1  ;;  %3268 = vmatpush.msrb.mxu0 %v3239_v5  ;;  %v6520_v5 = vld [vmem:[%s11942_s5 + $0xf0] sm:$0xf] }
 0x292   : > { %v3086_v47 = vadd.f32 %v3047_v62, %v2975_v0  ;;  %v3087_v24 = vadd.f32 %v3076_v51, %v2976_v2  ;;  %v3105_v62 = vmax.f32 %v3097_v3, 0.0  ;;  %v3112_v51 = vld [vmem:[%s11940_s3] sm:$0xff]  ;;  %v6487_v2 = vld [vmem:[%s11941_s4 + $0xc8] sm:$0xff] }
 0x293   : > { %3269 = vmatpush.msrb.mxu0 %v3238_v8  ;;  %v3252_v0 = vld [vmem:[%s11941_s4 + $0xa0] sm:$0xff] }
 0x294   : > { %v3100_v9 = vadd.f32 %v3092_v25, %v3086_v47  ;;  %v3101_v63 = vadd.f32 %v3093_v23, %v3087_v24  ;;  %3294 = vmatpush.msrb.mxu1 %v3252_v0  ;;  %v3250_v47 = vld [vmem:[%s11941_s4 + $0x90] sm:$0xff]  ;;  %v6518_v8 = vld [vmem:[%s11942_s5 + $0xe0] sm:$0xff] }
 0x295   : > { %3270 = vmatpush.msrb.mxu0 %v3237_v10  ;;  %v3234_v24 = vld [vmem:[%s11941_s4 + $0x10] sm:$0xff] }
 0x296   : > { %v3108_v46 = vmax.f32 %v3100_v9, 0.0  ;;  %v3109_v42 = vmax.f32 %v3101_v63, 0.0  ;;  %3295 = vmatpush.msrb.mxu1 %v3251_v52  ;;  %v6516_v10 = vld [vmem:[%s11942_s5 + $0xd0] sm:$0xff]  ;;  %v6513_v52 = vld [vmem:[%s11942_s5 + $0xb8] sm:$0xff] }
 0x297   : > { %3271 = vmatpush.msrb.mxu0 %v3236_v29 }
 0x298   : > { %3296 = vmatpush.msrb.mxu1 %v3250_v47  ;;  %v6508_v47 = vld [vmem:[%s11942_s5 + $0x90] sm:$0xff] }
 0x299   : > { %v3050_v17 = vpop.f32.mrf.mxu0  ;;  %v3079_v15 = vpop.f32.mrf.mxu1  ;;  %3272 = vmatpush.msrb.mxu0 %v3235_v33  ;;  %v6512_v33 = vld [vmem:[%s11942_s5 + $0xb0] sm:$0xff] }
 0x29a   : > { %v3088_v54 = vadd.f32 %v3050_v17, %v2977_v60  ;;  %v3089_v11 = vadd.f32 %v3079_v15, %v2978_v58  ;;  %v6486_v60 = vld [vmem:[%s11941_s4 + $0xc0] sm:$0xff]  ;;  %v6484_v17 = vld [vmem:[%s11941_s4 + $0xb0] sm:$0xff] }
 0x29b   : > { %v6502_v58 = vld [vmem:[%s11941_s4 + $0x140] sm:$0xff]  ;;  %3273 = vmatpush.msrb.mxu0 %v3234_v24  ;;  %v6500_v15 = vld [vmem:[%s11941_s4 + $0x130] sm:$0xff]  ;;  %v6509_v24 = vld [vmem:[%s11942_s5 + $0x98] sm:$0xff] }
 0x29c   : > { %v3102_v35 = vadd.f32 %v3092_v25, %v3088_v54  ;;  %v3103_v22 = vadd.f32 %v3093_v23, %v3089_v11  ;;  %v3233_v25 = vld [vmem:[%s11941_s4 + $0x8] sm:$0xff] }
 0x29d   : > { %v3249_v23 = vld [vmem:[%s11941_s4 + $0x88] sm:$0xff]  ;;  %3274 = vmatpush.msrb.mxu0 %v3233_v25 }
 0x29e   : > { %v3110_v36 = vmax.f32 %v3102_v35, 0.0  ;;  %v3111_v38 = vmax.f32 %v3103_v22, 0.0  ;;  %3297 = vmatpush.msrb.mxu1 %v3249_v23  ;;  %v6483_v54 = vld [vmem:[%s11941_s4 + $0xa8] sm:$0xff] }
 0x29f   : > { %v6499_v11 = vld [vmem:[%s11941_s4 + $0x128] sm:$0xff]  ;;  %3275 = vmatpush.msrb.mxu0 %v3232_v41 }
 0x2a0   : > { %6467 = vmatpush.msk.msra.mxu2 %vm401_vm0, %v3110_v36  ;;  %6470 = vmatpush.msk.msra.mxu3 %vm401_vm0, %v3111_v38  ;;  %v6547_v41 = vld [vmem:[%s11942_s5 + $0x168] sm:$0xff] }
 0x2a1   : > { %3298 = vmatpush.msrb.mxu1 %v3248_v1  ;;  %6531 = vmatpush.msk.msra.mxu0 %vm401_vm0, %v3391_v34  ;;  %v6545_v1 = vld [vmem:[%s11942_s5 + $0x158] sm:$0xff] }
 0x2a2   : > { %3140 = vmatpush.msra.mxu2 %v3108_v46  ;;  %3163 = vmatpush.msra.mxu3 %v3109_v42 }
 0x2a3   : > { %3514 = vmatpush.msra.mxu0 %v3389_v7  ;;  %v6539_v7 = vld [vmem:[%s11942_s5 + $0x128] sm:$0xff] }
 0x2a4   : > { %3141 = vmatpush.msra.mxu2 %v3106_v12  ;;  %3164 = vmatpush.msra.mxu3 %v3107_v28 }
 0x2a6   : > { %3142 = vmatpush.msra.mxu2 %v3104_v50  ;;  %3165 = vmatpush.msra.mxu3 %v3105_v62 }
 0x2a7   : > { %6468 = vmatmul.msk.f32.vlgmr.msra.gmra.mxu2 %vm3114_vm5, %v3112_v51  ;;  %6471 = vmatmul.msk.f32.vlgmr.msra.gmra.mxu3 %vm3114_vm5, %v3112_v51 }
 0x2a8   : > { %6475 = vmatpush.msk.msrb.mxu2 %vm401_vm0, %v3110_v36  ;;  %6478 = vmatpush.msk.msrb.mxu3 %vm401_vm0, %v3111_v38 }
 0x2aa   : > { %3195 = vmatpush.msrb.mxu2 %v3108_v46  ;;  %3218 = vmatpush.msrb.mxu3 %v3109_v42  ;;  %v3387_v42 = vld [vmem:[%s11942_s5 + $0x58] sm:$0xff] }
 0x2ab   : > { %3515 = vmatpush.msra.mxu0 %v3387_v42  ;;  %v3386_v42 = vld [vmem:[%s11942_s5 + $0x50] sm:$0xff] }
 0x2ac   : > { %3196 = vmatpush.msrb.mxu2 %v3106_v12  ;;  %3219 = vmatpush.msrb.mxu3 %v3107_v28  ;;  %v3383_v12 = vld [vmem:[%s11942_s5 + $0x38] sm:$0xff]  ;;  %v3381_v28 = vld [vmem:[%s11942_s5 + $0x28] sm:$0xff] }
 0x2ad   : > { %3516 = vmatpush.msra.mxu0 %v3385_v55  ;;  %v6544_v55 = vld [vmem:[%s11942_s5 + $0x150] sm:$0xff] }
 0x2ae   : > { %3197 = vmatpush.msrb.mxu2 %v3104_v50  ;;  %3220 = vmatpush.msrb.mxu3 %v3105_v62  ;;  %v3377_v50 = vld [vmem:[%s11942_s5 + $0x8] sm:$0xff] }
 0x2af   : > { %6469 = vmatmul.msk.f32.gmra.mxu2 %vm3114_vm5, %v3113_v4  ;;  %6472 = vmatmul.msk.f32.gmra.mxu3 %vm3114_vm5, %v3113_v4 }
 0x2b0   : > { %3328 = vmatpush.msra.mxu2 %v6498_v21  ;;  %3362 = vmatpush.msra.mxu3 %v6503_v43  ;;  %v6515_v43 = vld [vmem:[%s11942_s5 + $0xc8] sm:$0xff] }
 0x2b1   : > { %3517 = vmatpush.msra.mxu0 %v3383_v12  ;;  %v6567_v12 = vld [vmem:[%s11942_s5 + $0x1d8] sm:$0xff] }
 0x2b2   : > { %3329 = vmatpush.msra.mxu2 %v6497_v27  ;;  %3363 = vmatpush.msra.mxu3 %v6502_v58  ;;  %v6511_v58 = vld [vmem:[%s11942_s5 + $0xa8] sm:$0xff] }
 0x2b3   : > { %3518 = vmatpush.msra.mxu0 %v3381_v28  ;;  %v6589_v28 = vld [vmem:[%s11942_s5 + $0x258] sm:$0xff] }
 0x2b4   : > { %3330 = vmatpush.msra.mxu2 %v6496_v37  ;;  %3364 = vmatpush.msra.mxu3 %v6501_v13  ;;  %v6507_v13 = vld [vmem:[%s11942_s5 + $0x88] sm:$0xff] }
 0x2b5   : > { %3519 = vmatpush.msra.mxu0 %v3379_v6  ;;  %v3384_v6 = vld [vmem:[%s11942_s5 + $0x40] sm:$0xff] }
 0x2b6   : > { %3331 = vmatpush.msra.mxu2 %v6495_v53  ;;  %3365 = vmatpush.msra.mxu3 %v6500_v15  ;;  %v6549_v15 = vld [vmem:[%s11942_s5 + $0x178] sm:$0xf] }
 0x2b7   : > { %6476 = vmatmul.msk.f32.vlgmr.msrb.gmra.mxu2 %vm3114_vm5, %v6473_v39  ;;  %6479 = vmatmul.msk.f32.vlgmr.msrb.gmra.mxu3 %vm3114_vm5, %v6473_v39 }
 0x2b8   : > { %3332 = vmatpush.msra.mxu2 %v6494_v57  ;;  %3366 = vmatpush.msra.mxu3 %v6499_v11  ;;  %v6541_v11 = vld [vmem:[%s11942_s5 + $0x138] sm:$0xff] }
 0x2b9   : > { %3520 = vmatpush.msra.mxu0 %v3377_v50 }
 0x2ba   : > { %3333 = vmatpush.msra.mxu2 %v6493_v49  ;;  %6522 = vmatpush.msk.msrb.mxu3 %vm401_vm0, %v6520_v5  ;;  %v6559_v5 = vld [vmem:[%s11942_s5 + $0x198] sm:$0xff] }
 0x2bc   : > { %3334 = vmatpush.msra.mxu2 %v6492_v31  ;;  %3435 = vmatpush.msrb.mxu3 %v6518_v8  ;;  %v3376_v8 = vld [vmem:[%s11942_s5] sm:$0xff] }
 0x2be   : > { %3335 = vmatpush.msra.mxu2 %v6491_v19  ;;  %3436 = vmatpush.msrb.mxu3 %v6516_v10  ;;  %v6557_v10 = vld [vmem:[%s11942_s5 + $0x188] sm:$0xff] }
 0x2bf   : > { %6477 = vmatmul.msk.f32.gmra.mxu2 %vm3114_vm5, %v6474_v59  ;;  %6480 = vmatmul.msk.f32.gmra.mxu3 %vm3114_vm5, %v6474_v59 }
 0x2c0   : > { %3336 = vmatpush.msra.mxu2 %v6490_v44  ;;  %v6521_v44 = vld [vmem:[%s11942_s5 + $0xf8] sm:$0xf] }
 0x2c1   : > { %6525 = vmatpush.msk.msra.mxu1 %vm401_vm0, %v6521_v44  ;;  %v6581_v44 = vld [vmem:[%s11942_s5 + $0x218] sm:$0xff] }
 0x2c2   : > { %3337 = vmatpush.msra.mxu2 %v6489_v32  ;;  %v6519_v32 = vld [vmem:[%s11942_s5 + $0xe8] sm:$0xff] }
 0x2c3   : > { %3458 = vmatpush.msra.mxu1 %v6519_v32  ;;  %v6534_v32 = vld [vmem:[%s11942_s5 + $0x100] sm:$0xff] }
 0x2c4   : > { %3338 = vmatpush.msra.mxu2 %v6488_v14  ;;  %v6517_v14 = vld [vmem:[%s11942_s5 + $0xd8] sm:$0xff] }
 0x2c5   : > { %3459 = vmatpush.msra.mxu1 %v6517_v14  ;;  %v6579_v14 = vld [vmem:[%s11942_s5 + $0x208] sm:$0xff] }
 0x2c6   : > { %3339 = vmatpush.msra.mxu2 %v6487_v2  ;;  %v6514_v2 = vld [vmem:[%s11942_s5 + $0xc0] sm:$0xff] }
 0x2c7   : > { %3437 = vmatpush.msrb.mxu3 %v6514_v2  ;;  %3460 = vmatpush.msra.mxu1 %v6515_v43  ;;  %v6592_v2 = vld [vmem:[%s11942_s5 + $0x270] sm:$0xf]  ;;  %v6615_v43 = vld [vmem:[%s11942_s5 + $0x2f8] sm:$0xf] }
 0x2c8   : > { %3340 = vmatpush.msra.mxu2 %v6486_v60  ;;  %v6510_v60 = vld [vmem:[%s11942_s5 + $0xa0] sm:$0xff] }
 0x2c9   : > { %3438 = vmatpush.msrb.mxu3 %v6512_v33  ;;  %3461 = vmatpush.msra.mxu1 %v6513_v52  ;;  %v6568_v33 = vld [vmem:[%s11942_s5 + $0x1e0] sm:$0xff] }
 0x2ca   : > { %3341 = vmatpush.msra.mxu2 %v6485_v61  ;;  %v6506_v61 = vld [vmem:[%s11942_s5 + $0x80] sm:$0xff] }
 0x2cb   : > { %3439 = vmatpush.msrb.mxu3 %v6510_v60  ;;  %3462 = vmatpush.msra.mxu1 %v6511_v58  ;;  %v6590_v52 = vld [vmem:[%s11942_s5 + $0x260] sm:$0xff]  ;;  %v6613_v60 = vld [vmem:[%s11942_s5 + $0x2e8] sm:$0xff]  ;;  %v6566_v58 = vld [vmem:[%s11942_s5 + $0x1d0] sm:$0xff] }
 0x2cc   : > { %3342 = vmatpush.msra.mxu2 %v6484_v17 }
 0x2cd   : > { %3440 = vmatpush.msrb.mxu3 %v6508_v47  ;;  %3463 = vmatpush.msra.mxu1 %v6509_v24  ;;  %v6588_v47 = vld [vmem:[%s11942_s5 + $0x250] sm:$0xff]  ;;  %v6611_v24 = vld [vmem:[%s11942_s5 + $0x2d8] sm:$0xff] }
 0x2ce   : > { %3343 = vmatpush.msra.mxu2 %v6483_v54  ;;  %v6543_v54 = vld [vmem:[%s11942_s5 + $0x148] sm:$0xff] }
 0x2cf   : > { %3441 = vmatpush.msrb.mxu3 %v6506_v61  ;;  %3464 = vmatpush.msra.mxu1 %v6507_v13  ;;  %v6564_v61 = vld [vmem:[%s11942_s5 + $0x1c0] sm:$0xff] }
 0x2d0   : > { %6553 = vmatpush.msk.msrb.mxu2 %vm401_vm0, %v6549_v15  ;;  %v6586_v13 = vld [vmem:[%s11942_s5 + $0x240] sm:$0xff]  ;;  %v6562_v15 = vld [vmem:[%s11942_s5 + $0x1b0] sm:$0xff] }
 0x2d2   : > { %3591 = vmatpush.msrb.mxu2 %v6547_v41  ;;  %v6584_v41 = vld [vmem:[%s11942_s5 + $0x230] sm:$0xff] }
 0x2d4   : > { %3592 = vmatpush.msrb.mxu2 %v6545_v1  ;;  %v6607_v1 = vld [vmem:[%s11942_s5 + $0x2b8] sm:$0xff] }
 0x2d6   : > { %3593 = vmatpush.msrb.mxu2 %v6543_v54  ;;  %v6560_v54 = vld [vmem:[%s11942_s5 + $0x1a0] sm:$0xff] }
 0x2d8   : > { %3594 = vmatpush.msrb.mxu2 %v6541_v11  ;;  %v6582_v11 = vld [vmem:[%s11942_s5 + $0x220] sm:$0xff] }
 0x2da   : > { %3595 = vmatpush.msrb.mxu2 %v6539_v7  ;;  %v6637_v7 = vld [vmem:[%s11942_s5 + $0x378] sm:$0xf] }
 0x32a   : > { %v3144_v9 = vpop.f32.mrf.mxu2  ;;  %v3167_v63 = vpop.f32.mrf.mxu3 }
 0x332   : > { %v3147_v35 = vpop.f32.mrf.mxu2  ;;  %v3170_v22 = vpop.f32.mrf.mxu3 }
 0x33a   : > { %v3199_v40 = vpop.f32.mrf.mxu2  ;;  %v3222_v16 = vpop.f32.mrf.mxu3 }
 0x33b   : > { %v3228_v36 = vmax.f32 %v3144_v9, %v3199_v40  ;;  %v3229_v38 = vmax.f32 %v3167_v63, %v3222_v16  ;;  %v6537_v63 = vld [vmem:[%s11942_s5 + $0x118] sm:$0xff]  ;;  %v3390_v40 = vld [vmem:[%s11942_s5 + $0x70] sm:$0xf] }
 0x33c   : > { %3596 = vmatpush.msrb.mxu2 %v6537_v63  ;;  %v6548_v16 = vld [vmem:[%s11942_s5 + $0x170] sm:$0xf] }
 0x33d   : > { %3276 = vmatmul.f32.vlgmr.msrb.gmra.mxu0 %v3228_v36  ;;  %6481 = vmatmul.msk.f32.vlgmr.msrb.gmra.mxu1 %vm3253_vm6, %v3229_v38 }
 0x33e   : > { %3344 = vmatmul.f32.vlgmr.msra.gmra.mxu2 %v3228_v36  ;;  %6504 = vmatmul.msk.f32.vlgmr.msra.gmra.mxu3 %vm3253_vm6, %v3229_v38  ;;  %v6571_v36 = vld [vmem:[%s11942_s5 + $0x1f8] sm:$0xf] }
 0x33f   : > { %6528 = vmatpush.msk.msra.mxu3 %vm401_vm0, %v3390_v40  ;;  %6550 = vmatpush.msk.msrb.mxu1 %vm401_vm0, %v6548_v16  ;;  %v6593_v38 = vld [vmem:[%s11942_s5 + $0x278] sm:$0xf]  ;;  %v6580_v40 = vld [vmem:[%s11942_s5 + $0x210] sm:$0xff]  ;;  %v6635_v16 = vld [vmem:[%s11942_s5 + $0x368] sm:$0xff] }
 0x340   : > { %6575 = vmatpush.msk.msrb.mxu0 %vm401_vm0, %v6571_v36  ;;  %v6603_v36 = vld [vmem:[%s11942_s5 + $0x298] sm:$0xff] }
 0x342   : > { %v3202_v26 = vpop.f32.mrf.mxu2  ;;  %v3225_v56 = vpop.f32.mrf.mxu3 }
 0x343   : > { %v3230_v3 = vmax.f32 %v3147_v35, %v3202_v26  ;;  %v3231_v46 = vmax.f32 %v3170_v22, %v3225_v56  ;;  %v6535_v22 = vld [vmem:[%s11942_s5 + $0x108] sm:$0xff]  ;;  %v3388_v26 = vld [vmem:[%s11942_s5 + $0x60] sm:$0xff] }
 0x344   : > { %3597 = vmatpush.msrb.mxu2 %v6535_v22  ;;  %v6546_v56 = vld [vmem:[%s11942_s5 + $0x160] sm:$0xff]  ;;  %3491 = vmatpush.msra.mxu3 %v3388_v26  ;;  %v6558_v22 = vld [vmem:[%s11942_s5 + $0x190] sm:$0xff] }
 0x345   : > { %3279 = vmatmul.f32.gmra.mxu0 %v3230_v3  ;;  %6482 = vmatmul.msk.f32.gmra.mxu1 %vm3253_vm6, %v3231_v46  ;;  %v6578_v26 = vld [vmem:[%s11942_s5 + $0x200] sm:$0xff] }
 0x346   : > { %3347 = vmatmul.f32.gmra.mxu2 %v3230_v3  ;;  %6505 = vmatmul.msk.f32.gmra.mxu3 %vm3253_vm6, %v3231_v46  ;;  %v6569_v3 = vld [vmem:[%s11942_s5 + $0x1e8] sm:$0xff] }
 0x347   : > { %6597 = vmatpush.msk.msra.mxu2 %vm401_vm0, %v6593_v38  ;;  %v6591_v46 = vld [vmem:[%s11942_s5 + $0x268] sm:$0xff]  ;;  %3568 = vmatpush.msrb.mxu1 %v6546_v56  ;;  %v6556_v38 = vld [vmem:[%s11942_s5 + $0x180] sm:$0xff]  ;;  %v6633_v56 = vld [vmem:[%s11942_s5 + $0x358] sm:$0xff] }
 0x348   : > { %3672 = vmatpush.msrb.mxu0 %v6569_v3  ;;  %3492 = vmatpush.msra.mxu3 %v3386_v42  ;;  %v6601_v3 = vld [vmem:[%s11942_s5 + $0x288] sm:$0xff] }
 0x349   : > { %3753 = vmatpush.msra.mxu2 %v6591_v46  ;;  %3569 = vmatpush.msrb.mxu1 %v6544_v55  ;;  %v6631_v46 = vld [vmem:[%s11942_s5 + $0x348] sm:$0xff]  ;;  %v6629_v55 = vld [vmem:[%s11942_s5 + $0x338] sm:$0xff] }
 0x34a   : > { %3673 = vmatpush.msrb.mxu0 %v6567_v12  ;;  %3493 = vmatpush.msra.mxu3 %v3384_v6  ;;  %v6625_v6 = vld [vmem:[%s11942_s5 + $0x318] sm:$0xff] }
 0x34b   : > { %3754 = vmatpush.msra.mxu2 %v6589_v28  ;;  %v6627_v28 = vld [vmem:[%s11942_s5 + $0x328] sm:$0xff] }
 0x3ba   : > { %v3277_v62 = vpop.f32.mrf.mxu0  ;;  %v3300_v51 = vpop.f32.mrf.mxu1 }
 0x3bb   : > { %v3301_v48 = vadd.f32 %v3300_v51, %v3277_v62  ;;  %v6542_v62 = vld [vmem:[%s11942_s5 + $0x140] sm:$0xff]  ;;  %v6565_v51 = vld [vmem:[%s11942_s5 + $0x1c8] sm:$0xff] }
 0x3bc   : > { %3570 = vmatpush.msrb.mxu1 %v6542_v62  ;;  %3674 = vmatpush.msrb.mxu0 %v6565_v51  ;;  %v6623_v62 = vld [vmem:[%s11942_s5 + $0x308] sm:$0xff] }
 0x3c1   : > { %v3345_v45 = vpop.f32.mrf.mxu2  ;;  %v3368_v20 = vpop.f32.mrf.mxu3 }
 0x3c2   : > { %v3369_v4 = vadd.f32 %v3368_v20, %v3345_v45  ;;  %v3280_v27 = vpop.f32.mrf.mxu0  ;;  %v3303_v37 = vpop.f32.mrf.mxu1  ;;  %v6587_v45 = vld [vmem:[%s11942_s5 + $0x248] sm:$0xff]  ;;  %v3382_v20 = vld [vmem:[%s11942_s5 + $0x30] sm:$0xff] }
 0x3c3   : > { %v3304_v57 = vadd.f32 %v3303_v37, %v3280_v27  ;;  %3755 = vmatpush.msra.mxu2 %v6587_v45  ;;  %3494 = vmatpush.msra.mxu3 %v3382_v20  ;;  %v6585_v27 = vld [vmem:[%s11942_s5 + $0x238] sm:$0xff]  ;;  %v3380_v37 = vld [vmem:[%s11942_s5 + $0x20] sm:$0xff]  ;;  %v6614_v45 = vld [vmem:[%s11942_s5 + $0x2f0] sm:$0xf] }
 0x3c4   : > { %v10186_v21 = vmax.f32 %v3301_v48, %v3369_v4  ;;  %v6540_v48 = vld [vmem:[%s11942_s5 + $0x130] sm:$0xff]  ;;  %v6563_v4 = vld [vmem:[%s11942_s5 + $0x1b8] sm:$0xff] }
 0x3c5   : > { %3571 = vmatpush.msrb.mxu1 %v6540_v48  ;;  %3675 = vmatpush.msrb.mxu0 %v6563_v4  ;;  %v6636_v20 = vld [vmem:[%s11942_s5 + $0x370] sm:$0xf]  ;;  %v6659_v48 = vld [vmem:[%s11942_s5 + $0x3f8] sm:$0xf] }
 0x3c6   : > { %3545 = vrot.lane.b32.xlu1 %v10186_v21, %s7103_s12  ;;  %3411 = vrot.lane.b32.xlu2 %v10186_v21, %s7101_s16  ;;  %v3788_v31 = vrot.slane %v10186_v21, 1  ;;  %v4192_v29 = vrot.slane %v10186_v21, 2  ;;  %v4596_v23 = vrot.slane %v10186_v21, 3  ;;  %v5000_v9 = vrot.slane %v10186_v21, 4  ;;  %v6681_v4 = vld [vmem:[%s11942_s5 + $0x478] sm:$0xf] }
 0x3c7   : > { %6532 = vmatmul.msk.f32.vlgmr.msra.gmra.mxu0 %vm3415_vm7, %v10186_v21  ;;  %3756 = vmatpush.msra.mxu2 %v6585_v27  ;;  %v6612_v27 = vld [vmem:[%s11942_s5 + $0x2e0] sm:$0xff] }
 0x3c8   : > { %3495 = vmatpush.msra.mxu3 %v3380_v37  ;;  %v6657_v37 = vld [vmem:[%s11942_s5 + $0x3e8] sm:$0xff] }
 0x3c9   : > { %v3348_v53 = vpop.f32.mrf.mxu2  ;;  %v3371_v39 = vpop.f32.mrf.mxu3 }
 0x3ca   : > { %v3372_v49 = vadd.f32 %v3371_v39, %v3348_v53  ;;  %v6538_v53 = vld [vmem:[%s11942_s5 + $0x120] sm:$0xff]  ;;  %v6561_v39 = vld [vmem:[%s11942_s5 + $0x1a8] sm:$0xff] }
 0x3cb   : > { %3572 = vmatpush.msrb.mxu1 %v6538_v53  ;;  %3676 = vmatpush.msrb.mxu0 %v6561_v39  ;;  %v6679_v53 = vld [vmem:[%s11942_s5 + $0x468] sm:$0xff]  ;;  %v6610_v39 = vld [vmem:[%s11942_s5 + $0x2d0] sm:$0xff] }
 0x3cc   : > { %v10194_v59 = vmax.f32 %v3304_v57, %v3372_v49  ;;  %v6583_v57 = vld [vmem:[%s11942_s5 + $0x228] sm:$0xff]  ;;  %v3378_v49 = vld [vmem:[%s11942_s5 + $0x10] sm:$0xff] }
 0x3cd   : > { %3757 = vmatpush.msra.mxu2 %v6583_v57  ;;  %3496 = vmatpush.msra.mxu3 %v3378_v49  ;;  %v6632_v57 = vld [vmem:[%s11942_s5 + $0x350] sm:$0xff]  ;;  %v6655_v49 = vld [vmem:[%s11942_s5 + $0x3d8] sm:$0xff] }
 0x3ce   : > { %3628 = vrot.lane.b32.xlu1 %v10194_v59, %s7104_s22  ;;  %3547 = vrot.lane.b32.xlu2 %v10194_v59, %s7103_s12  ;;  %v10205_v18 = vrot.slane %v10194_v59, 1  ;;  %v10231_v19 = vrot.slane %v10194_v59, 2  ;;  %v10307_v25 = vrot.slane %v10194_v59, 3  ;;  %v10343_v34 = vrot.slane %v10194_v59, 4 }
 0x3cf   : > { %3413 = vrot.lane.b32.xlu0 %v10194_v59, %s7101_s16  ;;  %6533 = vmatmul.msk.f32.gmra.mxu0 %vm3415_vm7, %v10194_v59 }
 0x3d0   : > { %v10210_v30 = vsel %vm894_vm2, %v3788_v31, %v10205_v18  ;;  %v10262_v0 = vsel %vm1449_vm3, %v4192_v29, %v10231_v19  ;;  %v10312_v17 = vsel %vm2004_vm4, %v4596_v23, %v10307_v25  ;;  %v10354_v35 = vsel %vm401_vm0, %v5000_v9, %v10343_v34  ;;  %v6536_v31 = vld [vmem:[%s11942_s5 + $0x110] sm:$0xff]  ;;  %3677 = vmatpush.msrb.mxu0 %v6559_v5  ;;  %v6609_v23 = vld [vmem:[%s11942_s5 + $0x2c8] sm:$0xff] }
 0x3d1   : > { %3573 = vmatpush.msrb.mxu1 %v6536_v31  ;;  %3758 = vmatpush.msra.mxu2 %v6581_v44  ;;  %v6570_v29 = vld [vmem:[%s11942_s5 + $0x1f0] sm:$0xf]  ;;  %v6605_v9 = vld [vmem:[%s11942_s5 + $0x2a8] sm:$0xff]  ;;  %v6677_v31 = vld [vmem:[%s11942_s5 + $0x458] sm:$0xff] }
 0x3d2   : > { %3497 = vmatpush.msra.mxu3 %v3376_v8  ;;  %3678 = vmatpush.msrb.mxu0 %v6557_v10  ;;  %v6608_v8 = vld [vmem:[%s11942_s5 + $0x2c0] sm:$0xff]  ;;  %v6675_v10 = vld [vmem:[%s11942_s5 + $0x448] sm:$0xff] }
 0x3d3   : > { %3574 = vmatpush.msrb.mxu1 %v6534_v32  ;;  %3759 = vmatpush.msra.mxu2 %v6579_v14  ;;  %v6630_v32 = vld [vmem:[%s11942_s5 + $0x340] sm:$0xff]  ;;  %v6653_v14 = vld [vmem:[%s11942_s5 + $0x3c8] sm:$0xff] }
 0x3d4   : > { %6619 = vmatpush.msk.msra.mxu0 %vm401_vm0, %v6615_v43  ;;  %v6673_v43 = vld [vmem:[%s11942_s5 + $0x438] sm:$0xff] }
 0x3d6   : > { %3707 = vrot.lane.b32.xlu2 %v10186_v21, %s7105_s23  ;;  %3868 = vrot.lane.b32.xlu1 %v10210_v30, %s7101_s16 }
 0x3d7   : > { %3626 = vrot.lane.b32.xlu0 %v10186_v21, %s7104_s22  ;;  %3833 = vmatpush.msra.mxu0 %v6613_v60  ;;  %v6649_v60 = vld [vmem:[%s11942_s5 + $0x3a8] sm:$0xff] }
 0x3d9   : > { %3834 = vmatpush.msra.mxu0 %v6611_v24  ;;  %v6624_v24 = vld [vmem:[%s11942_s5 + $0x310] sm:$0xff] }
 0x3db   : > { %3835 = vmatpush.msra.mxu0 %v6609_v23  ;;  %v6669_v23 = vld [vmem:[%s11942_s5 + $0x418] sm:$0xff] }
 0x3dd   : > { %3836 = vmatpush.msra.mxu0 %v6607_v1  ;;  %v6667_v1 = vld [vmem:[%s11942_s5 + $0x408] sm:$0xff] }
 0x3de   : > { %3870 = vrot.lane.b32.xlu2 %v10205_v18, %s7101_s16  ;;  %3951 = vrot.lane.b32.xlu1 %v10205_v18, %s7103_s12 }
 0x3df   : > { %3709 = vrot.lane.b32.xlu0 %v10194_v59, %s7105_s23  ;;  %3837 = vmatpush.msra.mxu0 %v6605_v9  ;;  %v6703_v9 = vld [vmem:[%s11942_s5 + $0x4f8] sm:$0xf] }
 0x3e1   : > { %3838 = vmatpush.msra.mxu0 %v6603_v36  ;;  %v6701_v36 = vld [vmem:[%s11942_s5 + $0x4e8] sm:$0xff] }
 0x3e3   : > { %3839 = vmatpush.msra.mxu0 %v6601_v3  ;;  %v6699_v3 = vld [vmem:[%s11942_s5 + $0x4d8] sm:$0xff] }
 0x3e6   : > { %4030 = vrot.lane.b32.xlu2 %v10210_v30, %s7104_s22  ;;  %4111 = vrot.lane.b32.xlu1 %v10210_v30, %s7105_s23 }
 0x3e7   : > { %3949 = vrot.lane.b32.xlu0 %v10210_v30, %s7103_s12 }
 0x3ee   : > { %4113 = vrot.lane.b32.xlu2 %v10205_v18, %s7105_s23  ;;  %4274 = vrot.lane.b32.xlu1 %v10231_v19, %s7101_s16 }
 0x3ef   : > { %4032 = vrot.lane.b32.xlu0 %v10205_v18, %s7104_s22 }
 0x3f6   : > { %4353 = vrot.lane.b32.xlu2 %v10262_v0, %s7103_s12  ;;  %4434 = vrot.lane.b32.xlu1 %v10262_v0, %s7104_s22 }
 0x3f7   : > { %4272 = vrot.lane.b32.xlu0 %v10262_v0, %s7101_s16 }
 0x3fe   : > { %4436 = vrot.lane.b32.xlu2 %v10231_v19, %s7104_s22  ;;  %4517 = vrot.lane.b32.xlu1 %v10231_v19, %s7105_s23 }
 0x3ff   : > { %4355 = vrot.lane.b32.xlu0 %v10231_v19, %s7103_s12 }
 0x406   : > { %4676 = vrot.lane.b32.xlu2 %v10312_v17, %s7101_s16  ;;  %4757 = vrot.lane.b32.xlu1 %v10312_v17, %s7103_s12 }
 0x407   : > { %4515 = vrot.lane.b32.xlu0 %v10262_v0, %s7105_s23 }
 0x40e   : > { %4759 = vrot.lane.b32.xlu2 %v10307_v25, %s7103_s12  ;;  %4840 = vrot.lane.b32.xlu1 %v10307_v25, %s7104_s22 }
 0x40f   : > { %4678 = vrot.lane.b32.xlu0 %v10307_v25, %s7101_s16 }
 0x416   : > { %4919 = vrot.lane.b32.xlu2 %v10312_v17, %s7105_s23  ;;  %5080 = vrot.lane.b32.xlu1 %v10354_v35, %s7101_s16 }
 0x417   : > { %4838 = vrot.lane.b32.xlu0 %v10312_v17, %s7104_s22 }
 0x41e   : > { %5082 = vrot.lane.b32.xlu2 %v10343_v34, %s7101_s16  ;;  %5163 = vrot.lane.b32.xlu1 %v10343_v34, %s7103_s12 }
 0x41f   : > { %4921 = vrot.lane.b32.xlu0 %v10307_v25, %s7105_s23 }
 0x420   : > { %v3412_v50 = vpop.permute.xlu2 %3411 }
 0x421   : > { %6523 = vmatmul.msk.f32.vlgmr.msrb.gmra.mxu3 %vm3415_vm7, %v3412_v50  ;;  %6526 = vmatmul.msk.f32.vlgmr.msra.gmra.mxu1 %vm3415_vm7, %v3412_v50 }
 0x422   : > { %6572 = vmatpush.msk.msrb.mxu3 %vm401_vm0, %v6570_v29  ;;  %6594 = vmatpush.msk.msra.mxu1 %vm401_vm0, %v6592_v2  ;;  %v6628_v29 = vld [vmem:[%s11942_s5 + $0x330] sm:$0xff]  ;;  %v6651_v2 = vld [vmem:[%s11942_s5 + $0x3b8] sm:$0xff] }
 0x424   : > { %3649 = vmatpush.msrb.mxu3 %v6568_v33  ;;  %3730 = vmatpush.msra.mxu1 %v6590_v52  ;;  %v6604_v33 = vld [vmem:[%s11942_s5 + $0x2a0] sm:$0xff] }
 0x425   : > { %v6626_v52 = vld [vmem:[%s11942_s5 + $0x320] sm:$0xff] }
 0x426   : > { %5242 = vrot.lane.b32.xlu2 %v10354_v35, %s7104_s22  ;;  %5323 = vrot.lane.b32.xlu1 %v10354_v35, %s7105_s23 }
 0x427   : > { %5161 = vrot.lane.b32.xlu0 %v10354_v35, %s7103_s12  ;;  %3650 = vmatpush.msrb.mxu3 %v6566_v58  ;;  %v6671_v58 = vld [vmem:[%s11942_s5 + $0x428] sm:$0xff] }
 0x428   : > { %3731 = vmatpush.msra.mxu1 %v6588_v47  ;;  %v3548_v42 = vpop.permute.xlu2 %3547  ;;  %v6602_v47 = vld [vmem:[%s11942_s5 + $0x290] sm:$0xff] }
 0x429   : > { %3651 = vmatpush.msrb.mxu3 %v6564_v61 }
 0x42a   : > { %3732 = vmatpush.msra.mxu1 %v6586_v13  ;;  %v6647_v13 = vld [vmem:[%s11942_s5 + $0x398] sm:$0xff] }
 0x42b   : > { %3652 = vmatpush.msrb.mxu3 %v6562_v15  ;;  %v6600_v15 = vld [vmem:[%s11942_s5 + $0x280] sm:$0xff] }
 0x42c   : > { %3733 = vmatpush.msra.mxu1 %v6584_v41  ;;  %v6622_v41 = vld [vmem:[%s11942_s5 + $0x300] sm:$0xff] }
 0x42d   : > { %3653 = vmatpush.msrb.mxu3 %v6560_v54  ;;  %v6645_v54 = vld [vmem:[%s11942_s5 + $0x388] sm:$0xff] }
 0x42e   : > { %5325 = vrot.lane.b32.xlu2 %v10343_v34, %s7105_s23  ;;  %3734 = vmatpush.msra.mxu1 %v6582_v11  ;;  %v6658_v11 = vld [vmem:[%s11942_s5 + $0x3f0] sm:$0xf] }
 0x42f   : > { %5244 = vrot.lane.b32.xlu0 %v10343_v34, %s7104_s22  ;;  %3654 = vmatpush.msrb.mxu3 %v6558_v22  ;;  %s5688_s22 = sshll.u32 %s12024_s10, 3 }
 0x430   : > { %3735 = vmatpush.msra.mxu1 %v6580_v40  ;;  %v10584_v50 = vpop.permute.xlu2 %3707  ;;  %v6656_v40 = vld [vmem:[%s11942_s5 + $0x3e0] sm:$0xff]  ;;  %s330_s27 = scalar_lea.vmem %s11946_s9, %s5688_s22 }
 0x431   : > { %3655 = vmatpush.msrb.mxu3 %v6556_v38  ;;  %v6723_v38 = vld [vmem:[%s11942_s5 + $0x568] sm:$0xff] }
 0x432   : > { %3736 = vmatpush.msra.mxu1 %v6578_v26  ;;  %v6654_v26 = vld [vmem:[%s11942_s5 + $0x3d0] sm:$0xff] }
 0x438   : > { %v3546_v63 = vpop.permute.xlu1 %3545  ;;  %v10728_v22 = vpop.permute.xlu2 %3870 }
 0x439   : > { %6554 = vmatmul.msk.f32.vlgmr.msrb.gmra.mxu2 %vm3415_vm7, %v3546_v63 }
 0x43a   : > { %6641 = vmatpush.msk.msrb.mxu2 %vm401_vm0, %v6637_v7  ;;  %v6680_v7 = vld [vmem:[%s11942_s5 + $0x470] sm:$0xf] }
 0x43c   : > { %3914 = vmatpush.msrb.mxu2 %v6635_v16  ;;  %v6678_v16 = vld [vmem:[%s11942_s5 + $0x460] sm:$0xff] }
 0x43e   : > { %3915 = vmatpush.msrb.mxu2 %v6633_v56  ;;  %v6676_v56 = vld [vmem:[%s11942_s5 + $0x450] sm:$0xff] }
 0x440   : > { %3916 = vmatpush.msrb.mxu2 %v6631_v46  ;;  %v10638_v5 = vpop.permute.xlu1 %3628  ;;  %v6721_v46 = vld [vmem:[%s11942_s5 + $0x558] sm:$0xff] }
 0x441   : > { %v3414_v12 = vpop.permute.xlu0 %3413  ;;  %6555 = vmatmul.msk.f32.gmra.mxu2 %vm3415_vm7, %v3548_v42 }
 0x442   : > { %6524 = vmatmul.msk.f32.gmra.mxu3 %vm3415_vm7, %v3414_v12  ;;  %6527 = vmatmul.msk.f32.gmra.mxu1 %vm3415_vm7, %v3414_v12  ;;  %v6719_v12 = vld [vmem:[%s11942_s5 + $0x548] sm:$0xff] }
 0x443   : > { %3917 = vmatpush.msrb.mxu2 %v6629_v55  ;;  %v6674_v55 = vld [vmem:[%s11942_s5 + $0x440] sm:$0xff] }
 0x445   : > { %3918 = vmatpush.msrb.mxu2 %v6627_v28  ;;  %v6697_v28 = vld [vmem:[%s11942_s5 + $0x4c8] sm:$0xff] }
 0x447   : > { %3919 = vmatpush.msrb.mxu2 %v6625_v6 }
 0x448   : > { %v3869_v61 = vpop.permute.xlu1 %3868 }
 0x449   : > { %v10589_v51 = vpop.permute.xlu0 %3626  ;;  %6598 = vmatmul.msk.f32.vlgmr.msra.gmra.mxu2 %vm3415_vm7, %v10584_v50 }
 0x44a   : > { %6529 = vmatmul.msk.f32.vlgmr.msra.gmra.mxu3 %vm3415_vm7, %v10186_v21  ;;  %6551 = vmatmul.msk.f32.vlgmr.msrb.gmra.mxu1 %vm3415_vm7, %v3546_v63  ;;  %v6634_v21 = vld [vmem:[%s11942_s5 + $0x360] sm:$0xff]  ;;  %v6725_v63 = vld [vmem:[%s11942_s5 + $0x578] sm:$0xf] }
 0x44b   : > { %6576 = vmatmul.msk.f32.vlgmr.msrb.gmra.mxu0 %vm3415_vm7, %v10589_v51  ;;  %3920 = vmatpush.msrb.mxu2 %v6623_v62  ;;  %v6672_v62 = vld [vmem:[%s11942_s5 + $0x430] sm:$0xff] }
 0x44c   : > { %6616 = vmatpush.msk.msra.mxu3 %vm401_vm0, %v6614_v45  ;;  %6638 = vmatpush.msk.msrb.mxu1 %vm401_vm0, %v6636_v20  ;;  %v6695_v45 = vld [vmem:[%s11942_s5 + $0x4b8] sm:$0xff] }
 0x44d   : > { %6663 = vmatpush.msk.msrb.mxu0 %vm401_vm0, %v6659_v48  ;;  %6685 = vmatpush.msk.msra.mxu2 %vm401_vm0, %v6681_v4  ;;  %v6717_v20 = vld [vmem:[%s11942_s5 + $0x538] sm:$0xff]  ;;  %v6648_v48 = vld [vmem:[%s11942_s5 + $0x3a0] sm:$0xff]  ;;  %v6693_v4 = vld [vmem:[%s11942_s5 + $0x4a8] sm:$0xff] }
 0x44e   : > { %3810 = vmatpush.msra.mxu3 %v6612_v27  ;;  %3891 = vmatpush.msrb.mxu1 %v6634_v21  ;;  %v6715_v27 = vld [vmem:[%s11942_s5 + $0x528] sm:$0xff]  ;;  %v6646_v21 = vld [vmem:[%s11942_s5 + $0x390] sm:$0xff] }
 0x44f   : > { %3995 = vmatpush.msrb.mxu0 %v6657_v37  ;;  %4076 = vmatpush.msra.mxu2 %v6679_v53  ;;  %v6668_v37 = vld [vmem:[%s11942_s5 + $0x410] sm:$0xff]  ;;  %v6691_v53 = vld [vmem:[%s11942_s5 + $0x498] sm:$0xff] }
 0x450   : > { %3811 = vmatpush.msra.mxu3 %v6610_v39  ;;  %3892 = vmatpush.msrb.mxu1 %v6632_v57  ;;  %v6713_v39 = vld [vmem:[%s11942_s5 + $0x518] sm:$0xff]  ;;  %v10822_v57 = vpop.permute.xlu1 %3951 }
 0x451   : > { %v10640_v44 = vpop.permute.xlu0 %3709  ;;  %3996 = vmatpush.msrb.mxu0 %v6655_v49  ;;  %4077 = vmatpush.msra.mxu2 %v6677_v31  ;;  %v6644_v49 = vld [vmem:[%s11942_s5 + $0x380] sm:$0xff] }
 0x452   : > { %6530 = vmatmul.msk.f32.gmra.mxu3 %vm3415_vm7, %v10194_v59  ;;  %6552 = vmatmul.msk.f32.gmra.mxu1 %vm3415_vm7, %v3548_v42  ;;  %v6606_v59 = vld [vmem:[%s11942_s5 + $0x2b0] sm:$0xff]  ;;  %v6652_v42 = vld [vmem:[%s11942_s5 + $0x3c0] sm:$0xff] }
 0x453   : > { %6577 = vmatmul.msk.f32.gmra.mxu0 %vm3415_vm7, %v10638_v5  ;;  %6599 = vmatmul.msk.f32.gmra.mxu2 %vm3415_vm7, %v10640_v44  ;;  %v6666_v31 = vld [vmem:[%s11942_s5 + $0x400] sm:$0xff] }
 0x454   : > { %3812 = vmatpush.msra.mxu3 %v6608_v8  ;;  %3893 = vmatpush.msrb.mxu1 %v6630_v32  ;;  %v6689_v8 = vld [vmem:[%s11942_s5 + $0x488] sm:$0xff]  ;;  %v6724_v32 = vld [vmem:[%s11942_s5 + $0x570] sm:$0xf] }
 0x455   : > { %4078 = vmatpush.msra.mxu2 %v6675_v10  ;;  %3997 = vmatpush.msrb.mxu0 %v6653_v14  ;;  %v6747_v10 = vld [vmem:[%s11942_s5 + $0x5f8] sm:$0xf] }
 0x456   : > { %3813 = vmatpush.msra.mxu3 %v6606_v59  ;;  %3894 = vmatpush.msrb.mxu1 %v6628_v29  ;;  %v6769_v14 = vld [vmem:[%s11942_s5 + $0x678] sm:$0xf]  ;;  %v6700_v59 = vld [vmem:[%s11942_s5 + $0x4e0] sm:$0xff] }
 0x457   : > { %3998 = vmatpush.msrb.mxu0 %v6651_v2  ;;  %4079 = vmatpush.msra.mxu2 %v6673_v43  ;;  %v6722_v29 = vld [vmem:[%s11942_s5 + $0x560] sm:$0xff]  ;;  %v6745_v2 = vld [vmem:[%s11942_s5 + $0x5e8] sm:$0xff] }
 0x458   : > { %3814 = vmatpush.msra.mxu3 %v6604_v33  ;;  %3895 = vmatpush.msrb.mxu1 %v6626_v52  ;;  %v6767_v43 = vld [vmem:[%s11942_s5 + $0x668] sm:$0xff]  ;;  %v6698_v33 = vld [vmem:[%s11942_s5 + $0x4d0] sm:$0xff] }
 0x459   : > { %3999 = vmatpush.msrb.mxu0 %v6649_v60  ;;  %4080 = vmatpush.msra.mxu2 %v6671_v58  ;;  %v10778_v6 = vpop.permute.xlu0 %3949  ;;  %v6720_v52 = vld [vmem:[%s11942_s5 + $0x550] sm:$0xff]  ;;  %v4112_v60 = vpop.permute.xlu1 %4111  ;;  %v6743_v58 = vld [vmem:[%s11942_s5 + $0x5d8] sm:$0xff] }
 0x45a   : > { %6573 = vmatmul.msk.f32.vlgmr.msrb.gmra.mxu3 %vm3415_vm7, %v10589_v51  ;;  %6595 = vmatmul.msk.f32.vlgmr.msra.gmra.mxu1 %vm3415_vm7, %v10584_v50  ;;  %v6650_v50 = vld [vmem:[%s11942_s5 + $0x3b0] sm:$0xff]  ;;  %v4031_v51 = vpop.permute.xlu2 %4030 }
 0x45b   : > { %6620 = vmatmul.msk.f32.vlgmr.msra.gmra.mxu0 %vm3415_vm7, %v10210_v30  ;;  %6642 = vmatmul.msk.f32.vlgmr.msrb.gmra.mxu2 %vm3415_vm7, %v3869_v61 }
 0x45c   : > { %3815 = vmatpush.msra.mxu3 %v6602_v47  ;;  %3896 = vmatpush.msrb.mxu1 %v6624_v24  ;;  %v6765_v47 = vld [vmem:[%s11942_s5 + $0x658] sm:$0xff]  ;;  %v6718_v24 = vld [vmem:[%s11942_s5 + $0x540] sm:$0xff] }
 0x45d   : > { %4000 = vmatpush.msrb.mxu0 %v6647_v13  ;;  %4081 = vmatpush.msra.mxu2 %v6669_v23  ;;  %v6763_v13 = vld [vmem:[%s11942_s5 + $0x648] sm:$0xff] }
 0x45e   : > { %3816 = vmatpush.msra.mxu3 %v6600_v15  ;;  %3897 = vmatpush.msrb.mxu1 %v6622_v41  ;;  %v6741_v23 = vld [vmem:[%s11942_s5 + $0x5c8] sm:$0xff]  ;;  %v6694_v15 = vld [vmem:[%s11942_s5 + $0x4b0] sm:$0xff] }
 0x45f   : > { %4082 = vmatpush.msra.mxu2 %v6667_v1  ;;  %4001 = vmatpush.msrb.mxu0 %v6645_v54  ;;  %v6716_v41 = vld [vmem:[%s11942_s5 + $0x530] sm:$0xff]  ;;  %v6739_v1 = vld [vmem:[%s11942_s5 + $0x5b8] sm:$0xff] }
 0x460   : > { %6660 = vmatpush.msk.msrb.mxu3 %vm401_vm0, %v6658_v11  ;;  %6682 = vmatpush.msk.msra.mxu1 %vm401_vm0, %v6680_v7  ;;  %v6761_v54 = vld [vmem:[%s11942_s5 + $0x638] sm:$0xff]  ;;  %v6692_v7 = vld [vmem:[%s11942_s5 + $0x4a0] sm:$0xff] }
 0x461   : > { %6707 = vmatpush.msk.msra.mxu0 %vm401_vm0, %v6703_v9  ;;  %6729 = vmatpush.msk.msrb.mxu2 %vm401_vm0, %v6725_v63  ;;  %v6714_v9 = vld [vmem:[%s11942_s5 + $0x520] sm:$0xff]  ;;  %v6737_v63 = vld [vmem:[%s11942_s5 + $0x5a8] sm:$0xff] }
 0x462   : > { %6574 = vmatmul.msk.f32.gmra.mxu3 %vm3415_vm7, %v10638_v5  ;;  %6596 = vmatmul.msk.f32.gmra.mxu1 %vm3415_vm7, %v10640_v44  ;;  %v4033_v5 = vpop.permute.xlu0 %4032  ;;  %v6711_v44 = vld [vmem:[%s11942_s5 + $0x508] sm:$0xff]  ;;  %v10913_v11 = vpop.permute.xlu2 %4113 }
 0x463   : > { %6621 = vmatmul.msk.f32.gmra.mxu0 %vm3415_vm7, %v10205_v18  ;;  %6643 = vmatmul.msk.f32.gmra.mxu2 %vm3415_vm7, %v10728_v22 }
 0x464   : > { %3972 = vmatpush.msrb.mxu3 %v6656_v40  ;;  %4053 = vmatpush.msra.mxu1 %v6678_v16  ;;  %v6690_v40 = vld [vmem:[%s11942_s5 + $0x490] sm:$0xff] }
 0x465   : > { %4157 = vmatpush.msra.mxu0 %v6701_v36  ;;  %4237 = vmatpush.msrb.mxu2 %v6723_v38  ;;  %v6712_v16 = vld [vmem:[%s11942_s5 + $0x510] sm:$0xff]  ;;  %v6735_v36 = vld [vmem:[%s11942_s5 + $0x598] sm:$0xff] }
 0x466   : > { %3973 = vmatpush.msrb.mxu3 %v6654_v26  ;;  %4054 = vmatpush.msra.mxu1 %v6676_v56  ;;  %v6757_v38 = vld [vmem:[%s11942_s5 + $0x618] sm:$0xff]  ;;  %v6710_v26 = vld [vmem:[%s11942_s5 + $0x500] sm:$0xff] }
 0x467   : > { %4158 = vmatpush.msra.mxu0 %v6699_v3  ;;  %4238 = vmatpush.msrb.mxu2 %v6721_v46  ;;  %v6688_v56 = vld [vmem:[%s11942_s5 + $0x480] sm:$0xff]  ;;  %v6755_v3 = vld [vmem:[%s11942_s5 + $0x608] sm:$0xff] }
 0x468   : > { %3974 = vmatpush.msrb.mxu3 %v6652_v42  ;;  %4055 = vmatpush.msra.mxu1 %v6674_v55  ;;  %v6733_v46 = vld [vmem:[%s11942_s5 + $0x588] sm:$0xff]  ;;  %v6746_v42 = vld [vmem:[%s11942_s5 + $0x5f0] sm:$0xf] }
 0x469   : > { %4239 = vmatpush.msrb.mxu2 %v6719_v12  ;;  %4159 = vmatpush.msra.mxu0 %v6697_v28  ;;  %v6768_v55 = vld [vmem:[%s11942_s5 + $0x670] sm:$0xf] }
 0x46a   : > { %6617 = vmatmul.msk.f32.vlgmr.msra.gmra.mxu3 %vm3415_vm7, %v10210_v30  ;;  %6639 = vmatmul.msk.f32.vlgmr.msrb.gmra.mxu1 %vm3415_vm7, %v3869_v61  ;;  %v6670_v30 = vld [vmem:[%s11942_s5 + $0x420] sm:$0xff]  ;;  %v10964_v12 = vpop.permute.xlu2 %4353  ;;  %v10966_v28 = vpop.permute.xlu0 %4272 }
 0x46b   : > { %6664 = vmatmul.msk.f32.vlgmr.msrb.gmra.mxu0 %vm3415_vm7, %v10778_v6  ;;  %6686 = vmatmul.msk.f32.vlgmr.msra.gmra.mxu2 %vm3415_vm7, %v4031_v51  ;;  %v6696_v61 = vld [vmem:[%s11942_s5 + $0x4c0] sm:$0xff] }
 0x46c   : > { %3975 = vmatpush.msrb.mxu3 %v6650_v50  ;;  %4056 = vmatpush.msra.mxu1 %v6672_v62  ;;  %v6813_v50 = vld [vmem:[%s11942_s5 + $0x778] sm:$0xf]  ;;  %v6744_v62 = vld [vmem:[%s11942_s5 + $0x5e0] sm:$0xff] }
 0x46d   : > { %4160 = vmatpush.msra.mxu0 %v6695_v45  ;;  %4240 = vmatpush.msrb.mxu2 %v6717_v20  ;;  %v6811_v45 = vld [vmem:[%s11942_s5 + $0x768] sm:$0xff]  ;;  %v6742_v20 = vld [vmem:[%s11942_s5 + $0x5d0] sm:$0xff] }
 0x46e   : > { %3976 = vmatpush.msrb.mxu3 %v6648_v48  ;;  %4057 = vmatpush.msra.mxu1 %v6670_v30  ;;  %v6764_v48 = vld [vmem:[%s11942_s5 + $0x650] sm:$0xff]  ;;  %v6787_v30 = vld [vmem:[%s11942_s5 + $0x6d8] sm:$0xff] }
 0x46f   : > { %4161 = vmatpush.msra.mxu0 %v6693_v4  ;;  %4241 = vmatpush.msrb.mxu2 %v6715_v27  ;;  %v6809_v4 = vld [vmem:[%s11942_s5 + $0x758] sm:$0xff]  ;;  %v6762_v27 = vld [vmem:[%s11942_s5 + $0x640] sm:$0xff] }
 0x470   : > { %3977 = vmatpush.msrb.mxu3 %v6646_v21  ;;  %4058 = vmatpush.msra.mxu1 %v6668_v37  ;;  %v6740_v21 = vld [vmem:[%s11942_s5 + $0x5c0] sm:$0xff]  ;;  %v6807_v37 = vld [vmem:[%s11942_s5 + $0x748] sm:$0xff] }
 0x471   : > { %4162 = vmatpush.msra.mxu0 %v6691_v53  ;;  %4242 = vmatpush.msrb.mxu2 %v6713_v39  ;;  %v6785_v53 = vld [vmem:[%s11942_s5 + $0x6c8] sm:$0xff]  ;;  %v6738_v39 = vld [vmem:[%s11942_s5 + $0x5b0] sm:$0xff] }
 0x472   : > { %6618 = vmatmul.msk.f32.gmra.mxu3 %vm3415_vm7, %v10205_v18  ;;  %6640 = vmatmul.msk.f32.gmra.mxu1 %vm3415_vm7, %v10728_v22  ;;  %v6702_v18 = vld [vmem:[%s11942_s5 + $0x4f0] sm:$0xf]  ;;  %v6759_v22 = vld [vmem:[%s11942_s5 + $0x628] sm:$0xff] }
 0x473   : > { %6665 = vmatmul.msk.f32.gmra.mxu0 %vm3415_vm7, %v10822_v57  ;;  %6687 = vmatmul.msk.f32.gmra.mxu2 %vm3415_vm7, %v4033_v5 }
 0x474   : > { %3978 = vmatpush.msrb.mxu3 %v6644_v49  ;;  %4059 = vmatpush.msra.mxu1 %v6666_v31  ;;  %v11027_v49 = vpop.permute.xlu1 %4274  ;;  %v11029_v31 = vpop.permute.xlu0 %4355 }
 0x475   : > { %4243 = vmatpush.msrb.mxu2 %v6711_v44  ;;  %4163 = vmatpush.msra.mxu0 %v6689_v8  ;;  %v6805_v44 = vld [vmem:[%s11942_s5 + $0x738] sm:$0xff]  ;;  %v6736_v8 = vld [vmem:[%s11942_s5 + $0x5a0] sm:$0xff] }
 0x476   : > { %6704 = vmatpush.msk.msra.mxu3 %vm401_vm0, %v6702_v18  ;;  %6726 = vmatpush.msk.msrb.mxu1 %vm401_vm0, %v6724_v32  ;;  %v6781_v18 = vld [vmem:[%s11942_s5 + $0x6a8] sm:$0xff] }
 0x477   : > { %6751 = vmatpush.msk.msrb.mxu0 %vm401_vm0, %v6747_v10  ;;  %6773 = vmatpush.msk.msra.mxu2 %vm401_vm0, %v6769_v14  ;;  %v6803_v32 = vld [vmem:[%s11942_s5 + $0x728] sm:$0xff]  ;;  %v6734_v10 = vld [vmem:[%s11942_s5 + $0x590] sm:$0xff] }
 0x478   : > { %4134 = vmatpush.msra.mxu3 %v6700_v59  ;;  %4214 = vmatpush.msrb.mxu1 %v6722_v29  ;;  %v6756_v14 = vld [vmem:[%s11942_s5 + $0x610] sm:$0xff]  ;;  %v6779_v59 = vld [vmem:[%s11942_s5 + $0x698] sm:$0xff] }
 0x479   : > { %4318 = vmatpush.msrb.mxu0 %v6745_v2  ;;  %4399 = vmatpush.msra.mxu2 %v6767_v43  ;;  %v6801_v29 = vld [vmem:[%s11942_s5 + $0x718] sm:$0xff]  ;;  %v6754_v2 = vld [vmem:[%s11942_s5 + $0x600] sm:$0xff] }
 0x47a   : > { %6661 = vmatmul.msk.f32.vlgmr.msrb.gmra.mxu3 %vm3415_vm7, %v10778_v6  ;;  %6683 = vmatmul.msk.f32.vlgmr.msra.gmra.mxu1 %vm3415_vm7, %v4031_v51  ;;  %v6791_v6 = vld [vmem:[%s11942_s5 + $0x6f8] sm:$0xf]  ;;  %v6789_v51 = vld [vmem:[%s11942_s5 + $0x6e8] sm:$0xff]  ;;  %v6732_v43 = vld [vmem:[%s11942_s5 + $0x580] sm:$0xff] }
 0x47b   : > { %6708 = vmatmul.msk.f32.vlgmr.msra.gmra.mxu0 %vm3415_vm7, %v4112_v60  ;;  %6730 = vmatmul.msk.f32.vlgmr.msrb.gmra.mxu2 %vm3415_vm7, %v10262_v0 }
 0x47c   : > { %4135 = vmatpush.msra.mxu3 %v6698_v33  ;;  %4215 = vmatpush.msrb.mxu1 %v6720_v52  ;;  %v6799_v33 = vld [vmem:[%s11942_s5 + $0x708] sm:$0xff] }
 0x47d   : > { %4319 = vmatpush.msrb.mxu0 %v6743_v58  ;;  %4400 = vmatpush.msra.mxu2 %v6765_v47  ;;  %v6777_v52 = vld [vmem:[%s11942_s5 + $0x688] sm:$0xff]  ;;  %v6812_v58 = vld [vmem:[%s11942_s5 + $0x770] sm:$0xf]  ;;  %v11087_v47 = vpop.permute.xlu1 %4434 }
 0x47e   : > { %4216 = vmatpush.msrb.mxu1 %v6718_v24  ;;  %4136 = vmatpush.msra.mxu3 %v6696_v61  ;;  %v11089_v24 = vpop.permute.xlu0 %4515  ;;  %v6835_v61 = vld [vmem:[%s11942_s5 + $0x7f8] sm:$0xf] }
 0x47f   : > { %4401 = vmatpush.msra.mxu2 %v6763_v13  ;;  %4320 = vmatpush.msrb.mxu0 %v6741_v23  ;;  %v6857_v13 = vld [vmem:[%s11942_s5 + $0x878] sm:$0xf]  ;;  %v6788_v23 = vld [vmem:[%s11942_s5 + $0x6e0] sm:$0xff] }
 0x480   : > { %4137 = vmatpush.msra.mxu3 %v6694_v15  ;;  %4217 = vmatpush.msrb.mxu1 %v6716_v41  ;;  %v6810_v15 = vld [vmem:[%s11942_s5 + $0x760] sm:$0xff]  ;;  %v6833_v41 = vld [vmem:[%s11942_s5 + $0x7e8] sm:$0xff] }
 0x481   : > { %4321 = vmatpush.msrb.mxu0 %v6739_v1  ;;  %4402 = vmatpush.msra.mxu2 %v6761_v54  ;;  %v6855_v1 = vld [vmem:[%s11942_s5 + $0x868] sm:$0xff]  ;;  %v6786_v54 = vld [vmem:[%s11942_s5 + $0x6d0] sm:$0xff] }
 0x482   : > { %6662 = vmatmul.msk.f32.gmra.mxu3 %vm3415_vm7, %v10822_v57  ;;  %6684 = vmatmul.msk.f32.gmra.mxu1 %vm3415_vm7, %v4033_v5  ;;  %v6760_v57 = vld [vmem:[%s11942_s5 + $0x630] sm:$0xff]  ;;  %v6783_v5 = vld [vmem:[%s11942_s5 + $0x6b8] sm:$0xff] }
 0x483   : > { %6709 = vmatmul.msk.f32.gmra.mxu0 %vm3415_vm7, %v10913_v11  ;;  %6731 = vmatmul.msk.f32.gmra.mxu2 %vm3415_vm7, %v10231_v19 }
 0x484   : > { %4138 = vmatpush.msra.mxu3 %v6692_v7  ;;  %4218 = vmatpush.msrb.mxu1 %v6714_v9  ;;  %v6831_v7 = vld [vmem:[%s11942_s5 + $0x7d8] sm:$0xff] }
 0x485   : > { %4322 = vmatpush.msrb.mxu0 %v6737_v63  ;;  %4403 = vmatpush.msra.mxu2 %v6759_v22  ;;  %v6853_v9 = vld [vmem:[%s11942_s5 + $0x858] sm:$0xff]  ;;  %v6784_v63 = vld [vmem:[%s11942_s5 + $0x6c0] sm:$0xff] }
 0x486   : > { %4139 = vmatpush.msra.mxu3 %v6690_v40  ;;  %4219 = vmatpush.msrb.mxu1 %v6712_v16  ;;  %v6806_v22 = vld [vmem:[%s11942_s5 + $0x740] sm:$0xff]  ;;  %v6829_v40 = vld [vmem:[%s11942_s5 + $0x7c8] sm:$0xff] }
 0x487   : > { %4323 = vmatpush.msrb.mxu0 %v6735_v36  ;;  %4404 = vmatpush.msra.mxu2 %v6757_v38  ;;  %v6851_v16 = vld [vmem:[%s11942_s5 + $0x848] sm:$0xff]  ;;  %v6782_v36 = vld [vmem:[%s11942_s5 + $0x6b0] sm:$0xff] }
 0x488   : > { %4220 = vmatpush.msrb.mxu1 %v6710_v26  ;;  %4140 = vmatpush.msra.mxu3 %v6688_v56  ;;  %v6804_v38 = vld [vmem:[%s11942_s5 + $0x730] sm:$0xff]  ;;  %v11151_v26 = vpop.permute.xlu2 %4436  ;;  %v11153_v56 = vpop.permute.xlu1 %4517 }
 0x489   : > { %4405 = vmatpush.msra.mxu2 %v6755_v3  ;;  %4324 = vmatpush.msrb.mxu0 %v6733_v46  ;;  %v6827_v3 = vld [vmem:[%s11942_s5 + $0x7b8] sm:$0xff] }
 0x48a   : > { %6705 = vmatmul.msk.f32.vlgmr.msra.gmra.mxu3 %vm3415_vm7, %v4112_v60  ;;  %6727 = vmatmul.msk.f32.vlgmr.msrb.gmra.mxu1 %vm3415_vm7, %v10262_v0  ;;  %v6766_v0 = vld [vmem:[%s11942_s5 + $0x660] sm:$0xff]  ;;  %v6790_v60 = vld [vmem:[%s11942_s5 + $0x6f0] sm:$0xf]  ;;  %v6849_v46 = vld [vmem:[%s11942_s5 + $0x838] sm:$0xff] }
 0x48b   : > { %6752 = vmatmul.msk.f32.vlgmr.msrb.gmra.mxu0 %vm3415_vm7, %v10966_v28  ;;  %6774 = vmatmul.msk.f32.vlgmr.msra.gmra.mxu2 %vm3415_vm7, %v10964_v12 }
 0x48c   : > { %6748 = vmatpush.msk.msrb.mxu3 %vm401_vm0, %v6746_v42  ;;  %6770 = vmatpush.msk.msra.mxu1 %vm401_vm0, %v6768_v55  ;;  %v6780_v42 = vld [vmem:[%s11942_s5 + $0x6a0] sm:$0xff] }
 0x48d   : > { %6795 = vmatpush.msk.msra.mxu0 %vm401_vm0, %v6791_v6  ;;  %6817 = vmatpush.msk.msrb.mxu2 %vm401_vm0, %v6813_v50  ;;  %v6802_v55 = vld [vmem:[%s11942_s5 + $0x720] sm:$0xff]  ;;  %v6778_v6 = vld [vmem:[%s11942_s5 + $0x690] sm:$0xff] }
 0x48e   : > { %4295 = vmatpush.msrb.mxu3 %v6744_v62  ;;  %4376 = vmatpush.msra.mxu1 %v6766_v0  ;;  %v6800_v50 = vld [vmem:[%s11942_s5 + $0x710] sm:$0xff]  ;;  %v6823_v62 = vld [vmem:[%s11942_s5 + $0x798] sm:$0xff] }
 0x48f   : > { %4480 = vmatpush.msra.mxu0 %v6789_v51  ;;  %4561 = vmatpush.msrb.mxu2 %v6811_v45  ;;  %v6845_v0 = vld [vmem:[%s11942_s5 + $0x818] sm:$0xff]  ;;  %v6776_v51 = vld [vmem:[%s11942_s5 + $0x680] sm:$0xff] }
 0x490   : > { %4296 = vmatpush.msrb.mxu3 %v6742_v20  ;;  %4377 = vmatpush.msra.mxu1 %v6764_v48  ;;  %v6798_v45 = vld [vmem:[%s11942_s5 + $0x700] sm:$0xff]  ;;  %v6821_v20 = vld [vmem:[%s11942_s5 + $0x788] sm:$0xff] }
 0x491   : > { %4481 = vmatpush.msra.mxu0 %v6787_v30  ;;  %4562 = vmatpush.msrb.mxu2 %v6809_v4  ;;  %v6843_v48 = vld [vmem:[%s11942_s5 + $0x808] sm:$0xff]  ;;  %v6834_v30 = vld [vmem:[%s11942_s5 + $0x7f0] sm:$0xf] }
 0x492   : > { %4378 = vmatpush.msra.mxu1 %v6762_v27  ;;  %4297 = vmatpush.msrb.mxu3 %v6740_v21  ;;  %v6856_v4 = vld [vmem:[%s11942_s5 + $0x870] sm:$0xf]  ;;  %v11211_v27 = vpop.permute.xlu2 %4676  ;;  %v6879_v21 = vld [vmem:[%s11942_s5 + $0x8f8] sm:$0xf] }
 0x493   : > { %4563 = vmatpush.msrb.mxu2 %v6807_v37  ;;  %4482 = vmatpush.msra.mxu0 %v6785_v53  ;;  %v6901_v37 = vld [vmem:[%s11942_s5 + $0x978] sm:$0xf]  ;;  %v6832_v53 = vld [vmem:[%s11942_s5 + $0x7e0] sm:$0xff] }
 0x494   : > { %6706 = vmatmul.msk.f32.gmra.mxu3 %vm3415_vm7, %v10913_v11  ;;  %6728 = vmatmul.msk.f32.gmra.mxu1 %vm3415_vm7, %v10231_v19  ;;  %v6758_v19 = vld [vmem:[%s11942_s5 + $0x620] sm:$0xff]  ;;  %v6808_v11 = vld [vmem:[%s11942_s5 + $0x750] sm:$0xff] }
 0x495   : > { %6753 = vmatmul.msk.f32.gmra.mxu0 %vm3415_vm7, %v11027_v49  ;;  %6775 = vmatmul.msk.f32.gmra.mxu2 %vm3415_vm7, %v11029_v31 }
 0x496   : > { %4298 = vmatpush.msrb.mxu3 %v6738_v39  ;;  %4379 = vmatpush.msra.mxu1 %v6760_v57  ;;  %v6854_v39 = vld [vmem:[%s11942_s5 + $0x860] sm:$0xff]  ;;  %v6877_v57 = vld [vmem:[%s11942_s5 + $0x8e8] sm:$0xff] }
 0x497   : > { %4483 = vmatpush.msra.mxu0 %v6783_v5  ;;  %4564 = vmatpush.msrb.mxu2 %v6805_v44  ;;  %v6852_v5 = vld [vmem:[%s11942_s5 + $0x850] sm:$0xff]  ;;  %v11249_v44 = vpop.f32.mrf.mxu0 }
 0x498   : > { %4299 = vmatpush.msrb.mxu3 %v6736_v8  ;;  %4380 = vmatpush.msra.mxu1 %v6758_v19  ;;  %v6875_v8 = vld [vmem:[%s11942_s5 + $0x8d8] sm:$0xff] }
 0x499   : > { %4484 = vmatpush.msra.mxu0 %v6781_v18  ;;  %4565 = vmatpush.msrb.mxu2 %v6803_v32  ;;  %v6897_v19 = vld [vmem:[%s11942_s5 + $0x958] sm:$0xff]  ;;  %v6828_v32 = vld [vmem:[%s11942_s5 + $0x7c0] sm:$0xff] }
 0x49a   : > { %4300 = vmatpush.msrb.mxu3 %v6734_v10  ;;  %4381 = vmatpush.msra.mxu1 %v6756_v14  ;;  %v6850_v10 = vld [vmem:[%s11942_s5 + $0x840] sm:$0xff]  ;;  %v6873_v14 = vld [vmem:[%s11942_s5 + $0x8c8] sm:$0xff] }
 0x49b   : > { %4485 = vmatpush.msra.mxu0 %v6779_v59  ;;  %4566 = vmatpush.msrb.mxu2 %v6801_v29  ;;  %v6895_v59 = vld [vmem:[%s11942_s5 + $0x948] sm:$0xff]  ;;  %v6826_v29 = vld [vmem:[%s11942_s5 + $0x7b0] sm:$0xff] }
 0x49c   : > { %4382 = vmatpush.msra.mxu1 %v6754_v2  ;;  %4301 = vmatpush.msrb.mxu3 %v6732_v43  ;;  %v6848_v2 = vld [vmem:[%s11942_s5 + $0x830] sm:$0xff]  ;;  %v11277_v43 = vpop.permute.xlu0 %4678 }
 0x49d   : > { %4567 = vmatpush.msrb.mxu2 %v6799_v33  ;;  %4486 = vmatpush.msra.mxu0 %v6777_v52  ;;  %v6871_v33 = vld [vmem:[%s11942_s5 + $0x8b8] sm:$0xff] }
 0x49e   : > { %6749 = vmatmul.msk.f32.vlgmr.msrb.gmra.mxu3 %vm3415_vm7, %v10966_v28  ;;  %6771 = vmatmul.msk.f32.vlgmr.msra.gmra.mxu1 %vm3415_vm7, %v10964_v12  ;;  %v6825_v12 = vld [vmem:[%s11942_s5 + $0x7a8] sm:$0xff]  ;;  %v11257_v18 = vpop.f32.mrf.mxu1  ;;  %v6893_v52 = vld [vmem:[%s11942_s5 + $0x938] sm:$0xff] }
 0x49f   : > { %6796 = vmatmul.msk.f32.vlgmr.msra.gmra.mxu0 %vm3415_vm7, %v11087_v47  ;;  %6818 = vmatmul.msk.f32.vlgmr.msrb.gmra.mxu2 %vm3415_vm7, %v11089_v24  ;;  %v6847_v28 = vld [vmem:[%s11942_s5 + $0x828] sm:$0xff] }
 0x4a0   : > { %6792 = vmatpush.msk.msra.mxu3 %vm401_vm0, %v6790_v60  ;;  %6814 = vmatpush.msk.msrb.mxu1 %vm401_vm0, %v6812_v58 }
 0x4a1   : > { %6839 = vmatpush.msk.msrb.mxu0 %vm401_vm0, %v6835_v61  ;;  %6861 = vmatpush.msk.msra.mxu2 %vm401_vm0, %v6857_v13  ;;  %v6869_v61 = vld [vmem:[%s11942_s5 + $0x8a8] sm:$0xff] }
 0x4a2   : > { %4457 = vmatpush.msra.mxu3 %v6788_v23  ;;  %4538 = vmatpush.msrb.mxu1 %v6810_v15  ;;  %v6891_v13 = vld [vmem:[%s11942_s5 + $0x928] sm:$0xff]  ;;  %v6822_v23 = vld [vmem:[%s11942_s5 + $0x790] sm:$0xff] }
 0x4a3   : > { %4641 = vmatpush.msrb.mxu0 %v6833_v41  ;;  %4722 = vmatpush.msra.mxu2 %v6855_v1  ;;  %v6844_v15 = vld [vmem:[%s11942_s5 + $0x810] sm:$0xff]  ;;  %v3525_v1 = vpop.f32.mrf.mxu0 }
 0x4a4   : > { %4458 = vmatpush.msra.mxu3 %v6786_v54  ;;  %4539 = vmatpush.msrb.mxu1 %v6808_v11  ;;  %v11289_v58 = vpop.f32.mrf.mxu3  ;;  %v6867_v54 = vld [vmem:[%s11942_s5 + $0x898] sm:$0xff] }
 0x4a5   : > { %4642 = vmatpush.msrb.mxu0 %v6831_v7  ;;  %4723 = vmatpush.msra.mxu2 %v6853_v9  ;;  %v6889_v11 = vld [vmem:[%s11942_s5 + $0x918] sm:$0xff]  ;;  %v6820_v7 = vld [vmem:[%s11942_s5 + $0x780] sm:$0xff] }
 0x4a6   : > { %4459 = vmatpush.msra.mxu3 %v6784_v63  ;;  %4540 = vmatpush.msrb.mxu1 %v6806_v22  ;;  %v6842_v9 = vld [vmem:[%s11942_s5 + $0x800] sm:$0xff]  ;;  %v6865_v63 = vld [vmem:[%s11942_s5 + $0x888] sm:$0xff] }
 0x4a7   : > { %4643 = vmatpush.msrb.mxu0 %v6829_v40  ;;  %4724 = vmatpush.msra.mxu2 %v6851_v16  ;;  %v6887_v22 = vld [vmem:[%s11942_s5 + $0x908] sm:$0xff]  ;;  %v6878_v16 = vld [vmem:[%s11942_s5 + $0x8f0] sm:$0xf] }
 0x4a8   : > { %6750 = vmatmul.msk.f32.gmra.mxu3 %vm3415_vm7, %v11027_v49  ;;  %6772 = vmatmul.msk.f32.gmra.mxu1 %vm3415_vm7, %v11029_v31  ;;  %v6899_v49 = vld [vmem:[%s11942_s5 + $0x968] sm:$0xff]  ;;  %v6830_v31 = vld [vmem:[%s11942_s5 + $0x7d0] sm:$0xff] }
 0x4a9   : > { %6797 = vmatmul.msk.f32.gmra.mxu0 %vm3415_vm7, %v11151_v26  ;;  %6819 = vmatmul.msk.f32.gmra.mxu2 %vm3415_vm7, %v11153_v56 }
 0x4aa   : > { %4460 = vmatpush.msra.mxu3 %v6782_v36  ;;  %4541 = vmatpush.msrb.mxu1 %v6804_v38  ;;  %v6900_v36 = vld [vmem:[%s11942_s5 + $0x970] sm:$0xf] }
 0x4ab   : > { %4644 = vmatpush.msrb.mxu0 %v6827_v3  ;;  %4725 = vmatpush.msra.mxu2 %v6849_v46  ;;  %v6923_v3 = vld [vmem:[%s11942_s5 + $0x9f8] sm:$0xf] }
 0x4ac   : > { %4461 = vmatpush.msra.mxu3 %v6780_v42  ;;  %4542 = vmatpush.msrb.mxu1 %v6802_v55  ;;  %v6945_v46 = vld [vmem:[%s11942_s5 + $0xa78] sm:$0xf]  ;;  %v3523_v42 = vadd.f32 %v11249_v44, %v11257_v18  ;;  %v6898_v55 = vld [vmem:[%s11942_s5 + $0x960] sm:$0xff] }
 0x4ad   : > { %4645 = vmatpush.msrb.mxu0 %v6825_v12  ;;  %4726 = vmatpush.msra.mxu2 %v6847_v28  ;;  %v6921_v28 = vld [vmem:[%s11942_s5 + $0x9e8] sm:$0xff]  ;;  %v6915_v18 = vld [vmem:[%s11942_s5 + $0x9b8] sm:$0xff] }
 0x4ae   : > { %4462 = vmatpush.msra.mxu3 %v6778_v6  ;;  %4543 = vmatpush.msrb.mxu1 %v6800_v50  ;;  %v6943_v6 = vld [vmem:[%s11942_s5 + $0xa68] sm:$0xff] }
 0x4af   : > { %4646 = vmatpush.msrb.mxu0 %v6823_v62  ;;  %4727 = vmatpush.msra.mxu2 %v6845_v0  ;;  %v6874_v0 = vld [vmem:[%s11942_s5 + $0x8d0] sm:$0xff] }
 0x4b0   : > { %4463 = vmatpush.msra.mxu3 %v6776_v51  ;;  %4544 = vmatpush.msrb.mxu1 %v6798_v45  ;;  %v6896_v51 = vld [vmem:[%s11942_s5 + $0x950] sm:$0xff]  ;;  %v6919_v45 = vld [vmem:[%s11942_s5 + $0x9d8] sm:$0xff] }
 0x4b1   : > { %4647 = vmatpush.msrb.mxu0 %v6821_v20  ;;  %4728 = vmatpush.msra.mxu2 %v6843_v48  ;;  %v6941_v20 = vld [vmem:[%s11942_s5 + $0xa58] sm:$0xff]  ;;  %v6872_v48 = vld [vmem:[%s11942_s5 + $0x8c0] sm:$0xff] }
 0x4b2   : > { %6793 = vmatmul.msk.f32.vlgmr.msra.gmra.mxu3 %vm3415_vm7, %v11087_v47  ;;  %6815 = vmatmul.msk.f32.vlgmr.msrb.gmra.mxu1 %vm3415_vm7, %v11089_v24  ;;  %v6824_v47 = vld [vmem:[%s11942_s5 + $0x7a0] sm:$0xff] }
 0x4b3   : > { %6840 = vmatmul.msk.f32.vlgmr.msrb.gmra.mxu0 %vm3415_vm7, %v10312_v17  ;;  %6862 = vmatmul.msk.f32.vlgmr.msra.gmra.mxu2 %vm3415_vm7, %v11211_v27  ;;  %v6846_v24 = vld [vmem:[%s11942_s5 + $0x820] sm:$0xff] }
 0x4b4   : > { %6836 = vmatpush.msk.msrb.mxu3 %vm401_vm0, %v6834_v30  ;;  %6858 = vmatpush.msk.msra.mxu1 %vm401_vm0, %v6856_v4  ;;  %v6894_v30 = vld [vmem:[%s11942_s5 + $0x940] sm:$0xff] }
 0x4b5   : > { %6883 = vmatpush.msk.msra.mxu0 %vm401_vm0, %v6879_v21  ;;  %6905 = vmatpush.msk.msrb.mxu2 %vm401_vm0, %v6901_v37  ;;  %v6939_v21 = vld [vmem:[%s11942_s5 + $0xa48] sm:$0xff] }
 0x4b6   : > { %4618 = vmatpush.msrb.mxu3 %v6832_v53  ;;  %4699 = vmatpush.msra.mxu1 %v6854_v39 }
 0x4b7   : > { %4803 = vmatpush.msra.mxu0 %v6877_v57  ;;  %4884 = vmatpush.msrb.mxu2 %v6899_v49  ;;  %v11403_v49 = vpop.permute.xlu2 %4759 }
 0x4b8   : > { %4619 = vmatpush.msrb.mxu3 %v6830_v31  ;;  %4700 = vmatpush.msra.mxu1 %v6852_v5  ;;  %v6870_v31 = vld [vmem:[%s11942_s5 + $0x8b0] sm:$0xff] }
 0x4b9   : > { %4804 = vmatpush.msra.mxu0 %v6875_v8  ;;  %4885 = vmatpush.msrb.mxu2 %v6897_v19  ;;  %v6892_v5 = vld [vmem:[%s11942_s5 + $0x930] sm:$0xff] }
 0x4ba   : > { %4620 = vmatpush.msrb.mxu3 %v6828_v32  ;;  %4701 = vmatpush.msra.mxu1 %v6850_v10  ;;  %v6937_v32 = vld [vmem:[%s11942_s5 + $0xa38] sm:$0xff] }
 0x4bb   : > { %4805 = vmatpush.msra.mxu0 %v6873_v14  ;;  %4886 = vmatpush.msrb.mxu2 %v6895_v59  ;;  %v6890_v14 = vld [vmem:[%s11942_s5 + $0x920] sm:$0xff] }
 0x4bc   : > { %6794 = vmatmul.msk.f32.gmra.mxu3 %vm3415_vm7, %v11151_v26  ;;  %6816 = vmatmul.msk.f32.gmra.mxu1 %vm3415_vm7, %v11153_v56  ;;  %v3599_v60 = vpop.f32.mrf.mxu2  ;;  %v11339_v26 = vpop.permute.xlu1 %4757 }
 0x4bd   : > { %6841 = vmatmul.msk.f32.gmra.mxu0 %vm3415_vm7, %v10307_v25  ;;  %6863 = vmatmul.msk.f32.gmra.mxu2 %vm3415_vm7, %v11277_v43  ;;  %v11341_v56 = vpop.permute.xlu0 %4838  ;;  %v3606_v62 = vadd.f32 %v3599_v60, %v3523_v42  ;;  %v6933_v60 = vld [vmem:[%s11942_s5 + $0xa18] sm:$0xff] }
 0x4be   : > { %4621 = vmatpush.msrb.mxu3 %v6826_v29  ;;  %4702 = vmatpush.msra.mxu1 %v6848_v2  ;;  %v6913_v29 = vld [vmem:[%s11942_s5 + $0x9a8] sm:$0xff] }
 0x4bf   : > { %4806 = vmatpush.msra.mxu0 %v6871_v33  ;;  %4887 = vmatpush.msrb.mxu2 %v6893_v52  ;;  %v3469_v41 = vpop.f32.mrf.mxu1  ;;  %v6935_v2 = vld [vmem:[%s11942_s5 + $0xa28] sm:$0xff]  ;;  %v6888_v33 = vld [vmem:[%s11942_s5 + $0x910] sm:$0xff]  ;;  %v6911_v52 = vld [vmem:[%s11942_s5 + $0x998] sm:$0xff] }
 0x4c0   : > { %4622 = vmatpush.msrb.mxu3 %v6824_v47  ;;  %4703 = vmatpush.msra.mxu1 %v6846_v24  ;;  %v3526_v53 = vadd.f32 %v3525_v1, %v3469_v41  ;;  %v6864_v47 = vld [vmem:[%s11942_s5 + $0x880] sm:$0xff] }
 0x4c1   : > { %4807 = vmatpush.msra.mxu0 %v6869_v61  ;;  %4888 = vmatpush.msrb.mxu2 %v6891_v13  ;;  %v6886_v24 = vld [vmem:[%s11942_s5 + $0x900] sm:$0xff]  ;;  %v6909_v13 = vld [vmem:[%s11942_s5 + $0x988] sm:$0xff] }
 0x4c2   : > { %4623 = vmatpush.msrb.mxu3 %v6822_v23  ;;  %4704 = vmatpush.msra.mxu1 %v6844_v15  ;;  %v6931_v23 = vld [vmem:[%s11942_s5 + $0xa08] sm:$0xff] }
 0x4c3   : > { %4808 = vmatpush.msra.mxu0 %v6867_v54  ;;  %4889 = vmatpush.msrb.mxu2 %v6889_v11  ;;  %v6922_v11 = vld [vmem:[%s11942_s5 + $0x9f0] sm:$0xf] }
 0x4c4   : > { %4624 = vmatpush.msrb.mxu3 %v6820_v7  ;;  %4705 = vmatpush.msra.mxu1 %v6842_v9  ;;  %v3602_v40 = vpop.f32.mrf.mxu2  ;;  %v11413_v19 = vpop.permute.xlu1 %4840  ;;  %v6944_v7 = vld [vmem:[%s11942_s5 + $0xa70] sm:$0xf] }
 0x4c5   : > { %4809 = vmatpush.msra.mxu0 %v6865_v63  ;;  %4890 = vmatpush.msrb.mxu2 %v6887_v22  ;;  %v11337_v38 = vpop.f32.mrf.mxu3  ;;  %v3608_v44 = vadd.f32 %v3602_v40, %v3526_v53  ;;  %v11473_v63 = vpop.permute.xlu2 %4919  ;;  %v6967_v22 = vld [vmem:[%s11942_s5 + $0xaf8] sm:$0xf] }
 0x4c6   : > { %6837 = vmatmul.msk.f32.vlgmr.msrb.gmra.mxu3 %vm3415_vm7, %v10312_v17  ;;  %6859 = vmatmul.msk.f32.vlgmr.msra.gmra.mxu1 %vm3415_vm7, %v11211_v27  ;;  %v6876_v17 = vld [vmem:[%s11942_s5 + $0x8e0] sm:$0xff]  ;;  %v6917_v27 = vld [vmem:[%s11942_s5 + $0x9c8] sm:$0xff]  ;;  %v6989_v40 = vld [vmem:[%s11942_s5 + $0xb78] sm:$0xf] }
 0x4c7   : > { %6884 = vmatmul.msk.f32.vlgmr.msra.gmra.mxu0 %vm3415_vm7, %v11339_v26  ;;  %6906 = vmatmul.msk.f32.vlgmr.msrb.gmra.mxu2 %vm3415_vm7, %v11341_v56  ;;  %v11365_v12 = vpop.f32.mrf.mxu1 }
 0x4c8   : > { %6880 = vmatpush.msk.msra.mxu3 %vm401_vm0, %v6878_v16  ;;  %6902 = vmatpush.msk.msrb.mxu1 %vm401_vm0, %v6900_v36  ;;  %v3680_v50 = vpop.f32.mrf.mxu0  ;;  %v6920_v16 = vld [vmem:[%s11942_s5 + $0x9e0] sm:$0xff] }
 0x4c9   : > { %6927 = vmatpush.msk.msrb.mxu0 %vm401_vm0, %v6923_v3  ;;  %6949 = vmatpush.msk.msra.mxu2 %vm401_vm0, %v6945_v46  ;;  %v3687_v4 = vadd.f32 %v3680_v50, %v3606_v62  ;;  %v6942_v36 = vld [vmem:[%s11942_s5 + $0xa60] sm:$0xff]  ;;  %v6918_v3 = vld [vmem:[%s11942_s5 + $0x9d0] sm:$0xff] }
 0x4ca   : > { %4780 = vmatpush.msra.mxu3 %v6876_v17  ;;  %4861 = vmatpush.msrb.mxu1 %v6898_v55  ;;  %v6940_v46 = vld [vmem:[%s11942_s5 + $0xa50] sm:$0xff]  ;;  %v6963_v17 = vld [vmem:[%s11942_s5 + $0xad8] sm:$0xff]  ;;  %v6938_v50 = vld [vmem:[%s11942_s5 + $0xa40] sm:$0xff] }
 0x4cb   : > { %4965 = vmatpush.msrb.mxu0 %v6921_v28  ;;  %5045 = vmatpush.msra.mxu2 %v6943_v6  ;;  %v6985_v55 = vld [vmem:[%s11942_s5 + $0xb58] sm:$0xff]  ;;  %v6916_v6 = vld [vmem:[%s11942_s5 + $0x9c0] sm:$0xff] }
 0x4cc   : > { %4781 = vmatpush.msra.mxu3 %v6874_v0  ;;  %4862 = vmatpush.msrb.mxu1 %v6896_v51  ;;  %v3761_v37 = vpop.f32.mrf.mxu2  ;;  %v6961_v51 = vld [vmem:[%s11942_s5 + $0xac8] sm:$0xff] }
 0x4cd   : > { %4966 = vmatpush.msrb.mxu0 %v6919_v45  ;;  %5046 = vmatpush.msra.mxu2 %v6941_v20  ;;  %v11401_v39 = vpop.f32.mrf.mxu3  ;;  %v3768_v57 = vadd.f32 %v3761_v37, %v3687_v4  ;;  %v6983_v45 = vld [vmem:[%s11942_s5 + $0xb48] sm:$0xff]  ;;  %v6981_v37 = vld [vmem:[%s11942_s5 + $0xb38] sm:$0xff] }
 0x4ce   : > { %4782 = vmatpush.msra.mxu3 %v6872_v48  ;;  %4863 = vmatpush.msrb.mxu1 %v6894_v30  ;;  %v3500_v4 = vadd.f32 %v11401_v39, %v11289_v58  ;;  %v6959_v58 = vld [vmem:[%s11942_s5 + $0xab8] sm:$0xff]  ;;  %v6912_v39 = vld [vmem:[%s11942_s5 + $0x9a0] sm:$0xff] }
 0x4cf   : > { %4967 = vmatpush.msrb.mxu0 %v6917_v27  ;;  %5047 = vmatpush.msra.mxu2 %v6939_v21  ;;  %v11411_v8 = vpop.f32.mrf.mxu1  ;;  %v6914_v27 = vld [vmem:[%s11942_s5 + $0x9b0] sm:$0xff] }
 0x4d0   : > { %6838 = vmatmul.msk.f32.gmra.mxu3 %vm3415_vm7, %v10307_v25  ;;  %6860 = vmatmul.msk.f32.gmra.mxu1 %vm3415_vm7, %v11277_v43  ;;  %v3683_v10 = vpop.f32.mrf.mxu0  ;;  %v6868_v25 = vld [vmem:[%s11942_s5 + $0x8a0] sm:$0xff]  ;;  %v6866_v43 = vld [vmem:[%s11942_s5 + $0x890] sm:$0xff] }
 0x4d1   : > { %6885 = vmatmul.msk.f32.gmra.mxu0 %vm3415_vm7, %v11403_v49  ;;  %6907 = vmatmul.msk.f32.gmra.mxu2 %vm3415_vm7, %v11413_v19  ;;  %v3689_v59 = vadd.f32 %v3683_v10, %v3608_v44  ;;  %v6936_v21 = vld [vmem:[%s11942_s5 + $0xa30] sm:$0xff]  ;;  %v3605_v44 = vadd.f32 %v11365_v12, %v3500_v4  ;;  %v6955_v12 = vld [vmem:[%s11942_s5 + $0xa98] sm:$0xff] }
 0x4d2   : > { %4783 = vmatpush.msra.mxu3 %v6870_v31  ;;  %4864 = vmatpush.msrb.mxu1 %v6892_v5  ;;  %v6957_v31 = vld [vmem:[%s11942_s5 + $0xaa8] sm:$0xff] }
 0x4d3   : > { %4968 = vmatpush.msrb.mxu0 %v6915_v18  ;;  %5048 = vmatpush.msra.mxu2 %v6937_v32  ;;  %v6979_v5 = vld [vmem:[%s11942_s5 + $0xb28] sm:$0xff]  ;;  %v6910_v18 = vld [vmem:[%s11942_s5 + $0x990] sm:$0xff] }
 0x4d4   : > { %4784 = vmatpush.msra.mxu3 %v6868_v25  ;;  %4865 = vmatpush.msrb.mxu1 %v6890_v14  ;;  %v6932_v32 = vld [vmem:[%s11942_s5 + $0xa10] sm:$0xff]  ;;  %v6977_v14 = vld [vmem:[%s11942_s5 + $0xb18] sm:$0xff] }
 0x4d5   : > { %4969 = vmatpush.msrb.mxu0 %v6913_v29  ;;  %5049 = vmatpush.msra.mxu2 %v6935_v2  ;;  %v3502_v61 = vpop.f32.mrf.mxu3 }
 0x4d6   : > { %4785 = vmatpush.msra.mxu3 %v6866_v43  ;;  %4866 = vmatpush.msrb.mxu1 %v6888_v33  ;;  %v3764_v15 = vpop.f32.mrf.mxu2  ;;  %v3503_v20 = vadd.f32 %v3502_v61, %v11337_v38  ;;  %v11538_v38 = vpop.permute.xlu0 %4921  ;;  %v6908_v43 = vld [vmem:[%s11942_s5 + $0x980] sm:$0xff] }
 0x4d7   : > { %4970 = vmatpush.msrb.mxu0 %v6911_v52  ;;  %5050 = vmatpush.msra.mxu2 %v6933_v60  ;;  %v3770_v41 = vadd.f32 %v3764_v15, %v3689_v59  ;;  %v11465_v1 = vpop.f32.mrf.mxu1  ;;  %v6930_v33 = vld [vmem:[%s11942_s5 + $0xa00] sm:$0xff]  ;;  %v6953_v60 = vld [vmem:[%s11942_s5 + $0xa88] sm:$0xff]  ;;  %v11595_v61 = vpop.permute.xlu1 %5080 }
 0x4d8   : > { %4786 = vmatpush.msra.mxu3 %v6864_v47  ;;  %4867 = vmatpush.msrb.mxu1 %v6886_v24  ;;  %v3841_v54 = vpop.f32.mrf.mxu0  ;;  %v3607_v53 = vadd.f32 %v11411_v8, %v3503_v20  ;;  %v6975_v47 = vld [vmem:[%s11942_s5 + $0xb08] sm:$0xff]  ;;  %v6958_v20 = vld [vmem:[%s11942_s5 + $0xab0] sm:$0xff] }
 0x4d9   : > { %4971 = vmatpush.msrb.mxu0 %v6909_v13  ;;  %5051 = vmatpush.msra.mxu2 %v6931_v23  ;;  %v3848_v9 = vadd.f32 %v3841_v54, %v3768_v57  ;;  %v6934_v57 = vld [vmem:[%s11942_s5 + $0xa20] sm:$0xff]  ;;  %v6966_v13 = vld [vmem:[%s11942_s5 + $0xaf0] sm:$0xf]  ;;  %v7033_v54 = vld [vmem:[%s11942_s5 + $0xc78] sm:$0xf] }
 0x4da   : > { %6881 = vmatmul.msk.f32.vlgmr.msra.gmra.mxu3 %vm3415_vm7, %v11339_v26  ;;  %6903 = vmatmul.msk.f32.vlgmr.msrb.gmra.mxu1 %vm3415_vm7, %v11341_v56  ;;  %v6965_v26 = vld [vmem:[%s11942_s5 + $0xae8] sm:$0xff]  ;;  %v6988_v23 = vld [vmem:[%s11942_s5 + $0xb70] sm:$0xf] }
 0x4db   : > { %6928 = vmatmul.msk.f32.vlgmr.msrb.gmra.mxu0 %vm3415_vm7, %v11473_v63  ;;  %6950 = vmatmul.msk.f32.vlgmr.msra.gmra.mxu2 %vm3415_vm7, %v10354_v35  ;;  %v6987_v56 = vld [vmem:[%s11942_s5 + $0xb68] sm:$0xff] }
 0x4dc   : > { %6924 = vmatpush.msk.msrb.mxu3 %vm401_vm0, %v6922_v11  ;;  %6946 = vmatpush.msk.msra.mxu1 %vm401_vm0, %v6944_v7 }
 0x4dd   : > { %6971 = vmatpush.msk.msra.mxu0 %vm401_vm0, %v6967_v22  ;;  %6993 = vmatpush.msk.msrb.mxu2 %vm401_vm0, %v6989_v40  ;;  %v3657_v42 = vpop.f32.mrf.mxu3  ;;  %v7009_v40 = vld [vmem:[%s11942_s5 + $0xbe8] sm:$0xff] }
 0x4de   : > { %4942 = vmatpush.msrb.mxu3 %v6920_v16  ;;  %5022 = vmatpush.msra.mxu1 %v6942_v36  ;;  %v3922_v28 = vpop.f32.mrf.mxu2  ;;  %v3686_v59 = vadd.f32 %v3657_v42, %v3605_v44  ;;  %v7031_v16 = vld [vmem:[%s11942_s5 + $0xc68] sm:$0xff]  ;;  %v7007_v42 = vld [vmem:[%s11942_s5 + $0xbd8] sm:$0xff] }
 0x4df   : > { %5126 = vmatpush.msra.mxu0 %v6965_v26  ;;  %5207 = vmatpush.msrb.mxu2 %v6987_v56  ;;  %v3929_v62 = vadd.f32 %v3922_v28, %v3848_v9  ;;  %v3741_v0 = vpop.f32.mrf.mxu1  ;;  %v6986_v9 = vld [vmem:[%s11942_s5 + $0xb60] sm:$0xff]  ;;  %v6962_v56 = vld [vmem:[%s11942_s5 + $0xad0] sm:$0xff]  ;;  %v6999_v44 = vld [vmem:[%s11942_s5 + $0xb98] sm:$0xff] }
 0x4e0   : > { %4943 = vmatpush.msrb.mxu3 %v6918_v3  ;;  %5023 = vmatpush.msra.mxu1 %v6940_v46  ;;  %v3844_v48 = vpop.f32.mrf.mxu0  ;;  %v3767_v24 = vadd.f32 %v11465_v1, %v3686_v59  ;;  %v7011_v1 = vld [vmem:[%s11942_s5 + $0xbf8] sm:$0xf]  ;;  %v6984_v3 = vld [vmem:[%s11942_s5 + $0xb50] sm:$0xff]  ;;  %v6982_v28 = vld [vmem:[%s11942_s5 + $0xb40] sm:$0xff] }
 0x4e1   : > { %5127 = vmatpush.msra.mxu0 %v6963_v17  ;;  %5208 = vmatpush.msrb.mxu2 %v6985_v55  ;;  %v3850_v30 = vadd.f32 %v3844_v48, %v3770_v41  ;;  %v11603_v41 = vpop.permute.xlu0 %5161  ;;  %v7029_v17 = vld [vmem:[%s11942_s5 + $0xc58] sm:$0xff]  ;;  %v6960_v55 = vld [vmem:[%s11942_s5 + $0xac0] sm:$0xff]  ;;  %v6980_v48 = vld [vmem:[%s11942_s5 + $0xb30] sm:$0xff] }
 0x4e2   : > { %4944 = vmatpush.msrb.mxu3 %v6916_v6  ;;  %5024 = vmatpush.msra.mxu1 %v6938_v50  ;;  %v7005_v6 = vld [vmem:[%s11942_s5 + $0xbc8] sm:$0xff] }
 0x4e3   : > { %5128 = vmatpush.msra.mxu0 %v6961_v51  ;;  %5209 = vmatpush.msrb.mxu2 %v6983_v45  ;;  %v7027_v50 = vld [vmem:[%s11942_s5 + $0xc48] sm:$0xff] }
 0x4e4   : > { %6882 = vmatmul.msk.f32.gmra.mxu3 %vm3415_vm7, %v11403_v49  ;;  %6904 = vmatmul.msk.f32.gmra.mxu1 %vm3415_vm7, %v11413_v19 }
 0x4e5   : > { %6929 = vmatmul.msk.f32.gmra.mxu0 %vm3415_vm7, %v11538_v38  ;;  %6951 = vmatmul.msk.f32.gmra.mxu2 %vm3415_vm7, %v10343_v34  ;;  %v3660_v49 = vpop.f32.mrf.mxu3 }
 0x4e6   : > { %4945 = vmatpush.msrb.mxu3 %v6914_v27  ;;  %5025 = vmatpush.msra.mxu1 %v6936_v21  ;;  %v3688_v8 = vadd.f32 %v3660_v49, %v3607_v53  ;;  %v3925_v19 = vpop.f32.mrf.mxu2  ;;  %v11670_v27 = vpop.permute.xlu1 %5163  ;;  %v7003_v21 = vld [vmem:[%s11942_s5 + $0xbb8] sm:$0xff]  ;;  %v7023_v49 = vld [vmem:[%s11942_s5 + $0xc28] sm:$0xff] }
 0x4e7   : > { %5129 = vmatpush.msra.mxu0 %v6959_v58  ;;  %5210 = vmatpush.msrb.mxu2 %v6981_v37  ;;  %v3931_v10 = vadd.f32 %v3925_v19, %v3850_v30  ;;  %v3899_v25 = vpop.f32.mrf.mxu1  ;;  %v7025_v58 = vld [vmem:[%s11942_s5 + $0xc38] sm:$0xff]  ;;  %v6952_v19 = vld [vmem:[%s11942_s5 + $0xa80] sm:$0xff] }
 0x4e8   : > { %4946 = vmatpush.msrb.mxu3 %v6912_v39  ;;  %5026 = vmatpush.msra.mxu1 %v6934_v57  ;;  %v4003_v29 = vpop.f32.mrf.mxu0  ;;  %v11580_v2 = vadd.f32 %v3741_v0, %v3688_v8  ;;  %v11661_v0 = vpop.permute.xlu2 %5082  ;;  %v7001_v57 = vld [vmem:[%s11942_s5 + $0xba8] sm:$0xff]  ;;  %v7021_v8 = vld [vmem:[%s11942_s5 + $0xc18] sm:$0xff] }
 0x4e9   : > { %5130 = vmatpush.msra.mxu0 %v6957_v31  ;;  %5211 = vmatpush.msrb.mxu2 %v6979_v5  ;;  %v4010_v52 = vadd.f32 %v4003_v29, %v3929_v62  ;;  %v6954_v31 = vld [vmem:[%s11942_s5 + $0xa90] sm:$0xff] }
 0x4ea   : > { %4947 = vmatpush.msrb.mxu3 %v6910_v18  ;;  %5027 = vmatpush.msra.mxu1 %v6932_v32  ;;  %v6976_v5 = vld [vmem:[%s11942_s5 + $0xb10] sm:$0xff]  ;;  %v6974_v18 = vld [vmem:[%s11942_s5 + $0xb00] sm:$0xff] }
 0x4eb   : > { %5131 = vmatpush.msra.mxu0 %v6955_v12  ;;  %5212 = vmatpush.msrb.mxu2 %v6977_v14 }
 0x4ec   : > { %4948 = vmatpush.msrb.mxu3 %v6908_v43  ;;  %5028 = vmatpush.msra.mxu1 %v6930_v33  ;;  %v7010_v33 = vld [vmem:[%s11942_s5 + $0xbf0] sm:$0xf] }
 0x4ed   : > { %5132 = vmatpush.msra.mxu0 %v6953_v60  ;;  %5213 = vmatpush.msrb.mxu2 %v6975_v47  ;;  %v3818_v15 = vpop.f32.mrf.mxu3 }
 0x4ee   : > { %6925 = vmatmul.msk.f32.vlgmr.msrb.gmra.mxu3 %vm3415_vm7, %v11473_v63  ;;  %6947 = vmatmul.msk.f32.vlgmr.msra.gmra.mxu1 %vm3415_vm7, %v10354_v35  ;;  %v3847_v11 = vadd.f32 %v3818_v15, %v3767_v24  ;;  %v4084_v7 = vpop.f32.mrf.mxu2  ;;  %v6964_v35 = vld [vmem:[%s11942_s5 + $0xae0] sm:$0xff]  ;;  %v5324_v24 = vpop.permute.xlu1 %5323  ;;  %v7028_v15 = vld [vmem:[%s11942_s5 + $0xc50] sm:$0xff] }
 0x4ef   : > { %6972 = vmatmul.msk.f32.vlgmr.msra.gmra.mxu0 %vm3415_vm7, %v11595_v61  ;;  %6994 = vmatmul.msk.f32.vlgmr.msrb.gmra.mxu2 %vm3415_vm7, %v11603_v41  ;;  %v4091_v63 = vadd.f32 %v4084_v7, %v4010_v52  ;;  %v3902_v22 = vpop.f32.mrf.mxu1  ;;  %v7032_v52 = vld [vmem:[%s11942_s5 + $0xc70] sm:$0xf]  ;;  %v7026_v7 = vld [vmem:[%s11942_s5 + $0xc40] sm:$0xff] }
 0x4f0   : > { %6968 = vmatpush.msk.msra.mxu3 %vm401_vm0, %v6966_v13  ;;  %6990 = vmatpush.msk.msrb.mxu1 %vm401_vm0, %v6988_v23  ;;  %v4006_v36 = vpop.f32.mrf.mxu0  ;;  %v11633_v26 = vadd.f32 %v3899_v25, %v3847_v11  ;;  %v7019_v25 = vld [vmem:[%s11942_s5 + $0xc08] sm:$0xff]  ;;  %v11723_v29 = vpop.permute.xlu2 %5242  ;;  %v7008_v13 = vld [vmem:[%s11942_s5 + $0xbe0] sm:$0xff] }
 0x4f1   : > { %7015 = vmatpush.msk.msrb.mxu0 %vm401_vm0, %v7011_v1  ;;  %7037 = vmatpush.msk.msra.mxu2 %vm401_vm0, %v7033_v54  ;;  %v4012_v46 = vadd.f32 %v4006_v36, %v3931_v10  ;;  %v6997_v10 = vld [vmem:[%s11942_s5 + $0xb88] sm:$0xff]  ;;  %v7030_v23 = vld [vmem:[%s11942_s5 + $0xc60] sm:$0xff]  ;;  %v7024_v36 = vld [vmem:[%s11942_s5 + $0xc30] sm:$0xff] }
 0x4f2   : > { %5103 = vmatpush.msra.mxu3 %v6964_v35  ;;  %5184 = vmatpush.msrb.mxu1 %v6986_v9  ;;  %v7004_v11 = vld [vmem:[%s11942_s5 + $0xbc0] sm:$0xff] }
 0x4f3   : > { %5288 = vmatpush.msrb.mxu0 %v7009_v40  ;;  %5369 = vmatpush.msra.mxu2 %v7031_v16  ;;  %v7002_v16 = vld [vmem:[%s11942_s5 + $0xbb0] sm:$0xff] }
 0x4f4   : > { %5104 = vmatpush.msra.mxu3 %v6962_v56  ;;  %5185 = vmatpush.msrb.mxu1 %v6984_v3  ;;  %v7000_v3 = vld [vmem:[%s11942_s5 + $0xba0] sm:$0xff] }
 0x4f5   : > { %5289 = vmatpush.msrb.mxu0 %v7007_v42  ;;  %5370 = vmatpush.msra.mxu2 %v7029_v17  ;;  %v3821_v62 = vpop.f32.mrf.mxu3  ;;  %v6998_v17 = vld [vmem:[%s11942_s5 + $0xb90] sm:$0xff] }
 0x4f6   : > { %5105 = vmatpush.msra.mxu3 %v6960_v55  ;;  %5186 = vmatpush.msrb.mxu1 %v6982_v28  ;;  %v3849_v51 = vadd.f32 %v3821_v62, %v11580_v2  ;;  %v4087_v45 = vpop.f32.mrf.mxu2  ;;  %v7020_v55 = vld [vmem:[%s11942_s5 + $0xc10] sm:$0xff]  ;;  %v6996_v62 = vld [vmem:[%s11942_s5 + $0xb80] sm:$0xff] }
 0x4f7   : > { %5290 = vmatpush.msrb.mxu0 %v7005_v6  ;;  %5371 = vmatpush.msra.mxu2 %v7027_v50  ;;  %v4093_v30 = vadd.f32 %v4087_v45, %v4012_v46  ;;  %v4061_v4 = vpop.f32.mrf.mxu1  ;;  %v7022_v46 = vld [vmem:[%s11942_s5 + $0xc20] sm:$0xff] }
 0x4f8   : > { %6926 = vmatmul.msk.f32.gmra.mxu3 %vm3415_vm7, %v11538_v38  ;;  %6948 = vmatmul.msk.f32.gmra.mxu1 %vm3415_vm7, %v10343_v34  ;;  %v4165_v37 = vpop.f32.mrf.mxu0  ;;  %v3930_v53 = vadd.f32 %v3902_v22, %v3849_v51  ;;  %v6956_v34 = vld [vmem:[%s11942_s5 + $0xaa0] sm:$0xff]  ;;  %v5326_v40 = vpop.permute.xlu2 %5325 }
 0x4f9   : > { %6973 = vmatmul.msk.f32.gmra.mxu0 %vm3415_vm7, %v11661_v0  ;;  %6995 = vmatmul.msk.f32.gmra.mxu2 %vm3415_vm7, %v11670_v27  ;;  %v6978_v38 = vld [vmem:[%s11942_s5 + $0xb20] sm:$0xff]  ;;  %v4172_v39 = vadd.f32 %v4165_v37, %v4091_v63 }
 0x4fa   : > { %5106 = vmatpush.msra.mxu3 %v6958_v20  ;;  %5187 = vmatpush.msrb.mxu1 %v6980_v48 }
 0x4fb   : > { %5291 = vmatpush.msrb.mxu0 %v7003_v21  ;;  %5372 = vmatpush.msra.mxu2 %v7025_v58 }
 0x4fc   : > { %5107 = vmatpush.msra.mxu3 %v6956_v34  ;;  %5188 = vmatpush.msrb.mxu1 %v6978_v38 }
 0x4fd   : > { %5292 = vmatpush.msrb.mxu0 %v7001_v57  ;;  %5373 = vmatpush.msra.mxu2 %v7023_v49  ;;  %v3980_v32 = vpop.f32.mrf.mxu3 }
 0x4fe   : > { %5108 = vmatpush.msra.mxu3 %v6954_v31  ;;  %5189 = vmatpush.msrb.mxu1 %v6976_v5  ;;  %v4009_v12 = vadd.f32 %v3980_v32, %v11633_v26  ;;  %v4245_v14 = vpop.f32.mrf.mxu2  ;;  %v5245_v26 = vpop.permute.xlu0 %5244 }
 0x4ff   : > { %5293 = vmatpush.msrb.mxu0 %v6999_v44  ;;  %5374 = vmatpush.msra.mxu2 %v7021_v8  ;;  %v4252_v59 = vadd.f32 %v4245_v14, %v4172_v39  ;;  %v4064_v60 = vpop.f32.mrf.mxu1 }
 0x500   : > { %5109 = vmatpush.msra.mxu3 %v6952_v19  ;;  %5190 = vmatpush.msrb.mxu1 %v6974_v18  ;;  %v4168_v2 = vpop.f32.mrf.mxu0  ;;  %v4090_v43 = vadd.f32 %v4061_v4, %v4009_v12 }
 0x501   : > { %5294 = vmatpush.msrb.mxu0 %v6997_v10  ;;  %5375 = vmatpush.msra.mxu2 %v7019_v25  ;;  %v4174_v47 = vadd.f32 %v4168_v2, %v4093_v30 }
 0x502   : > { %6969 = vmatmul.msk.f32.vlgmr.msra.gmra.mxu3 %vm3415_vm7, %v11595_v61  ;;  %6991 = vmatmul.msk.f32.vlgmr.msrb.gmra.mxu1 %vm3415_vm7, %v11603_v41  ;;  %v7006_v61 = vld [vmem:[%s11942_s5 + $0xbd0] sm:$0xff] }
 0x503   : > { %7016 = vmatmul.msk.f32.vlgmr.msrb.gmra.mxu0 %vm3415_vm7, %v11723_v29  ;;  %7038 = vmatmul.msk.f32.vlgmr.msra.gmra.mxu2 %vm3415_vm7, %v5324_v24 }
 0x504   : > { %7012 = vmatpush.msk.msrb.mxu3 %vm401_vm0, %v7010_v33  ;;  %7034 = vmatpush.msk.msra.mxu1 %vm401_vm0, %v7032_v52 }
 0x505   : > { %v3983_v41 = vpop.f32.mrf.mxu3 }
 0x506   : > { %5265 = vmatpush.msrb.mxu3 %v7008_v13  ;;  %5346 = vmatpush.msra.mxu1 %v7030_v23  ;;  %v4011_v1 = vadd.f32 %v3983_v41, %v3930_v53  ;;  %v4248_v54 = vpop.f32.mrf.mxu2 }
 0x507   : > { %v4254_v35 = vadd.f32 %v4248_v54, %v4174_v47  ;;  %v4222_v56 = vpop.f32.mrf.mxu1 }
 0x508   : > { %5266 = vmatpush.msrb.mxu3 %v7006_v61  ;;  %5347 = vmatpush.msra.mxu1 %v7028_v15  ;;  %v4326_v9 = vpop.f32.mrf.mxu0  ;;  %v4092_v63 = vadd.f32 %v4064_v60, %v4011_v1 }
 0x509   : > { %v4333_v22 = vadd.f32 %v4326_v9, %v4252_v59 }
 0x50a   : > { %5267 = vmatpush.msrb.mxu3 %v7004_v11  ;;  %5348 = vmatpush.msra.mxu1 %v7026_v7 }
 0x50b   : > { %6970 = vmatmul.msk.f32.gmra.mxu3 %vm3415_vm7, %v11661_v0  ;;  %6992 = vmatmul.msk.f32.gmra.mxu1 %vm3415_vm7, %v11670_v27  ;;  %v7018_v0 = vld [vmem:[%s11942_s5 + $0xc00] sm:$0xff] }
 0x50c   : > { %7017 = vmatmul.msk.f32.gmra.mxu0 %vm3415_vm7, %v5245_v26  ;;  %7039 = vmatmul.msk.f32.gmra.mxu2 %vm3415_vm7, %v5326_v40 }
 0x50d   : > { %5268 = vmatpush.msrb.mxu3 %v7002_v16  ;;  %5349 = vmatpush.msra.mxu1 %v7024_v36  ;;  %v4142_v42 = vpop.f32.mrf.mxu3 }
 0x50e   : > { %v4171_v28 = vadd.f32 %v4142_v42, %v4090_v43  ;;  %v4407_v6 = vpop.f32.mrf.mxu2 }
 0x50f   : > { %5269 = vmatpush.msrb.mxu3 %v7000_v3  ;;  %5350 = vmatpush.msra.mxu1 %v7022_v46  ;;  %v4414_v50 = vadd.f32 %v4407_v6, %v4333_v22 }
 0x510   : > { %v4251_v51 = vadd.f32 %v4222_v56, %v4171_v28 }
 0x511   : > { %5270 = vmatpush.msrb.mxu3 %v6998_v17  ;;  %5351 = vmatpush.msra.mxu1 %v7020_v55  ;;  %v4225_v48 = vpop.f32.mrf.mxu1 }
 0x512   : > { %v4329_v45 = vpop.f32.mrf.mxu0 }
 0x513   : > { %5271 = vmatpush.msrb.mxu3 %v6996_v62  ;;  %5352 = vmatpush.msra.mxu1 %v7018_v0  ;;  %v4335_v20 = vadd.f32 %v4329_v45, %v4254_v35 }
 0x514   : > { %7013 = vmatmul.msk.f32.vlgmr.msrb.gmra.mxu3 %vm3415_vm7, %v11723_v29  ;;  %7035 = vmatmul.msk.f32.vlgmr.msra.gmra.mxu1 %vm3415_vm7, %v5324_v24 }
 0x517   : > { %v4145_v30 = vpop.f32.mrf.mxu3 }
 0x518   : > { %v4173_v4 = vadd.f32 %v4145_v30, %v4092_v63  ;;  %v4410_v27 = vpop.f32.mrf.mxu2 }
 0x519   : > { %v4416_v21 = vadd.f32 %v4410_v27, %v4335_v20 }
 0x51a   : > { %v4253_v58 = vadd.f32 %v4225_v48, %v4173_v4 }
 0x51b   : > { %v4384_v34 = vpop.f32.mrf.mxu1 }
 0x51c   : > { %7014 = vmatmul.msk.f32.gmra.mxu3 %vm3415_vm7, %v5245_v26  ;;  %7036 = vmatmul.msk.f32.gmra.mxu1 %vm3415_vm7, %v5326_v40  ;;  %v4488_v37 = vpop.f32.mrf.mxu0 }
 0x51d   : > { %v4495_v53 = vadd.f32 %v4488_v37, %v4414_v50 }
 0x521   : > { %v4303_v38 = vpop.f32.mrf.mxu3 }
 0x522   : > { %v4332_v39 = vadd.f32 %v4303_v38, %v4251_v51  ;;  %v4569_v57 = vpop.f32.mrf.mxu2 }
 0x523   : > { %v4576_v49 = vadd.f32 %v4569_v57, %v4495_v53 }
 0x524   : > { %v4413_v31 = vadd.f32 %v4384_v34, %v4332_v39 }
 0x525   : > { %v4387_v44 = vpop.f32.mrf.mxu1 }
 0x526   : > { %v4491_v5 = vpop.f32.mrf.mxu0 }
 0x527   : > { %v4497_v46 = vadd.f32 %v4491_v5, %v4416_v21 }
 0x52b   : > { %v4306_v8 = vpop.f32.mrf.mxu3 }
 0x52c   : > { %v4334_v19 = vadd.f32 %v4306_v8, %v4253_v58  ;;  %v4572_v18 = vpop.f32.mrf.mxu2 }
 0x52d   : > { %v4578_v17 = vadd.f32 %v4572_v18, %v4497_v46  ;;  %v5510_v46 = vld [vmem:[%s11945_s8 + $0x50] sm:$0xff] }
 0x52e   : > { %v4415_v32 = vadd.f32 %v4387_v44, %v4334_v19  ;;  %v5387_v19 = vld [vmem:[%s11943_s6] sm:$0x3] }
 0x52f   : > { %v4546_v25 = vpop.f32.mrf.mxu1 }
 0x530   : > { %v4649_v10 = vpop.f32.mrf.mxu0 }
 0x531   : > { %v4656_v55 = vadd.f32 %v4649_v10, %v4576_v49 }
 0x535   : > { %v4465_v12 = vpop.f32.mrf.mxu3 }
 0x536   : > { %v4494_v14 = vadd.f32 %v4465_v12, %v4413_v31  ;;  %v4730_v59 = vpop.f32.mrf.mxu2 }
 0x537   : > { %v4737_v6 = vadd.f32 %v4730_v59, %v4656_v55 }
 0x538   : > { %v4575_v29 = vadd.f32 %v4546_v25, %v4494_v14 }
 0x539   : > { %v4549_v43 = vpop.f32.mrf.mxu1 }
 0x53a   : > { %v4652_v2 = vpop.f32.mrf.mxu0 }
 0x53b   : > { %v4658_v50 = vadd.f32 %v4652_v2, %v4578_v17  ;;  %v5390_v2 = vperm.slane %v5387_v19, 1  ;;  %v5509_v17 = vld [vmem:[%s11945_s8 + $0x48] sm:$0xff] }
 0x53f   : > { %v4468_v33 = vpop.f32.mrf.mxu3 }
 0x540   : > { %v4733_v52 = vpop.f32.mrf.mxu2  ;;  %v4496_v45 = vadd.f32 %v4468_v33, %v4415_v32 }
 0x541   : > { %v4739_v62 = vadd.f32 %v4733_v52, %v4658_v50  ;;  %v5389_v50 = vperm.slane %v5387_v19, 0  ;;  %v5504_v19 = vld [vmem:[%s11945_s8 + $0x20] sm:$0xff] }
 0x542   : > { %v4577_v53 = vadd.f32 %v4549_v43, %v4496_v45  ;;  %v5507_v45 = vld [vmem:[%s11945_s8 + $0x38] sm:$0xff] }
 0x543   : > { %v4707_v47 = vpop.f32.mrf.mxu1 }
 0x544   : > { %v4811_v60 = vpop.f32.mrf.mxu0 }
 0x545   : > { %v4818_v0 = vadd.f32 %v4811_v60, %v4737_v6 }
 0x549   : > { %v4626_v24 = vpop.f32.mrf.mxu3 }
 0x54a   : > { %v4892_v13 = vpop.f32.mrf.mxu2  ;;  %v4655_v30 = vadd.f32 %v4626_v24, %v4575_v29 }
 0x54b   : > { %v4899_v20 = vadd.f32 %v4892_v13, %v4818_v0 }
 0x54c   : > { %v4736_v39 = vadd.f32 %v4707_v47, %v4655_v30  ;;  %v5506_v30 = vld [vmem:[%s11945_s8 + $0x30] sm:$0xff] }
 0x54d   : > { %v4710_v61 = vpop.f32.mrf.mxu1 }
 0x54e   : > { %v4814_v23 = vpop.f32.mrf.mxu0 }
 0x54f   : > { %v4820_v48 = vadd.f32 %v4814_v23, %v4739_v62  ;;  %v5508_v62 = vld [vmem:[%s11945_s8 + $0x40] sm:$0xff] }
 0x553   : > { %v4629_v15 = vpop.f32.mrf.mxu3 }
 0x554   : > { %v4895_v41 = vpop.f32.mrf.mxu2  ;;  %v4657_v57 = vadd.f32 %v4629_v15, %v4577_v53  ;;  %v7064_v53 = vld [vmem:[%s11945_s8 + $0x110] sm:$0xff] }
 0x555   : > { %v4901_v27 = vadd.f32 %v4895_v41, %v4820_v48 }
 0x556   : > { %v4738_v32 = vadd.f32 %v4710_v61, %v4657_v57  ;;  %v5515_v61 = vld [vmem:[%s11945_s8 + $0x78] sm:$0xff]  ;;  %v7059_v57 = vld [vmem:[%s11945_s8 + $0xe8] sm:$0xff] }
 0x557   : > { %v4869_v54 = vpop.f32.mrf.mxu1  ;;  %5524 = vmatpush.msrb.mxu2 %v5515_v61 }
 0x558   : > { %v4973_v1 = vpop.f32.mrf.mxu0 }
 0x559   : > { %v4980_v58 = vadd.f32 %v4973_v1, %v4899_v20 }
 0x55d   : > { %v4788_v11 = vpop.f32.mrf.mxu3 }
 0x55e   : > { %v5053_v7 = vpop.f32.mrf.mxu2  ;;  %v4817_v5 = vadd.f32 %v4788_v11, %v4736_v39  ;;  %v7060_v39 = vld [vmem:[%s11945_s8 + $0xf0] sm:$0xff] }
 0x55f   : > { %v5060_v34 = vadd.f32 %v5053_v7, %v4980_v58  ;;  %v5401_v58 = vld [vmem:[%s11944_s7] sm:$0x1f] }
 0x560   : > { %v4898_v12 = vadd.f32 %v4869_v54, %v4817_v5  ;;  %v5514_v54 = vld [vmem:[%s11945_s8 + $0x70] sm:$0xff] }
 0x561   : > { %v4872_v9 = vpop.f32.mrf.mxu1  ;;  %5525 = vmatpush.msrb.mxu2 %v5514_v54  ;;  %v7056_v5 = vld [vmem:[%s11945_s8 + $0xd0] sm:$0xff] }
 0x562   : > { %v4976_v35 = vpop.f32.mrf.mxu0 }
 0x563   : > { %v4982_v21 = vadd.f32 %v4976_v35, %v4901_v27  ;;  %v5513_v35 = vld [vmem:[%s11945_s8 + $0x68] sm:$0xff] }
 0x564   : > { %5526 = vmatpush.msrb.mxu2 %v5513_v35 }
 0x567   : > { %v4791_v63 = vpop.f32.mrf.mxu3 }
 0x568   : > { %v5056_v22 = vpop.f32.mrf.mxu2  ;;  %v4819_v59 = vadd.f32 %v4791_v63, %v4738_v32  ;;  %v5503_v32 = vld [vmem:[%s11945_s8 + $0x18] sm:$0xff] }
 0x569   : > { %v5062_v49 = vadd.f32 %v5056_v22, %v4982_v21  ;;  %v7062_v21 = vld [vmem:[%s11945_s8 + $0x100] sm:$0xff] }
 0x56a   : > { %v4900_v24 = vadd.f32 %v4872_v9, %v4819_v59  ;;  %v7051_v59 = vld [vmem:[%s11945_s8 + $0xa8] sm:$0xff] }
 0x56b   : > { %v5030_v16 = vpop.f32.mrf.mxu1 }
 0x56c   : > { %v5134_v40 = vpop.f32.mrf.mxu0 }
 0x56d   : > { %v5141_v31 = vadd.f32 %v5134_v40, %v5060_v34  ;;  %v7044_v40 = vld [vmem:[%s11944_s7 + $0x8] sm:$0x1f] }
 0x56e   : > { %v7063_v34 = vld [vmem:[%s11945_s8 + $0x108] sm:$0xff] }
 0x571   : > { %v4950_v36 = vpop.f32.mrf.mxu3 }
 0x572   : > { %v5215_v26 = vpop.f32.mrf.mxu2  ;;  %v4979_v60 = vadd.f32 %v4950_v36, %v4898_v12  ;;  %v7052_v12 = vld [vmem:[%s11945_s8 + $0xb0] sm:$0xff] }
 0x573   : > { %v5222_v44 = vadd.f32 %v5215_v26, %v5141_v31  ;;  %v7057_v31 = vld [vmem:[%s11945_s8 + $0xd8] sm:$0xff] }
 0x574   : > { %v5059_v41 = vadd.f32 %v5030_v16, %v4979_v60  ;;  %v5512_v16 = vld [vmem:[%s11945_s8 + $0x60] sm:$0xff]  ;;  %v7068_v60 = vld [vmem:[%s11945_s8 + $0x130] sm:$0xff] }
 0x575   : > { %v5033_v3 = vpop.f32.mrf.mxu1  ;;  %5527 = vmatpush.msrb.mxu2 %v5512_v16 }
 0x576   : > { %v5137_v56 = vpop.f32.mrf.mxu0 }
 0x577   : > { %v5143_v8 = vadd.f32 %v5137_v56, %v5062_v49  ;;  %v5511_v56 = vld [vmem:[%s11945_s8 + $0x58] sm:$0xff]  ;;  %v7058_v49 = vld [vmem:[%s11945_s8 + $0xe0] sm:$0xff] }
 0x578   : > { %5528 = vmatpush.msrb.mxu2 %v5511_v56 }
 0x57a   : > { %5529 = vmatpush.msrb.mxu2 %v5510_v46 }
 0x57b   : > { %v4953_v42 = vpop.f32.mrf.mxu3 }
 0x57c   : > { %v5218_v28 = vpop.f32.mrf.mxu2  ;;  %v4981_v15 = vadd.f32 %v4953_v42, %v4900_v24  ;;  %5530 = vmatpush.msrb.mxu2 %v5509_v17  ;;  %v7067_v24 = vld [vmem:[%s11945_s8 + $0x128] sm:$0xff] }
 0x57d   : > { %v5224_v10 = vadd.f32 %v5218_v28, %v5143_v8  ;;  %v7055_v8 = vld [vmem:[%s11945_s8 + $0xc8] sm:$0xff] }
 0x57e   : > { %v5061_v22 = vadd.f32 %v5033_v3, %v4981_v15  ;;  %5531 = vmatpush.msrb.mxu2 %v5508_v62 }
 0x57f   : > { %v5192_v4 = vpop.f32.mrf.mxu1 }
 0x580   : > { %v5296_v51 = vpop.f32.mrf.mxu0  ;;  %5532 = vmatpush.msrb.mxu2 %v5507_v45 }
 0x581   : > { %v5303_v25 = vadd.f32 %v5296_v51, %v5222_v44  ;;  %v5505_v44 = vld [vmem:[%s11945_s8 + $0x28] sm:$0xff] }
 0x582   : > { %5533 = vmatpush.msrb.mxu2 %v5506_v30 }
 0x584   : > { %5534 = vmatpush.msrb.mxu2 %v5505_v44 }
 0x585   : > { %v5111_v37 = vpop.f32.mrf.mxu3 }
 0x586   : > { %v5377_v38 = vpop.f32.mrf.mxu2  ;;  %v5140_v11 = vadd.f32 %v5111_v37, %v5059_v41  ;;  %v7065_v37 = vld [vmem:[%s11945_s8 + $0x118] sm:$0xff]  ;;  %5535 = vmatpush.msrb.mxu2 %v5504_v19 }
 0x587   : > { %v5384_v29 = vadd.f32 %v5377_v38, %v5303_v25  ;;  %v7061_v38 = vld [vmem:[%s11945_s8 + $0xf8] sm:$0xff]  ;;  %v5502_v25 = vld [vmem:[%s11945_s8 + $0x10] sm:$0xff] }
 0x588   : > { %v5195_v14 = vpop.f32.mrf.mxu1  ;;  %v5221_v26 = vadd.f32 %v5192_v4, %v5140_v11  ;;  %5536 = vmatpush.msrb.mxu2 %v5503_v32 }
 0x589   : > { %v5299_v18 = vpop.f32.mrf.mxu0  ;;  %v5394_v13 = vadd.f32 %v5390_v2, %v5384_v29  ;;  %v5519_v29 = vld [vmem:[%s11945_s8 + $0x98] sm:$0xff] }
 0x58a   : > { %v5305_v43 = vadd.f32 %v5299_v18, %v5224_v10  ;;  %v7054_v18 = vld [vmem:[%s11945_s8 + $0xc0] sm:$0xff]  ;;  %v7053_v10 = vld [vmem:[%s11945_s8 + $0xb8] sm:$0xff]  ;;  %5537 = vmatpush.msrb.mxu2 %v5502_v25 }
 0x58b   : > { %v5398_v7 = vmax.f32 %v5394_v13, 0.0  ;;  %v5516_v13 = vld [vmem:[%s11945_s8 + $0x80] sm:$0xff] }
 0x58e   : > { %v5114_v33 = vpop.f32.mrf.mxu3 }
 0x58f   : > { %v5380_v52 = vpop.f32.mrf.mxu2  ;;  %v5142_v36 = vadd.f32 %v5114_v33, %v5061_v22  ;;  %v7050_v33 = vld [vmem:[%s11945_s8 + $0xa0] sm:$0xff] }
 0x590   : > { %v5386_v47 = vadd.f32 %v5380_v52, %v5305_v43  ;;  %v5500_v43 = vld [vmem:[%s11945_s8] sm:$0xff]  ;;  %v7069_v52 = vld [vmem:[%s11945_s8 + $0x138] sm:$0xff] }
 0x591   : > { %v5354_v9 = vpop.f32.mrf.mxu1  ;;  %v5223_v42 = vadd.f32 %v5195_v14, %v5142_v36  ;;  %v5501_v14 = vld [vmem:[%s11945_s8 + $0x8] sm:$0xff] }
 0x592   : > { %v5396_v23 = vadd.f32 %v5390_v2, %v5386_v47  ;;  %v5518_v2 = vld [vmem:[%s11945_s8 + $0x90] sm:$0xff]  ;;  %5538 = vmatpush.msrb.mxu2 %v5501_v14  ;;  %v5517_v47 = vld [vmem:[%s11945_s8 + $0x88] sm:$0xff] }
 0x594   : > { %v5400_v1 = vmax.f32 %v5396_v23, 0.0  ;;  %5539 = vmatpush.msrb.mxu2 %v5500_v43  ;;  %v7066_v23 = vld [vmem:[%s11945_s8 + $0x120] sm:$0xff] }
 0x596   : > { %7047 = vmatpush.msk.msrb.mxu1 %vm5406_vm8, %v5400_v1 }
 0x597   : > { %v5273_v63 = vpop.f32.mrf.mxu3 }
 0x598   : > { %5493 = vmatpush.msrb.mxu1 %v5398_v7  ;;  %v5302_v3 = vadd.f32 %v5273_v63, %v5221_v26 }
 0x599   : > { %7048 = vmatmul.msk.f32.vlgmr.msrb.gmra.mxu1 %vm5402_vm9, %v7044_v40  ;;  %v5357_v0 = vpop.f32.mrf.mxu1 }
 0x59a   : > { %v5383_v28 = vadd.f32 %v5354_v9, %v5302_v3  ;;  %5617 = vmatpush.msra.mxu1 %v7069_v52 }
 0x59c   : > { %v5393_v48 = vadd.f32 %v5389_v50, %v5383_v28  ;;  %5618 = vmatpush.msra.mxu1 %v7068_v60 }
 0x59e   : > { %v5397_v27 = vmax.f32 %v5393_v48, 0.0  ;;  %5619 = vmatpush.msra.mxu1 %v7067_v24 }
 0x59f   : > { %v5276_v55 = vpop.f32.mrf.mxu3 }
 0x5a0   : > { %v5304_v6 = vadd.f32 %v5276_v55, %v5223_v42  ;;  %5620 = vmatpush.msra.mxu1 %v7066_v23 }
 0x5a2   : > { %v5385_v51 = vadd.f32 %v5357_v0, %v5304_v6 }
 0x5a4   : > { %v5395_v20 = vadd.f32 %v5389_v50, %v5385_v51 }
 0x5a6   : > { %v5399_v4 = vmax.f32 %v5395_v20, 0.0 }
 0x5a8   : > { %7040 = vmatpush.msk.msra.mxu3 %vm5406_vm8, %v5399_v4  ;;  %7045 = vmatpush.msk.msra.mxu0 %vm5406_vm8, %v5399_v4 }
 0x5aa   : > { %5428 = vmatpush.msra.mxu3 %v5397_v27  ;;  %5473 = vmatpush.msra.mxu0 %v5397_v27 }
 0x5ab   : > { %7046 = vmatmul.msk.f32.vlgmr.msra.gmra.mxu0 %vm5402_vm9, %v7044_v40  ;;  %7041 = vmatmul.msk.f32.vlgmr.msra.gmra.mxu3 %vm5402_vm9, %v5401_v58 }
 0x5ac   : > { %7042 = vmatpush.msk.msrb.mxu3 %vm5406_vm8, %v5400_v1  ;;  %5585 = vmatpush.msrb.mxu0 %v7065_v37 }
 0x5ae   : > { %5448 = vmatpush.msrb.mxu3 %v5398_v7  ;;  %5586 = vmatpush.msrb.mxu0 %v7064_v53 }
 0x5b0   : > { %5587 = vmatpush.msrb.mxu0 %v7063_v34  ;;  %5556 = vmatpush.msra.mxu3 %v5519_v29 }
 0x5b2   : > { %5588 = vmatpush.msrb.mxu0 %v7062_v21  ;;  %5557 = vmatpush.msra.mxu3 %v5518_v2 }
 0x5b3   : > { %7043 = vmatmul.msk.f32.vlgmr.msrb.gmra.mxu3 %vm5402_vm9, %v5401_v58 }
 0x5b4   : > { %5589 = vmatpush.msrb.mxu0 %v7061_v38  ;;  %5558 = vmatpush.msra.mxu3 %v5517_v47 }
 0x5b6   : > { %5590 = vmatpush.msrb.mxu0 %v7060_v39  ;;  %5559 = vmatpush.msra.mxu3 %v5516_v13 }
 0x5b8   : > { %5591 = vmatpush.msrb.mxu0 %v7059_v57 }
 0x5ba   : > { %5592 = vmatpush.msrb.mxu0 %v7058_v49 }
 0x5bc   : > { %5593 = vmatpush.msrb.mxu0 %v7057_v31 }
 0x5be   : > { %5594 = vmatpush.msrb.mxu0 %v7056_v5 }
 0x5c0   : > { %5595 = vmatpush.msrb.mxu0 %v7055_v8 }
 0x5c2   : > { %5596 = vmatpush.msrb.mxu0 %v7054_v18 }
 0x5c4   : > { %5597 = vmatpush.msrb.mxu0 %v7053_v10 }
 0x5c6   : > { %5598 = vmatpush.msrb.mxu0 %v7052_v12 }
 0x5c8   : > { %5599 = vmatpush.msrb.mxu0 %v7051_v59 }
 0x5ca   : > { %5600 = vmatpush.msrb.mxu0 %v7050_v33 }
 0x616   : > { %v5495_v61 = vpop.f32.mrf.mxu1 }
 0x628   : > { %v5475_v15 = vpop.f32.mrf.mxu0 }
 0x62e   : > { %v5430_v41 = vpop.f32.mrf.mxu3 }
 0x62f   : > { %v5498_v1 = vmax.f32 %v5430_v41, %v5475_v15 }
 0x631   : > { %5540 = vmatmul.f32.vlgmr.msrb.gmra.mxu2 %v5498_v1  ;;  %5601 = vmatmul.f32.vlgmr.msrb.gmra.mxu0 %v5498_v1 }
 0x636   : > { %v5450_v54 = vpop.f32.mrf.mxu3 }
 0x637   : > { %v5499_v11 = vmax.f32 %v5450_v54, %v5495_v61 }
 0x639   : > { %7049 = vmatmul.msk.f32.vlgmr.msra.gmra.mxu3 %vm5520_vm10, %v5499_v11  ;;  %7070 = vmatmul.msk.f32.vlgmr.msra.gmra.mxu1 %vm5520_vm10, %v5499_v11 }
 0x6ae   : > { %v5602_v35 = vpop.f32.mrf.mxu0 }
 0x6b4   : > { %v5541_v9 = vpop.f32.mrf.mxu2 }
 0x6b6   : > { %v5622_v7 = vpop.f32.mrf.mxu1 }
 0x6b7   : > { %v5623_v40 = vadd.f32 %v5622_v7, %v5602_v35 }
 0x6bc   : > { %v5561_v63 = vpop.f32.mrf.mxu3 }
 0x6bd   : > { %v5562_v22 = vadd.f32 %v5561_v63, %v5541_v9 }
 0x6bf   : > { %v5625_v16 = vmax.f32 %v5562_v22, %v5623_v40 }
 0x6c1   : > { %5627 = vst.msk [vmem:[%s330_s27] sm:$0x1f] %vm5626_vm11, %v5625_v16 }
 0x6c2 PF: > { %s19_s30 = sadd.s32 1, %s7098_s30  }
 0x6c3   : > { %p16_p4 = scmp.ge.s32.totalorder %s19_s30, 4  }
 0x6c5   :  { %18 = sbr.rel (!%p16_p4) target bundleno = 1 (0x1), region = 138 }

</bundles_post_ra>
